<compile_context>
chip_gen: v7x
topology: tpu7x:2x2x1
jax: 0.10.0
libtpu: 0.0.40
codegen_flags: <defaults>
</compile_context>

<pallas_src>
from functools import partial

import jax
import jax.numpy as jnp
from jax.experimental import pallas as pl
from jax.experimental.pallas import tpu as pltpu


# --------------------------------------------------------------------------
# Kernel body (shared by the whole-image and row-tiled variants)
# --------------------------------------------------------------------------
def _spp_body(x_ref, x_hbm_ref, w1_ref, b1_ref, w2_ref, b2_ref, o_ref,
              top_buf, bot_buf, sem, pad_ref, *,
              kc, n_pools, H, W, Th, halo, pool_dtype):
    # x_ref:     (1, Th*W, c1)  bf16 core rows of this tile (auto-pipelined)
    # x_hbm_ref: (N, H*W, c1)   bf16 whole image in HBM (halo rows, manual DMA)
    # w1_ref: (c1, c_) bf16   b1_ref: (1, c_) f32   (BN scale folded offline)
    # w2_ref: (nb, c_, c2) bf16 per-branch blocks   b2_ref: (1, c2) f32
    # o_ref: (1, Th*W, c2)
    # pad_ref: (He+2P, W+2P, c_) pooling scratch in pool_dtype
    c_ = w1_ref.shape[1]
    c2 = o_ref.shape[-1]
    P = kc // 2
    He = Th + 2 * halo
    neg_inf = float("-inf")

    if halo:
        n = pl.program_id(0)
        t = pl.program_id(1)
        r0 = t * Th
        # Clamped, fixed-size halo fetches (contents of out-of-image tiles are
        # overwritten with -inf below).
        top_start = jnp.maximum(r0 - halo, 0) * W
        bot_start = jnp.minimum(r0 + Th, H - halo) * W
        cp_top = pltpu.make_async_copy(
            x_hbm_ref.at[n, pl.ds(top_start, halo * W)], top_buf, sem.at[0])
        cp_bot = pltpu.make_async_copy(
            x_hbm_ref.at[n, pl.ds(bot_start, halo * W)], bot_buf, sem.at[1])
        cp_top.start()
        cp_bot.start()

    # ---- cv1: 1x1 conv == MXU matmul (bf16 operands, f32 acc) + bias + SiLU
    # on the core rows; overlaps the in-flight halo DMAs.
    y_core = jnp.dot(x_ref[0], w1_ref[...], preferred_element_type=jnp.float32)
    y_core = y_core + b1_ref[...]
    y_core = y_core * jax.nn.sigmoid(y_core)            # (Th*W, c_) f32

    # cv2 branch 0 (un-pooled branch) accumulated immediately -> no concat.
    z = jnp.dot(y_core.astype(jnp.bfloat16), w2_ref[0],
                preferred_element_type=jnp.float32)      # (Th*W, c2) f32

    # ---- -inf border of the padded pooling scratch.  The center is rewritten
    # every cascade stage; the border is only read.  Rewritten per grid step so
    # every core's private scratch instance is initialized.
    pad_ref[0:P, :, :] = jnp.full((P, W + 2 * P, c_), neg_inf, pool_dtype)
    pad_ref[P + He:He + 2 * P, :, :] = jnp.full((P, W + 2 * P, c_), neg_inf,
                                                pool_dtype)
    pad_ref[:, 0:P, :] = jnp.full((He + 2 * P, P, c_), neg_inf, pool_dtype)
    pad_ref[:, P + W:W + 2 * P, :] = jnp.full((He + 2 * P, P, c_), neg_inf,
                                              pool_dtype)

    # ---- Seed the scratch center with y over the (halo-extended) row range.
    pad_ref[P + halo:P + halo + Th, P:P + W, :] = (
        y_core.reshape(Th, W, c_).astype(pool_dtype))

    if halo:
        cp_top.wait()
        cp_bot.wait()

        def cv1(xb):
            yb = jnp.dot(xb, w1_ref[...], preferred_element_type=jnp.float32)
            yb = yb + b1_ref[...]
            return yb * jax.nn.sigmoid(yb)

        y_top = cv1(top_buf[...]).reshape(halo, W, c_).astype(pool_dtype)
        y_bot = cv1(bot_buf[...]).reshape(halo, W, c_).astype(pool_dtype)
        inf_blk = jnp.full((halo, W, c_), neg_inf, pool_dtype)

        # Halo rows above/below the image are -inf (same as MaxPool2d padding).
        @pl.when(r0 >= halo)
        def _():
            pad_ref[P:P + halo, P:P + W, :] = y_top

        @pl.when(r0 < halo)
        def _():
            pad_ref[P:P + halo, P:P + W, :] = inf_blk

        @pl.when(r0 + Th + halo <= H)
        def _():
            pad_ref[P + halo + Th:P + He, P:P + W, :] = y_bot

        @pl.when(r0 + Th + halo > H)
        def _():
            pad_ref[P + halo + Th:P + He, P:P + W, :] = inf_blk

    # ---- SPPF cascade: each stage is a kc x kc stride-1 max pool of the
    # previous stage (== the original independent k = 5, 9, 13 pools, but 30
    # instead of 54 max ops per element).  Height direction first: the
    # leading-dim slices pad_ref[di:di+He] are alignment free; the width
    # shifts then run on the smaller (He, W+2P) intermediate.
    # TODO(synk): consider pltpu.roll for the width shifts (XLU slot) and fp8
    # weights on v7x once the kernel is MXU-bound there.
    cur = None
    for i in range(n_pools):
        if i > 0:
            pad_ref[P:P + He, P:P + W, :] = cur
        m = pad_ref[0:He, :, :]
        for di in range(1, kc):
            m = jnp.maximum(m, pad_ref[di:di + He, :, :])
        cur = m[:, 0:W, :]
        for dj in range(1, kc):
            cur = jnp.maximum(cur, m[:, dj:dj + W, :])
        # Only the Th output rows of this branch feed cv2.
        zi = cur[halo:halo + Th].reshape(Th * W, c_)
        z = z + jnp.dot(zi.astype(jnp.bfloat16), w2_ref[i + 1],
                        preferred_element_type=jnp.float32)

    # ---- cv2 epilogue: bias (BN folded) + SiLU; bf16 output halves writeback.
    z = z + b2_ref[...]
    z = z * jax.nn.sigmoid(z)
    o_ref[...] = z.reshape(1, Th * W, c2).astype(o_ref.dtype)


def _spp_kernel_whole(x_ref, w1_ref, b1_ref, w2_ref, b2_ref, o_ref, pad_ref,
                      **kw):
    _spp_body(x_ref, None, w1_ref, b1_ref, w2_ref, b2_ref, o_ref,
              None, None, None, pad_ref, **kw)


def _spp_kernel_halo(x_ref, x_hbm_ref, w1_ref, b1_ref, w2_ref, b2_ref, o_ref,
                     top_buf, bot_buf, sem, pad_ref, **kw):
    _spp_body(x_ref, x_hbm_ref, w1_ref, b1_ref, w2_ref, b2_ref, o_ref,
              top_buf, bot_buf, sem, pad_ref, **kw)


# --------------------------------------------------------------------------
# Planning helpers (generation aware)
# --------------------------------------------------------------------------
def _vmem_capacity_bytes():
    try:
        return int(pltpu.get_tpu_info().vmem_capacity_bytes)
    except Exception:
        try:
            kind = jax.devices()[0].device_kind.lower()
        except Exception:
            kind = ""
        return (64 << 20) if "v7" in kind else (128 << 20)


def _default_pool_dtype():
    # bf16 VALUs exist on v6e/v7x; keep f32 pooling on v5e and older where
    # there is no bf16 VPU and pooling hides under the MXU anyway.
    try:
        kind = jax.devices()[0].device_kind.lower()
    except Exception:
        return jnp.bfloat16
    if any(v in kind for v in ("v2", "v3", "v4")):
        return jnp.float32
    if "v5" in kind and ("lite" in kind or "v5e" in kind):
        return jnp.float32
    return jnp.bfloat16


def _estimate_vmem(Th, halo, W, c1, c_, c2, nb, P, pool_isize, out_isize):
    """Rough per-grid-step VMEM residency (double-buffered blocks + scratch +
    live intermediates); used to pick the row tile and the vmem limit."""
    He = Th + 2 * halo
    blocks = (2 * Th * W * c1 * 2                 # x core block (bf16), x2 buf
              + 2 * Th * W * c2 * out_isize       # output block, x2 buf
              + 2 * ((c1 * c_ + nb * c_ * c2) * 2 + (c_ + c2) * 4))  # weights
    halo_b = 2 * halo * W * c1 * 2
    pad_b = (He + 2 * P) * (W + 2 * P) * c_ * pool_isize
    live = (He * (W + 2 * P) * c_ * 2 * pool_isize    # m + cur values
            + He * W * c_ * 4                          # y pieces (f32)
            + Th * W * c2 * 4)                         # z accumulator (f32)
    return blocks + halo_b + pad_b + live


def _choose_row_tile(H, W, c1, c_, c2, nb, P, halo, pool_isize, out_isize,
                     budget):
    if _estimate_vmem(H, 0, W, c1, c_, c2, nb, P,
                      pool_isize, out_isize) <= budget:
        return H                                   # whole image fits: no halo
    fallback = H
    for th in range(H - 1, halo - 1, -1):          # largest fitting divisor
        if H % th or (th * W) % 8:
            continue
        fallback = th
        if _estimate_vmem(th, halo, W, c1, c_, c2, nb, P,
                          pool_isize, out_isize) <= budget:
            return th
    # TODO(synk): support non-divisor row tiles (ragged last tile) via masking.
    return fallback


# --------------------------------------------------------------------------
# Wrappers
# --------------------------------------------------------------------------
def spp_forward_nhwc(x_nhwc, params, ks=(5, 9, 13), row_tile=None,
                     out_dtype=jnp.bfloat16, pool_dtype=None):
    """SPP forward on an NHWC input; returns NHWC output in `out_dtype`."""
    w1, s1, b1, w2, s2, b2 = params
    N, H, W, c1 = x_nhwc.shape
    c_ = w1.shape[1]
    c2 = w2.shape[1]
    nb = len(ks) + 1
    kc = ks[0]
    assert kc % 2 == 1, "MaxPool2d(k, padding=k//2) geometry needs odd k"
    # SPPF cascade validity: pooling with `kc` applied n times == one
    # n*(kc-1)+1 pool; holds for the module default (5, 9, 13).
    assert all(k == (i + 1) * (kc - 1) + 1 for i, k in enumerate(ks)), ks
    P = kc // 2
    halo = len(ks) * P        # rows of context the cascade needs per side

    if pool_dtype is None:
        pool_dtype = _default_pool_dtype()
    pool_isize = jnp.dtype(pool_dtype).itemsize
    out_isize = jnp.dtype(out_dtype).itemsize

    vmem_cap = _vmem_capacity_bytes()
    if row_tile is None:
        Th = _choose_row_tile(H, W, c1, c_, c2, nb, P, halo, pool_isize,
                              out_isize, budget=int(0.45 * vmem_cap))
    else:
        Th = int(row_tile)
    assert H % Th == 0, (H, Th)
    T = H // Th
    if T > 1:
        assert Th >= halo, (Th, halo)
        assert (Th * W) % 8 == 0, (Th, W)
    eff_halo = halo if T > 1 else 0
    He = Th + 2 * eff_halo

    # Fold the BN scale into the weights; bf16 MXU operands, f32 biases.
    w1f = (w1 * s1).astype(jnp.bfloat16)                       # (c1, c_)
    w2f = (w2 * s2).astype(jnp.bfloat16).reshape(nb, c_, c2)   # per-branch
    b1f = b1.astype(jnp.float32)
    b2f = b2.astype(jnp.float32)

    # bf16 + flattened (H*W) layout in XLA: halves the input DMA and makes the
    # cv1 MXU operand reshape-free regardless of W % 8.
    xf = x_nhwc.astype(jnp.bfloat16).reshape(N, H * W, c1)

    vmem_need = _estimate_vmem(Th, eff_halo, W, c1, c_, c2, nb, P,
                               pool_isize, out_isize)
    vmem_limit = int(min(max(2 * vmem_need, 32 << 20), int(0.85 * vmem_cap)))

    cost = pl.CostEstimate(
        flops=2 * N * H * W * (c1 * c_ + nb * c_ * c2),
        transcendentals=N * H * W * (c_ + c2),
        bytes_accessed=(N * H * W * (2 * c1 + out_isize * c2)
                        + 2 * (c1 * c_ + nb * c_ * c2) + 4 * (c_ + c2)))

    kw = dict(kc=kc, n_pools=len(ks), H=H, W=W, Th=Th, halo=eff_halo,
              pool_dtype=pool_dtype)

    # TODO(synk): add pipeline_mode=pl.Buffered(1) to these constant-block
    # specs once single-buffering is supported end-to-end in pallas_call
    # (their index_maps are constant, so the second buffer is never used).
    wspecs = [
        pl.BlockSpec((c1, c_), lambda n, t: (0, 0)),
        pl.BlockSpec((1, c_), lambda n, t: (0, 0)),
        pl.BlockSpec((nb, c_, c2), lambda n, t: (0, 0, 0)),
        pl.BlockSpec((1, c2), lambda n, t: (0, 0)),
    ]
    x_core_spec = pl.BlockSpec((1, Th * W, c1), lambda n, t: (n, t, 0))
    out_spec = pl.BlockSpec((1, Th * W, c2), lambda n, t: (n, t, 0))
    pad_scratch = pltpu.VMEM((He + 2 * P, W + 2 * P, c_), pool_dtype)

    if eff_halo:
        kernel = partial(_spp_kernel_halo, **kw)
        in_specs = [x_core_spec, pl.BlockSpec(memory_space=pl.ANY)] + wspecs
        args = (xf, xf, w1f, b1f, w2f, b2f)
        scratch = [pltpu.VMEM((eff_halo * W, c1), jnp.bfloat16),
                   pltpu.VMEM((eff_halo * W, c1), jnp.bfloat16),
                   pltpu.SemaphoreType.DMA((2,)),
                   pad_scratch]
    else:
        kernel = partial(_spp_kernel_whole, **kw)
        in_specs = [x_core_spec] + wspecs
        args = (xf, w1f, b1f, w2f, b2f)
        scratch = [pad_scratch]

    out = pl.pallas_call(
        kernel,
        out_shape=jax.ShapeDtypeStruct((N, H * W, c2), out_dtype),
        grid=(N, T),
        in_specs=in_specs,
        out_specs=out_spec,
        scratch_shapes=scratch,
        compiler_params=pltpu.CompilerParams(
            dimension_semantics=("parallel", "parallel"),
            vmem_limit_bytes=vmem_limit),
        cost_estimate=cost,
    )(*args)
    return out.reshape(N, H, W, c2)


def spp_forward(x_nchw, params, ks=(5, 9, 13), row_tile=None,
                out_dtype=jnp.bfloat16, pool_dtype=None):
    """NCHW wrapper matching the PyTorch module's layout convention.

    The two transposes are pure layout plumbing; NHWC callers should use
    spp_forward_nhwc directly."""
    x = jnp.transpose(x_nchw.astype(jnp.bfloat16), (0, 2, 3, 1))
    out = spp_forward_nhwc(x, params, ks, row_tile=row_tile,
                           out_dtype=out_dtype, pool_dtype=pool_dtype)
    return jnp.transpose(out, (0, 3, 1, 2))


# --------------------------------------------------------------------------
# Pure-JAX references + synthetic params
# --------------------------------------------------------------------------
def spp_reference(x_nchw, params, ks=(5, 9, 13)):
    """Exact f32 reference matching the PyTorch SPP forward (eval mode)."""
    w1, s1, b1, w2, s2, b2 = params
    x = jnp.transpose(x_nchw, (0, 2, 3, 1))
    y = jnp.einsum('nhwc,cd->nhwd', x, w1) * s1 + b1
    y = y * jax.nn.sigmoid(y)
    pooled = [y]
    for k in ks:
        p = k // 2
        m = jax.lax.reduce_window(
            y, -jnp.inf, jax.lax.max,
            window_dimensions=(1, k, k, 1), window_strides=(1, 1, 1, 1),
            padding=((0, 0), (p, p), (p, p), (0, 0)))
        pooled.append(m)
    cat = jnp.concatenate(pooled, axis=-1)
    z = jnp.einsum('nhwc,cd->nhwd', cat, w2) * s2 + b2
    z = z * jax.nn.sigmoid(z)
    return jnp.transpose(z, (0, 3, 1, 2))


def spp_reference_bf16(x_nchw, params, ks=(5, 9, 13)):
    """Reference with the kernel's numerics: BN scale folded into the weights,
    bf16 MXU operands, f32 accumulation, f32 bias/SiLU (pooling in bf16 is
    bit-identical because max commutes with monotone bf16 rounding)."""
    w1, s1, b1, w2, s2, b2 = params
    w1f = (w1 * s1).astype(jnp.bfloat16)
    w2f = (w2 * s2).astype(jnp.bfloat16)
    x = jnp.transpose(x_nchw, (0, 2, 3, 1)).astype(jnp.bfloat16)
    y = jnp.einsum('nhwc,cd->nhwd', x, w1f,
                   preferred_element_type=jnp.float32) + b1
    y = y * jax.nn.sigmoid(y)
    pooled = [y]
    for k in ks:
        p = k // 2
        m = jax.lax.reduce_window(
            y, -jnp.inf, jax.lax.max,
            window_dimensions=(1, k, k, 1), window_strides=(1, 1, 1, 1),
            padding=((0, 0), (p, p), (p, p), (0, 0)))
        pooled.append(m)
    cat = jnp.concatenate(pooled, axis=-1).astype(jnp.bfloat16)
    z = jnp.einsum('nhwc,cd->nhwd', cat, w2f,
                   preferred_element_type=jnp.float32) + b2
    z = z * jax.nn.sigmoid(z)
    return jnp.transpose(z, (0, 3, 1, 2))


def make_params(key, c1, c2, ks=(5, 9, 13), eps=1e-5):
    """Deterministic synthetic weights; BN folded into per-channel scale/bias."""
    c_ = c1 // 2
    cin2 = c_ * (len(ks) + 1)
    k = jax.random.split(key, 10)

    w1 = (0.5 * jax.random.normal(k[0], (c_, c1), jnp.float32)).T
    g1 = 1.0 + 0.1 * jax.random.normal(k[1], (c_,), jnp.float32)
    be1 = 0.1 * jax.random.normal(k[2], (c_,), jnp.float32)
    mu1 = 0.1 * jax.random.normal(k[3], (c_,), jnp.float32)
    var1 = jnp.abs(jax.random.normal(k[4], (c_,), jnp.float32)) + 0.5
    s1 = (g1 / jnp.sqrt(var1 + eps)).reshape(1, c_)
    b1 = (be1 - mu1 * (g1 / jnp.sqrt(var1 + eps))).reshape(1, c_)

    w2 = (0.5 * jax.random.normal(k[5], (c2, cin2), jnp.float32)).T
    g2 = 1.0 + 0.1 * jax.random.normal(k[6], (c2,), jnp.float32)
    be2 = 0.1 * jax.random.normal(k[7], (c2,), jnp.float32)
    mu2 = 0.1 * jax.random.normal(k[8], (c2,), jnp.float32)
    var2 = jnp.abs(jax.random.normal(k[9], (c2,), jnp.float32)) + 0.5
    s2 = (g2 / jnp.sqrt(var2 + eps)).reshape(1, c2)
    b2 = (be2 - mu2 * (g2 / jnp.sqrt(var2 + eps))).reshape(1, c2)

    return (w1, s1, b1, w2, s2, b2)


if __name__ == "__main__":
    N, c1, c2, H, W = 2, 4, 8, 16, 16
    key = jax.random.PRNGKey(0)
    kx, kp = jax.random.split(key)
    x = jax.random.normal(kx, (N, c1, H, W), jnp.float32)   # NCHW like PyTorch
    params = make_params(kp, c1, c2)

    ref_q = spp_reference_bf16(x, params)    # kernel numerics (bf16 MXU, f32 acc)
    ref = spp_reference(x, params)           # exact f32 module semantics

    # Exercise both the whole-image path (auto) and the row-tiled + halo-DMA
    # path (forced Th=8 -> 2 tiles, halo=6) and validate each.
    for row_tile in (None, 8):
        out = jax.block_until_ready(spp_forward(x, params, row_tile=row_tile))
        assert out.shape == (N, c2, H, W), out.shape
        o32 = out.astype(jnp.float32)

        err_q = float(jnp.max(jnp.abs(o32 - ref_q)))
        assert jnp.allclose(o32, ref_q, atol=4e-2, rtol=4e-2), \
            f"row_tile={row_tile}: bf16-numerics mismatch, max abs err {err_q}"

        err = float(jnp.max(jnp.abs(o32 - ref)))
        assert jnp.allclose(o32, ref, atol=2e-1, rtol=2e-1), \
            f"row_tile={row_tile}: f32 reference mismatch, max abs err {err}"

    print("KERNEL_OK")
</pallas_src>

<mosaic_0001>
module attributes {stable_mosaic.version = 11 : i64} {
  func.func @_spp_kernel_whole(%arg0: i32, %arg1: i32, %arg2: memref<1x256x4xbf16, #tpu.memory_space<vmem>>, %arg3: memref<4x2xbf16, #tpu.memory_space<vmem>>, %arg4: memref<1x2xf32, #tpu.memory_space<vmem>>, %arg5: memref<4x2x8xbf16, #tpu.memory_space<vmem>>, %arg6: memref<1x8xf32, #tpu.memory_space<vmem>>, %arg7: memref<1x256x8xbf16, #tpu.memory_space<vmem>>, %arg8: memref<20x20x2xbf16, #tpu.memory_space<vmem>>) attributes {dimension_semantics = [#tpu.dimension_semantics<parallel>, #tpu.dimension_semantics<parallel>], iteration_bounds = array<i64: 2, 1>, scalar_prefetch = 0 : i64, scratch_operands = 1 : i64, tpu.core_type = #tpu.core_type<tc>, window_params = [{transform_indices = @transform_0, window_bounds = array<i64: 1, 256, 4>}, {pipeline_mode = #tpu.pipeline_mode<synchronous>, transform_indices = @transform_1, window_bounds = array<i64: 4, 2>}, {pipeline_mode = #tpu.pipeline_mode<synchronous>, transform_indices = @transform_2, window_bounds = array<i64: 1, 2>}, {pipeline_mode = #tpu.pipeline_mode<synchronous>, transform_indices = @transform_3, window_bounds = array<i64: 4, 2, 8>}, {pipeline_mode = #tpu.pipeline_mode<synchronous>, transform_indices = @transform_4, window_bounds = array<i64: 1, 8>}, {transform_indices = @transform_5, window_bounds = array<i64: 1, 256, 8>}]} {
    %c0 = arith.constant 0 : index
    %c0_0 = arith.constant 0 : index
    %c0_1 = arith.constant 0 : index
    %0 = vector.load %arg2[%c0, %c0_0, %c0_1] : memref<1x256x4xbf16, #tpu.memory_space<vmem>>, vector<1x256x4xbf16>
    %1 = vector.shape_cast %0 : vector<1x256x4xbf16> to vector<256x4xbf16>
    %c0_2 = arith.constant 0 : index
    %c0_3 = arith.constant 0 : index
    %2 = vector.load %arg3[%c0_2, %c0_3] : memref<4x2xbf16, #tpu.memory_space<vmem>>, vector<4x2xbf16>
    %cst = arith.constant dense<0.000000e+00> : vector<256x2xf32>
    %3 = tpu.matmul %1, %2, %cst {dimension_numbers = #tpu.dot_dimension_numbers<[1], [0], [0], [1], [0, 0, 1, 1], [], []>} : vector<256x4xbf16>, vector<4x2xbf16>, vector<256x2xf32> -> vector<256x2xf32>
    %c0_4 = arith.constant 0 : index
    %c0_5 = arith.constant 0 : index
    %4 = vector.load %arg4[%c0_4, %c0_5] : memref<1x2xf32, #tpu.memory_space<vmem>>, vector<1x2xf32>
    %5 = vector.broadcast %4 : vector<1x2xf32> to vector<256x2xf32>
    %6 = arith.addf %3, %5 : vector<256x2xf32>
    %7 = arith.negf %6 : vector<256x2xf32>
    %8 = math.exp %7 : vector<256x2xf32>
    %cst_6 = arith.constant 1.000000e+00 : f32
    %9 = vector.broadcast %cst_6 : f32 to vector<256x2xf32>
    %10 = arith.addf %9, %8 : vector<256x2xf32>
    %11 = arith.divf %9, %10 : vector<256x2xf32>
    %12 = arith.mulf %6, %11 : vector<256x2xf32>
    %13 = arith.truncf %12 : vector<256x2xf32> to vector<256x2xbf16>
    %c0_7 = arith.constant 0 : index
    %c0_8 = arith.constant 0 : index
    %c0_9 = arith.constant 0 : index
    %14 = vector.load %arg5[%c0_7, %c0_8, %c0_9] : memref<4x2x8xbf16, #tpu.memory_space<vmem>>, vector<1x2x8xbf16>
    %15 = vector.shape_cast %14 : vector<1x2x8xbf16> to vector<2x8xbf16>
    %cst_10 = arith.constant dense<0.000000e+00> : vector<256x8xf32>
    %16 = tpu.matmul %13, %15, %cst_10 {dimension_numbers = #tpu.dot_dimension_numbers<[1], [0], [0], [1], [0, 0, 1, 1], [], []>} : vector<256x2xbf16>, vector<2x8xbf16>, vector<256x8xf32> -> vector<256x8xf32>
    %cst_11 = arith.constant 0xFF80 : bf16
    %17 = vector.broadcast %cst_11 : bf16 to vector<2x20x2xbf16>
    %c0_12 = arith.constant 0 : index
    %c0_13 = arith.constant 0 : index
    %c0_14 = arith.constant 0 : index
    %18 = vector.load %arg8[%c0_12, %c0_13, %c0_14] : memref<20x20x2xbf16, #tpu.memory_space<vmem>>, vector<2x20x2xbf16>
    tpu.vector_store %arg8[%c0_12, %c0_13, %c0_14], %17 {strides = array<i32>} : memref<20x20x2xbf16, #tpu.memory_space<vmem>>, vector<2x20x2xbf16>,
    %cst_15 = arith.constant 0xFF80 : bf16
    %19 = vector.broadcast %cst_15 : bf16 to vector<2x20x2xbf16>
    %c18 = arith.constant 18 : index
    %c0_16 = arith.constant 0 : index
    %c0_17 = arith.constant 0 : index
    %20 = vector.load %arg8[%c18, %c0_16, %c0_17] : memref<20x20x2xbf16, #tpu.memory_space<vmem>>, vector<2x20x2xbf16>
    tpu.vector_store %arg8[%c18, %c0_16, %c0_17], %19 {strides = array<i32>} : memref<20x20x2xbf16, #tpu.memory_space<vmem>>, vector<2x20x2xbf16>,
    %cst_18 = arith.constant 0xFF80 : bf16
    %21 = vector.broadcast %cst_18 : bf16 to vector<20x2x2xbf16>
    %c0_19 = arith.constant 0 : index
    %c0_20 = arith.constant 0 : index
    %c0_21 = arith.constant 0 : index
    %22 = vector.load %arg8[%c0_19, %c0_20, %c0_21] : memref<20x20x2xbf16, #tpu.memory_space<vmem>>, vector<20x2x2xbf16>
    tpu.vector_store %arg8[%c0_19, %c0_20, %c0_21], %21 {strides = array<i32>} : memref<20x20x2xbf16, #tpu.memory_space<vmem>>, vector<20x2x2xbf16>,
    %cst_22 = arith.constant 0xFF80 : bf16
    %23 = vector.broadcast %cst_22 : bf16 to vector<20x2x2xbf16>
    %c0_23 = arith.constant 0 : index
    %c18_24 = arith.constant 18 : index
    %c0_25 = arith.constant 0 : index
    %24 = vector.load %arg8[%c0_23, %c18_24, %c0_25] : memref<20x20x2xbf16, #tpu.memory_space<vmem>>, vector<20x2x2xbf16>
    tpu.vector_store %arg8[%c0_23, %c18_24, %c0_25], %23 {strides = array<i32>} : memref<20x20x2xbf16, #tpu.memory_space<vmem>>, vector<20x2x2xbf16>,
    %25 = vector.shape_cast %12 : vector<256x2xf32> to vector<16x16x2xf32>
    %26 = arith.truncf %25 : vector<16x16x2xf32> to vector<16x16x2xbf16>
    %c2 = arith.constant 2 : index
    %c2_26 = arith.constant 2 : index
    %c0_27 = arith.constant 0 : index
    %27 = vector.load %arg8[%c2, %c2_26, %c0_27] : memref<20x20x2xbf16, #tpu.memory_space<vmem>>, vector<16x16x2xbf16>
    tpu.vector_store %arg8[%c2, %c2_26, %c0_27], %26 {strides = array<i32>} : memref<20x20x2xbf16, #tpu.memory_space<vmem>>, vector<16x16x2xbf16>,
    %c0_28 = arith.constant 0 : index
    %c0_29 = arith.constant 0 : index
    %c0_30 = arith.constant 0 : index
    %28 = vector.load %arg8[%c0_28, %c0_29, %c0_30] : memref<20x20x2xbf16, #tpu.memory_space<vmem>>, vector<16x20x2xbf16>
    %c1 = arith.constant 1 : index
    %c0_31 = arith.constant 0 : index
    %c0_32 = arith.constant 0 : index
    %29 = vector.load %arg8[%c1, %c0_31, %c0_32] : memref<20x20x2xbf16, #tpu.memory_space<vmem>>, vector<16x20x2xbf16>
    %30 = arith.maximumf %28, %29 : vector<16x20x2xbf16>
    %c2_33 = arith.constant 2 : index
    %c0_34 = arith.constant 0 : index
    %c0_35 = arith.constant 0 : index
    %31 = vector.load %arg8[%c2_33, %c0_34, %c0_35] : memref<20x20x2xbf16, #tpu.memory_space<vmem>>, vector<16x20x2xbf16>
    %32 = arith.maximumf %30, %31 : vector<16x20x2xbf16>
    %c3 = arith.constant 3 : index
    %c0_36 = arith.constant 0 : index
    %c0_37 = arith.constant 0 : index
    %33 = vector.load %arg8[%c3, %c0_36, %c0_37] : memref<20x20x2xbf16, #tpu.memory_space<vmem>>, vector<16x20x2xbf16>
    %34 = arith.maximumf %32, %33 : vector<16x20x2xbf16>
    %c4 = arith.constant 4 : index
    %c0_38 = arith.constant 0 : index
    %c0_39 = arith.constant 0 : index
    %35 = vector.load %arg8[%c4, %c0_38, %c0_39] : memref<20x20x2xbf16, #tpu.memory_space<vmem>>, vector<16x20x2xbf16>
    %36 = arith.maximumf %34, %35 : vector<16x20x2xbf16>
    %37 = vector.extract_strided_slice %36 {offsets = [0, 0, 0], sizes = [16, 16, 2], strides = [1, 1, 1]} : vector<16x20x2xbf16> to vector<16x16x2xbf16>
    %38 = vector.extract_strided_slice %36 {offsets = [0, 1, 0], sizes = [16, 16, 2], strides = [1, 1, 1]} : vector<16x20x2xbf16> to vector<16x16x2xbf16>
    %39 = arith.maximumf %37, %38 : vector<16x16x2xbf16>
    %40 = vector.extract_strided_slice %36 {offsets = [0, 2, 0], sizes = [16, 16, 2], strides = [1, 1, 1]} : vector<16x20x2xbf16> to vector<16x16x2xbf16>
    %41 = arith.maximumf %39, %40 : vector<16x16x2xbf16>
    %42 = vector.extract_strided_slice %36 {offsets = [0, 3, 0], sizes = [16, 16, 2], strides = [1, 1, 1]} : vector<16x20x2xbf16> to vector<16x16x2xbf16>
    %43 = arith.maximumf %41, %42 : vector<16x16x2xbf16>
    %44 = vector.extract_strided_slice %36 {offsets = [0, 4, 0], sizes = [16, 16, 2], strides = [1, 1, 1]} : vector<16x20x2xbf16> to vector<16x16x2xbf16>
    %45 = arith.maximumf %43, %44 : vector<16x16x2xbf16>
    %46 = vector.shape_cast %45 : vector<16x16x2xbf16> to vector<256x2xbf16>
    %c1_40 = arith.constant 1 : index
    %c0_41 = arith.constant 0 : index
    %c0_42 = arith.constant 0 : index
    %47 = vector.load %arg5[%c1_40, %c0_41, %c0_42] : memref<4x2x8xbf16, #tpu.memory_space<vmem>>, vector<1x2x8xbf16>
    %48 = vector.shape_cast %47 : vector<1x2x8xbf16> to vector<2x8xbf16>
    %cst_43 = arith.constant dense<0.000000e+00> : vector<256x8xf32>
    %49 = tpu.matmul %46, %48, %cst_43 {dimension_numbers = #tpu.dot_dimension_numbers<[1], [0], [0], [1], [0, 0, 1, 1], [], []>} : vector<256x2xbf16>, vector<2x8xbf16>, vector<256x8xf32> -> vector<256x8xf32>
    %50 = arith.addf %16, %49 : vector<256x8xf32>
    %c2_44 = arith.constant 2 : index
    %c2_45 = arith.constant 2 : index
    %c0_46 = arith.constant 0 : index
    %51 = vector.load %arg8[%c2_44, %c2_45, %c0_46] : memref<20x20x2xbf16, #tpu.memory_space<vmem>>, vector<16x16x2xbf16>
    tpu.vector_store %arg8[%c2_44, %c2_45, %c0_46], %45 {strides = array<i32>} : memref<20x20x2xbf16, #tpu.memory_space<vmem>>, vector<16x16x2xbf16>,
    %c0_47 = arith.constant 0 : index
    %c0_48 = arith.constant 0 : index
    %c0_49 = arith.constant 0 : index
    %52 = vector.load %arg8[%c0_47, %c0_48, %c0_49] : memref<20x20x2xbf16, #tpu.memory_space<vmem>>, vector<16x20x2xbf16>
    %c1_50 = arith.constant 1 : index
    %c0_51 = arith.constant 0 : index
    %c0_52 = arith.constant 0 : index
    %53 = vector.load %arg8[%c1_50, %c0_51, %c0_52] : memref<20x20x2xbf16, #tpu.memory_space<vmem>>, vector<16x20x2xbf16>
    %54 = arith.maximumf %52, %53 : vector<16x20x2xbf16>
    %c2_53 = arith.constant 2 : index
    %c0_54 = arith.constant 0 : index
    %c0_55 = arith.constant 0 : index
    %55 = vector.load %arg8[%c2_53, %c0_54, %c0_55] : memref<20x20x2xbf16, #tpu.memory_space<vmem>>, vector<16x20x2xbf16>
    %56 = arith.maximumf %54, %55 : vector<16x20x2xbf16>
    %c3_56 = arith.constant 3 : index
    %c0_57 = arith.constant 0 : index
    %c0_58 = arith.constant 0 : index
    %57 = vector.load %arg8[%c3_56, %c0_57, %c0_58] : memref<20x20x2xbf16, #tpu.memory_space<vmem>>, vector<16x20x2xbf16>
    %58 = arith.maximumf %56, %57 : vector<16x20x2xbf16>
    %c4_59 = arith.constant 4 : index
    %c0_60 = arith.constant 0 : index
    %c0_61 = arith.constant 0 : index
    %59 = vector.load %arg8[%c4_59, %c0_60, %c0_61] : memref<20x20x2xbf16, #tpu.memory_space<vmem>>, vector<16x20x2xbf16>
    %60 = arith.maximumf %58, %59 : vector<16x20x2xbf16>
    %61 = vector.extract_strided_slice %60 {offsets = [0, 0, 0], sizes = [16, 16, 2], strides = [1, 1, 1]} : vector<16x20x2xbf16> to vector<16x16x2xbf16>
    %62 = vector.extract_strided_slice %60 {offsets = [0, 1, 0], sizes = [16, 16, 2], strides = [1, 1, 1]} : vector<16x20x2xbf16> to vector<16x16x2xbf16>
    %63 = arith.maximumf %61, %62 : vector<16x16x2xbf16>
    %64 = vector.extract_strided_slice %60 {offsets = [0, 2, 0], sizes = [16, 16, 2], strides = [1, 1, 1]} : vector<16x20x2xbf16> to vector<16x16x2xbf16>
    %65 = arith.maximumf %63, %64 : vector<16x16x2xbf16>
    %66 = vector.extract_strided_slice %60 {offsets = [0, 3, 0], sizes = [16, 16, 2], strides = [1, 1, 1]} : vector<16x20x2xbf16> to vector<16x16x2xbf16>
    %67 = arith.maximumf %65, %66 : vector<16x16x2xbf16>
    %68 = vector.extract_strided_slice %60 {offsets = [0, 4, 0], sizes = [16, 16, 2], strides = [1, 1, 1]} : vector<16x20x2xbf16> to vector<16x16x2xbf16>
    %69 = arith.maximumf %67, %68 : vector<16x16x2xbf16>
    %70 = vector.shape_cast %69 : vector<16x16x2xbf16> to vector<256x2xbf16>
    %c2_62 = arith.constant 2 : index
    %c0_63 = arith.constant 0 : index
    %c0_64 = arith.constant 0 : index
    %71 = vector.load %arg5[%c2_62, %c0_63, %c0_64] : memref<4x2x8xbf16, #tpu.memory_space<vmem>>, vector<1x2x8xbf16>
    %72 = vector.shape_cast %71 : vector<1x2x8xbf16> to vector<2x8xbf16>
    %cst_65 = arith.constant dense<0.000000e+00> : vector<256x8xf32>
    %73 = tpu.matmul %70, %72, %cst_65 {dimension_numbers = #tpu.dot_dimension_numbers<[1], [0], [0], [1], [0, 0, 1, 1], [], []>} : vector<256x2xbf16>, vector<2x8xbf16>, vector<256x8xf32> -> vector<256x8xf32>
    %74 = arith.addf %50, %73 : vector<256x8xf32>
    %c2_66 = arith.constant 2 : index
    %c2_67 = arith.constant 2 : index
    %c0_68 = arith.constant 0 : index
    %75 = vector.load %arg8[%c2_66, %c2_67, %c0_68] : memref<20x20x2xbf16, #tpu.memory_space<vmem>>, vector<16x16x2xbf16>
    tpu.vector_store %arg8[%c2_66, %c2_67, %c0_68], %69 {strides = array<i32>} : memref<20x20x2xbf16, #tpu.memory_space<vmem>>, vector<16x16x2xbf16>,
    %c0_69 = arith.constant 0 : index
    %c0_70 = arith.constant 0 : index
    %c0_71 = arith.constant 0 : index
    %76 = vector.load %arg8[%c0_69, %c0_70, %c0_71] : memref<20x20x2xbf16, #tpu.memory_space<vmem>>, vector<16x20x2xbf16>
    %c1_72 = arith.constant 1 : index
    %c0_73 = arith.constant 0 : index
    %c0_74 = arith.constant 0 : index
    %77 = vector.load %arg8[%c1_72, %c0_73, %c0_74] : memref<20x20x2xbf16, #tpu.memory_space<vmem>>, vector<16x20x2xbf16>
    %78 = arith.maximumf %76, %77 : vector<16x20x2xbf16>
    %c2_75 = arith.constant 2 : index
    %c0_76 = arith.constant 0 : index
    %c0_77 = arith.constant 0 : index
    %79 = vector.load %arg8[%c2_75, %c0_76, %c0_77] : memref<20x20x2xbf16, #tpu.memory_space<vmem>>, vector<16x20x2xbf16>
    %80 = arith.maximumf %78, %79 : vector<16x20x2xbf16>
    %c3_78 = arith.constant 3 : index
    %c0_79 = arith.constant 0 : index
    %c0_80 = arith.constant 0 : index
    %81 = vector.load %arg8[%c3_78, %c0_79, %c0_80] : memref<20x20x2xbf16, #tpu.memory_space<vmem>>, vector<16x20x2xbf16>
    %82 = arith.maximumf %80, %81 : vector<16x20x2xbf16>
    %c4_81 = arith.constant 4 : index
    %c0_82 = arith.constant 0 : index
    %c0_83 = arith.constant 0 : index
    %83 = vector.load %arg8[%c4_81, %c0_82, %c0_83] : memref<20x20x2xbf16, #tpu.memory_space<vmem>>, vector<16x20x2xbf16>
    %84 = arith.maximumf %82, %83 : vector<16x20x2xbf16>
    %85 = vector.extract_strided_slice %84 {offsets = [0, 0, 0], sizes = [16, 16, 2], strides = [1, 1, 1]} : vector<16x20x2xbf16> to vector<16x16x2xbf16>
    %86 = vector.extract_strided_slice %84 {offsets = [0, 1, 0], sizes = [16, 16, 2], strides = [1, 1, 1]} : vector<16x20x2xbf16> to vector<16x16x2xbf16>
    %87 = arith.maximumf %85, %86 : vector<16x16x2xbf16>
    %88 = vector.extract_strided_slice %84 {offsets = [0, 2, 0], sizes = [16, 16, 2], strides = [1, 1, 1]} : vector<16x20x2xbf16> to vector<16x16x2xbf16>
    %89 = arith.maximumf %87, %88 : vector<16x16x2xbf16>
    %90 = vector.extract_strided_slice %84 {offsets = [0, 3, 0], sizes = [16, 16, 2], strides = [1, 1, 1]} : vector<16x20x2xbf16> to vector<16x16x2xbf16>
    %91 = arith.maximumf %89, %90 : vector<16x16x2xbf16>
    %92 = vector.extract_strided_slice %84 {offsets = [0, 4, 0], sizes = [16, 16, 2], strides = [1, 1, 1]} : vector<16x20x2xbf16> to vector<16x16x2xbf16>
    %93 = arith.maximumf %91, %92 : vector<16x16x2xbf16>
    %94 = vector.shape_cast %93 : vector<16x16x2xbf16> to vector<256x2xbf16>
    %c3_84 = arith.constant 3 : index
    %c0_85 = arith.constant 0 : index
    %c0_86 = arith.constant 0 : index
    %95 = vector.load %arg5[%c3_84, %c0_85, %c0_86] : memref<4x2x8xbf16, #tpu.memory_space<vmem>>, vector<1x2x8xbf16>
    %96 = vector.shape_cast %95 : vector<1x2x8xbf16> to vector<2x8xbf16>
    %cst_87 = arith.constant dense<0.000000e+00> : vector<256x8xf32>
    %97 = tpu.matmul %94, %96, %cst_87 {dimension_numbers = #tpu.dot_dimension_numbers<[1], [0], [0], [1], [0, 0, 1, 1], [], []>} : vector<256x2xbf16>, vector<2x8xbf16>, vector<256x8xf32> -> vector<256x8xf32>
    %98 = arith.addf %74, %97 : vector<256x8xf32>
    %c0_88 = arith.constant 0 : index
    %c0_89 = arith.constant 0 : index
    %99 = vector.load %arg6[%c0_88, %c0_89] : memref<1x8xf32, #tpu.memory_space<vmem>>, vector<1x8xf32>
    %100 = vector.broadcast %99 : vector<1x8xf32> to vector<256x8xf32>
    %101 = arith.addf %98, %100 : vector<256x8xf32>
    %102 = arith.negf %101 : vector<256x8xf32>
    %103 = math.exp %102 : vector<256x8xf32>
    %cst_90 = arith.constant 1.000000e+00 : f32
    %104 = vector.broadcast %cst_90 : f32 to vector<256x8xf32>
    %105 = arith.addf %104, %103 : vector<256x8xf32>
    %106 = arith.divf %104, %105 : vector<256x8xf32>
    %107 = arith.mulf %101, %106 : vector<256x8xf32>
    %108 = vector.shape_cast %107 : vector<256x8xf32> to vector<1x256x8xf32>
    %109 = arith.truncf %108 : vector<1x256x8xf32> to vector<1x256x8xbf16>
    %c0_91 = arith.constant 0 : index
    %c0_92 = arith.constant 0 : index
    %c0_93 = arith.constant 0 : index
    %110 = vector.load %arg7[%c0_91, %c0_92, %c0_93] : memref<1x256x8xbf16, #tpu.memory_space<vmem>>, vector<1x256x8xbf16>
    tpu.vector_store %arg7[%c0_91, %c0_92, %c0_93], %109 {strides = array<i32>} : memref<1x256x8xbf16, #tpu.memory_space<vmem>>, vector<1x256x8xbf16>,
    return
  }
  func.func @transform_0(%arg0: i32, %arg1: i32) -> (i32, i32, i32) {
    %c0_i32 = arith.constant 0 : i32
    %c0_i32_0 = arith.constant 0 : i32
    return %arg0, %arg1, %c0_i32 : i32, i32, i32
  }
  func.func @transform_1(%arg0: i32, %arg1: i32) -> (i32, i32) {
    %c0_i32 = arith.constant 0 : i32
    %c0_i32_0 = arith.constant 0 : i32
    %c0_i32_1 = arith.constant 0 : i32
    return %c0_i32, %c0_i32_0 : i32, i32
  }
  func.func @transform_2(%arg0: i32, %arg1: i32) -> (i32, i32) {
    %c0_i32 = arith.constant 0 : i32
    %c0_i32_0 = arith.constant 0 : i32
    %c0_i32_1 = arith.constant 0 : i32
    return %c0_i32, %c0_i32_0 : i32, i32
  }
  func.func @transform_3(%arg0: i32, %arg1: i32) -> (i32, i32, i32) {
    %c0_i32 = arith.constant 0 : i32
    %c0_i32_0 = arith.constant 0 : i32
    %c0_i32_1 = arith.constant 0 : i32
    %c0_i32_2 = arith.constant 0 : i32
    return %c0_i32, %c0_i32_0, %c0_i32_1 : i32, i32, i32
  }
  func.func @transform_4(%arg0: i32, %arg1: i32) -> (i32, i32) {
    %c0_i32 = arith.constant 0 : i32
    %c0_i32_0 = arith.constant 0 : i32
    %c0_i32_1 = arith.constant 0 : i32
    return %c0_i32, %c0_i32_0 : i32, i32
  }
  func.func @transform_5(%arg0: i32, %arg1: i32) -> (i32, i32, i32) {
    %c0_i32 = arith.constant 0 : i32
    %c0_i32_0 = arith.constant 0 : i32
    return %arg0, %arg1, %c0_i32 : i32, i32, i32
  }
}

</mosaic_0001>

<bundles_post_ra>
// kernel: tpu_custom_call.1
= control target key start
LH: loop header
LB: loop body
LE: loop exit
PB: predicated region body
PF: predicated region fallthrough
CT: control target
= control target key end

     0   :  { %s9111_s18 = smov 0   ;;  %s9113_s19 = smov 0   ;;  %s12487_s0 = inlined_call_operand.vmem [shape: bf16[2,256,4], index: 0, kind: input, shape index: {}]   ;;  %s12488_s1 = inlined_call_operand.vmem [shape: bf16[4,2], index: 1, kind: input, shape index: {}]   ;;  %s12489_s2 = inlined_call_operand.vmem [shape: f32[1,2], index: 2, kind: input, shape index: {}]   ;;  %s12490_s3 = inlined_call_operand.vmem [shape: bf16[4,2,8], index: 3, kind: input, shape index: {}]   ;;  %s12491_s4 = inlined_call_operand.vmem [shape: f32[1,8], index: 4, kind: input, shape index: {}]   ;;  %s12492_s5 = inlined_call_operand.vmem [shape: bf16[2,256,8], index: 5, kind: output, shape index: {}]  }
   0x1   :  { %s9115_s20 = smov 0  }
   0x2 LB: > { %s27_s21 = sadd.s32 1, %s9074_s19  ;;  %p7953_p0 = scmp.ge.s32.totalorder %s9078_s20, 1  ;;  %s9078_s20 = sphi %s9115_s20, %s15_s20   ;;  %s9074_s19 = sphi %s9113_s19, %s12543_s19   ;;  %s9070_s18 = sphi %s9111_s18, %s12542_s18  }
   0x3   : > { %p29_p1 = scmp.ge.s32.totalorder %s27_s21, 2  ;;  %p208_p2 = scmp.lt.s32.totalorder %s9078_s20, 3 }
   0x5   : > { %s12545_s21 = smov (%p29_p1, %s27_s21), 0  ;;  %p209_p3 = pnand %p7953_p0, %p208_p2 }
   0x7   : > { %212 = sbr.rel (%p209_p3) target bundleno = 1384 (0x568), region = 40 }
   0xe   : > { %v298_v0 = vld [vmem:[%s12488_s1] sm:$0x3]  ;;  %vm435_vm0 = vcmask 1041408   ;;  %p245_p4 = scmp.lt.s32.totalorder %s9070_s18, 1  ;;  %vm386_vm1 = vcmask 31744   ;;  %vm856_vm2 = vcmask 8192  }
   0xf   : > { %8752 = vmatprep.subr.msk.bf16.mxu0 %vm435_vm0, %v298_v0  ;;  %v437_v1 = vsel %vm435_vm0, %v298_v0, 0  ;;  %v9080_v18 = vmov 4286644096   ;;  %vm841_vm3 = vcmask 11264   ;;  %vm877_vm4 = vcmask 9217  }
  0x10   : > { %8485 = vmatpush3.bf16.msra.mxu0 %v437_v1  ;;  %s12547_s18 = smov (!%p245_p4, %s9070_s18), 1  ;;  %860 = vst.msk [vmem:[#allocation2 + $0x24] sm:$0x1] %vm856_vm2, %v9080_v18  ;;  %859 = vst.msk [vmem:[#allocation2 + $0x18] sm:$0x1] %vm856_vm2, %v9080_v18  ;;  %vm844_vm5 = vcmask 9216  }
  0x11   : > { %s8333_s24 = sshll.u32 %s12547_s18, 7  ;;  %861 = vst.msk [vmem:[#allocation2 + $0x30] sm:$0x1] %vm856_vm2, %v9080_v18  ;;  %862 = vst.msk [vmem:[#allocation2 + $0x3c] sm:$0x1] %vm856_vm2, %v9080_v18  ;;  %vm978_vm6 = vcmask 1040384  }
  0x12   : > { %s9142_s27 = scalar_lea.vmem %s12487_s0, %s8333_s24  ;;  %863 = vst.msk [vmem:[#allocation2 + $0x48] sm:$0x1] %vm856_vm2, %v9080_v18  ;;  %864 = vst.msk [vmem:[#allocation2 + $0x54] sm:$0x1] %vm856_vm2, %v9080_v18  ;;  %v840_v19 = vld [vmem:[%s12490_s3] sm:$0x1]  ;;  %s12356_s23 = scalar_lea.vmem %s12492_s5, %s8333_s24 }
  0x13   : > { %v8783_v2 = vld [vmem:[%s9142_s27] sm:$0xff]   ;;  %v8784_v3 = vld [vmem:[%s9142_s27 + $0x8] sm:$0xff]   ;;  %v8785_v4 = vld [vmem:[%s9142_s27 + $0x10] sm:$0xff]   ;;  %865 = vst.msk [vmem:[#allocation2 + $0x60] sm:$0x1] %vm856_vm2, %v9080_v18  ;;  %8755 = vmatprep.subr.msk.bf16.mxu1 %vm978_vm6, %v840_v19  ;;  %v9229_v20 = vsel %vm978_vm6, %v840_v19, 0 }
  0x14   : > { %8486 = vmatprep.mubr.msk.bf16.mxu0 %vm386_vm1, %v8783_v2  ;;  %v8786_v5 = vld [vmem:[%s9142_s27 + $0x18] sm:$0xff]   ;;  %v8787_v6 = vld [vmem:[%s9142_s27 + $0x20] sm:$0xff]   ;;  %v8788_v7 = vld [vmem:[%s9142_s27 + $0x28] sm:$0xff]   ;;  %866 = vst.msk [vmem:[#allocation2 + $0x6c] sm:$0x1] %vm856_vm2, %v9080_v18  ;;  %8655 = vmatpush3.bf16.msra.mxu1 %v9229_v20  ;;  %vm1110_vm7 = vcmask 11265  }
  0x15   : > { %8487 = vmatmul.mubr.msk.bf16.vlgmr.msra.gmra.mrb[0].mxu0 %vm386_vm1, %v8784_v3  ;;  %v8789_v8 = vld [vmem:[%s9142_s27 + $0x30] sm:$0xff]   ;;  %v8790_v9 = vld [vmem:[%s9142_s27 + $0x38] sm:$0xff]   ;;  %v8791_v10 = vld [vmem:[%s9142_s27 + $0x40] sm:$0xff]   ;;  %867 = vst.msk [vmem:[#allocation2 + $0x78] sm:$0x1] %vm856_vm2, %v9080_v18  ;;  %vm979_vm8 = vcmask 1044484  }
  0x16   : > { %8490 = vmatprep.mubr.msk.bf16.mxu0 %vm386_vm1, %v8785_v4  ;;  %v8792_v11 = vld [vmem:[%s9142_s27 + $0x48] sm:$0xff]   ;;  %v8793_v12 = vld [vmem:[%s9142_s27 + $0x50] sm:$0xff]   ;;  %v8794_v13 = vld [vmem:[%s9142_s27 + $0x58] sm:$0xff]   ;;  %868 = vst.msk [vmem:[#allocation2 + $0x84] sm:$0x1] %vm856_vm2, %v9080_v18  ;;  %vm2840_vm10 = vcmask 15360  }
  0x17   : > { %v8795_v14 = vld [vmem:[%s9142_s27 + $0x60] sm:$0xff]   ;;  %v8796_v15 = vld [vmem:[%s9142_s27 + $0x68] sm:$0xff]   ;;  %v8797_v16 = vld [vmem:[%s9142_s27 + $0x70] sm:$0xff]   ;;  %869 = vst.msk [vmem:[#allocation2 + $0x90] sm:$0x1] %vm856_vm2, %v9080_v18  ;;  %vm2093_vm13 = vcmask 1042432  }
  0x18   : > { %v8798_v17 = vld [vmem:[%s9142_s27 + $0x78] sm:$0xff]   ;;  %870 = vst.msk [vmem:[#allocation2 + $0x9c] sm:$0x1] %vm856_vm2, %v9080_v18  ;;  %871 = vst.msk [vmem:[#allocation2 + $0xa8] sm:$0x1] %vm856_vm2, %v9080_v18  ;;  %vm2094_vm14 = vcmask 1046532  }
  0x19   : > { %872 = vst.msk [vmem:[#allocation2 + $0xb4] sm:$0x1] %vm856_vm2, %v9080_v18  ;;  %873 = vst.msk [vmem:[#allocation2 + $0xc0] sm:$0x1] %vm856_vm2, %v9080_v18  ;;  %v8087_v21 = vld [vmem:[%s12490_s3 + $0x1] sm:$0x1] }
  0x1a   : > { %874 = vst.msk [vmem:[#allocation2 + $0xcc] sm:$0x1] %vm856_vm2, %v9080_v18  ;;  %8753 = vmatprep.subr.msk.bf16.mxu0 %vm978_vm6, %v8087_v21  ;;  %v2891_v22 = vsel %vm978_vm6, %v8087_v21, 0  ;;  %v9241_v23 = vld [vmem:[%s12489_s2] ss:$0 sm:$0xff]  ;;  %vm9358_vm9 = vmor %vm978_vm6, %vm979_vm8 }
  0x1b   : > { %842 = vst.msk [vmem:[#allocation2] sm:$0xf] %vm841_vm3, %v9080_v18  ;;  %843 = vst.msk [vmem:[#allocation2 + $0x4] sm:$0xf] %vm841_vm3, %v9080_v18  ;;  %8519 = vmatpush3.bf16.msra.mxu0 %v2891_v22  ;;  %v9262_v36 = vld [vmem:[%s12490_s3 + $0x2] sm:$0x1] }
  0x1c   : > { %846 = vst.msk [vmem:[#allocation2 + $0xc] sm:$0xf] %vm841_vm3, %v9080_v18  ;;  %847 = vst.msk [vmem:[#allocation2 + $0x10] sm:$0xf] %vm841_vm3, %v9080_v18  ;;  %8754 = vmatprep.subr.msk.bf16.mxu0 %vm978_vm6, %v840_v19  ;;  %8756 = vmatprep.subr.msk.bf16.mxu1 %vm978_vm6, %v9262_v36  ;;  %vm1594_vm11 = vsmask.f32 3328 }
  0x1d   : > { %8491 = vmatmul.mubr.msk.bf16.gmra.mrb[4].mxu0 %vm386_vm1, %v8786_v5  ;;  %850 = vst.msk [vmem:[#allocation2 + $0xd8] sm:$0xf] %vm841_vm3, %v9080_v18  ;;  %851 = vst.msk [vmem:[#allocation2 + $0xdc] sm:$0xf] %vm841_vm3, %v9080_v18  ;;  %vm1595_vm12 = vsmask.f32 7440 }
  0x1e   : > { %8494 = vmatprep.mubr.msk.bf16.mxu0 %vm386_vm1, %v8787_v6  ;;  %853 = vst.msk [vmem:[#allocation2 + $0xe4] sm:$0xf] %vm841_vm3, %v9080_v18  ;;  %854 = vst.msk [vmem:[#allocation2 + $0xe8] sm:$0xf] %vm841_vm3, %v9080_v18 }
  0x1f   : > { %857 = vst.msk [vmem:[#allocation2] sm:$0x1] %vm856_vm2, %v9080_v18  ;;  %858 = vst.msk [vmem:[#allocation2 + $0xc] sm:$0x1] %vm856_vm2, %v9080_v18 }
  0x20   : > { %875 = vst.msk [vmem:[#allocation2 + $0xd8] sm:$0x1] %vm856_vm2, %v9080_v18  ;;  %876 = vst.msk [vmem:[#allocation2 + $0xe4] sm:$0x1] %vm856_vm2, %v9080_v18 }
  0x21   : > { %880 = vst.msk [vmem:[#allocation2 + $0x20] sm:$0x2] %vm877_vm4, %v9080_v18  ;;  %881 = vst.msk [vmem:[#allocation2 + $0x2c] sm:$0x2] %vm877_vm4, %v9080_v18 }
  0x22   : > { %882 = vst.msk [vmem:[#allocation2 + $0x38] sm:$0x2] %vm877_vm4, %v9080_v18  ;;  %883 = vst.msk [vmem:[#allocation2 + $0x44] sm:$0x2] %vm877_vm4, %v9080_v18 }
  0x23   : > { %884 = vst.msk [vmem:[#allocation2 + $0x50] sm:$0x2] %vm877_vm4, %v9080_v18  ;;  %885 = vst.msk [vmem:[#allocation2 + $0x5c] sm:$0x2] %vm877_vm4, %v9080_v18  ;;  %v9312_v22 = vld [vmem:[#allocation2 + $0x10] sm:$0xf] }
  0x24   : > { %886 = vst.msk [vmem:[#allocation2 + $0x68] sm:$0x2] %vm877_vm4, %v9080_v18  ;;  %887 = vst.msk [vmem:[#allocation2 + $0x74] sm:$0x2] %vm877_vm4, %v9080_v18 }
  0x25   : > { %8495 = vmatmul.mubr.msk.bf16.gmra.mrb[8].mxu0 %vm386_vm1, %v8788_v7  ;;  %888 = vst.msk [vmem:[#allocation2 + $0x80] sm:$0x2] %vm877_vm4, %v9080_v18  ;;  %889 = vst.msk [vmem:[#allocation2 + $0x8c] sm:$0x2] %vm877_vm4, %v9080_v18 }
  0x26   : > { %8498 = vmatprep.mubr.msk.bf16.mxu0 %vm386_vm1, %v8789_v8  ;;  %890 = vst.msk [vmem:[#allocation2 + $0x98] sm:$0x2] %vm877_vm4, %v9080_v18  ;;  %891 = vst.msk [vmem:[#allocation2 + $0xa4] sm:$0x2] %vm877_vm4, %v9080_v18 }
  0x27   : > { %892 = vst.msk [vmem:[#allocation2 + $0xb0] sm:$0x2] %vm877_vm4, %v9080_v18  ;;  %893 = vst.msk [vmem:[#allocation2 + $0xbc] sm:$0x2] %vm877_vm4, %v9080_v18 }
  0x28   : > { %894 = vst.msk [vmem:[#allocation2 + $0xc8] sm:$0x2] %vm877_vm4, %v9080_v18  ;;  %895 = vst.msk [vmem:[#allocation2 + $0xd4] sm:$0x2] %vm877_vm4, %v9080_v18 }
  0x29   : > { %845 = vst.msk [vmem:[#allocation2 + $0x8] sm:$0x3] %vm844_vm5, %v9080_v18  ;;  %848 = vst.msk [vmem:[#allocation2 + $0x14] sm:$0x3] %vm844_vm5, %v9080_v18 }
  0x2a   : > { %852 = vst.msk [vmem:[#allocation2 + $0xe0] sm:$0x3] %vm844_vm5, %v9080_v18  ;;  %855 = vst.msk [vmem:[#allocation2 + $0xec] sm:$0x3] %vm844_vm5, %v9080_v18  ;;  %vm2580_vm5 = vcmask 1045508  }
  0x2b   : > { %878 = vst.msk [vmem:[#allocation2 + $0x8] sm:$0x2] %vm877_vm4, %v9080_v18  ;;  %879 = vst.msk [vmem:[#allocation2 + $0x14] sm:$0x2] %vm877_vm4, %v9080_v18 }
  0x2c   : > { %896 = vst.msk [vmem:[#allocation2 + $0xe0] sm:$0x2] %vm877_vm4, %v9080_v18  ;;  %897 = vst.msk [vmem:[#allocation2 + $0xec] sm:$0x2] %vm877_vm4, %v9080_v18  ;;  %vm2273_vm4 = vsmask.f32 6416 }
  0x2d   : > { %8499 = vmatmul.mubr.msk.bf16.gmra.mrb[12].mxu0 %vm386_vm1, %v8790_v9  ;;  %v9298_v9 = vld [vmem:[#allocation2] sm:$0xf]  ;;  %vm9631_vm15 = vmor %vm1594_vm11, %vm1595_vm12 }
  0x2e   : > { %8502 = vmatprep.mubr.msk.bf16.mxu0 %vm386_vm1, %v8791_v10  ;;  %vm9686_vm8 = vmor %vm2093_vm13, %vm2094_vm14 }
  0x2f   : > { %vm9739_vm12 = vmor %vm435_vm0, %vm2580_vm5  ;;  %vm7829_vm0 = vcmask 60416  }
  0x32   : > { %v9310_v21 = vld [vmem:[#allocation2 + $0x8] sm:$0x3] }
  0x35   : > { %8503 = vmatmul.mubr.msk.bf16.gmra.mrb[16].mxu0 %vm386_vm1, %v8792_v11 }
  0x36   : > { %8506 = vmatprep.mubr.msk.bf16.mxu0 %vm386_vm1, %v8793_v12 }
  0x3d   : > { %8507 = vmatmul.mubr.msk.bf16.gmra.mrb[20].mxu0 %vm386_vm1, %v8794_v13 }
  0x3e   : > { %8510 = vmatprep.mubr.msk.bf16.mxu0 %vm386_vm1, %v8795_v14  ;;  %v9303_v14 = vld [vmem:[#allocation2 + $0x4] sm:$0xf] }
  0x45   : > { %8511 = vmatmul.mubr.msk.bf16.gmra.mrb[24].mxu0 %vm386_vm1, %v8796_v15  ;;  %v9305_v15 = vld [vmem:[#allocation2 + $0xc] sm:$0xf] }
  0x46   : > { %8514 = vmatprep.mubr.msk.bf16.mxu0 %vm386_vm1, %v8797_v16 }
  0x4d   : > { %8515 = vmatmul.mubr.msk.bf16.gmra.mrb[28].mxu0 %vm386_vm1, %v8798_v17  ;;  %vm2272_vm1 = vsmask.f32 2304 }
  0x4e   : > { %vm9732_vm11 = vmor %vm2272_vm1, %vm2273_vm4 }
  0xe8   : > { %v8488_v24 = vpop.f32.mrb[0].mxu0 }
  0xe9   : > { %v9244_v25 = vadd.f32 %v8488_v24, %v9241_v23  ;;  %v473_v26 = vpop.f32.mrb[1].mxu0 }
  0xea   : > { %v9247_v27 = vadd.f32 %v9241_v23, %v473_v26  ;;  %v8489_v28 = vpop.f32.mrb[2].mxu0 }
  0xeb   : > { %v7993_v29 = vmul.f32 -1.442695, %v9244_v25  ;;  %v9251_v30 = vadd.f32 %v8489_v28, %v9241_v23  ;;  %v476_v31 = vpop.f32.mrb[3].mxu0 }
  0xec   : > { %v7991_v32 = vmul.f32 -1.442695, %v9247_v27  ;;  %v9255_v33 = vadd.f32 %v9241_v23, %v476_v31  ;;  %v9318_v31 = vld [vmem:[#allocation2 + $0x14] sm:$0x3] }
  0xed   : > { %8799 = vpow2.f32 %v7993_v29  ;;  %v7994_v34 = vmul.f32 -1.442695, %v9251_v30 }
  0xee   : > { %8801 = vpow2.f32 %v7991_v32  ;;  %v7992_v35 = vmul.f32 -1.442695, %v9255_v33 }
  0xef   : > { %8803 = vpow2.f32 %v7994_v34 }
  0xf0   : > { %8805 = vpow2.f32 %v7992_v35  ;;  %v8492_v37 = vpop.f32.mrb[4].mxu0 }
  0xf1   : > { %v9267_v38 = vadd.f32 %v8492_v37, %v9241_v23  ;;  %v489_v39 = vpop.f32.mrb[5].mxu0 }
  0xf2   : > { %v9270_v40 = vadd.f32 %v9241_v23, %v489_v39  ;;  %v8493_v41 = vpop.f32.mrb[6].mxu0 }
  0xf3   : > { %v7997_v42 = vmul.f32 -1.442695, %v9267_v38  ;;  %v9274_v43 = vadd.f32 %v8493_v41, %v9241_v23  ;;  %v492_v44 = vpop.f32.mrb[7].mxu0 }
  0xf4   : > { %v7995_v45 = vmul.f32 -1.442695, %v9270_v40  ;;  %v9278_v46 = vadd.f32 %v9241_v23, %v492_v44 }
  0xf5   : > { %8807 = vpow2.f32 %v7997_v42  ;;  %v7998_v47 = vmul.f32 -1.442695, %v9274_v43 }
  0xf6   : > { %8809 = vpow2.f32 %v7995_v45  ;;  %v7996_v48 = vmul.f32 -1.442695, %v9278_v46 }
  0xf7   : > { %v8800_v49 = vpop.eup %8799  ;;  %8811 = vpow2.f32 %v7998_v47 }
  0xf8   : > { %v8802_v50 = vpop.eup %8801  ;;  %v698_v51 = vadd.f32 1.0, %v8800_v49  ;;  %8813 = vpow2.f32 %v7996_v48  ;;  %v8496_v52 = vpop.f32.mrb[8].mxu0 }
  0xf9   : > { %v8804_v53 = vpop.eup %8803  ;;  %v696_v54 = vadd.f32 1.0, %v8802_v50  ;;  %v9283_v55 = vadd.f32 %v8496_v52, %v9241_v23  ;;  %v505_v56 = vpop.f32.mrb[9].mxu0 }
  0xfa   : > { %v8806_v57 = vpop.eup %8805  ;;  %8815 = vrcp.f32 %v698_v51  ;;  %v699_v58 = vadd.f32 1.0, %v8804_v53  ;;  %v9286_v59 = vadd.f32 %v9241_v23, %v505_v56  ;;  %v8497_v60 = vpop.f32.mrb[10].mxu0  ;;  %v9344_v51 = vsel %vm978_vm6, %v9262_v36, 0 }
  0xfb   : > { %8817 = vrcp.f32 %v696_v54  ;;  %v697_v61 = vadd.f32 1.0, %v8806_v57  ;;  %v8001_v62 = vmul.f32 -1.442695, %v9283_v55  ;;  %v9290_v63 = vadd.f32 %v8497_v60, %v9241_v23  ;;  %v508_v0 = vpop.f32.mrb[11].mxu0 }
  0xfc   : > { %8819 = vrcp.f32 %v699_v58  ;;  %v7999_v1 = vmul.f32 -1.442695, %v9286_v59  ;;  %v9294_v2 = vadd.f32 %v9241_v23, %v508_v0 }
  0xfd   : > { %8821 = vrcp.f32 %v697_v61  ;;  %v8002_v3 = vmul.f32 -1.442695, %v9290_v63 }
  0xfe   : > { %8823 = vpow2.f32 %v8001_v62  ;;  %v8000_v4 = vmul.f32 -1.442695, %v9294_v2 }
  0xff   : > { %v8808_v5 = vpop.eup %8807  ;;  %8825 = vpow2.f32 %v7999_v1 }
 0x100   : > { %v8810_v6 = vpop.eup %8809  ;;  %v702_v7 = vadd.f32 1.0, %v8808_v5  ;;  %8827 = vpow2.f32 %v8002_v3  ;;  %v8500_v8 = vpop.f32.mrb[12].mxu0 }
 0x101   : > { %v8812_v10 = vpop.eup %8811  ;;  %v700_v11 = vadd.f32 1.0, %v8810_v6  ;;  %8829 = vpow2.f32 %v8000_v4  ;;  %v9301_v12 = vadd.f32 %v8500_v8, %v9241_v23  ;;  %v521_v13 = vpop.f32.mrb[13].mxu0 }
 0x102   : > { %v8814_v16 = vpop.eup %8813  ;;  %8831 = vrcp.f32 %v702_v7  ;;  %v703_v17 = vadd.f32 1.0, %v8812_v10  ;;  %v9308_v18 = vadd.f32 %v9241_v23, %v521_v13  ;;  %v8501_v19 = vpop.f32.mrb[14].mxu0 }
 0x103   : > { %8833 = vrcp.f32 %v700_v11  ;;  %v701_v24 = vadd.f32 1.0, %v8814_v16  ;;  %v8005_v26 = vmul.f32 -1.442695, %v9301_v12  ;;  %v9316_v28 = vadd.f32 %v8501_v19, %v9241_v23  ;;  %v524_v29 = vpop.f32.mrb[15].mxu0 }
 0x104   : > { %v8816_v32 = vpop.eup %8815  ;;  %8835 = vrcp.f32 %v703_v17  ;;  %v8003_v34 = vmul.f32 -1.442695, %v9308_v18  ;;  %v9322_v35 = vadd.f32 %v9241_v23, %v524_v29 }
 0x105   : > { %v8818_v37 = vpop.eup %8817  ;;  %v9325_v39 = vmul.f32 %v8816_v32, %v9244_v25  ;;  %8837 = vrcp.f32 %v701_v24  ;;  %v8006_v41 = vmul.f32 -1.442695, %v9316_v28 }
 0x106   : > { %v8820_v44 = vpop.eup %8819  ;;  %v9331_v45 = vmul.f32 %v8818_v37, %v9247_v27  ;;  %8839 = vpow2.f32 %v8005_v26  ;;  %v8004_v54 = vmul.f32 -1.442695, %v9322_v35 }
 0x107   : > { %v8822_v49 = vpop.eup %8821  ;;  %v8337_v25 = vpack.c.bf16 %v9325_v39, %v9325_v39  ;;  %v9340_v50 = vmul.f32 %v8820_v44, %v9251_v30  ;;  %8841 = vpow2.f32 %v8003_v34 }
 0x108   : > { %v8824_v27 = vpop.eup %8823  ;;  %v8335_v52 = vpack.c.bf16 %v9331_v45, %v9331_v45  ;;  %v9349_v53 = vmul.f32 %v8822_v49, %v9255_v33  ;;  %8843 = vpow2.f32 %v8006_v41  ;;  %v8504_v56 = vpop.f32.mrb[16].mxu0 }
 0x109   : > { %v8826_v57 = vpop.eup %8825  ;;  %v986_v58 = vrot.slane %v8337_v25, 7  ;;  %v8338_v36 = vpack.c.bf16 %v9340_v50, %v9340_v50  ;;  %v706_v60 = vadd.f32 1.0, %v8824_v27  ;;  %v537_v61 = vpop.f32.mrb[17].mxu0  ;;  %v9389_v27 = vadd.f32 %v8504_v56, %v9241_v23 }
 0x10a   : > { %v8828_v62 = vpop.eup %8827  ;;  %v981_v0 = vrot.slane %v8335_v52, 7  ;;  %v8336_v3 = vpack.c.bf16 %v9349_v53, %v9349_v53  ;;  %v704_v4 = vadd.f32 1.0, %v8826_v57  ;;  %v8505_v5 = vpop.f32.mrb[18].mxu0 }
 0x10b   : > { %v8830_v6 = vpop.eup %8829  ;;  %v987_v7 = vrot.slane %v986_v58, 4  ;;  %1114 = vst.msk [vmem:[#allocation2 + $0x24] sm:$0xe] %vm1110_vm7, %v986_v58  ;;  %v988_v8 = vrot.slane %v8338_v36, 7  ;;  %8845 = vrcp.f32 %v706_v60  ;;  %v707_v10 = vadd.f32 1.0, %v8828_v62  ;;  %v9367_v11 = vpop.f32.mrb[19].mxu0 }
 0x10c   : > { %v8832_v13 = vpop.eup %8831  ;;  %v982_v16 = vrot.slane %v981_v0, 4  ;;  %1111 = vst.msk [vmem:[#allocation2 + $0x18] sm:$0xe] %vm1110_vm7, %v981_v0  ;;  %v983_v17 = vrot.slane %v8336_v3, 7  ;;  %8847 = vrcp.f32 %v704_v4  ;;  %v705_v19 = vadd.f32 1.0, %v8830_v6 }
 0x10d   : > { %v8834_v24 = vpop.eup %8833  ;;  %v989_v26 = vsel %vm9358_vm9, %v987_v7, %v988_v8  ;;  %v990_v29 = vrot.slane %v988_v8, 4  ;;  %v9373_v32 = vmul.f32 %v8832_v13, %v9267_v38  ;;  %8849 = vrcp.f32 %v707_v10 }
 0x10e   : > { %v8836_v34 = vpop.eup %8835  ;;  %1115 = vst.msk [vmem:[#allocation2 + $0x28] sm:$0xf] %vm841_vm3, %v989_v26  ;;  %v984_v37 = vsel %vm9358_vm9, %v982_v16, %v983_v17  ;;  %v985_v41 = vrot.slane %v983_v17, 4  ;;  %v9379_v44 = vmul.f32 %v8834_v24, %v9270_v40  ;;  %8851 = vrcp.f32 %v705_v19 }
 0x10f   : > { %v8838_v49 = vpop.eup %8837  ;;  %1116 = vst.msk [vmem:[#allocation2 + $0x2c] sm:$0x1] %vm856_vm2, %v990_v29  ;;  %v8341_v38 = vpack.c.bf16 %v9373_v32, %v9373_v32  ;;  %v9386_v25 = vmul.f32 %v8836_v34, %v9274_v43  ;;  %8853 = vpow2.f32 %v8004_v54  ;;  %v9398_v58 = vadd.f32 %v9241_v23, %v537_v61 }
 0x110   : > { %1112 = vst.msk [vmem:[#allocation2 + $0x1c] sm:$0xf] %vm841_vm3, %v984_v37  ;;  %v8840_v52 = vpop.eup %8839  ;;  %v8339_v40 = vpack.c.bf16 %v9379_v44, %v9379_v44  ;;  %v9395_v57 = vmul.f32 %v8838_v49, %v9278_v46  ;;  %v9401_v36 = vadd.f32 %v8505_v5, %v9241_v23  ;;  %v8508_v43 = vpop.f32.mrb[20].mxu0  ;;  %v8009_v24 = vmul.f32 -1.442695, %v9389_v27 }
 0x111   : > { %1113 = vst.msk [vmem:[#allocation2 + $0x20] sm:$0x1] %vm856_vm2, %v985_v41  ;;  %v8842_v54 = vpop.eup %8841  ;;  %v996_v60 = vrot.slane %v8341_v38, 7  ;;  %v8342_v62 = vpack.c.bf16 %v9386_v25, %v9386_v25  ;;  %v710_v0 = vadd.f32 1.0, %v8840_v52  ;;  %v553_v3 = vpop.f32.mrb[21].mxu0 }
 0x112   : > { %v8844_v4 = vpop.eup %8843  ;;  %v991_v46 = vrot.slane %v8339_v40, 7  ;;  %v8340_v5 = vpack.c.bf16 %v9395_v57, %v9395_v57  ;;  %v708_v6 = vadd.f32 1.0, %v8842_v54  ;;  %v8509_v7 = vpop.f32.mrb[22].mxu0  ;;  %v8007_v37 = vmul.f32 -1.442695, %v9398_v58 }
 0x113   : > { %v997_v8 = vrot.slane %v996_v60, 4  ;;  %1120 = vst.msk [vmem:[#allocation2 + $0x3c] sm:$0xe] %vm1110_vm7, %v996_v60  ;;  %v998_v10 = vrot.slane %v8342_v62, 7  ;;  %8855 = vrcp.f32 %v710_v0  ;;  %v711_v13 = vadd.f32 1.0, %v8844_v4  ;;  %v556_v16 = vpop.f32.mrb[23].mxu0 }
 0x114   : > { %v992_v17 = vrot.slane %v991_v46, 4  ;;  %1117 = vst.msk [vmem:[#allocation2 + $0x30] sm:$0xe] %vm1110_vm7, %v991_v46  ;;  %v993_v19 = vrot.slane %v8340_v5, 7  ;;  %8857 = vrcp.f32 %v708_v6  ;;  %v8010_v60 = vmul.f32 -1.442695, %v9401_v36 }
 0x115   : > { %v8846_v26 = vpop.eup %8845  ;;  %v999_v29 = vsel %vm9358_vm9, %v997_v8, %v998_v10  ;;  %v1000_v34 = vrot.slane %v998_v10, 4  ;;  %8859 = vrcp.f32 %v711_v13  ;;  %v9431_v62 = vadd.f32 %v9241_v23, %v9367_v11 }
 0x116   : > { %v8848_v41 = vpop.eup %8847  ;;  %1121 = vst.msk [vmem:[#allocation2 + $0x40] sm:$0xf] %vm841_vm3, %v999_v29  ;;  %v994_v49 = vsel %vm9358_vm9, %v992_v17, %v993_v19  ;;  %v995_v38 = vrot.slane %v993_v19, 4  ;;  %v9421_v52 = vmul.f32 %v8846_v26, %v9283_v55  ;;  %8861 = vpow2.f32 %v8009_v24 }
 0x117   : > { %v8850_v40 = vpop.eup %8849  ;;  %1122 = vst.msk [vmem:[#allocation2 + $0x44] sm:$0x1] %vm856_vm2, %v1000_v34  ;;  %v9426_v54 = vmul.f32 %v8848_v41, %v9286_v59  ;;  %8863 = vpow2.f32 %v8007_v37  ;;  %v9440_v46 = vadd.f32 %v8508_v43, %v9241_v23  ;;  %v9443_v59 = vadd.f32 %v9241_v23, %v553_v3  ;;  %v1305_v48 = vld [vmem:[#allocation2 + $0x1c] sm:$0xf] }
 0x118   : > { %1118 = vst.msk [vmem:[#allocation2 + $0x34] sm:$0xf] %vm841_vm3, %v994_v49  ;;  %v8852_v0 = vpop.eup %8851  ;;  %v8345_v55 = vpack.c.bf16 %v9421_v52, %v9421_v52  ;;  %v9437_v4 = vmul.f32 %v8850_v40, %v9290_v63  ;;  %v8512_v5 = vpop.f32.mrb[24].mxu0  ;;  %8865 = vpow2.f32 %v8010_v60  ;;  %v8008_v10 = vmul.f32 -1.442695, %v9431_v62 }
 0x119   : > { %1119 = vst.msk [vmem:[#allocation2 + $0x38] sm:$0x1] %vm856_vm2, %v995_v38  ;;  %v8854_v6 = vpop.eup %8853  ;;  %v8343_v11 = vpack.c.bf16 %v9426_v54, %v9426_v54  ;;  %v9448_v8 = vmul.f32 %v8852_v0, %v9294_v2  ;;  %v569_v13 = vpop.f32.mrb[25].mxu0  ;;  %v8013_v41 = vmul.f32 -1.442695, %v9440_v46  ;;  %v9467_v60 = vadd.f32 %v8509_v7, %v9241_v23 }
 0x11a   : > { %v1006_v63 = vrot.slane %v8345_v55, 7  ;;  %v8346_v3 = vpack.c.bf16 %v9437_v4, %v9437_v4  ;;  %v709_v17 = vadd.f32 1.0, %v8854_v6  ;;  %v9455_v19 = vpop.f32.mrb[26].mxu0  ;;  %8867 = vpow2.f32 %v8008_v10  ;;  %v1306_v47 = vld [vmem:[#allocation2 + $0x20] sm:$0x3] }
 0x11b   : > { %v1001_v24 = vrot.slane %v8343_v11, 7  ;;  %v8344_v2 = vpack.c.bf16 %v9448_v8, %v9448_v8  ;;  %v9461_v29 = vpop.f32.mrb[27].mxu0  ;;  %v9470_v0 = vadd.f32 %v9241_v23, %v556_v16  ;;  %v8011_v16 = vmul.f32 -1.442695, %v9443_v59 }
 0x11c   : > { %v1007_v34 = vrot.slane %v1006_v63, 4  ;;  %1126 = vst.msk [vmem:[#allocation2 + $0x54] sm:$0xe] %vm1110_vm7, %v1006_v63  ;;  %v1008_v37 = vrot.slane %v8346_v3, 7  ;;  %8869 = vrcp.f32 %v709_v17 }
 0x11d   : > { %v8856_v49 = vpop.eup %8855  ;;  %v1002_v38 = vrot.slane %v1001_v24, 4  ;;  %1123 = vst.msk [vmem:[#allocation2 + $0x48] sm:$0xe] %vm1110_vm7, %v1001_v24  ;;  %v1003_v40 = vrot.slane %v8344_v2, 7  ;;  %8871 = vpow2.f32 %v8013_v41 }
 0x11e   : > { %v8858_v55 = vpop.eup %8857  ;;  %v1009_v6 = vsel %vm9358_vm9, %v1007_v34, %v1008_v37  ;;  %v1010_v11 = vrot.slane %v1008_v37, 4  ;;  %v9475_v10 = vmul.f32 %v8856_v49, %v9301_v12  ;;  %v8014_v34 = vmul.f32 -1.442695, %v9467_v60 }
 0x11f   : > { %v8860_v63 = vpop.eup %8859  ;;  %1127 = vst.msk [vmem:[#allocation2 + $0x58] sm:$0xf] %vm841_vm3, %v1009_v6  ;;  %v1004_v3 = vsel %vm9358_vm9, %v1002_v38, %v1003_v40  ;;  %v1005_v7 = vrot.slane %v1003_v40, 4  ;;  %v9481_v17 = vmul.f32 %v8858_v55, %v9308_v18  ;;  %v8012_v37 = vmul.f32 -1.442695, %v9470_v0 }
 0x120   : > { %12497 = vst [vmem:[#allocation3_spill] sm:$0xff] %v9475_v10  ;;  %v8862_v24 = vpop.eup %8861  ;;  %1128 = vst.msk [vmem:[#allocation2 + $0x5c] sm:$0x1] %vm856_vm2, %v1010_v11  ;;  %v8349_v12 = vpack.c.bf16 %v9475_v10, %v9475_v10  ;;  %v9489_v2 = vmul.f32 %v8860_v63, %v9316_v28  ;;  %v8516_v41 = vpop.f32.mrb[28].mxu0  ;;  %8873 = vpow2.f32 %v8011_v16  ;;  %v9497_v40 = vadd.f32 %v8512_v5, %v9241_v23 }
 0x121   : > { %1124 = vst.msk [vmem:[#allocation2 + $0x4c] sm:$0xf] %vm841_vm3, %v1004_v3  ;;  %v8864_v18 = vpop.eup %8863  ;;  %v8347_v49 = vpack.c.bf16 %v9481_v17, %v9481_v17  ;;  %v714_v38 = vadd.f32 1.0, %v8862_v24  ;;  %v585_v55 = vpop.f32.mrb[29].mxu0  ;;  %v9505_v16 = vadd.f32 %v9241_v23, %v569_v13 }
 0x122   : > { %12498 = vst [vmem:[#allocation4_spill] sm:$0xff] %v9489_v2  ;;  %1125 = vst.msk [vmem:[#allocation2 + $0x50] sm:$0x1] %vm856_vm2, %v1005_v7  ;;  %v1016_v6 = vrot.slane %v8349_v12, 7  ;;  %v8350_v11 = vpack.c.bf16 %v9489_v2, %v9489_v2  ;;  %v712_v63 = vadd.f32 1.0, %v8864_v18  ;;  %v8517_v3 = vpop.f32.mrb[30].mxu0  ;;  %v8866_v43 = vpop.eup %8865 }
 0x123   : > { %v1011_v7 = vrot.slane %v8347_v49, 7  ;;  %8875 = vrcp.f32 %v714_v38  ;;  %v8017_v26 = vmul.f32 -1.442695, %v9497_v40  ;;  %v588_v5 = vpop.f32.mrb[31].mxu0  ;;  %v715_v28 = vadd.f32 1.0, %v8866_v43 }
 0x124   : > { %v1017_v24 = vrot.slane %v1016_v6, 4  ;;  %1132 = vst.msk [vmem:[#allocation2 + $0x6c] sm:$0xe] %vm1110_vm7, %v1016_v6  ;;  %v1018_v12 = vrot.slane %v8350_v11, 7  ;;  %8877 = vrcp.f32 %v712_v63  ;;  %v8868_v56 = vpop.eup %8867  ;;  %v8015_v18 = vmul.f32 -1.442695, %v9505_v16 }
 0x125   : > { %v1012_v61 = vrot.slane %v1011_v7, 4  ;;  %1129 = vst.msk [vmem:[#allocation2 + $0x60] sm:$0xe] %vm1110_vm7, %v1011_v7  ;;  %8879 = vpow2.f32 %v8014_v34  ;;  %v9512_v49 = vadd.f32 %v9455_v19, %v9241_v23  ;;  %v713_v6 = vadd.f32 1.0, %v8868_v56  ;;  %v9537_v7 = vld [vmem:[#allocation2 + $0x18] sm:$0xf] }
 0x126   : > { %v8870_v13 = vpop.eup %8869  ;;  %v1019_v38 = vsel %vm9358_vm9, %v1017_v24, %v1018_v12  ;;  %v1020_v30 = vrot.slane %v1018_v12, 4  ;;  %8881 = vrcp.f32 %v715_v28  ;;  %v9523_v11 = vadd.f32 %v9241_v23, %v9461_v29  ;;  %v1163_v28 = vld [vmem:[#allocation2 + $0x10] sm:$0xf]  ;;  %v1304_v12 = vld [vmem:[#allocation2 + $0x18] sm:$0xf] }
 0x127   : > { %1133 = vst.msk [vmem:[#allocation2 + $0x70] sm:$0xf] %vm841_vm3, %v1019_v38  ;;  %v9518_v43 = vmul.f32 %v8870_v13, %v9322_v35  ;;  %8883 = vpow2.f32 %v8012_v37  ;;  %v8018_v34 = vmul.f32 -1.442695, %v9512_v49  ;;  %v8872_v19 = vpop.eup %8871  ;;  %v9527_v63 = vadd.f32 %v8516_v41, %v9241_v23  ;;  %v9535_v37 = vld [vmem:[#allocation2 + $0xc] sm:$0xf] }
 0x128   : > { %1134 = vst.msk [vmem:[#allocation2 + $0x74] sm:$0x1] %vm856_vm2, %v1020_v30  ;;  %8885 = vrcp.f32 %v713_v6  ;;  %v9530_v56 = vadd.f32 %v9241_v23, %v585_v55  ;;  %v9533_v35 = vadd.f32 %v8517_v3, %v9241_v23  ;;  %v718_v24 = vadd.f32 1.0, %v8872_v19  ;;  %v1212_v41 = vld [vmem:[#allocation2 + $0x1c] sm:$0xf] }
 0x129   : > { %v8348_v30 = vpack.c.bf16 %v9518_v43, %v9518_v43  ;;  %8887 = vpow2.f32 %v8017_v26  ;;  %v8016_v55 = vmul.f32 -1.442695, %v9523_v11  ;;  %v8021_v3 = vmul.f32 -1.442695, %v9527_v63 }
 0x12a   : > { %8889 = vpow2.f32 %v8015_v18  ;;  %v8019_v13 = vmul.f32 -1.442695, %v9530_v56  ;;  %v8874_v38 = vpop.eup %8873  ;;  %v8022_v1 = vmul.f32 -1.442695, %v9533_v35  ;;  %v9548_v29 = vadd.f32 %v9241_v23, %v588_v5  ;;  %v1308_v5 = vld [vmem:[#allocation2 + $0x28] sm:$0xf] }
 0x12b   : > { %v1013_v6 = vrot.slane %v8348_v30, 7  ;;  %8891 = vrcp.f32 %v718_v24  ;;  %v716_v19 = vadd.f32 1.0, %v8874_v38  ;;  %v1259_v26 = vmax.bf16 %v9537_v7, %v9535_v37 }
 0x12c   : > { %8893 = vpow2.f32 %v8018_v34  ;;  %v1260_v18 = vmax.bf16 %v1212_v41, %v1163_v28  ;;  %v8020_v30 = vmul.f32 -1.442695, %v9548_v29  ;;  %v12499_v34 = vmax.bf16 %v9305_v15, %v9298_v9  ;;  %v1401_v9 = vld [vmem:[#allocation2 + $0x24] sm:$0xf] }
 0x12d   : > { %v8876_v42 = vpop.eup %8875  ;;  %v1014_v10 = vsel %vm9358_vm9, %v1012_v61, %v1013_v6  ;;  %v1015_v2 = vrot.slane %v1013_v6, 4  ;;  %8895 = vpow2.f32 %v8016_v55  ;;  %v12500_v61 = vmax.bf16 %v9312_v22, %v9303_v14 }
 0x12e   : > { %v8878_v24 = vpop.eup %8877  ;;  %1130 = vst.msk [vmem:[#allocation2 + $0x64] sm:$0xf] %vm841_vm3, %v1014_v10  ;;  %v9557_v23 = vmul.f32 %v8876_v42, %v9389_v27  ;;  %8897 = vrcp.f32 %v716_v19  ;;  %v1352_v28 = vmax.bf16 %v1304_v12, %v12499_v34  ;;  %v12501_v42 = vmax.bf16 %v9318_v31, %v9310_v21  ;;  %v1498_v31 = vld [vmem:[#allocation2 + $0x30] sm:$0xf] }
 0x12f   : > { %v9565_v41 = vmax.bf16 %v1305_v48, %v12500_v61  ;;  %v8880_v55 = vpop.eup %8879  ;;  %1131 = vst.msk [vmem:[#allocation2 + $0x68] sm:$0x1] %vm856_vm2, %v1015_v2  ;;  %v808_v38 = vmul.f32 %v8878_v24, %v9398_v58  ;;  %8899 = vpow2.f32 %v8021_v3  ;;  %v9574_v10 = vmax.bf16 %v1308_v5, %v1260_v18  ;;  %v1402_v48 = vld [vmem:[#allocation2 + $0x28] sm:$0xf]  ;;  %v1403_v3 = vld [vmem:[#allocation2 + $0x2c] sm:$0x3] }
 0x130   : > { %v9572_v27 = vmax.bf16 %v1306_v47, %v12501_v42  ;;  %v8882_v15 = vpop.eup %8881  ;;  %v8353_v14 = vpack.c.bf16 %v9557_v23, %v9557_v23  ;;  %v719_v22 = vadd.f32 1.0, %v8880_v55  ;;  %8901 = vpow2.f32 %v8019_v13 }
 0x131   : > { %v1449_v12 = vmax.bf16 %v1401_v9, %v1352_v28  ;;  %v8884_v2 = vpop.eup %8883  ;;  %v8351_v6 = vpack.c.bf16 %v808_v38, %v808_v38  ;;  %v811_v58 = vmul.f32 %v8882_v15, %v9401_v36  ;;  %8903 = vpow2.f32 %v8022_v1 }
 0x132   : > { %v1450_v21 = vmax.bf16 %v1402_v48, %v9565_v41  ;;  %v8886_v47 = vpop.eup %8885  ;;  %v1026_v19 = vrot.slane %v8353_v14, 7  ;;  %8905 = vrcp.f32 %v719_v22  ;;  %v717_v18 = vadd.f32 1.0, %v8884_v2  ;;  %v1499_v14 = vld [vmem:[#allocation2 + $0x34] sm:$0xf] }
 0x133   : > { %v1451_v24 = vmax.bf16 %v1403_v3, %v9572_v27  ;;  %v8888_v5 = vpop.eup %8887  ;;  %v1021_v34 = vrot.slane %v8351_v6, 7  ;;  %v833_v13 = vpack.c.bf16 %v811_v58, %v9557_v23  ;;  %v8354_v28 = vpack.c.bf16 %v811_v58, %v811_v58 }
 0x134   : > { %v809_v61 = vmul.f32 %v8886_v47, %v9431_v62  ;;  %v8890_v55 = vpop.eup %8889  ;;  %v1027_v36 = vrot.slane %v1026_v19, 4  ;;  %1138 = vst.msk [vmem:[#allocation2 + $0x84] sm:$0xe] %vm1110_vm7, %v1026_v19  ;;  %8907 = vrcp.f32 %v717_v18  ;;  %v722_v1 = vadd.f32 1.0, %v8888_v5 }
 0x135   : > { %v9584_v41 = vmax.bf16 %v1498_v31, %v1449_v12  ;;  %v8892_v42 = vpop.eup %8891  ;;  %v1022_v9 = vrot.slane %v1021_v34, 4  ;;  %1135 = vst.msk [vmem:[#allocation2 + $0x78] sm:$0xe] %vm1110_vm7, %v1021_v34  ;;  %v1028_v27 = vrot.slane %v8354_v28, 7  ;;  %8909 = vpow2.f32 %v8020_v30  ;;  %v1500_v31 = vld [vmem:[#allocation2 + $0x38] sm:$0x3] }
 0x136   : > { %v8352_v15 = vpack.c.bf16 %v809_v61, %v809_v61  ;;  %v8894_v23 = vpop.eup %8893  ;;  %v9588_v22 = vmul.f32 %v8892_v42, %v9440_v46  ;;  %8911 = vrcp.f32 %v722_v1  ;;  %v720_v62 = vadd.f32 1.0, %v8890_v55 }
 0x137   : > { %v832_v48 = vpack.c.bf16 %v809_v61, %v808_v38  ;;  %v8896_v2 = vpop.eup %8895  ;;  %v1029_v12 = vsel %vm9358_vm9, %v1027_v36, %v1028_v27  ;;  %v1030_v6 = vrot.slane %v1028_v27, 4  ;;  %v723_v3 = vadd.f32 1.0, %v8894_v23 }
 0x138   : > { %v1023_v58 = vrot.slane %v8352_v15, 7  ;;  %v8898_v47 = vpop.eup %8897  ;;  %1139 = vst.msk [vmem:[#allocation2 + $0x88] sm:$0xf] %vm841_vm3, %v1029_v12  ;;  %v8357_v46 = vpack.c.bf16 %v9588_v22, %v9588_v22  ;;  %8913 = vrcp.f32 %v720_v62  ;;  %v721_v30 = vadd.f32 1.0, %v8896_v2 }
 0x139   : > { %8570 = vmatprep.mubr.msk.bf16.mxu1 %vm2840_vm10, %v832_v48  ;;  %v9596_v38 = vmax.bf16 %v1499_v14, %v1450_v21  ;;  %v8900_v19 = vpop.eup %8899  ;;  %1140 = vst.msk [vmem:[#allocation2 + $0x8c] sm:$0x1] %vm856_vm2, %v1030_v6  ;;  %v812_v34 = vmul.f32 %v8898_v47, %v9443_v59  ;;  %8915 = vrcp.f32 %v723_v3  ;;  %v9604_v21 = vmax.bf16 %v1500_v31, %v1451_v24 }
 0x13a   : > { %v1024_v18 = vsel %vm9358_vm9, %v1022_v9, %v1023_v58  ;;  %v1025_v5 = vrot.slane %v1023_v58, 4  ;;  %8571 = vmatmul.mubr.msk.bf16.vlgmr.msra.gmra.mrb[0].mxu1 %vm2840_vm10, %v833_v13  ;;  %v8902_v28 = vpop.eup %8901  ;;  %v1036_v61 = vrot.slane %v8357_v46, 7  ;;  %8917 = vrcp.f32 %v721_v30 }
 0x13b   : > { %1136 = vst.msk [vmem:[#allocation2 + $0x7c] sm:$0xf] %vm841_vm3, %v1024_v18  ;;  %v726_v55 = vadd.f32 1.0, %v8900_v19  ;;  %8587 = vmatpush3.bf16.msra.mxu1 %v9344_v51  ;;  %v8904_v36 = vpop.eup %8903  ;;  %v8355_v1 = vpack.c.bf16 %v812_v34, %v812_v34  ;;  %v724_v42 = vadd.f32 1.0, %v8902_v28  ;;  %v1598_v59 = vshrl.u32 %v9584_v41, 16 }
 0x13c   : > { %1137 = vst.msk [vmem:[#allocation2 + $0x80] sm:$0x1] %vm856_vm2, %v1025_v5  ;;  %v1601_v9 = vshll.u32 %v9584_v41, 16  ;;  %v8906_v13 = vpop.eup %8905  ;;  %v1037_v27 = vrot.slane %v1036_v61, 4  ;;  %v727_v15 = vadd.f32 1.0, %v8904_v36  ;;  %v1607_v24 = vshll.u32 %v9596_v38, 16 }
 0x13d   : > { %1144 = vst.msk [vmem:[#allocation2 + $0x9c] sm:$0xe] %vm1110_vm7, %v1036_v61  ;;  %8919 = vrcp.f32 %v726_v55  ;;  %v1031_v14 = vrot.slane %v8355_v1, 7  ;;  %v815_v51 = vmul.f32 %v8906_v13, %v9467_v60  ;;  %v1600_v23 = vrot.slane %v1598_v59, 4 }
 0x13e   : > { %8921 = vrcp.f32 %v724_v42  ;;  %v8908_v62 = vpop.eup %8907  ;;  %v1603_v48 = vrot.slane %v1601_v9, 5  ;;  %v1609_v2 = vrot.slane %v1607_v24, 5  ;;  %v1611_v12 = vshrl.u32 %v9596_v38, 16 }
 0x13f   : > { %8923 = vrcp.f32 %v727_v15  ;;  %v8910_v6 = vpop.eup %8909  ;;  %v1032_v58 = vrot.slane %v1031_v14, 4  ;;  %1141 = vst.msk [vmem:[#allocation2 + $0x90] sm:$0xe] %vm1110_vm7, %v1031_v14  ;;  %v835_v60 = vpack.c.bf16 %v815_v51, %v9588_v22  ;;  %v8358_v3 = vpack.c.bf16 %v815_v51, %v815_v51 }
 0x140   : > { %v813_v31 = vmul.f32 %v8908_v62, %v9470_v0  ;;  %v8912_v47 = vpop.eup %8911  ;;  %v725_v46 = vadd.f32 1.0, %v8910_v6  ;;  %v1604_v30 = vor.u32 %v1603_v48, %v1600_v23  ;;  %v1613_v19 = vrot.slane %v1611_v12, 4 }
 0x141   : > { %v1617_v18 = vshll.u32 %v9604_v21, 16  ;;  %v1038_v5 = vrot.slane %v8358_v3, 7  ;;  %v9627_v55 = vmul.f32 %v8912_v47, %v9497_v40 }
 0x142   : > { %v834_v28 = vpack.c.bf16 %v813_v31, %v812_v34  ;;  %v8356_v61 = vpack.c.bf16 %v813_v31, %v813_v31  ;;  %v8914_v22 = vpop.eup %8913  ;;  %8925 = vrcp.f32 %v725_v46  ;;  %v1605_v36 = vrot.slane %v1604_v30, 4 }
 0x143   : > { %v1614_v1 = vor.u32 %v1613_v19, %v1609_v2  ;;  %v1619_v42 = vrot.slane %v1617_v18, 5  ;;  %v8916_v13 = vpop.eup %8915  ;;  %v1039_v34 = vsel %vm9358_vm9, %v1037_v27, %v1038_v5  ;;  %v1040_v15 = vrot.slane %v1038_v5, 4 }
 0x144   : > { %v1033_v40 = vrot.slane %v8356_v61, 7  ;;  %v8361_v14 = vpack.c.bf16 %v9627_v55, %v9627_v55  ;;  %8574 = vmatprep.mubr.msk.bf16.mxu1 %vm2840_vm10, %v834_v28  ;;  %v8918_v51 = vpop.eup %8917  ;;  %1145 = vst.msk [vmem:[#allocation2 + $0xa0] sm:$0xf] %vm841_vm3, %v1039_v34  ;;  %v816_v23 = vmul.f32 %v8914_v22, %v9505_v16  ;;  %v819_v62 = vmul.f32 %v8916_v13, %v9512_v49  ;;  %v9674_v34 = vld [vmem:[#allocation2 + $0x20] sm:$0x3] }
 0x145   : > { %v1610_v48 = vsel %vm9631_vm15, %v1605_v36, %v1609_v2  ;;  %v1615_v6 = vrot.slane %v1614_v1, 4  ;;  %8575 = vmatmul.mubr.msk.bf16.gmra.mrb[4].mxu1 %vm2840_vm10, %v835_v60  ;;  %1146 = vst.msk [vmem:[#allocation2 + $0xa4] sm:$0x1] %vm856_vm2, %v1040_v15  ;;  %v817_v47 = vmul.f32 %v8918_v51, %v9523_v11  ;;  %v1164_v51 = vld [vmem:[#allocation2 + $0x14] sm:$0x3] }
 0x146   : > { %v1034_v27 = vsel %vm9358_vm9, %v1032_v58, %v1033_v40  ;;  %v1035_v3 = vrot.slane %v1033_v40, 4  ;;  %v1046_v31 = vrot.slane %v8361_v14, 7  ;;  %v8359_v16 = vpack.c.bf16 %v816_v23, %v816_v23 }
 0x147   : > { %v8920_v46 = vpop.eup %8919  ;;  %1142 = vst.msk [vmem:[#allocation2 + $0x94] sm:$0xf] %vm841_vm3, %v1034_v27  ;;  %v837_v49 = vpack.c.bf16 %v819_v62, %v9627_v55  ;;  %v8362_v30 = vpack.c.bf16 %v819_v62, %v819_v62  ;;  %v1620_v2 = vsel %vm9631_vm15, %v1615_v6, %v1619_v42  ;;  %v836_v58 = vpack.c.bf16 %v817_v47, %v816_v23 }
 0x148   : > { %v8922_v60 = vpop.eup %8921  ;;  %1143 = vst.msk [vmem:[#allocation2 + $0x98] sm:$0x1] %vm856_vm2, %v1035_v3  ;;  %v1047_v19 = vrot.slane %v1046_v31, 4  ;;  %v8360_v5 = vpack.c.bf16 %v817_v47, %v817_v47  ;;  %v9659_v11 = vmul.f32 %v8920_v46, %v9527_v63  ;;  %v1041_v61 = vrot.slane %v8359_v16, 7 }
 0x149   : > { %1150 = vst.msk [vmem:[#allocation2 + $0xb4] sm:$0xe] %vm1110_vm7, %v1046_v31  ;;  %v8924_v28 = vpop.eup %8923  ;;  %v1048_v22 = vrot.slane %v8362_v30, 7  ;;  %v820_v55 = vmul.f32 %v8922_v60, %v9530_v56  ;;  %v9663_v36 = vmax.bf16 %v1610_v48, %v9584_v41  ;;  %v9671_v63 = vmax.bf16 %v1620_v2, %v9596_v38  ;;  %8578 = vmatprep.mubr.msk.bf16.mxu1 %vm2840_vm10, %v836_v58 }
 0x14a   : > { %v1043_v1 = vrot.slane %v8360_v5, 7  ;;  %v8365_v42 = vpack.c.bf16 %v9659_v11, %v9659_v11  ;;  %v9668_v13 = vmul.f32 %v8924_v28, %v9533_v35  ;;  %v1042_v56 = vrot.slane %v1041_v61, 4  ;;  %1147 = vst.msk [vmem:[#allocation2 + $0xa8] sm:$0xe] %vm1110_vm7, %v1041_v61 }
 0x14b   : > { %v1049_v15 = vsel %vm9358_vm9, %v1047_v19, %v1048_v22  ;;  %v1050_v40 = vrot.slane %v1048_v22, 4  ;;  %v8363_v14 = vpack.c.bf16 %v820_v55, %v820_v55  ;;  %v8055_v47 = vrot.slane %v9584_v41, 9 }
 0x14c   : > { %1151 = vst.msk [vmem:[#allocation2 + $0xb8] sm:$0xf] %vm841_vm3, %v1049_v15  ;;  %v1045_v35 = vrot.slane %v1043_v1, 4  ;;  %v1056_v23 = vrot.slane %v8365_v42, 7  ;;  %v839_v62 = vpack.c.bf16 %v9668_v13, %v9659_v11  ;;  %v8366_v48 = vpack.c.bf16 %v9668_v13, %v9668_v13  ;;  %v8926_v27 = vpop.eup %8925 }
 0x14d   : > { %1152 = vst.msk [vmem:[#allocation2 + $0xbc] sm:$0x1] %vm856_vm2, %v1050_v40  ;;  %v1044_v3 = vsel %vm9358_vm9, %v1042_v56, %v1043_v1  ;;  %v1051_v31 = vrot.slane %v8363_v14, 7  ;;  %v2098_v46 = vrot.slane %v9596_v38, 5  ;;  %8579 = vmatmul.mubr.msk.bf16.gmra.mrb[8].mxu1 %vm2840_vm10, %v837_v49  ;;  %v821_v2 = vmul.f32 %v8926_v27, %v9548_v29  ;;  %v1307_v1 = vld [vmem:[#allocation2 + $0x24] sm:$0xf] }
 0x14e   : > { %1148 = vst.msk [vmem:[#allocation2 + $0xac] sm:$0xf] %vm841_vm3, %v1044_v3  ;;  %v1057_v16 = vrot.slane %v1056_v23, 4  ;;  %v1058_v30 = vrot.slane %v8366_v48, 7  ;;  %v1261_v60 = vmax.bf16 %v9674_v34, %v1164_v51  ;;  %v2101_v49 = vrot.slane %v9604_v21, 5 }
 0x14f   : > { %1149 = vst.msk [vmem:[#allocation2 + $0xb0] sm:$0x1] %vm856_vm2, %v1045_v35  ;;  %v1052_v19 = vrot.slane %v1051_v31, 4  ;;  %v2099_v58 = vsel %vm9686_vm8, %v8055_v47, %v2098_v46  ;;  %v2100_v5 = vrot.slane %v2098_v46, 4  ;;  %v838_v61 = vpack.c.bf16 %v821_v2, %v820_v55  ;;  %v1404_v56 = vld [vmem:[#allocation2 + $0x30] sm:$0xf] }
 0x150   : > { %1156 = vst.msk [vmem:[#allocation2 + $0xcc] sm:$0xe] %vm1110_vm7, %v1056_v23  ;;  %1153 = vst.msk [vmem:[#allocation2 + $0xc0] sm:$0xe] %vm1110_vm7, %v1051_v31  ;;  %v1059_v11 = vsel %vm9358_vm9, %v1057_v16, %v1058_v30  ;;  %v1060_v28 = vrot.slane %v1058_v30, 4  ;;  %v8364_v22 = vpack.c.bf16 %v821_v2, %v821_v2  ;;  %v2240_v42 = vmax.bf16 %v2099_v58, %v9663_v36 }
 0x151   : > { %1157 = vst.msk [vmem:[#allocation2 + $0xd0] sm:$0xf] %vm841_vm3, %v1059_v11  ;;  %v2102_v29 = vsel %vm9686_vm8, %v2100_v5, %v2101_v49  ;;  %v2275_v13 = vrot.slane %v1598_v59, 5  ;;  %v2276_v34 = vrot.slane %v1601_v9, 6  ;;  %v2279_v40 = vrot.slane %v1611_v12, 5  ;;  %8582 = vmatprep.mubr.msk.bf16.mxu1 %vm2840_vm10, %v838_v61 }
 0x152   : > { %1158 = vst.msk [vmem:[#allocation2 + $0xd4] sm:$0x1] %vm856_vm2, %v1060_v28  ;;  %v1053_v15 = vrot.slane %v8364_v22, 7  ;;  %v2241_v55 = vmax.bf16 %v2102_v29, %v9671_v63  ;;  %v2280_v14 = vrot.slane %v1607_v24, 6  ;;  %v2284_v59 = vshrl.u32 %v9604_v21, 16 }
 0x153   : > { %v2277_v36 = vor.u32 %v2276_v34, %v2275_v13  ;;  %v2287_v9 = vrot.slane %v1617_v18, 6  ;;  %v1355_v51 = vmax.bf16 %v1307_v1, %v1259_v26  ;;  %v1405_v35 = vld [vmem:[#allocation2 + $0x34] sm:$0xf]  ;;  %v8071_v48 = vrot.slane %v9584_v41, 10  ;;  %v1309_v27 = vld [vmem:[#allocation2 + $0x2c] sm:$0x3] }
 0x154   : > { %v1054_v63 = vsel %vm9358_vm9, %v1052_v19, %v1053_v15  ;;  %v1055_v12 = vrot.slane %v1053_v15, 4  ;;  %v2281_v23 = vor.u32 %v2280_v14, %v2279_v40  ;;  %v1406_v18 = vld [vmem:[#allocation2 + $0x38] sm:$0x3]  ;;  %v2286_v26 = vrot.slane %v2284_v59, 5  ;;  %v1501_v47 = vld [vmem:[#allocation2 + $0x3c] sm:$0xf] }
 0x155   : > { %1154 = vst.msk [vmem:[#allocation2 + $0xc4] sm:$0xf] %vm841_vm3, %v1054_v63  ;;  %v2278_v7 = vrot.slane %v2277_v36, 4  ;;  %v1357_v3 = vmax.bf16 %v1309_v27, %v1261_v60  ;;  %v1452_v31 = vmax.bf16 %v1404_v56, %v1355_v51  ;;  %8583 = vmatmul.mubr.msk.bf16.gmra.mrb[12].mxu1 %vm2840_vm10, %v839_v62  ;;  %v2584_v46 = vrot.slane %v9596_v38, 6  ;;  %v1502_v5 = vld [vmem:[#allocation2 + $0x40] sm:$0xf] }
 0x156   : > { %1155 = vst.msk [vmem:[#allocation2 + $0xc8] sm:$0x1] %vm856_vm2, %v1055_v12  ;;  %v2283_v41 = vrot.slane %v2281_v23, 4  ;;  %v2587_v16 = vrot.slane %v9604_v21, 6  ;;  %v1453_v30 = vmax.bf16 %v1405_v35, %v9574_v10  ;;  %v2288_v19 = vor.u32 %v2287_v9, %v2286_v26  ;;  %v1503_v28 = vld [vmem:[#allocation2 + $0x44] sm:$0x3] }
 0x157   : > { %v2282_v2 = vsel %vm9732_vm11, %v2278_v7, %v2281_v23  ;;  %v1454_v58 = vmax.bf16 %v1406_v18, %v1357_v3  ;;  %v9751_v60 = vmax.bf16 %v1501_v47, %v1452_v31  ;;  %v2585_v62 = vsel %vm9739_vm12, %v8071_v48, %v2584_v46  ;;  %v9769_v51 = vld [vmem:[#allocation2 + $0x18] sm:$0xf]  ;;  %v1166_v47 = vld [vmem:[#allocation2 + $0x1c] sm:$0xf] }
 0x158   : > { %v2547_v49 = vmax.bf16 %v2282_v2, %v2240_v42  ;;  %v2586_v11 = vrot.slane %v2584_v46, 4  ;;  %v9755_v61 = vmax.bf16 %v1502_v5, %v1453_v30  ;;  %v2289_v38 = vsel %vm9732_vm11, %v2283_v41, %v2288_v19 }
 0x159   : > { %v9759_v10 = vmax.bf16 %v1503_v28, %v1454_v58  ;;  %v1622_v21 = vshrl.u32 %v9751_v60, 16  ;;  %v1625_v22 = vshll.u32 %v9751_v60, 16  ;;  %v2548_v1 = vmax.bf16 %v2289_v38, %v2241_v55 }
 0x15a   : > { %v2588_v29 = vsel %vm9739_vm12, %v2586_v11, %v2587_v16  ;;  %v2726_v42 = vmax.bf16 %v2585_v62, %v2547_v49  ;;  %v1631_v13 = vshll.u32 %v9755_v61, 16  ;;  %v1635_v15 = vshrl.u32 %v9755_v61, 16  ;;  %v1167_v49 = vld [vmem:[#allocation2 + $0x20] sm:$0x3] }
 0x15b   : > { %v1624_v34 = vrot.slane %v1622_v21, 4  ;;  %v1627_v56 = vrot.slane %v1625_v22, 5  ;;  %v1641_v40 = vshll.u32 %v9759_v10, 16  ;;  %v2727_v14 = vmax.bf16 %v2588_v29, %v2548_v1  ;;  %v1214_v1 = vld [vmem:[#allocation2 + $0x24] sm:$0xf] }
 0x15c   : > { %v3266_v36 = vrot.slane %v2726_v42, 7  ;;  %v1633_v59 = vrot.slane %v1631_v13, 5  ;;  %v8056_v9 = vrot.slane %v9751_v60, 9  ;;  %v1637_v35 = vrot.slane %v1635_v15, 4 }
 0x15d   : > { %v1628_v55 = vor.u32 %v1627_v56, %v1624_v34  ;;  %v1643_v63 = vrot.slane %v1641_v40, 5  ;;  %v2105_v12 = vrot.slane %v9755_v61, 5  ;;  %v8088_v23 = vcombine.low %v2726_v42, %v2727_v14 }
 0x15e   : > { %v3267_v48 = vrot.slane %v3266_v36, 4  ;;  %v3268_v27 = vrot.slane %v2727_v14, 7  ;;  %3394 = vst.msk [vmem:[#allocation2 + $0x18] sm:$0xe] %vm1110_vm7, %v3266_v36  ;;  %v2108_v18 = vrot.slane %v9759_v10, 5  ;;  %v1638_v26 = vor.u32 %v1637_v35, %v1633_v59 }
 0x15f   : > { %v1629_v7 = vrot.slane %v1628_v55, 4  ;;  %v2106_v3 = vsel %vm9686_vm8, %v8056_v9, %v2105_v12  ;;  %v2107_v31 = vrot.slane %v2105_v12, 4  ;;  %8520 = vmatprep.mubr.msk.bf16.mxu0 %vm2840_vm10, %v8088_v23  ;;  %v2290_v16 = vrot.slane %v1622_v21, 5  ;;  %v1215_v21 = vld [vmem:[#allocation2 + $0x28] sm:$0xf] }
 0x160   : > { %v3269_v41 = vsel %vm9358_vm9, %v3267_v48, %v3268_v27  ;;  %v3270_v46 = vrot.slane %v3268_v27, 4  ;;  %v2291_v30 = vrot.slane %v1625_v22, 6  ;;  %v1639_v19 = vrot.slane %v1638_v26, 4  ;;  %v1218_v22 = vld [vmem:[#allocation2 + $0x34] sm:$0xf] }
 0x161   : > { %3395 = vst.msk [vmem:[#allocation2 + $0x1c] sm:$0xf] %vm841_vm3, %v3269_v41  ;;  %v1634_v2 = vsel %vm9631_vm15, %v1629_v7, %v1633_v59  ;;  %v2109_v58 = vsel %vm9686_vm8, %v2107_v31, %v2108_v18  ;;  %v2294_v5 = vrot.slane %v1635_v15, 5  ;;  %v2295_v28 = vrot.slane %v1631_v13, 6  ;;  %v1216_v15 = vld [vmem:[#allocation2 + $0x2c] sm:$0x3] }
 0x162   : > { %v2015_v62 = vmax.bf16 %v1634_v2, %v9751_v60  ;;  %v2292_v11 = vor.u32 %v2291_v30, %v2290_v16  ;;  %v2299_v38 = vshrl.u32 %v9759_v10, 16  ;;  %3396 = vst.msk [vmem:[#allocation2 + $0x20] sm:$0x1] %vm856_vm2, %v3270_v46  ;;  %v1644_v29 = vsel %vm9631_vm15, %v1639_v19, %v1643_v63  ;;  %v1310_v9 = vld [vmem:[#allocation2 + $0x30] sm:$0xf] }
 0x163   : > { %v2302_v42 = vrot.slane %v1641_v40, 6  ;;  %v8072_v34 = vrot.slane %v9751_v60, 10  ;;  %v2591_v56 = vrot.slane %v9755_v61, 6  ;;  %v2016_v14 = vmax.bf16 %v1644_v29, %v9755_v61  ;;  %v1311_v55 = vld [vmem:[#allocation2 + $0x34] sm:$0xf] }
 0x164   : > { %v2242_v36 = vmax.bf16 %v2106_v3, %v2015_v62  ;;  %v2293_v13 = vrot.slane %v2292_v11, 4  ;;  %v2296_v59 = vor.u32 %v2295_v28, %v2294_v5  ;;  %v2301_v35 = vrot.slane %v2299_v38, 5  ;;  %v1217_v40 = vld [vmem:[#allocation2 + $0x30] sm:$0xf]  ;;  %v1312_v18 = vld [vmem:[#allocation2 + $0x38] sm:$0x3] }
 0x165   : > { %v2592_v12 = vsel %vm9739_vm12, %v8072_v34, %v2591_v56  ;;  %v2593_v23 = vrot.slane %v2591_v56, 4  ;;  %v2594_v63 = vrot.slane %v9759_v10, 6  ;;  %v2243_v48 = vmax.bf16 %v2109_v58, %v2016_v14  ;;  %v1219_v7 = vld [vmem:[#allocation2 + $0x38] sm:$0x3]  ;;  %v1407_v46 = vld [vmem:[#allocation2 + $0x3c] sm:$0xf] }
 0x166   : > { %v2297_v60 = vsel %vm9732_vm11, %v2293_v13, %v2296_v59  ;;  %v2298_v27 = vrot.slane %v2296_v59, 4  ;;  %v1262_v61 = vmax.bf16 %v1214_v1, %v9769_v51  ;;  %v2303_v26 = vor.u32 %v2302_v42, %v2301_v35  ;;  %v1168_v16 = vld [vmem:[#allocation2 + $0x24] sm:$0xf]  ;;  %v1169_v30 = vld [vmem:[#allocation2 + $0x28] sm:$0xf] }
 0x167   : > { %v2549_v3 = vmax.bf16 %v2297_v60, %v2242_v36  ;;  %v2595_v31 = vsel %vm9739_vm12, %v2593_v23, %v2594_v63  ;;  %v1263_v41 = vmax.bf16 %v1215_v21, %v1166_v47  ;;  %v1264_v10 = vmax.bf16 %v1216_v15, %v1167_v49  ;;  %v1408_v19 = vld [vmem:[#allocation2 + $0x40] sm:$0xf]  ;;  %v1504_v58 = vld [vmem:[#allocation2 + $0x48] sm:$0xf]  ;;  %v1505_v5 = vld [vmem:[#allocation2 + $0x4c] sm:$0xf] }
 0x168   : > { %v1358_v2 = vmax.bf16 %v1310_v9, %v1262_v61  ;;  %v1170_v62 = vld [vmem:[#allocation2 + $0x2c] sm:$0x3]  ;;  %v1265_v11 = vmax.bf16 %v1217_v40, %v1168_v16  ;;  %v1266_v28 = vmax.bf16 %v1218_v22, %v1169_v30  ;;  %v2304_v51 = vsel %vm9732_vm11, %v2298_v27, %v2303_v26  ;;  %v1313_v42 = vld [vmem:[#allocation2 + $0x3c] sm:$0xf]  ;;  %v1314_v34 = vld [vmem:[#allocation2 + $0x40] sm:$0xf] }
 0x169   : > { %v2728_v38 = vmax.bf16 %v2592_v12, %v2549_v3  ;;  %v1359_v1 = vmax.bf16 %v1311_v55, %v1263_v41  ;;  %v1267_v29 = vmax.bf16 %v1219_v7, %v1170_v62  ;;  %v9802_v47 = vld [vmem:[#allocation2 + $0x48] sm:$0xf]  ;;  %v2550_v21 = vmax.bf16 %v2304_v51, %v2243_v48  ;;  %v1315_v15 = vld [vmem:[#allocation2 + $0x44] sm:$0x3]  ;;  %v9806_v36 = vld [vmem:[#allocation2 + $0x4c] sm:$0xf] }
 0x16a   : > { %v1360_v56 = vmax.bf16 %v1312_v18, %v1264_v10  ;;  %v1455_v49 = vmax.bf16 %v1407_v46, %v1358_v2  ;;  %v9804_v14 = vmax.bf16 %v1313_v42, %v1265_v11  ;;  %v9808_v13 = vld [vmem:[#allocation2 + $0x50] sm:$0x3]  ;;  %v1409_v59 = vld [vmem:[#allocation2 + $0x44] sm:$0x3]  ;;  %v9810_v55 = vmax.bf16 %v1314_v34, %v1266_v28 }
 0x16b   : > { %v3271_v22 = vrot.slane %v2728_v38, 7  ;;  %v1456_v9 = vmax.bf16 %v1408_v19, %v1359_v1  ;;  %v1506_v35 = vld [vmem:[#allocation2 + $0x50] sm:$0x3]  ;;  %v9812_v12 = vmax.bf16 %v1315_v15, %v1267_v29  ;;  %v2729_v23 = vmax.bf16 %v2595_v31, %v2550_v21 }
 0x16c   : > { %v1457_v63 = vmax.bf16 %v1409_v59, %v1360_v56  ;;  %v1552_v40 = vmax.bf16 %v1504_v58, %v1455_v49  ;;  %v1458_v48 = vmax.bf16 %v9802_v47, %v9804_v14  ;;  %v1459_v61 = vmax.bf16 %v9806_v36, %v9810_v55 }
 0x16d   : > { %v3272_v60 = vrot.slane %v3271_v22, 4  ;;  %v1553_v27 = vmax.bf16 %v1505_v5, %v1456_v9  ;;  %v1460_v18 = vmax.bf16 %v9808_v13, %v9812_v12  ;;  %3397 = vst.msk [vmem:[#allocation2 + $0x24] sm:$0xe] %vm1110_vm7, %v3271_v22  ;;  %v8089_v7 = vcombine.low %v2728_v38, %v2729_v23 }
 0x16e   : > { %v3273_v26 = vrot.slane %v2729_v23, 7  ;;  %v1554_v3 = vmax.bf16 %v1506_v35, %v1457_v63  ;;  %v1646_v41 = vshrl.u32 %v1552_v40, 16  ;;  %v1649_v31 = vshll.u32 %v1552_v40, 16 }
 0x16f   : > { %v1655_v46 = vshll.u32 %v1553_v27, 16  ;;  %v1659_v16 = vshrl.u32 %v1553_v27, 16  ;;  %v8057_v30 = vrot.slane %v1552_v40, 9  ;;  %8521 = vmatmul.mubr.msk.bf16.vlgmr.msra.gmra.mrb[32].mxu0 %vm2840_vm10, %v8089_v7  ;;  %v2112_v28 = vrot.slane %v1553_v27, 5 }
 0x170   : > { %v3274_v10 = vsel %vm9358_vm9, %v3272_v60, %v3273_v26  ;;  %v3275_v2 = vrot.slane %v3273_v26, 4  ;;  %v1648_v19 = vrot.slane %v1646_v41, 4  ;;  %v1665_v58 = vshll.u32 %v1554_v3, 16  ;;  %8553 = vmatpush3.bf16.msra.mxu0 %v9229_v20 }
 0x171   : > { %v1651_v5 = vrot.slane %v1649_v31, 5  ;;  %v1657_v62 = vrot.slane %v1655_v46, 5  ;;  %v1661_v11 = vrot.slane %v1659_v16, 4  ;;  %3398 = vst.msk [vmem:[#allocation2 + $0x28] sm:$0xf] %vm841_vm3, %v3274_v10  ;;  %v2115_v38 = vrot.slane %v1554_v3, 5 }
 0x172   : > { %v1667_v51 = vrot.slane %v1665_v58, 5  ;;  %v2305_v1 = vrot.slane %v1646_v41, 5  ;;  %v2306_v29 = vrot.slane %v1649_v31, 6  ;;  %3399 = vst.msk [vmem:[#allocation2 + $0x2c] sm:$0x1] %vm856_vm2, %v3275_v2  ;;  %v2113_v47 = vsel %vm9686_vm8, %v8057_v30, %v2112_v28 }
 0x173   : > { %v1652_v42 = vor.u32 %v1651_v5, %v1648_v19  ;;  %v1662_v34 = vor.u32 %v1661_v11, %v1657_v62  ;;  %v2114_v21 = vrot.slane %v2112_v28, 4  ;;  %v2309_v49 = vrot.slane %v1659_v16, 5  ;;  %v1508_v2 = vld [vmem:[#allocation2 + $0x58] sm:$0xf]  ;;  %v1509_v19 = vld [vmem:[#allocation2 + $0x5c] sm:$0x3] }
 0x174   : > { %v2307_v56 = vor.u32 %v2306_v29, %v2305_v1  ;;  %v2310_v15 = vrot.slane %v1655_v46, 6  ;;  %v2314_v14 = vshrl.u32 %v1554_v3, 16  ;;  %v2317_v22 = vrot.slane %v1665_v58, 6  ;;  %v1507_v46 = vld [vmem:[#allocation2 + $0x54] sm:$0xf] }
 0x175   : > { %v1653_v36 = vrot.slane %v1652_v42, 4  ;;  %v1663_v13 = vrot.slane %v1662_v34, 4  ;;  %v2116_v20 = vsel %vm9686_vm8, %v2114_v21, %v2115_v38  ;;  %v8073_v55 = vrot.slane %v1552_v40, 10 }
 0x176   : > { %v2308_v59 = vrot.slane %v2307_v56, 4  ;;  %v2311_v9 = vor.u32 %v2310_v15, %v2309_v49  ;;  %v2316_v35 = vrot.slane %v2314_v14, 5  ;;  %v2598_v63 = vrot.slane %v1553_v27, 6 }
 0x177   : > { %v1658_v12 = vsel %vm9631_vm15, %v1653_v36, %v1657_v62  ;;  %v1668_v23 = vsel %vm9631_vm15, %v1663_v13, %v1667_v51  ;;  %v2601_v60 = vrot.slane %v1554_v3, 6  ;;  %v9839_v58 = vmax.bf16 %v1507_v46, %v1458_v48 }
 0x178   : > { %v2017_v7 = vmax.bf16 %v1658_v12, %v1552_v40  ;;  %v2018_v26 = vmax.bf16 %v1668_v23, %v1553_v27  ;;  %v2312_v41 = vsel %vm9732_vm11, %v2308_v59, %v2311_v9  ;;  %v2313_v31 = vrot.slane %v2311_v9, 4 }
 0x179   : > { %v2318_v16 = vor.u32 %v2317_v22, %v2316_v35  ;;  %v2599_v30 = vsel %vm9739_vm12, %v8073_v55, %v2598_v63  ;;  %v2600_v10 = vrot.slane %v2598_v63, 4  ;;  %v9841_v11 = vmax.bf16 %v1508_v2, %v1459_v61  ;;  %v1171_v63 = vld [vmem:[#allocation2 + $0x30] sm:$0xf]  ;;  %v1221_v2 = vld [vmem:[#allocation2 + $0x40] sm:$0xf] }
 0x17a   : > { %v2244_v5 = vmax.bf16 %v2113_v47, %v2017_v7  ;;  %v2245_v62 = vmax.bf16 %v2116_v20, %v2018_v26  ;;  %v9843_v40 = vmax.bf16 %v1509_v19, %v1460_v18  ;;  %v1670_v28 = vshrl.u32 %v9839_v58, 16  ;;  %v1172_v19 = vld [vmem:[#allocation2 + $0x34] sm:$0xf] }
 0x17b   : > { %v2319_v27 = vsel %vm9732_vm11, %v2313_v31, %v2318_v16  ;;  %v2602_v3 = vsel %vm9739_vm12, %v2600_v10, %v2601_v60  ;;  %v1673_v51 = vshll.u32 %v9839_v58, 16  ;;  %v1679_v48 = vshll.u32 %v9841_v11, 16  ;;  %v1173_v10 = vld [vmem:[#allocation2 + $0x38] sm:$0x3] }
 0x17c   : > { %v2551_v38 = vmax.bf16 %v2312_v41, %v2244_v5  ;;  %v2552_v1 = vmax.bf16 %v2319_v27, %v2245_v62  ;;  %v1683_v29 = vshrl.u32 %v9841_v11, 16  ;;  %v1672_v61 = vrot.slane %v1670_v28, 4 }
 0x17d   : > { %v1675_v42 = vrot.slane %v1673_v51, 5  ;;  %v1689_v18 = vshll.u32 %v9843_v40, 16  ;;  %v8058_v34 = vrot.slane %v9839_v58, 9  ;;  %v1681_v56 = vrot.slane %v1679_v48, 5 }
 0x17e   : > { %v2730_v47 = vmax.bf16 %v2599_v30, %v2551_v38  ;;  %v2731_v21 = vmax.bf16 %v2602_v3, %v2552_v1  ;;  %v1685_v49 = vrot.slane %v1683_v29, 4  ;;  %v2119_v36 = vrot.slane %v9841_v11, 5 }
 0x17f   : > { %v1676_v15 = vor.u32 %v1675_v42, %v1672_v61  ;;  %v1691_v14 = vrot.slane %v1689_v18, 5  ;;  %v2122_v13 = vrot.slane %v9843_v40, 5  ;;  %v2320_v23 = vrot.slane %v1670_v28, 5  ;;  %v1224_v28 = vld [vmem:[#allocation2 + $0x4c] sm:$0xf] }
 0x180   : > { %v8090_v20 = vcombine.low %v2730_v47, %v2731_v21  ;;  %v3276_v22 = vrot.slane %v2730_v47, 7  ;;  %v3278_v59 = vrot.slane %v2731_v21, 7  ;;  %v1686_v9 = vor.u32 %v1685_v49, %v1681_v56  ;;  %v1222_v61 = vld [vmem:[#allocation2 + $0x44] sm:$0x3]  ;;  %v1175_v49 = vld [vmem:[#allocation2 + $0x40] sm:$0xf] }
 0x181   : > { %v1677_v35 = vrot.slane %v1676_v15, 4  ;;  %v2120_v55 = vsel %vm9686_vm8, %v8058_v34, %v2119_v36  ;;  %v2121_v12 = vrot.slane %v2119_v36, 4  ;;  %v2321_v41 = vrot.slane %v1673_v51, 6 }
 0x182   : > { %8524 = vmatprep.mubr.msk.bf16.mxu0 %vm2840_vm10, %v8090_v20  ;;  %v3277_v60 = vrot.slane %v3276_v22, 4  ;;  %v3280_v7 = vrot.slane %v3278_v59, 4  ;;  %v1687_v26 = vrot.slane %v1686_v9, 4  ;;  %3400 = vst.msk [vmem:[#allocation2 + $0x30] sm:$0xe] %vm1110_vm7, %v3276_v22  ;;  %v2324_v16 = vrot.slane %v1683_v29, 5 }
 0x183   : > { %v1682_v31 = vsel %vm9631_vm15, %v1677_v35, %v1681_v56  ;;  %v2123_v46 = vsel %vm9686_vm8, %v2121_v12, %v2122_v13  ;;  %v2325_v30 = vrot.slane %v1679_v48, 6  ;;  %v2322_v3 = vor.u32 %v2321_v41, %v2320_v23  ;;  %v1220_v29 = vld [vmem:[#allocation2 + $0x3c] sm:$0xf]  ;;  %v1316_v56 = vld [vmem:[#allocation2 + $0x48] sm:$0xf] }
 0x184   : > { %v3279_v5 = vsel %vm9358_vm9, %v3277_v60, %v3278_v59  ;;  %v1692_v62 = vsel %vm9631_vm15, %v1687_v26, %v1691_v14  ;;  %v2019_v27 = vmax.bf16 %v1682_v31, %v9839_v58  ;;  %3402 = vst.msk [vmem:[#allocation2 + $0x38] sm:$0x1] %vm856_vm2, %v3280_v7  ;;  %v2329_v1 = vshrl.u32 %v9843_v40, 16  ;;  %v1223_v20 = vld [vmem:[#allocation2 + $0x48] sm:$0xf] }
 0x185   : > { %3401 = vst.msk [vmem:[#allocation2 + $0x34] sm:$0xf] %vm841_vm3, %v3279_v5  ;;  %v2020_v51 = vmax.bf16 %v1692_v62, %v9841_v11  ;;  %v2326_v38 = vor.u32 %v2325_v30, %v2324_v16  ;;  %v2332_v48 = vrot.slane %v1689_v18, 6  ;;  %v2323_v34 = vrot.slane %v2322_v3, 4  ;;  %v1317_v35 = vld [vmem:[#allocation2 + $0x4c] sm:$0xf] }
 0x186   : > { %v2246_v42 = vmax.bf16 %v2120_v55, %v2019_v27  ;;  %v8074_v47 = vrot.slane %v9839_v58, 10  ;;  %v2605_v21 = vrot.slane %v9841_v11, 6  ;;  %v2331_v36 = vrot.slane %v2329_v1, 5  ;;  %v1318_v58 = vld [vmem:[#allocation2 + $0x50] sm:$0x3] }
 0x187   : > { %v2247_v15 = vmax.bf16 %v2123_v46, %v2020_v51  ;;  %v2328_v14 = vrot.slane %v2326_v38, 4  ;;  %v2608_v13 = vrot.slane %v9843_v40, 6  ;;  %v2327_v22 = vsel %vm9732_vm11, %v2323_v34, %v2326_v38  ;;  %v1413_v60 = vld [vmem:[#allocation2 + $0x54] sm:$0xf]  ;;  %v1174_v7 = vld [vmem:[#allocation2 + $0x3c] sm:$0xf] }
 0x188   : > { %v2606_v18 = vsel %vm9739_vm12, %v8074_v47, %v2605_v21  ;;  %v2607_v59 = vrot.slane %v2605_v21, 4  ;;  %v1268_v9 = vmax.bf16 %v1220_v29, %v1171_v63  ;;  %v2333_v55 = vor.u32 %v2332_v48, %v2331_v36  ;;  %v1225_v26 = vld [vmem:[#allocation2 + $0x50] sm:$0x3]  ;;  %v8233_v40 = vld [vmem:[%s12490_s3 + $0x3] sm:$0x1] }
 0x189   : > { %v2553_v11 = vmax.bf16 %v2327_v22, %v2246_v42  ;;  %v1269_v12 = vmax.bf16 %v1221_v2, %v1172_v19  ;;  %v1270_v23 = vmax.bf16 %v1222_v61, %v1173_v10  ;;  %v1414_v46 = vld [vmem:[#allocation2 + $0x58] sm:$0xf]  ;;  %v1415_v16 = vld [vmem:[#allocation2 + $0x5c] sm:$0x3]  ;;  %v1510_v63 = vld [vmem:[#allocation2 + $0x60] sm:$0xf]  ;;  %v1271_v5 = vmax.bf16 %v1223_v20, %v1174_v7  ;;  %8757 = vmatprep.subr.msk.bf16.mxu1 %vm978_vm6, %v8233_v40 }
 0x18a   : > { %v2609_v41 = vsel %vm9739_vm12, %v2607_v59, %v2608_v13  ;;  %v1364_v31 = vmax.bf16 %v1316_v56, %v1268_v9  ;;  %v1511_v30 = vld [vmem:[#allocation2 + $0x64] sm:$0xf]  ;;  %v1272_v62 = vmax.bf16 %v1224_v28, %v1175_v49  ;;  %v2334_v10 = vsel %vm9732_vm11, %v2328_v14, %v2333_v55  ;;  %v1319_v51 = vld [vmem:[#allocation2 + $0x54] sm:$0xf]  ;;  %v9889_v38 = vld [vmem:[#allocation2 + $0x60] sm:$0xf] }
 0x18b   : > { %v2732_v2 = vmax.bf16 %v2606_v18, %v2553_v11  ;;  %v1365_v19 = vmax.bf16 %v1317_v35, %v1269_v12  ;;  %v1366_v27 = vmax.bf16 %v1318_v58, %v1270_v23  ;;  %v1176_v3 = vld [vmem:[#allocation2 + $0x44] sm:$0x3]  ;;  %v2554_v1 = vmax.bf16 %v2334_v10, %v2247_v15  ;;  %v1512_v29 = vld [vmem:[#allocation2 + $0x68] sm:$0x3]  ;;  %v1320_v42 = vld [vmem:[#allocation2 + $0x58] sm:$0xf] }
 0x18c   : > { %v1461_v48 = vmax.bf16 %v1413_v60, %v1364_v31  ;;  %v1273_v61 = vmax.bf16 %v1225_v26, %v1176_v3  ;;  %v9891_v34 = vmax.bf16 %v1319_v51, %v1271_v5  ;;  %v9893_v28 = vld [vmem:[#allocation2 + $0x64] sm:$0xf]  ;;  %v1321_v49 = vld [vmem:[#allocation2 + $0x5c] sm:$0x3]  ;;  %v9895_v14 = vmax.bf16 %v1320_v42, %v1272_v62 }
 0x18d   : > { %v3281_v47 = vrot.slane %v2732_v2, 7  ;;  %v1462_v21 = vmax.bf16 %v1414_v46, %v1365_v19  ;;  %v1463_v56 = vmax.bf16 %v1415_v16, %v1366_v27  ;;  %v2733_v36 = vmax.bf16 %v2609_v41, %v2554_v1 }
 0x18e   : > { %v1558_v13 = vmax.bf16 %v1510_v63, %v1461_v48  ;;  %v9897_v20 = vmax.bf16 %v1321_v49, %v1273_v61  ;;  %v1464_v15 = vmax.bf16 %v9889_v38, %v9891_v34  ;;  %v1465_v9 = vmax.bf16 %v9893_v28, %v9895_v14 }
 0x18f   : > { %v3282_v22 = vrot.slane %v3281_v47, 4  ;;  %v1559_v18 = vmax.bf16 %v1511_v30, %v1462_v21  ;;  %v9901_v59 = vmax.bf16 %v1512_v29, %v1463_v56  ;;  %3403 = vst.msk [vmem:[#allocation2 + $0x3c] sm:$0xe] %vm1110_vm7, %v3281_v47  ;;  %v8091_v35 = vcombine.low %v2732_v2, %v2733_v36 }
 0x190   : > { %v3283_v58 = vrot.slane %v2733_v36, 7  ;;  %v1694_v55 = vshrl.u32 %v1558_v13, 16  ;;  %v1697_v11 = vshll.u32 %v1558_v13, 16  ;;  %v8059_v7 = vrot.slane %v1558_v13, 9 }
 0x191   : > { %v1703_v12 = vshll.u32 %v1559_v18, 16  ;;  %v1707_v23 = vshrl.u32 %v1559_v18, 16  ;;  %v1713_v60 = vshll.u32 %v9901_v59, 16  ;;  %8525 = vmatmul.mubr.msk.bf16.gmra.mrb[36].mxu0 %vm2840_vm10, %v8091_v35  ;;  %v2126_v30 = vrot.slane %v1559_v18, 5 }
 0x192   : > { %v3284_v26 = vsel %vm9358_vm9, %v3282_v22, %v3283_v58  ;;  %v3285_v40 = vrot.slane %v3283_v58, 4  ;;  %v1696_v41 = vrot.slane %v1694_v55, 4  ;;  %v1699_v31 = vrot.slane %v1697_v11, 5  ;;  %v1418_v22 = vld [vmem:[#allocation2 + $0x68] sm:$0x3] }
 0x193   : > { %3404 = vst.msk [vmem:[#allocation2 + $0x40] sm:$0xf] %vm841_vm3, %v3284_v26  ;;  %v1705_v46 = vrot.slane %v1703_v12, 5  ;;  %v1709_v16 = vrot.slane %v1707_v23, 4  ;;  %v1715_v63 = vrot.slane %v1713_v60, 5  ;;  %v2129_v62 = vrot.slane %v9901_v59, 5 }
 0x194   : > { %v1700_v5 = vor.u32 %v1699_v31, %v1696_v41  ;;  %v2335_v10 = vrot.slane %v1694_v55, 5  ;;  %v2336_v2 = vrot.slane %v1697_v11, 6  ;;  %3405 = vst.msk [vmem:[#allocation2 + $0x44] sm:$0x1] %vm856_vm2, %v3285_v40  ;;  %v2127_v27 = vsel %vm9686_vm8, %v8059_v7, %v2126_v30  ;;  %v9925_v26 = vld [vmem:[#allocation2 + $0x48] sm:$0xf] }
 0x195   : > { %v1710_v19 = vor.u32 %v1709_v16, %v1705_v46  ;;  %v2128_v3 = vrot.slane %v2126_v30, 4  ;;  %v2339_v51 = vrot.slane %v1707_v23, 5  ;;  %v2340_v29 = vrot.slane %v1703_v12, 6  ;;  %v9927_v40 = vld [vmem:[#allocation2 + $0x54] sm:$0xf] }
 0x196   : > { %v1701_v1 = vrot.slane %v1700_v5, 4  ;;  %v2337_v48 = vor.u32 %v2336_v2, %v2335_v10  ;;  %v2344_v61 = vshrl.u32 %v9901_v59, 16  ;;  %v2347_v47 = vrot.slane %v1713_v60, 6  ;;  %v1513_v16 = vld [vmem:[#allocation2 + $0x6c] sm:$0xf] }
 0x197   : > { %v1711_v42 = vrot.slane %v1710_v19, 4  ;;  %v2130_v28 = vsel %vm9686_vm8, %v2128_v3, %v2129_v62  ;;  %v8075_v21 = vrot.slane %v1558_v13, 10  ;;  %v2341_v14 = vor.u32 %v2340_v29, %v2339_v51  ;;  %v1515_v30 = vld [vmem:[#allocation2 + $0x74] sm:$0x3] }
 0x198   : > { %v1706_v56 = vsel %vm9631_vm15, %v1701_v1, %v1705_v46  ;;  %v2338_v49 = vrot.slane %v2337_v48, 4  ;;  %v2346_v36 = vrot.slane %v2344_v61, 5  ;;  %v2612_v55 = vrot.slane %v1559_v18, 6 }
 0x199   : > { %v1716_v35 = vsel %vm9631_vm15, %v1711_v42, %v1715_v63  ;;  %v2021_v58 = vmax.bf16 %v1706_v56, %v1558_v13  ;;  %v2615_v11 = vrot.slane %v9901_v59, 6  ;;  %v2343_v60 = vrot.slane %v2341_v14, 4  ;;  %v1514_v63 = vld [vmem:[#allocation2 + $0x70] sm:$0xf] }
 0x19a   : > { %v2022_v12 = vmax.bf16 %v1716_v35, %v1559_v18  ;;  %v2342_v23 = vsel %vm9732_vm11, %v2338_v49, %v2341_v14  ;;  %v2348_v7 = vor.u32 %v2347_v47, %v2346_v36  ;;  %v2613_v31 = vsel %vm9739_vm12, %v8075_v21, %v2612_v55 }
 0x19b   : > { %v2248_v41 = vmax.bf16 %v2127_v27, %v2021_v58  ;;  %v2614_v46 = vrot.slane %v2612_v55, 4  ;;  %v1466_v13 = vmax.bf16 %v1418_v22, %v9897_v20  ;;  %v9937_v5 = vmax.bf16 %v1513_v16, %v1464_v15 }
 0x19c   : > { %v2249_v59 = vmax.bf16 %v2130_v28, %v2022_v12  ;;  %v2349_v18 = vsel %vm9732_vm11, %v2343_v60, %v2348_v7  ;;  %v9939_v62 = vmax.bf16 %v1514_v63, %v1465_v9  ;;  %v1274_v20 = vmax.bf16 %v9927_v40, %v9925_v26  ;;  %v1179_v63 = vld [vmem:[#allocation2 + $0x50] sm:$0x3]  ;;  %v1325_v40 = vld [vmem:[#allocation2 + $0x6c] sm:$0xf] }
 0x19d   : > { %v2555_v10 = vmax.bf16 %v2342_v23, %v2248_v41  ;;  %v2616_v2 = vsel %vm9739_vm12, %v2614_v46, %v2615_v11  ;;  %v9943_v19 = vmax.bf16 %v1515_v30, %v1466_v13  ;;  %v1718_v3 = vshrl.u32 %v9937_v5, 16  ;;  %v1178_v41 = vld [vmem:[#allocation2 + $0x4c] sm:$0xf] }
 0x19e   : > { %v2556_v27 = vmax.bf16 %v2349_v18, %v2249_v59  ;;  %v1721_v51 = vshll.u32 %v9937_v5, 16  ;;  %v1727_v38 = vshll.u32 %v9939_v62, 16  ;;  %v1731_v15 = vshrl.u32 %v9939_v62, 16  ;;  %v1227_v59 = vld [vmem:[#allocation2 + $0x58] sm:$0xf] }
 0x19f   : > { %v2734_v34 = vmax.bf16 %v2613_v31, %v2555_v10  ;;  %v1737_v9 = vshll.u32 %v9943_v19, 16  ;;  %v8060_v1 = vrot.slane %v9937_v5, 9  ;;  %v1720_v29 = vrot.slane %v1718_v3, 4 }
 0x1a0   : > { %v2735_v48 = vmax.bf16 %v2616_v2, %v2556_v27  ;;  %v1723_v61 = vrot.slane %v1721_v51, 5  ;;  %v1729_v42 = vrot.slane %v1727_v38, 5  ;;  %v1733_v47 = vrot.slane %v1731_v15, 4 }
 0x1a1   : > { %v3286_v28 = vrot.slane %v2734_v34, 7  ;;  %v1739_v21 = vrot.slane %v1737_v9, 5  ;;  %v2133_v56 = vrot.slane %v9939_v62, 5  ;;  %v2136_v22 = vrot.slane %v9943_v19, 5 }
 0x1a2   : > { %v8092_v49 = vcombine.low %v2734_v34, %v2735_v48  ;;  %v3288_v14 = vrot.slane %v2735_v48, 7  ;;  %v1724_v36 = vor.u32 %v1723_v61, %v1720_v29  ;;  %v1734_v58 = vor.u32 %v1733_v47, %v1729_v42  ;;  %v1228_v61 = vld [vmem:[#allocation2 + $0x5c] sm:$0x3] }
 0x1a3   : > { %v3287_v35 = vrot.slane %v3286_v28, 4  ;;  %v2134_v55 = vsel %vm9686_vm8, %v8060_v1, %v2133_v56  ;;  %v2135_v11 = vrot.slane %v2133_v56, 4  ;;  %3406 = vst.msk [vmem:[#allocation2 + $0x48] sm:$0xe] %vm1110_vm7, %v3286_v28  ;;  %v2350_v60 = vrot.slane %v1718_v3, 5 }
 0x1a4   : > { %8528 = vmatprep.mubr.msk.bf16.mxu0 %vm2840_vm10, %v8092_v49  ;;  %v3290_v12 = vrot.slane %v3288_v14, 4  ;;  %v1725_v23 = vrot.slane %v1724_v36, 4  ;;  %v2351_v7 = vrot.slane %v1721_v51, 6  ;;  %v1735_v46 = vrot.slane %v1734_v58, 4  ;;  %v1323_v49 = vld [vmem:[#allocation2 + $0x64] sm:$0xf] }
 0x1a5   : > { %v3289_v31 = vsel %vm9358_vm9, %v3287_v35, %v3288_v14  ;;  %v2137_v13 = vsel %vm9686_vm8, %v2135_v11, %v2136_v22  ;;  %v2354_v16 = vrot.slane %v1731_v15, 5  ;;  %v2355_v10 = vrot.slane %v1727_v38, 6  ;;  %v1230_v14 = vld [vmem:[#allocation2 + $0x64] sm:$0xf]  ;;  %v1324_v35 = vld [vmem:[#allocation2 + $0x68] sm:$0x3] }
 0x1a6   : > { %3407 = vst.msk [vmem:[#allocation2 + $0x4c] sm:$0xf] %vm841_vm3, %v3289_v31  ;;  %v1730_v18 = vsel %vm9631_vm15, %v1725_v23, %v1729_v42  ;;  %v2352_v30 = vor.u32 %v2351_v7, %v2350_v60  ;;  %v2359_v2 = vshrl.u32 %v9943_v19, 16  ;;  %v1740_v27 = vsel %vm9631_vm15, %v1735_v46, %v1739_v21  ;;  %v1322_v42 = vld [vmem:[#allocation2 + $0x60] sm:$0xf] }
 0x1a7   : > { %3408 = vst.msk [vmem:[#allocation2 + $0x50] sm:$0x1] %vm856_vm2, %v3290_v12  ;;  %v2023_v3 = vmax.bf16 %v1730_v18, %v9937_v5  ;;  %v2362_v51 = vrot.slane %v1737_v9, 6  ;;  %v8076_v34 = vrot.slane %v9937_v5, 10  ;;  %v2024_v15 = vmax.bf16 %v1740_v27, %v9939_v62  ;;  %v1229_v21 = vld [vmem:[#allocation2 + $0x60] sm:$0xf] }
 0x1a8   : > { %v2353_v1 = vrot.slane %v2352_v30, 4  ;;  %v2356_v48 = vor.u32 %v2355_v10, %v2354_v16  ;;  %v2361_v29 = vrot.slane %v2359_v2, 5  ;;  %v2619_v28 = vrot.slane %v9939_v62, 6  ;;  %v1180_v62 = vld [vmem:[#allocation2 + $0x54] sm:$0xf] }
 0x1a9   : > { %v2250_v38 = vmax.bf16 %v2134_v55, %v2023_v3  ;;  %v2622_v47 = vrot.slane %v9943_v19, 6  ;;  %v1275_v56 = vmax.bf16 %v1227_v59, %v1178_v41  ;;  %v2251_v36 = vmax.bf16 %v2137_v13, %v2024_v15  ;;  %v1231_v23 = vld [vmem:[#allocation2 + $0x68] sm:$0x3]  ;;  %v1181_v19 = vld [vmem:[#allocation2 + $0x58] sm:$0xf] }
 0x1aa   : > { %v2357_v5 = vsel %vm9732_vm11, %v2353_v1, %v2356_v48  ;;  %v2358_v9 = vrot.slane %v2356_v48, 4  ;;  %v2363_v22 = vor.u32 %v2362_v51, %v2361_v29  ;;  %v2620_v11 = vsel %vm9739_vm12, %v8076_v34, %v2619_v28  ;;  %v1419_v31 = vld [vmem:[#allocation2 + $0x6c] sm:$0xf]  ;;  %v1420_v46 = vld [vmem:[#allocation2 + $0x70] sm:$0xf] }
 0x1ab   : > { %v2557_v58 = vmax.bf16 %v2357_v5, %v2250_v38  ;;  %v2621_v55 = vrot.slane %v2619_v28, 4  ;;  %v1276_v12 = vmax.bf16 %v1228_v61, %v1179_v63  ;;  %v1370_v7 = vmax.bf16 %v1322_v42, %v1274_v20  ;;  %v1516_v30 = vld [vmem:[#allocation2 + $0x78] sm:$0xf]  ;;  %v1517_v10 = vld [vmem:[#allocation2 + $0x7c] sm:$0xf] }
 0x1ac   : > { %v2364_v60 = vsel %vm9732_vm11, %v2358_v9, %v2363_v22  ;;  %v1371_v41 = vmax.bf16 %v1323_v49, %v1275_v56  ;;  %v1277_v13 = vmax.bf16 %v1229_v21, %v1180_v62  ;;  %v1182_v2 = vld [vmem:[#allocation2 + $0x5c] sm:$0x3]  ;;  %v1421_v27 = vld [vmem:[#allocation2 + $0x74] sm:$0x3]  ;;  %v1518_v34 = vld [vmem:[#allocation2 + $0x80] sm:$0x3]  ;;  %v1278_v15 = vmax.bf16 %v1230_v14, %v1181_v19 }
 0x1ad   : > { %v2558_v16 = vmax.bf16 %v2364_v60, %v2251_v36  ;;  %v2623_v59 = vsel %vm9739_vm12, %v2621_v55, %v2622_v47  ;;  %v2736_v18 = vmax.bf16 %v2620_v11, %v2557_v58  ;;  %v1372_v63 = vmax.bf16 %v1324_v35, %v1276_v12  ;;  %v1326_v29 = vld [vmem:[#allocation2 + $0x70] sm:$0xf]  ;;  %v1327_v61 = vld [vmem:[#allocation2 + $0x74] sm:$0x3] }
 0x1ae   : > { %v1467_v3 = vmax.bf16 %v1419_v31, %v1370_v7  ;;  %v1468_v51 = vmax.bf16 %v1420_v46, %v1371_v41  ;;  %v1279_v26 = vmax.bf16 %v1231_v23, %v1182_v2  ;;  %v9986_v42 = vmax.bf16 %v1325_v40, %v1277_v13 }
 0x1af   : > { %v2737_v20 = vmax.bf16 %v2623_v59, %v2558_v16  ;;  %v3291_v1 = vrot.slane %v2736_v18, 7  ;;  %v1469_v48 = vmax.bf16 %v1421_v27, %v1372_v63  ;;  %v9988_v47 = vmax.bf16 %v1326_v29, %v1278_v15 }
 0x1b0   : > { %v1564_v38 = vmax.bf16 %v1516_v30, %v1467_v3  ;;  %v1565_v28 = vmax.bf16 %v1517_v10, %v1468_v51  ;;  %v9990_v56 = vmax.bf16 %v1327_v61, %v1279_v26 }
 0x1b1   : > { %v8093_v49 = vcombine.low %v2736_v18, %v2737_v20  ;;  %v3292_v21 = vrot.slane %v3291_v1, 4  ;;  %v3293_v36 = vrot.slane %v2737_v20, 7  ;;  %v9992_v5 = vmax.bf16 %v1518_v34, %v1469_v48  ;;  %3409 = vst.msk [vmem:[#allocation2 + $0x54] sm:$0xe] %vm1110_vm7, %v3291_v1  ;;  %v1422_v1 = vld [vmem:[#allocation2 + $0x78] sm:$0xf] }
 0x1b2   : > { %v1742_v14 = vshrl.u32 %v1564_v38, 16  ;;  %v1745_v9 = vshll.u32 %v1564_v38, 16  ;;  %v1751_v22 = vshll.u32 %v1565_v28, 16  ;;  %v1755_v35 = vshrl.u32 %v1565_v28, 16 }
 0x1b3   : > { %8529 = vmatmul.mubr.msk.bf16.gmra.mrb[40].mxu0 %vm2840_vm10, %v8093_v49  ;;  %v3294_v58 = vsel %vm9358_vm9, %v3292_v21, %v3293_v36  ;;  %v3295_v11 = vrot.slane %v3293_v36, 4  ;;  %v1761_v55 = vshll.u32 %v9992_v5, 16  ;;  %v8061_v12 = vrot.slane %v1564_v38, 9  ;;  %v1423_v21 = vld [vmem:[#allocation2 + $0x7c] sm:$0xf] }
 0x1b4   : > { %3410 = vst.msk [vmem:[#allocation2 + $0x58] sm:$0xf] %vm841_vm3, %v3294_v58  ;;  %v1744_v62 = vrot.slane %v1742_v14, 4  ;;  %v1747_v23 = vrot.slane %v1745_v9, 5  ;;  %v1753_v19 = vrot.slane %v1751_v22, 5  ;;  %v1757_v60 = vrot.slane %v1755_v35, 4 }
 0x1b5   : > { %v1763_v7 = vrot.slane %v1761_v55, 5  ;;  %v2140_v41 = vrot.slane %v1565_v28, 5  ;;  %v2143_v31 = vrot.slane %v9992_v5, 5  ;;  %v2365_v46 = vrot.slane %v1742_v14, 5  ;;  %3411 = vst.msk [vmem:[#allocation2 + $0x5c] sm:$0x1] %vm856_vm2, %v3295_v11 }
 0x1b6   : > { %v1748_v13 = vor.u32 %v1747_v23, %v1744_v62  ;;  %v1758_v16 = vor.u32 %v1757_v60, %v1753_v19  ;;  %v2366_v59 = vrot.slane %v1745_v9, 6  ;;  %v2369_v18 = vrot.slane %v1755_v35, 5  ;;  %v1424_v36 = vld [vmem:[#allocation2 + $0x80] sm:$0x3]  ;;  %v1232_v11 = vld [vmem:[#allocation2 + $0x6c] sm:$0xf] }
 0x1b7   : > { %v2141_v63 = vsel %vm9686_vm8, %v8061_v12, %v2140_v41  ;;  %v2142_v30 = vrot.slane %v2140_v41, 4  ;;  %v2370_v10 = vrot.slane %v1751_v22, 6  ;;  %v2374_v2 = vshrl.u32 %v9992_v5, 16  ;;  %v1183_v58 = vld [vmem:[#allocation2 + $0x60] sm:$0xf] }
 0x1b8   : > { %v1749_v27 = vrot.slane %v1748_v13, 4  ;;  %v1759_v3 = vrot.slane %v1758_v16, 4  ;;  %v2367_v51 = vor.u32 %v2366_v59, %v2365_v46  ;;  %v2377_v34 = vrot.slane %v1761_v55, 6  ;;  %v10011_v55 = vld [vmem:[#allocation2 + $0x70] sm:$0xf] }
 0x1b9   : > { %v2144_v15 = vsel %vm9686_vm8, %v2142_v30, %v2143_v31  ;;  %v2371_v26 = vor.u32 %v2370_v10, %v2369_v18  ;;  %v2376_v40 = vrot.slane %v2374_v2, 5  ;;  %v8077_v20 = vrot.slane %v1564_v38, 10  ;;  %v10013_v12 = vld [vmem:[#allocation2 + $0x64] sm:$0xf]  ;;  %v10023_v31 = vld [vmem:[#allocation2 + $0x68] sm:$0x3] }
 0x1ba   : > { %v1754_v48 = vsel %vm9631_vm15, %v1749_v27, %v1753_v19  ;;  %v1764_v29 = vsel %vm9631_vm15, %v1759_v3, %v1763_v7  ;;  %v2368_v61 = vrot.slane %v2367_v51, 4  ;;  %v2626_v49 = vrot.slane %v1565_v28, 6  ;;  %v10025_v46 = vld [vmem:[#allocation2 + $0x74] sm:$0x3]  ;;  %v1328_v13 = vld [vmem:[#allocation2 + $0x78] sm:$0xf] }
 0x1bb   : > { %v2025_v14 = vmax.bf16 %v1754_v48, %v1564_v38  ;;  %v2026_v9 = vmax.bf16 %v1764_v29, %v1565_v28  ;;  %v2373_v22 = vrot.slane %v2371_v26, 4  ;;  %v2378_v35 = vor.u32 %v2377_v34, %v2376_v40  ;;  %v1520_v2 = vld [vmem:[#allocation2 + $0x88] sm:$0xf]  ;;  %v1521_v27 = vld [vmem:[#allocation2 + $0x8c] sm:$0x3] }
 0x1bc   : > { %v2372_v62 = vsel %vm9732_vm11, %v2368_v61, %v2371_v26  ;;  %v2627_v23 = vsel %vm9739_vm12, %v8077_v20, %v2626_v49  ;;  %v2628_v19 = vrot.slane %v2626_v49, 4  ;;  %v2629_v60 = vrot.slane %v9992_v5, 6  ;;  %v1519_v5 = vld [vmem:[#allocation2 + $0x84] sm:$0xf] }
 0x1bd   : > { %v2252_v7 = vmax.bf16 %v2141_v63, %v2025_v14  ;;  %v2253_v38 = vmax.bf16 %v2144_v15, %v2026_v9  ;;  %v2379_v28 = vsel %vm9732_vm11, %v2373_v22, %v2378_v35  ;;  %v1470_v41 = vmax.bf16 %v1422_v1, %v9986_v42 }
 0x1be   : > { %v2630_v16 = vsel %vm9739_vm12, %v2628_v19, %v2629_v60  ;;  %v1471_v59 = vmax.bf16 %v1423_v21, %v9988_v47  ;;  %v1472_v18 = vmax.bf16 %v1424_v36, %v9990_v56  ;;  %v1280_v63 = vmax.bf16 %v1232_v11, %v1183_v58 }
 0x1bf   : > { %v2559_v30 = vmax.bf16 %v2372_v62, %v2252_v7  ;;  %v2560_v10 = vmax.bf16 %v2379_v28, %v2253_v38  ;;  %v10031_v3 = vmax.bf16 %v1519_v5, %v1470_v41  ;;  %v1281_v42 = vmax.bf16 %v10011_v55, %v10013_v12 }
 0x1c0   : > { %v10035_v51 = vmax.bf16 %v1520_v2, %v1471_v59  ;;  %v10037_v34 = vmax.bf16 %v1521_v27, %v1472_v18  ;;  %v1282_v47 = vmax.bf16 %v10025_v46, %v10023_v31  ;;  %v10041_v15 = vmax.bf16 %v1328_v13, %v1280_v63  ;;  %v1329_v27 = vld [vmem:[#allocation2 + $0x7c] sm:$0xf] }
 0x1c1   : > { %v2738_v56 = vmax.bf16 %v2627_v23, %v2559_v30  ;;  %v2739_v26 = vmax.bf16 %v2630_v16, %v2560_v10  ;;  %v1766_v40 = vshrl.u32 %v10031_v3, 16  ;;  %v1769_v20 = vshll.u32 %v10031_v3, 16 }
 0x1c2   : > { %v1775_v1 = vshll.u32 %v10035_v51, 16  ;;  %v1779_v48 = vshrl.u32 %v10035_v51, 16  ;;  %v1785_v29 = vshll.u32 %v10037_v34, 16  ;;  %v8062_v61 = vrot.slane %v10031_v3, 9 }
 0x1c3   : > { %v8094_v49 = vcombine.low %v2738_v56, %v2739_v26  ;;  %v3296_v21 = vrot.slane %v2738_v56, 7  ;;  %v3298_v36 = vrot.slane %v2739_v26, 7  ;;  %v1768_v14 = vrot.slane %v1766_v40, 4 }
 0x1c4   : > { %v1771_v9 = vrot.slane %v1769_v20, 5  ;;  %v1777_v22 = vrot.slane %v1775_v1, 5  ;;  %v1781_v35 = vrot.slane %v1779_v48, 4  ;;  %v1787_v58 = vrot.slane %v1785_v29, 5 }
 0x1c5   : > { %8532 = vmatprep.mubr.msk.bf16.mxu0 %vm2840_vm10, %v8094_v49  ;;  %v3297_v11 = vrot.slane %v3296_v21, 4  ;;  %v3300_v55 = vrot.slane %v3298_v36, 4  ;;  %v2147_v12 = vrot.slane %v10035_v51, 5  ;;  %v2150_v62 = vrot.slane %v10037_v34, 5  ;;  %3412 = vst.msk [vmem:[#allocation2 + $0x60] sm:$0xe] %vm1110_vm7, %v3296_v21 }
 0x1c6   : > { %v1772_v23 = vor.u32 %v1771_v9, %v1768_v14  ;;  %v1782_v19 = vor.u32 %v1781_v35, %v1777_v22  ;;  %v2380_v60 = vrot.slane %v1766_v40, 5  ;;  %v2381_v7 = vrot.slane %v1769_v20, 6  ;;  %v1330_v21 = vld [vmem:[#allocation2 + $0x80] sm:$0x3] }
 0x1c7   : > { %v3299_v38 = vsel %vm9358_vm9, %v3297_v11, %v3298_v36  ;;  %v2148_v28 = vsel %vm9686_vm8, %v8062_v61, %v2147_v12  ;;  %v2149_v41 = vrot.slane %v2147_v12, 4  ;;  %v2384_v13 = vrot.slane %v1779_v48, 5  ;;  %3414 = vst.msk [vmem:[#allocation2 + $0x68] sm:$0x1] %vm856_vm2, %v3300_v55  ;;  %v10067_v48 = vld [vmem:[#allocation2 + $0x7c] sm:$0xf] }
 0x1c8   : > { %3413 = vst.msk [vmem:[#allocation2 + $0x64] sm:$0xf] %vm841_vm3, %v3299_v38  ;;  %v1773_v16 = vrot.slane %v1772_v23, 4  ;;  %v1783_v59 = vrot.slane %v1782_v19, 4  ;;  %v2382_v18 = vor.u32 %v2381_v7, %v2380_v60  ;;  %v2385_v5 = vrot.slane %v1775_v1, 6 }
 0x1c9   : > { %v2151_v63 = vsel %vm9686_vm8, %v2149_v41, %v2150_v62  ;;  %v2389_v30 = vshrl.u32 %v10037_v34, 16  ;;  %v2392_v10 = vrot.slane %v1785_v29, 6  ;;  %v8078_v2 = vrot.slane %v10031_v3, 10  ;;  %v10072_v36 = vld [vmem:[#allocation2 + $0x70] sm:$0xf] }
 0x1ca   : > { %v1778_v56 = vsel %vm9631_vm15, %v1773_v16, %v1777_v22  ;;  %v1788_v26 = vsel %vm9631_vm15, %v1783_v59, %v1787_v58  ;;  %v2383_v40 = vrot.slane %v2382_v18, 4  ;;  %v2386_v20 = vor.u32 %v2385_v5, %v2384_v13  ;;  %v1425_v58 = vld [vmem:[#allocation2 + $0x84] sm:$0xf]  ;;  %v1235_v11 = vld [vmem:[#allocation2 + $0x78] sm:$0xf] }
 0x1cb   : > { %v2027_v1 = vmax.bf16 %v1778_v56, %v10031_v3  ;;  %v2028_v61 = vmax.bf16 %v1788_v26, %v10035_v51  ;;  %v2391_v49 = vrot.slane %v2389_v30, 5  ;;  %v2633_v29 = vrot.slane %v10035_v51, 6  ;;  %v1426_v23 = vld [vmem:[#allocation2 + $0x88] sm:$0xf]  ;;  %v1522_v51 = vld [vmem:[#allocation2 + $0x90] sm:$0xf] }
 0x1cc   : > { %v2387_v14 = vsel %vm9732_vm11, %v2383_v40, %v2386_v20  ;;  %v2388_v9 = vrot.slane %v2386_v20, 4  ;;  %v2636_v22 = vrot.slane %v10037_v34, 6  ;;  %v1377_v35 = vmax.bf16 %v1329_v27, %v1281_v42  ;;  %v1523_v19 = vld [vmem:[#allocation2 + $0x94] sm:$0xf]  ;;  %v1186_v42 = vld [vmem:[#allocation2 + $0x6c] sm:$0xf] }
 0x1cd   : > { %v2254_v55 = vmax.bf16 %v2148_v28, %v2027_v1  ;;  %v2255_v12 = vmax.bf16 %v2151_v63, %v2028_v61  ;;  %v2393_v3 = vor.u32 %v2392_v10, %v2391_v49  ;;  %v2634_v62 = vsel %vm9739_vm12, %v8078_v2, %v2633_v29  ;;  %v10083_v41 = vld [vmem:[#allocation2 + $0x80] sm:$0x3]  ;;  %v1427_v16 = vld [vmem:[#allocation2 + $0x8c] sm:$0x3]  ;;  %v1524_v59 = vld [vmem:[#allocation2 + $0x98] sm:$0x3] }
 0x1ce   : > { %v2635_v60 = vrot.slane %v2633_v29, 4  ;;  %v1378_v7 = vmax.bf16 %v1330_v21, %v1282_v47  ;;  %v1473_v38 = vmax.bf16 %v1425_v58, %v10041_v15  ;;  %v1474_v34 = vmax.bf16 %v1426_v23, %v1377_v35  ;;  %v10093_v15 = vld [vmem:[#allocation2 + $0x74] sm:$0x3]  ;;  %v1331_v30 = vld [vmem:[#allocation2 + $0x84] sm:$0xf] }
 0x1cf   : > { %v2394_v28 = vsel %vm9732_vm11, %v2388_v9, %v2393_v3  ;;  %v2561_v13 = vmax.bf16 %v2387_v14, %v2254_v55  ;;  %v1283_v18 = vmax.bf16 %v1235_v11, %v1186_v42  ;;  %v1284_v5 = vmax.bf16 %v10067_v48, %v10072_v36 }
 0x1d0   : > { %v2562_v63 = vmax.bf16 %v2394_v28, %v2255_v12  ;;  %v2637_v31 = vsel %vm9739_vm12, %v2635_v60, %v2636_v22  ;;  %v1475_v46 = vmax.bf16 %v1427_v16, %v1378_v7  ;;  %v10091_v47 = vmax.bf16 %v1522_v51, %v1473_v38 }
 0x1d1   : > { %v2740_v10 = vmax.bf16 %v2634_v62, %v2561_v13  ;;  %v10095_v2 = vmax.bf16 %v1523_v19, %v1474_v34  ;;  %v1285_v27 = vmax.bf16 %v10083_v41, %v10093_v15  ;;  %v10099_v56 = vmax.bf16 %v1331_v30, %v1283_v18  ;;  %v1526_v15 = vld [vmem:[#allocation2 + $0xa0] sm:$0xf] }
 0x1d2   : > { %v2741_v26 = vmax.bf16 %v2637_v31, %v2562_v63  ;;  %v10101_v40 = vmax.bf16 %v1524_v59, %v1475_v46  ;;  %v1790_v20 = vshrl.u32 %v10091_v47, 16  ;;  %v1793_v1 = vshll.u32 %v10091_v47, 16 }
 0x1d3   : > { %v3301_v61 = vrot.slane %v2740_v10, 7  ;;  %v1799_v49 = vshll.u32 %v10095_v2, 16  ;;  %v1803_v29 = vshrl.u32 %v10095_v2, 16  ;;  %v8063_v21 = vrot.slane %v10091_v47, 9 }
 0x1d4   : > { %v8095_v14 = vcombine.low %v2740_v10, %v2741_v26  ;;  %v3303_v9 = vrot.slane %v2741_v26, 7  ;;  %v1792_v22 = vrot.slane %v1790_v20, 4  ;;  %v1795_v35 = vrot.slane %v1793_v1, 5 }
 0x1d5   : > { %v3302_v58 = vrot.slane %v3301_v61, 4  ;;  %v1801_v11 = vrot.slane %v1799_v49, 5  ;;  %v1805_v55 = vrot.slane %v1803_v29, 4  ;;  %v1809_v12 = vshll.u32 %v10101_v40, 16  ;;  %3415 = vst.msk [vmem:[#allocation2 + $0x6c] sm:$0xe] %vm1110_vm7, %v3301_v61 }
 0x1d6   : > { %8533 = vmatmul.mubr.msk.bf16.gmra.mrb[44].mxu0 %vm2840_vm10, %v8095_v14  ;;  %v3305_v3 = vrot.slane %v3303_v9, 4  ;;  %v1796_v62 = vor.u32 %v1795_v35, %v1792_v22  ;;  %v2154_v23 = vrot.slane %v10095_v2, 5  ;;  %v2157_v51 = vrot.slane %v10101_v40, 5  ;;  %v1332_v22 = vld [vmem:[#allocation2 + $0x88] sm:$0xf] }
 0x1d7   : > { %v3304_v19 = vsel %vm9358_vm9, %v3302_v58, %v3303_v9  ;;  %v1806_v60 = vor.u32 %v1805_v55, %v1801_v11  ;;  %v1811_v7 = vrot.slane %v1809_v12, 5  ;;  %v2395_v38 = vrot.slane %v1790_v20, 5  ;;  %v1333_v35 = vld [vmem:[#allocation2 + $0x8c] sm:$0x3]  ;;  %v1429_v58 = vld [vmem:[#allocation2 + $0x94] sm:$0xf] }
 0x1d8   : > { %3416 = vst.msk [vmem:[#allocation2 + $0x70] sm:$0xf] %vm841_vm3, %v3304_v19  ;;  %v1797_v34 = vrot.slane %v1796_v62, 4  ;;  %v2155_v42 = vsel %vm9686_vm8, %v8063_v21, %v2154_v23  ;;  %v2156_v28 = vrot.slane %v2154_v23, 4  ;;  %v2396_v13 = vrot.slane %v1793_v1, 6 }
 0x1d9   : > { %3417 = vst.msk [vmem:[#allocation2 + $0x74] sm:$0x1] %vm856_vm2, %v3305_v3  ;;  %v1807_v16 = vrot.slane %v1806_v60, 4  ;;  %v2399_v59 = vrot.slane %v1803_v29, 5  ;;  %v2400_v18 = vrot.slane %v1799_v49, 6  ;;  %v2404_v63 = vshrl.u32 %v10101_v40, 16 }
 0x1da   : > { %v1802_v31 = vsel %vm9631_vm15, %v1797_v34, %v1801_v11  ;;  %v2158_v46 = vsel %vm9686_vm8, %v2156_v28, %v2157_v51  ;;  %v2397_v30 = vor.u32 %v2396_v13, %v2395_v38  ;;  %v2407_v10 = vrot.slane %v1809_v12, 6  ;;  %v1428_v21 = vld [vmem:[#allocation2 + $0x90] sm:$0xf]  ;;  %v1430_v11 = vld [vmem:[#allocation2 + $0x98] sm:$0x3] }
 0x1db   : > { %v1812_v26 = vsel %vm9631_vm15, %v1807_v16, %v1811_v7  ;;  %v2029_v20 = vmax.bf16 %v1802_v31, %v10091_v47  ;;  %v2401_v1 = vor.u32 %v2400_v18, %v2399_v59  ;;  %v2406_v61 = vrot.slane %v2404_v63, 5  ;;  %v3442_v23 = vld [vmem:[#allocation2] sm:$0xf]  ;;  %v3490_v51 = vld [vmem:[#allocation2 + $0xc] sm:$0xf] }
 0x1dc   : > { %v2030_v49 = vmax.bf16 %v1812_v26, %v10095_v2  ;;  %v2398_v29 = vrot.slane %v2397_v30, 4  ;;  %v8079_v14 = vrot.slane %v10091_v47, 10  ;;  %v2640_v9 = vrot.slane %v10095_v2, 6  ;;  %v3443_v2 = vld [vmem:[#allocation2 + $0x4] sm:$0xf] }
 0x1dd   : > { %v2256_v55 = vmax.bf16 %v2155_v42, %v2029_v20  ;;  %v2403_v12 = vrot.slane %v2401_v1, 4  ;;  %v2408_v3 = vor.u32 %v2407_v10, %v2406_v61  ;;  %v2643_v62 = vrot.slane %v10101_v40, 6  ;;  %v3491_v38 = vld [vmem:[#allocation2 + $0x10] sm:$0xf]  ;;  %v10143_v13 = vld [vmem:[#allocation2 + $0x8] sm:$0x3] }
 0x1de   : > { %v2257_v19 = vmax.bf16 %v2158_v46, %v2030_v49  ;;  %v2402_v60 = vsel %vm9732_vm11, %v2398_v29, %v2401_v1  ;;  %v2641_v47 = vsel %vm9739_vm12, %v8079_v14, %v2640_v9  ;;  %v2642_v7 = vrot.slane %v2640_v9, 4  ;;  %v10145_v16 = vld [vmem:[#allocation2 + $0x14] sm:$0x3]  ;;  %v3586_v59 = vld [vmem:[#allocation2 + $0x18] sm:$0xf] }
 0x1df   : > { %v2409_v34 = vsel %vm9732_vm11, %v2403_v12, %v2408_v3  ;;  %v2563_v42 = vmax.bf16 %v2402_v60, %v2256_v55  ;;  %v1380_v40 = vmax.bf16 %v1332_v22, %v1284_v5  ;;  %v1381_v28 = vmax.bf16 %v1333_v35, %v1285_v27  ;;  %v3587_v30 = vld [vmem:[#allocation2 + $0x1c] sm:$0xf]  ;;  %v1527_v27 = vld [vmem:[#allocation2 + $0xa4] sm:$0x3] }
 0x1e0   : > { %v2564_v18 = vmax.bf16 %v2409_v34, %v2257_v19  ;;  %v2644_v63 = vsel %vm9739_vm12, %v2642_v7, %v2643_v62  ;;  %v1476_v31 = vmax.bf16 %v1428_v21, %v10099_v56  ;;  %v3538_v46 = vmax.bf16 %v3490_v51, %v3442_v23  ;;  %v1525_v5 = vld [vmem:[#allocation2 + $0x9c] sm:$0xf]  ;;  %v10176_v34 = vld [vmem:[#allocation2 + $0x80] sm:$0x3] }
 0x1e1   : > { %v2742_v10 = vmax.bf16 %v2641_v47, %v2563_v42  ;;  %v1477_v48 = vmax.bf16 %v1429_v58, %v1380_v40  ;;  %v1478_v36 = vmax.bf16 %v1430_v11, %v1381_v28  ;;  %v3539_v26 = vmax.bf16 %v3491_v38, %v3443_v2  ;;  %v10164_v58 = vld [vmem:[#allocation2 + $0x78] sm:$0xf]  ;;  %v10170_v62 = vld [vmem:[#allocation2 + $0x7c] sm:$0xf] }
 0x1e2   : > { %v2743_v41 = vmax.bf16 %v2644_v63, %v2564_v18  ;;  %v10150_v20 = vmax.bf16 %v1525_v5, %v1476_v31  ;;  %v3540_v1 = vmax.bf16 %v10145_v16, %v10143_v13  ;;  %v10154_v61 = vmax.bf16 %v3586_v59, %v3538_v46 }
 0x1e3   : > { %v3306_v49 = vrot.slane %v2742_v10, 7  ;;  %v10156_v29 = vmax.bf16 %v1526_v15, %v1477_v48  ;;  %v10158_v56 = vmax.bf16 %v1527_v27, %v1478_v36  ;;  %v10160_v21 = vmax.bf16 %v3587_v30, %v3539_v26 }
 0x1e4   : > { %v8096_v14 = vcombine.low %v2742_v10, %v2743_v41  ;;  %v3308_v9 = vrot.slane %v2743_v41, 7  ;;  %v1814_v22 = vshrl.u32 %v10150_v20, 16  ;;  %v1817_v35 = vshll.u32 %v10150_v20, 16 }
 0x1e5   : > { %v3307_v11 = vrot.slane %v3306_v49, 4  ;;  %v1823_v55 = vshll.u32 %v10156_v29, 16  ;;  %v1827_v12 = vshrl.u32 %v10156_v29, 16  ;;  %v1833_v3 = vshll.u32 %v10158_v56, 16  ;;  %3418 = vst.msk [vmem:[#allocation2 + $0x78] sm:$0xe] %vm1110_vm7, %v3306_v49 }
 0x1e6   : > { %8536 = vmatprep.mubr.msk.bf16.mxu0 %vm2840_vm10, %v8096_v14  ;;  %v3310_v23 = vrot.slane %v3308_v9, 4  ;;  %v1816_v51 = vrot.slane %v1814_v22, 4  ;;  %v1819_v19 = vrot.slane %v1817_v35, 5  ;;  %v8064_v60 = vrot.slane %v10150_v20, 9 }
 0x1e7   : > { %v3309_v47 = vsel %vm9358_vm9, %v3307_v11, %v3308_v9  ;;  %v1825_v7 = vrot.slane %v1823_v55, 5  ;;  %v1829_v2 = vrot.slane %v1827_v12, 4  ;;  %v1835_v38 = vrot.slane %v1833_v3, 5 }
 0x1e8   : > { %3419 = vst.msk [vmem:[#allocation2 + $0x7c] sm:$0xf] %vm841_vm3, %v3309_v47  ;;  %v1820_v42 = vor.u32 %v1819_v19, %v1816_v51  ;;  %v2161_v40 = vrot.slane %v10156_v29, 5  ;;  %v2164_v28 = vrot.slane %v10158_v56, 5  ;;  %v2410_v59 = vrot.slane %v1814_v22, 5 }
 0x1e9   : > { %3420 = vst.msk [vmem:[#allocation2 + $0x80] sm:$0x1] %vm856_vm2, %v3310_v23  ;;  %v1830_v18 = vor.u32 %v1829_v2, %v1825_v7  ;;  %v2411_v63 = vrot.slane %v1817_v35, 6  ;;  %v2414_v31 = vrot.slane %v1827_v12, 5  ;;  %v2415_v46 = vrot.slane %v1823_v55, 6 }
 0x1ea   : > { %v1821_v30 = vrot.slane %v1820_v42, 4  ;;  %v2162_v10 = vsel %vm9686_vm8, %v8064_v60, %v2161_v40  ;;  %v2163_v48 = vrot.slane %v2161_v40, 4  ;;  %v2419_v36 = vshrl.u32 %v10158_v56, 16  ;;  %v3588_v22 = vld [vmem:[#allocation2 + $0x20] sm:$0x3] }
 0x1eb   : > { %v1831_v5 = vrot.slane %v1830_v18, 4  ;;  %v2412_v26 = vor.u32 %v2411_v63, %v2410_v59  ;;  %v2416_v41 = vor.u32 %v2415_v46, %v2414_v31  ;;  %v2422_v15 = vrot.slane %v1833_v3, 6  ;;  %v3682_v35 = vld [vmem:[#allocation2 + $0x24] sm:$0xf]  ;;  %v3683_v51 = vld [vmem:[#allocation2 + $0x28] sm:$0xf] }
 0x1ec   : > { %v1826_v27 = vsel %vm9631_vm15, %v1821_v30, %v1825_v7  ;;  %v2165_v49 = vsel %vm9686_vm8, %v2163_v48, %v2164_v28  ;;  %v2421_v14 = vrot.slane %v2419_v36, 5  ;;  %v8080_v9 = vrot.slane %v10150_v20, 10  ;;  %v3684_v7 = vld [vmem:[#allocation2 + $0x2c] sm:$0x3]  ;;  %v3778_v2 = vld [vmem:[#allocation2 + $0x30] sm:$0xf] }
 0x1ed   : > { %v1836_v11 = vsel %vm9631_vm15, %v1831_v5, %v1835_v38  ;;  %v2031_v55 = vmax.bf16 %v1826_v27, %v10150_v20  ;;  %v2413_v12 = vrot.slane %v2412_v26, 4  ;;  %v2418_v23 = vrot.slane %v2416_v41, 4  ;;  %v10196_v42 = vld [vmem:[#allocation2 + $0x88] sm:$0xf]  ;;  %v10204_v59 = vld [vmem:[#allocation2 + $0x84] sm:$0xf] }
 0x1ee   : > { %v2032_v3 = vmax.bf16 %v1836_v11, %v10156_v29  ;;  %v2423_v19 = vor.u32 %v2422_v15, %v2421_v14  ;;  %v2647_v60 = vrot.slane %v10156_v29, 6  ;;  %v2650_v47 = vrot.slane %v10158_v56, 6  ;;  %v3779_v31 = vld [vmem:[#allocation2 + $0x34] sm:$0xf]  ;;  %v3780_v46 = vld [vmem:[#allocation2 + $0x38] sm:$0x3] }
 0x1ef   : > { %v2258_v40 = vmax.bf16 %v2162_v10, %v2031_v55  ;;  %v2417_v38 = vsel %vm9732_vm11, %v2413_v12, %v2416_v41  ;;  %v3636_v20 = vmax.bf16 %v3588_v22, %v3540_v1  ;;  %v3730_v28 = vmax.bf16 %v3682_v35, %v10154_v61 }
 0x1f0   : > { %v2259_v18 = vmax.bf16 %v2165_v49, %v2032_v3  ;;  %v2424_v29 = vsel %vm9732_vm11, %v2418_v23, %v2423_v19  ;;  %v2648_v56 = vsel %vm9739_vm12, %v8080_v9, %v2647_v60  ;;  %v2649_v63 = vrot.slane %v2647_v60, 4  ;;  %v10226_v3 = vld [vmem:[#allocation2 + $0x84] sm:$0xf] }
 0x1f1   : > { %v2565_v30 = vmax.bf16 %v2417_v38, %v2258_v40  ;;  %v3731_v10 = vmax.bf16 %v3683_v51, %v10160_v21  ;;  %v3732_v48 = vmax.bf16 %v3684_v7, %v3636_v20  ;;  %v10211_v13 = vmax.bf16 %v3778_v2, %v3730_v28  ;;  %v10229_v2 = vld [vmem:[#allocation2 + $0x88] sm:$0xf] }
 0x1f2   : > { %v2566_v16 = vmax.bf16 %v2424_v29, %v2259_v18  ;;  %v2651_v1 = vsel %vm9739_vm12, %v2649_v63, %v2650_v47  ;;  %v1286_v61 = vmax.bf16 %v10204_v59, %v10164_v58  ;;  %v1287_v36 = vmax.bf16 %v10196_v42, %v10170_v62 }
 0x1f3   : > { %v2744_v5 = vmax.bf16 %v2648_v56, %v2565_v30  ;;  %v3827_v26 = vmax.bf16 %v3779_v31, %v3731_v10  ;;  %v10219_v41 = vmax.bf16 %v3780_v46, %v3732_v48  ;;  %v3875_v15 = vshrl.u32 %v10211_v13, 16  ;;  %v1240_v31 = vld [vmem:[#allocation2 + $0x8c] sm:$0x3] }
 0x1f4   : > { %v2745_v21 = vmax.bf16 %v2651_v1, %v2566_v16  ;;  %v3878_v27 = vshll.u32 %v10211_v13, 16  ;;  %v8136_v49 = vrot.slane %v10211_v13, 9  ;;  %v8152_v14 = vrot.slane %v10211_v13, 10  ;;  %v10237_v46 = vld [vmem:[#allocation2 + $0x8c] sm:$0x3] }
 0x1f5   : > { %v3311_v9 = vrot.slane %v2744_v5, 7  ;;  %v3877_v22 = vrot.slane %v3875_v15, 4  ;;  %v3884_v35 = vshll.u32 %v3827_v26, 16  ;;  %v3888_v11 = vshrl.u32 %v3827_v26, 16 }
 0x1f6   : > { %v8097_v55 = vcombine.low %v2744_v5, %v2745_v21  ;;  %v3313_v12 = vrot.slane %v2745_v21, 7  ;;  %v3880_v23 = vrot.slane %v3878_v27, 5  ;;  %v3894_v51 = vshll.u32 %v10219_v41, 16 }
 0x1f7   : > { %v3312_v19 = vrot.slane %v3311_v9, 4  ;;  %v3886_v60 = vrot.slane %v3884_v35, 5  ;;  %v3890_v47 = vrot.slane %v3888_v11, 4  ;;  %v4372_v7 = vrot.slane %v3827_v26, 5  ;;  %3421 = vst.msk [vmem:[#allocation2 + $0x84] sm:$0xe] %vm1110_vm7, %v3311_v9 }
 0x1f8   : > { %8537 = vmatmul.mubr.msk.bf16.gmra.mrb[48].mxu0 %vm2840_vm10, %v8097_v55  ;;  %v3315_v40 = vrot.slane %v3313_v12, 4  ;;  %v3881_v38 = vor.u32 %v3880_v23, %v3877_v22  ;;  %v3896_v20 = vrot.slane %v3894_v51, 5  ;;  %v4375_v28 = vrot.slane %v10219_v41, 5 }
 0x1f9   : > { %v3314_v18 = vsel %vm9358_vm9, %v3312_v19, %v3313_v12  ;;  %v3891_v29 = vor.u32 %v3890_v47, %v3886_v60  ;;  %v4373_v56 = vsel %vm9686_vm8, %v8136_v49, %v4372_v7  ;;  %v4374_v63 = vrot.slane %v4372_v7, 4  ;;  %v1334_v19 = vld [vmem:[#allocation2 + $0x90] sm:$0xf]  ;;  %v3445_v47 = vld [vmem:[#allocation2 + $0xc] sm:$0xf] }
 0x1fa   : > { %3422 = vst.msk [vmem:[#allocation2 + $0x88] sm:$0xf] %vm841_vm3, %v3314_v18  ;;  %v3882_v30 = vrot.slane %v3881_v38, 4  ;;  %v4546_v10 = vrot.slane %v3875_v15, 5  ;;  %v4547_v48 = vrot.slane %v3878_v27, 6  ;;  %v4550_v16 = vrot.slane %v3888_v11, 5 }
 0x1fb   : > { %3423 = vst.msk [vmem:[#allocation2 + $0x8c] sm:$0x1] %vm856_vm2, %v3315_v40  ;;  %v3892_v1 = vrot.slane %v3891_v29, 4  ;;  %v4376_v5 = vsel %vm9686_vm8, %v4374_v63, %v4375_v28  ;;  %v4551_v21 = vrot.slane %v3884_v35, 6  ;;  %v4555_v9 = vshrl.u32 %v10219_v41, 16 }
 0x1fc   : > { %v3887_v49 = vsel %vm9631_vm15, %v3882_v30, %v3886_v60  ;;  %v4548_v22 = vor.u32 %v4547_v48, %v4546_v10  ;;  %v4558_v55 = vrot.slane %v3894_v51, 6  ;;  %v4852_v12 = vrot.slane %v3827_v26, 6  ;;  %v1335_v28 = vld [vmem:[#allocation2 + $0x94] sm:$0xf]  ;;  %v3493_v60 = vld [vmem:[#allocation2 + $0x18] sm:$0xf] }
 0x1fd   : > { %v3897_v15 = vsel %vm9631_vm15, %v3892_v1, %v3896_v20  ;;  %v4290_v27 = vmax.bf16 %v3887_v49, %v10211_v13  ;;  %v4552_v11 = vor.u32 %v4551_v21, %v4550_v16  ;;  %v4557_v23 = vrot.slane %v4555_v9, 5  ;;  %v1336_v20 = vld [vmem:[#allocation2 + $0x98] sm:$0x3]  ;;  %v1431_v30 = vld [vmem:[#allocation2 + $0x9c] sm:$0xf] }
 0x1fe   : > { %v4291_v7 = vmax.bf16 %v3897_v15, %v3827_v26  ;;  %v4549_v40 = vrot.slane %v4548_v22, 4  ;;  %v4853_v35 = vsel %vm9739_vm12, %v8152_v14, %v4852_v12  ;;  %v4854_v38 = vrot.slane %v4852_v12, 4  ;;  %v3446_v13 = vld [vmem:[#allocation2 + $0x10] sm:$0xf]  ;;  %v3447_v16 = vld [vmem:[#allocation2 + $0x14] sm:$0x3] }
 0x1ff   : > { %v4514_v18 = vmax.bf16 %v4373_v56, %v4290_v27  ;;  %v4554_v51 = vrot.slane %v4552_v11, 4  ;;  %v4559_v29 = vor.u32 %v4558_v55, %v4557_v23  ;;  %v4855_v63 = vrot.slane %v10219_v41, 6  ;;  %v3494_v1 = vld [vmem:[#allocation2 + $0x1c] sm:$0xf]  ;;  %v3495_v56 = vld [vmem:[#allocation2 + $0x20] sm:$0x3] }
 0x200   : > { %v4515_v10 = vmax.bf16 %v4376_v5, %v4291_v7  ;;  %v4553_v48 = vsel %vm9732_vm11, %v4549_v40, %v4552_v11  ;;  %v1288_v26 = vmax.bf16 %v1240_v31, %v10176_v34  ;;  %v1382_v14 = vmax.bf16 %v1334_v19, %v1286_v61  ;;  %v1432_v49 = vld [vmem:[#allocation2 + $0xa0] sm:$0xf]  ;;  %v1528_v34 = vld [vmem:[#allocation2 + $0xa8] sm:$0xf]  ;;  %v3589_v31 = vld [vmem:[#allocation2 + $0x24] sm:$0xf] }
 0x201   : > { %v4560_v21 = vsel %vm9732_vm11, %v4554_v51, %v4559_v29  ;;  %v4818_v41 = vmax.bf16 %v4553_v48, %v4514_v18  ;;  %v4856_v9 = vsel %vm9739_vm12, %v4854_v38, %v4855_v63  ;;  %v1383_v5 = vmax.bf16 %v1335_v28, %v1287_v36  ;;  %v1529_v61 = vld [vmem:[#allocation2 + $0xac] sm:$0xf]  ;;  %v3590_v12 = vld [vmem:[#allocation2 + $0x28] sm:$0xf]  ;;  %v1433_v11 = vld [vmem:[#allocation2 + $0xa4] sm:$0x3] }
 0x202   : > { %v4819_v22 = vmax.bf16 %v4560_v21, %v4515_v10  ;;  %v1384_v58 = vmax.bf16 %v1336_v20, %v1288_v26  ;;  %v1479_v59 = vmax.bf16 %v1431_v30, %v1382_v14  ;;  %v3541_v55 = vmax.bf16 %v3493_v60, %v3445_v47  ;;  %v3591_v15 = vld [vmem:[#allocation2 + $0x2c] sm:$0x3]  ;;  %v1530_v19 = vld [vmem:[#allocation2 + $0xb0] sm:$0x3]  ;;  %v10276_v20 = vld [vmem:[#allocation2 + $0x18] sm:$0xf] }
 0x203   : > { %v4994_v27 = vmax.bf16 %v4853_v35, %v4818_v41  ;;  %v1480_v23 = vmax.bf16 %v1432_v49, %v1383_v5  ;;  %v3542_v7 = vmax.bf16 %v3494_v1, %v3446_v13  ;;  %v3543_v40 = vmax.bf16 %v3495_v56, %v3447_v16  ;;  %v10283_v56 = vld [vmem:[#allocation2 + $0x1c] sm:$0xf]  ;;  %v10287_v49 = vld [vmem:[#allocation2 + $0x20] sm:$0x3] }
 0x204   : > { %v4995_v38 = vmax.bf16 %v4856_v9, %v4819_v22  ;;  %v1481_v18 = vmax.bf16 %v1433_v11, %v1384_v58  ;;  %v10265_v62 = vmax.bf16 %v1528_v34, %v1479_v59  ;;  %v10267_v42 = vmax.bf16 %v3589_v31, %v3541_v55 }
 0x205   : > { %v5352_v36 = vrot.slane %v4994_v27, 7  ;;  %v1577_v28 = vmax.bf16 %v1529_v61, %v1480_v23  ;;  %v10269_v51 = vmax.bf16 %v3590_v12, %v3542_v7  ;;  %v10271_v29 = vmax.bf16 %v3591_v15, %v3543_v40 }
 0x206   : > { %v8169_v47 = vcombine.low %v4994_v27, %v4995_v38  ;;  %v5354_v60 = vrot.slane %v4995_v38, 7  ;;  %v10273_v35 = vmax.bf16 %v1530_v19, %v1481_v18  ;;  %v1838_v63 = vshrl.u32 %v10265_v62, 16 }
 0x207   : > { %v5353_v30 = vrot.slane %v5352_v36, 4  ;;  %v1841_v13 = vshll.u32 %v10265_v62, 16  ;;  %v1847_v10 = vshll.u32 %v1577_v28, 16  ;;  %v1851_v48 = vshrl.u32 %v1577_v28, 16  ;;  %5480 = vst.msk [vmem:[#allocation2 + $0x18] sm:$0xe] %vm1110_vm7, %v5352_v36 }
 0x208   : > { %8588 = vmatprep.mubr.msk.bf16.mxu1 %vm2840_vm10, %v8169_v47  ;;  %v5356_v26 = vrot.slane %v5354_v60, 4  ;;  %v1840_v14 = vrot.slane %v1838_v63, 4  ;;  %v1857_v16 = vshll.u32 %v10273_v35, 16  ;;  %v8065_v1 = vrot.slane %v10265_v62, 9 }
 0x209   : > { %v5355_v21 = vsel %vm9358_vm9, %v5353_v30, %v5354_v60  ;;  %v1843_v41 = vrot.slane %v1841_v13, 5  ;;  %v1849_v9 = vrot.slane %v1847_v10, 5  ;;  %v1853_v5 = vrot.slane %v1851_v48, 4 }
 0x20a   : > { %v1859_v34 = vrot.slane %v1857_v16, 5  ;;  %v2168_v31 = vrot.slane %v1577_v28, 5  ;;  %v2171_v22 = vrot.slane %v10273_v35, 5  ;;  %v2425_v58 = vrot.slane %v1838_v63, 5  ;;  %5481 = vst.msk [vmem:[#allocation2 + $0x1c] sm:$0xf] %vm841_vm3, %v5355_v21 }
 0x20b   : > { %5482 = vst.msk [vmem:[#allocation2 + $0x20] sm:$0x1] %vm856_vm2, %v5356_v26  ;;  %v1844_v59 = vor.u32 %v1843_v41, %v1840_v14  ;;  %v1854_v61 = vor.u32 %v1853_v5, %v1849_v9  ;;  %v2426_v55 = vrot.slane %v1841_v13, 6  ;;  %v2429_v12 = vrot.slane %v1851_v48, 5  ;;  %v3685_v48 = vld [vmem:[#allocation2 + $0x30] sm:$0xf] }
 0x20c   : > { %v2169_v15 = vsel %vm9686_vm8, %v8065_v1, %v2168_v31  ;;  %v2170_v27 = vrot.slane %v2168_v31, 4  ;;  %v2430_v11 = vrot.slane %v1847_v10, 6  ;;  %v2434_v23 = vshrl.u32 %v10273_v35, 16  ;;  %v10302_v26 = vld [vmem:[#allocation2 + $0x94] sm:$0xf] }
 0x20d   : > { %v1845_v19 = vrot.slane %v1844_v59, 4  ;;  %v1855_v7 = vrot.slane %v1854_v61, 4  ;;  %v2427_v40 = vor.u32 %v2426_v55, %v2425_v58  ;;  %v2437_v38 = vrot.slane %v1857_v16, 6  ;;  %v3686_v41 = vld [vmem:[#allocation2 + $0x34] sm:$0xf] }
 0x20e   : > { %v2172_v18 = vsel %vm9686_vm8, %v2170_v27, %v2171_v22  ;;  %v2431_v36 = vor.u32 %v2430_v11, %v2429_v12  ;;  %v2436_v47 = vrot.slane %v2434_v23, 5  ;;  %v8081_v60 = vrot.slane %v10265_v62, 10  ;;  %v3687_v5 = vld [vmem:[#allocation2 + $0x38] sm:$0x3]  ;;  %v3781_v58 = vld [vmem:[#allocation2 + $0x3c] sm:$0xf] }
 0x20f   : > { %v1850_v63 = vsel %vm9631_vm15, %v1845_v19, %v1849_v9  ;;  %v1860_v30 = vsel %vm9631_vm15, %v1855_v7, %v1859_v34  ;;  %v2428_v13 = vrot.slane %v2427_v40, 4  ;;  %v2654_v10 = vrot.slane %v1577_v28, 6  ;;  %v10310_v59 = vld [vmem:[#allocation2 + $0x90] sm:$0xf]  ;;  %v3782_v12 = vld [vmem:[#allocation2 + $0x40] sm:$0xf] }
 0x210   : > { %v2033_v14 = vmax.bf16 %v1850_v63, %v10265_v62  ;;  %v2034_v16 = vmax.bf16 %v1860_v30, %v1577_v28  ;;  %v2433_v1 = vrot.slane %v2431_v36, 4  ;;  %v2438_v21 = vor.u32 %v2437_v38, %v2436_v47  ;;  %v3783_v27 = vld [vmem:[#allocation2 + $0x44] sm:$0x3]  ;;  %v10315_v11 = vld [vmem:[#allocation2 + $0x98] sm:$0x3] }
 0x211   : > { %v2432_v31 = vsel %vm9732_vm11, %v2428_v13, %v2431_v36  ;;  %v2655_v9 = vsel %vm9739_vm12, %v8081_v60, %v2654_v10  ;;  %v2656_v22 = vrot.slane %v2654_v10, 4  ;;  %v2657_v34 = vrot.slane %v10273_v35, 6 }
 0x212   : > { %v2260_v61 = vmax.bf16 %v2169_v15, %v2033_v14  ;;  %v2261_v55 = vmax.bf16 %v2172_v18, %v2034_v16  ;;  %v2439_v62 = vsel %vm9732_vm11, %v2433_v1, %v2438_v21  ;;  %v3733_v28 = vmax.bf16 %v3685_v48, %v10267_v42  ;;  %v9055_v15 = vld [vmem:[%s12490_s3 + $0x3] sm:$0x1] }
 0x213   : > { %v2658_v23 = vsel %vm9739_vm12, %v2656_v22, %v2657_v34  ;;  %v3734_v19 = vmax.bf16 %v3686_v41, %v10269_v51  ;;  %v3735_v35 = vmax.bf16 %v3687_v5, %v10271_v29  ;;  %v10325_v7 = vsel %vm978_vm6, %v9055_v15, 0  ;;  %v10345_v34 = vld [vmem:[#allocation2 + $0x90] sm:$0xf] }
 0x214   : > { %v2567_v40 = vmax.bf16 %v2432_v31, %v2260_v61  ;;  %v2568_v42 = vmax.bf16 %v2439_v62, %v2261_v55  ;;  %v10327_v38 = vmax.bf16 %v3781_v58, %v3733_v28  ;;  %v1289_v18 = vmax.bf16 %v10310_v59, %v10226_v3 }
 0x215   : > { %v10331_v36 = vmax.bf16 %v3782_v12, %v3734_v19  ;;  %v10333_v47 = vmax.bf16 %v3783_v27, %v3735_v35  ;;  %v1290_v51 = vmax.bf16 %v10302_v26, %v10229_v2  ;;  %v1291_v29 = vmax.bf16 %v10315_v11, %v10237_v46  ;;  %v10353_v19 = vld [vmem:[#allocation2 + $0x94] sm:$0xf] }
 0x216   : > { %v2746_v60 = vmax.bf16 %v2655_v9, %v2567_v40  ;;  %v2747_v63 = vmax.bf16 %v2658_v23, %v2568_v42  ;;  %v3899_v30 = vshrl.u32 %v10327_v38, 16  ;;  %v3902_v13 = vshll.u32 %v10327_v38, 16  ;;  %v10351_v23 = vld [vmem:[#allocation2 + $0x98] sm:$0x3]  ;;  %v1531_v11 = vld [vmem:[#allocation2 + $0xb4] sm:$0xf] }
 0x217   : > { %v3908_v10 = vshll.u32 %v10331_v36, 16  ;;  %v3912_v3 = vshrl.u32 %v10331_v36, 16  ;;  %v3918_v48 = vshll.u32 %v10333_v47, 16  ;;  %v8137_v14 = vrot.slane %v10327_v38, 9 }
 0x218   : > { %v8098_v16 = vcombine.low %v2746_v60, %v2747_v63  ;;  %v3316_v1 = vrot.slane %v2746_v60, 7  ;;  %v3318_v21 = vrot.slane %v2747_v63, 7  ;;  %v3901_v41 = vrot.slane %v3899_v30, 4 }
 0x219   : > { %v3904_v5 = vrot.slane %v3902_v13, 5  ;;  %v3910_v31 = vrot.slane %v3908_v10, 5  ;;  %v3914_v9 = vrot.slane %v3912_v3, 4  ;;  %v3920_v22 = vrot.slane %v3918_v48, 5 }
 0x21a   : > { %8540 = vmatprep.mubr.msk.bf16.mxu0 %vm2840_vm10, %v8098_v16  ;;  %v3317_v58 = vrot.slane %v3316_v1, 4  ;;  %v3320_v59 = vrot.slane %v3318_v21, 4  ;;  %v4379_v61 = vrot.slane %v10331_v36, 5  ;;  %v4382_v55 = vrot.slane %v10333_v47, 5  ;;  %3424 = vst.msk [vmem:[#allocation2 + $0x90] sm:$0xe] %vm1110_vm7, %v3316_v1 }
 0x21b   : > { %v3905_v62 = vor.u32 %v3904_v5, %v3901_v41  ;;  %v3915_v28 = vor.u32 %v3914_v9, %v3910_v31  ;;  %v4561_v12 = vrot.slane %v3899_v30, 5  ;;  %v4562_v27 = vrot.slane %v3902_v13, 6 }
 0x21c   : > { %v3319_v35 = vsel %vm9358_vm9, %v3317_v58, %v3318_v21  ;;  %v4380_v15 = vsel %vm9686_vm8, %v8137_v14, %v4379_v61  ;;  %v4381_v40 = vrot.slane %v4379_v61, 4  ;;  %v4565_v42 = vrot.slane %v3912_v3, 5  ;;  %3426 = vst.msk [vmem:[#allocation2 + $0x98] sm:$0x1] %vm856_vm2, %v3320_v59  ;;  %v1337_v58 = vld [vmem:[#allocation2 + $0x9c] sm:$0xf] }
 0x21d   : > { %3425 = vst.msk [vmem:[#allocation2 + $0x94] sm:$0xf] %vm841_vm3, %v3319_v35  ;;  %v3906_v60 = vrot.slane %v3905_v62, 4  ;;  %v3916_v63 = vrot.slane %v3915_v28, 4  ;;  %v4563_v30 = vor.u32 %v4562_v27, %v4561_v12  ;;  %v4566_v13 = vrot.slane %v3908_v10, 6 }
 0x21e   : > { %v4383_v16 = vsel %vm9686_vm8, %v4381_v40, %v4382_v55  ;;  %v4570_v1 = vshrl.u32 %v10333_v47, 16  ;;  %v4573_v41 = vrot.slane %v3918_v48, 6  ;;  %v8153_v21 = vrot.slane %v10327_v38, 10  ;;  %v1338_v62 = vld [vmem:[#allocation2 + $0xa0] sm:$0xf] }
 0x21f   : > { %v3911_v14 = vsel %vm9631_vm15, %v3906_v60, %v3910_v31  ;;  %v3921_v3 = vsel %vm9631_vm15, %v3916_v63, %v3920_v22  ;;  %v4564_v5 = vrot.slane %v4563_v30, 4  ;;  %v4567_v9 = vor.u32 %v4566_v13, %v4565_v42  ;;  %v1434_v48 = vld [vmem:[#allocation2 + $0xa8] sm:$0xf]  ;;  %v3496_v22 = vld [vmem:[#allocation2 + $0x24] sm:$0xf] }
 0x220   : > { %v4292_v59 = vmax.bf16 %v3911_v14, %v10327_v38  ;;  %v4293_v10 = vmax.bf16 %v3921_v3, %v10331_v36  ;;  %v4572_v61 = vrot.slane %v4570_v1, 5  ;;  %v4859_v55 = vrot.slane %v10331_v36, 6  ;;  %v3497_v35 = vld [vmem:[#allocation2 + $0x28] sm:$0xf]  ;;  %v1339_v63 = vld [vmem:[#allocation2 + $0xa4] sm:$0x3] }
 0x221   : > { %v4568_v28 = vsel %vm9732_vm11, %v4564_v5, %v4567_v9  ;;  %v4569_v12 = vrot.slane %v4567_v9, 4  ;;  %v4862_v31 = vrot.slane %v10333_v47, 6  ;;  %v1385_v27 = vmax.bf16 %v1337_v58, %v1289_v18  ;;  %v1435_v30 = vld [vmem:[#allocation2 + $0xac] sm:$0xf]  ;;  %v1436_v36 = vld [vmem:[#allocation2 + $0xb0] sm:$0x3] }
 0x222   : > { %v4516_v40 = vmax.bf16 %v4380_v15, %v4292_v59  ;;  %v4517_v42 = vmax.bf16 %v4383_v16, %v4293_v10  ;;  %v4574_v60 = vor.u32 %v4573_v41, %v4572_v61  ;;  %v4860_v38 = vsel %vm9739_vm12, %v8153_v21, %v4859_v55  ;;  %v10383_v14 = vld [vmem:[#allocation2 + $0x2c] sm:$0x3]  ;;  %v3592_v15 = vld [vmem:[#allocation2 + $0x30] sm:$0xf]  ;;  %v3593_v5 = vld [vmem:[#allocation2 + $0x34] sm:$0xf] }
 0x223   : > { %v4861_v13 = vrot.slane %v4859_v55, 4  ;;  %v1386_v1 = vmax.bf16 %v1338_v62, %v1290_v51  ;;  %v1387_v18 = vmax.bf16 %v1339_v63, %v1291_v29  ;;  %v1482_v47 = vmax.bf16 %v1434_v48, %v1385_v27  ;;  %v1532_v29 = vld [vmem:[#allocation2 + $0xb8] sm:$0xf]  ;;  %v1533_v58 = vld [vmem:[#allocation2 + $0xbc] sm:$0x3] }
 0x224   : > { %v4575_v16 = vsel %vm9732_vm11, %v4569_v12, %v4574_v60  ;;  %v4820_v41 = vmax.bf16 %v4568_v28, %v4516_v40  ;;  %v3544_v21 = vmax.bf16 %v3496_v22, %v10276_v20  ;;  %v3545_v3 = vmax.bf16 %v3497_v35, %v10283_v56 }
 0x225   : > { %v4821_v9 = vmax.bf16 %v4575_v16, %v4517_v42  ;;  %v4863_v2 = vsel %vm9739_vm12, %v4861_v13, %v4862_v31  ;;  %v1483_v26 = vmax.bf16 %v1435_v30, %v1386_v1  ;;  %v1484_v46 = vmax.bf16 %v1436_v36, %v1387_v18  ;;  %v10408_v42 = vld [vmem:[#allocation2 + $0x24] sm:$0xf] }
 0x226   : > { %v4996_v51 = vmax.bf16 %v4860_v38, %v4820_v41  ;;  %v10391_v59 = vmax.bf16 %v1531_v11, %v1482_v47  ;;  %v3546_v10 = vmax.bf16 %v10383_v14, %v10287_v49  ;;  %v10395_v61 = vmax.bf16 %v3592_v15, %v3544_v21  ;;  %v10418_v21 = vld [vmem:[#allocation2 + $0x28] sm:$0xf] }
 0x227   : > { %v4997_v20 = vmax.bf16 %v4863_v2, %v4821_v9  ;;  %v10397_v56 = vmax.bf16 %v1532_v29, %v1483_v26  ;;  %v10399_v55 = vmax.bf16 %v1533_v58, %v1484_v46  ;;  %v10401_v62 = vmax.bf16 %v3593_v5, %v3545_v3  ;;  %v10420_v3 = vld [vmem:[#allocation2 + $0x2c] sm:$0x3] }
 0x228   : > { %v5357_v48 = vrot.slane %v4996_v51, 7  ;;  %v1862_v28 = vshrl.u32 %v10391_v59, 16  ;;  %v1865_v12 = vshll.u32 %v10391_v59, 16  ;;  %v8066_v31 = vrot.slane %v10391_v59, 9 }
 0x229   : > { %v8170_v27 = vcombine.low %v4996_v51, %v4997_v20  ;;  %v5359_v22 = vrot.slane %v4997_v20, 7  ;;  %v1871_v35 = vshll.u32 %v10397_v56, 16  ;;  %v1875_v40 = vshrl.u32 %v10397_v56, 16 }
 0x22a   : > { %v5358_v60 = vrot.slane %v5357_v48, 4  ;;  %v1864_v38 = vrot.slane %v1862_v28, 4  ;;  %v1867_v63 = vrot.slane %v1865_v12, 5  ;;  %v1881_v30 = vshll.u32 %v10399_v55, 16  ;;  %5483 = vst.msk [vmem:[#allocation2 + $0x24] sm:$0xe] %vm1110_vm7, %v5357_v48 }
 0x22b   : > { %8589 = vmatmul.mubr.msk.bf16.vlgmr.msra.gmra.mrb[16].mxu1 %vm2840_vm10, %v8170_v27  ;;  %v5361_v36 = vrot.slane %v5359_v22, 4  ;;  %v1873_v13 = vrot.slane %v1871_v35, 5  ;;  %v1877_v1 = vrot.slane %v1875_v40, 4  ;;  %v2175_v18 = vrot.slane %v10397_v56, 5 }
 0x22c   : > { %v5360_v47 = vsel %vm9358_vm9, %v5358_v60, %v5359_v22  ;;  %8621 = vmatpush3.bf16.msra.mxu1 %v10325_v7  ;;  %v1868_v15 = vor.u32 %v1867_v63, %v1864_v38  ;;  %v1883_v16 = vrot.slane %v1881_v30, 5  ;;  %v2178_v41 = vrot.slane %v10399_v55, 5  ;;  %v3594_v60 = vld [vmem:[#allocation2 + $0x38] sm:$0x3]  ;;  %v3688_v63 = vld [vmem:[#allocation2 + $0x3c] sm:$0xf] }
 0x22d   : > { %v1878_v5 = vor.u32 %v1877_v1, %v1873_v13  ;;  %v2176_v9 = vsel %vm9686_vm8, %v8066_v31, %v2175_v18  ;;  %v2177_v2 = vrot.slane %v2175_v18, 4  ;;  %v2440_v26 = vrot.slane %v1862_v28, 5  ;;  %5484 = vst.msk [vmem:[#allocation2 + $0x28] sm:$0xf] %vm841_vm3, %v5360_v47  ;;  %v3689_v47 = vld [vmem:[#allocation2 + $0x40] sm:$0xf] }
 0x22e   : > { %5485 = vst.msk [vmem:[#allocation2 + $0x2c] sm:$0x1] %vm856_vm2, %v5361_v36  ;;  %v1869_v46 = vrot.slane %v1868_v15, 4  ;;  %v2441_v7 = vrot.slane %v1865_v12, 6  ;;  %v2444_v11 = vrot.slane %v1875_v40, 5  ;;  %v2445_v51 = vrot.slane %v1871_v35, 6 }
 0x22f   : > { %v1879_v29 = vrot.slane %v1878_v5, 4  ;;  %v2179_v58 = vsel %vm9686_vm8, %v2177_v2, %v2178_v41  ;;  %v2449_v20 = vshrl.u32 %v10399_v55, 16  ;;  %v2452_v48 = vrot.slane %v1881_v30, 6  ;;  %v10436_v36 = vld [vmem:[#allocation2 + $0x9c] sm:$0xf] }
 0x230   : > { %v1874_v31 = vsel %vm9631_vm15, %v1869_v46, %v1873_v13  ;;  %v2442_v27 = vor.u32 %v2441_v7, %v2440_v26  ;;  %v2446_v28 = vor.u32 %v2445_v51, %v2444_v11  ;;  %v8082_v22 = vrot.slane %v10391_v59, 10  ;;  %v3784_v2 = vld [vmem:[#allocation2 + $0x48] sm:$0xf]  ;;  %v10442_v26 = vld [vmem:[#allocation2 + $0xa0] sm:$0xf] }
 0x231   : > { %v1884_v12 = vsel %vm9631_vm15, %v1879_v29, %v1883_v16  ;;  %v2035_v35 = vmax.bf16 %v1874_v31, %v10391_v59  ;;  %v2451_v40 = vrot.slane %v2449_v20, 5  ;;  %v2661_v38 = vrot.slane %v10397_v56, 6  ;;  %v3690_v59 = vld [vmem:[#allocation2 + $0x44] sm:$0x3] }
 0x232   : > { %v2036_v30 = vmax.bf16 %v1884_v12, %v10397_v56  ;;  %v2443_v1 = vrot.slane %v2442_v27, 4  ;;  %v2448_v13 = vrot.slane %v2446_v28, 4  ;;  %v2664_v18 = vrot.slane %v10399_v55, 6  ;;  %v10450_v11 = vld [vmem:[#allocation2 + $0xa4] sm:$0x3] }
 0x233   : > { %v2262_v15 = vmax.bf16 %v2176_v9, %v2035_v35  ;;  %v2453_v41 = vor.u32 %v2452_v48, %v2451_v40  ;;  %v2662_v16 = vsel %vm9739_vm12, %v8082_v22, %v2661_v38  ;;  %v2663_v5 = vrot.slane %v2661_v38, 4  ;;  %v3785_v9 = vld [vmem:[#allocation2 + $0x4c] sm:$0xf]  ;;  %v3786_v48 = vld [vmem:[#allocation2 + $0x50] sm:$0x3] }
 0x234   : > { %v2263_v46 = vmax.bf16 %v2179_v58, %v2036_v30  ;;  %v2447_v7 = vsel %vm9732_vm11, %v2443_v1, %v2446_v28  ;;  %v3642_v56 = vmax.bf16 %v3594_v60, %v3546_v10  ;;  %v3736_v55 = vmax.bf16 %v3688_v63, %v10395_v61 }
 0x235   : > { %v2454_v51 = vsel %vm9732_vm11, %v2448_v13, %v2453_v41  ;;  %v2569_v29 = vmax.bf16 %v2447_v7, %v2262_v15  ;;  %v2665_v20 = vsel %vm9739_vm12, %v2663_v5, %v2664_v18  ;;  %v3737_v58 = vmax.bf16 %v3689_v47, %v10401_v62  ;;  %v10474_v15 = vld [vmem:[#allocation2 + $0x9c] sm:$0xf] }
 0x236   : > { %v2570_v31 = vmax.bf16 %v2454_v51, %v2263_v46  ;;  %v3738_v27 = vmax.bf16 %v3690_v59, %v3642_v56  ;;  %v10457_v28 = vmax.bf16 %v3784_v2, %v3736_v55  ;;  %v1292_v49 = vmax.bf16 %v10436_v36, %v10345_v34  ;;  %v10481_v55 = vld [vmem:[#allocation2 + $0xa0] sm:$0xf] }
 0x237   : > { %v2748_v14 = vmax.bf16 %v2662_v16, %v2569_v29  ;;  %v10461_v10 = vmax.bf16 %v3785_v9, %v3737_v58  ;;  %v1293_v61 = vmax.bf16 %v10442_v26, %v10353_v19  ;;  %v1294_v22 = vmax.bf16 %v10450_v11, %v10351_v23  ;;  %v10485_v58 = vld [vmem:[#allocation2 + $0xa4] sm:$0x3]  ;;  %v3596_v36 = vld [vmem:[#allocation2 + $0x40] sm:$0xf] }
 0x238   : > { %v2749_v60 = vmax.bf16 %v2665_v20, %v2570_v31  ;;  %v10467_v12 = vmax.bf16 %v3786_v48, %v3738_v27  ;;  %v3923_v62 = vshrl.u32 %v10457_v28, 16  ;;  %v3926_v35 = vshll.u32 %v10457_v28, 16 }
 0x239   : > { %v3321_v40 = vrot.slane %v2748_v14, 7  ;;  %v3932_v38 = vshll.u32 %v10461_v10, 16  ;;  %v3936_v63 = vshrl.u32 %v10461_v10, 16  ;;  %v8138_v30 = vrot.slane %v10457_v28, 9 }
 0x23a   : > { %v8099_v1 = vcombine.low %v2748_v14, %v2749_v60  ;;  %v3323_v13 = vrot.slane %v2749_v60, 7  ;;  %v3925_v18 = vrot.slane %v3923_v62, 4  ;;  %v3928_v47 = vrot.slane %v3926_v35, 5 }
 0x23b   : > { %v3322_v41 = vrot.slane %v3321_v40, 4  ;;  %v3934_v16 = vrot.slane %v3932_v38, 5  ;;  %v3938_v5 = vrot.slane %v3936_v63, 4  ;;  %v3942_v59 = vshll.u32 %v10467_v12, 16  ;;  %3427 = vst.msk [vmem:[#allocation2 + $0x9c] sm:$0xe] %vm1110_vm7, %v3321_v40 }
 0x23c   : > { %8541 = vmatmul.mubr.msk.bf16.gmra.mrb[52].mxu0 %vm2840_vm10, %v8099_v1  ;;  %v3325_v2 = vrot.slane %v3323_v13, 4  ;;  %v3929_v46 = vor.u32 %v3928_v47, %v3925_v18  ;;  %v4386_v7 = vrot.slane %v10461_v10, 5  ;;  %v4389_v56 = vrot.slane %v10467_v12, 5 }
 0x23d   : > { %v3324_v9 = vsel %vm9358_vm9, %v3322_v41, %v3323_v13  ;;  %v3939_v51 = vor.u32 %v3938_v5, %v3934_v16  ;;  %v3944_v29 = vrot.slane %v3942_v59, 5  ;;  %v4576_v20 = vrot.slane %v3923_v62, 5 }
 0x23e   : > { %3428 = vst.msk [vmem:[#allocation2 + $0xa0] sm:$0xf] %vm841_vm3, %v3324_v9  ;;  %v3930_v48 = vrot.slane %v3929_v46, 4  ;;  %v4387_v31 = vsel %vm9686_vm8, %v8138_v30, %v4386_v7  ;;  %v4388_v27 = vrot.slane %v4386_v7, 4  ;;  %v4577_v14 = vrot.slane %v3926_v35, 6 }
 0x23f   : > { %3429 = vst.msk [vmem:[#allocation2 + $0xa4] sm:$0x1] %vm856_vm2, %v3325_v2  ;;  %v3940_v60 = vrot.slane %v3939_v51, 4  ;;  %v4580_v40 = vrot.slane %v3936_v63, 5  ;;  %v4581_v1 = vrot.slane %v3932_v38, 6  ;;  %v4585_v13 = vshrl.u32 %v10467_v12, 16 }
 0x240   : > { %v3935_v62 = vsel %vm9631_vm15, %v3930_v48, %v3934_v16  ;;  %v4390_v18 = vsel %vm9686_vm8, %v4388_v27, %v4389_v56  ;;  %v4578_v47 = vor.u32 %v4577_v14, %v4576_v20  ;;  %v4588_v41 = vrot.slane %v3942_v59, 6  ;;  %v1340_v46 = vld [vmem:[#allocation2 + $0xa8] sm:$0xf]  ;;  %v1341_v9 = vld [vmem:[#allocation2 + $0xac] sm:$0xf] }
 0x241   : > { %v3945_v30 = vsel %vm9631_vm15, %v3940_v60, %v3944_v29  ;;  %v4294_v35 = vmax.bf16 %v3935_v62, %v10457_v28  ;;  %v4582_v5 = vor.u32 %v4581_v1, %v4580_v40  ;;  %v4587_v2 = vrot.slane %v4585_v13, 5  ;;  %v1342_v48 = vld [vmem:[#allocation2 + $0xb0] sm:$0x3]  ;;  %v1437_v1 = vld [vmem:[#allocation2 + $0xb4] sm:$0xf] }
 0x242   : > { %v4295_v38 = vmax.bf16 %v3945_v30, %v10461_v10  ;;  %v4579_v63 = vrot.slane %v4578_v47, 4  ;;  %v8154_v7 = vrot.slane %v10457_v28, 10  ;;  %v4866_v16 = vrot.slane %v10461_v10, 6  ;;  %v3499_v29 = vld [vmem:[#allocation2 + $0x30] sm:$0xf] }
 0x243   : > { %v4518_v51 = vmax.bf16 %v4387_v31, %v4294_v35  ;;  %v4584_v56 = vrot.slane %v4582_v5, 4  ;;  %v4589_v20 = vor.u32 %v4588_v41, %v4587_v2  ;;  %v4869_v59 = vrot.slane %v10467_v12, 6  ;;  %v3500_v28 = vld [vmem:[#allocation2 + $0x34] sm:$0xf]  ;;  %v1438_v62 = vld [vmem:[#allocation2 + $0xb8] sm:$0xf] }
 0x244   : > { %v4519_v27 = vmax.bf16 %v4390_v18, %v4295_v38  ;;  %v4583_v14 = vsel %vm9732_vm11, %v4579_v63, %v4582_v5  ;;  %v4867_v60 = vsel %vm9739_vm12, %v8154_v7, %v4866_v16  ;;  %v4868_v40 = vrot.slane %v4866_v16, 4  ;;  %v3501_v18 = vld [vmem:[#allocation2 + $0x38] sm:$0x3]  ;;  %v3595_v47 = vld [vmem:[#allocation2 + $0x3c] sm:$0xf] }
 0x245   : > { %v4590_v10 = vsel %vm9732_vm11, %v4584_v56, %v4589_v20  ;;  %v4822_v31 = vmax.bf16 %v4583_v14, %v4518_v51  ;;  %v1388_v12 = vmax.bf16 %v1340_v46, %v1292_v49  ;;  %v1389_v13 = vmax.bf16 %v1341_v9, %v1293_v61  ;;  %v1534_v5 = vld [vmem:[#allocation2 + $0xc0] sm:$0xf]  ;;  %v1535_v2 = vld [vmem:[#allocation2 + $0xc4] sm:$0xf]  ;;  %v1439_v46 = vld [vmem:[#allocation2 + $0xbc] sm:$0x3] }
 0x246   : > { %v4823_v41 = vmax.bf16 %v4590_v10, %v4519_v27  ;;  %v4870_v30 = vsel %vm9739_vm12, %v4868_v40, %v4869_v59  ;;  %v1390_v35 = vmax.bf16 %v1342_v48, %v1294_v22  ;;  %v3547_v34 = vmax.bf16 %v3499_v29, %v10408_v42  ;;  %v1536_v61 = vld [vmem:[#allocation2 + $0xc8] sm:$0x3]  ;;  %v3597_v63 = vld [vmem:[#allocation2 + $0x44] sm:$0x3]  ;;  %v10545_v10 = vld [vmem:[#allocation2 + $0x34] sm:$0xf] }
 0x247   : > { %v4998_v49 = vmax.bf16 %v4867_v60, %v4822_v31  ;;  %v1485_v19 = vmax.bf16 %v1437_v1, %v1388_v12  ;;  %v1486_v26 = vmax.bf16 %v1438_v62, %v1389_v13  ;;  %v3548_v38 = vmax.bf16 %v3500_v28, %v10418_v21  ;;  %v10535_v21 = vld [vmem:[#allocation2 + $0x30] sm:$0xf] }
 0x248   : > { %v4999_v7 = vmax.bf16 %v4870_v30, %v4823_v41  ;;  %v1487_v16 = vmax.bf16 %v1439_v46, %v1390_v35  ;;  %v3549_v9 = vmax.bf16 %v3501_v18, %v10420_v3  ;;  %v10523_v51 = vmax.bf16 %v3595_v47, %v3547_v34  ;;  %v10549_v18 = vld [vmem:[#allocation2 + $0x38] sm:$0x3] }
 0x249   : > { %v5362_v23 = vrot.slane %v4998_v49, 7  ;;  %v10525_v11 = vmax.bf16 %v1534_v5, %v1485_v19  ;;  %v10527_v22 = vmax.bf16 %v1535_v2, %v1486_v26  ;;  %v10529_v42 = vmax.bf16 %v3596_v36, %v3548_v38 }
 0x24a   : > { %v8171_v56 = vcombine.low %v4998_v49, %v4999_v7  ;;  %v5364_v20 = vrot.slane %v4999_v7, 7  ;;  %v10531_v59 = vmax.bf16 %v1536_v61, %v1487_v16  ;;  %v10533_v48 = vmax.bf16 %v3597_v63, %v3549_v9 }
 0x24b   : > { %v5363_v29 = vrot.slane %v5362_v23, 4  ;;  %v1886_v3 = vshrl.u32 %v10525_v11, 16  ;;  %v1889_v27 = vshll.u32 %v10525_v11, 16  ;;  %v1895_v14 = vshll.u32 %v10527_v22, 16  ;;  %5486 = vst.msk [vmem:[#allocation2 + $0x30] sm:$0xe] %vm1110_vm7, %v5362_v23 }
 0x24c   : > { %8592 = vmatprep.mubr.msk.bf16.mxu1 %vm2840_vm10, %v8171_v56  ;;  %v5366_v60 = vrot.slane %v5364_v20, 4  ;;  %v1899_v40 = vshrl.u32 %v10527_v22, 16  ;;  %v1905_v1 = vshll.u32 %v10531_v59, 16  ;;  %v8067_v28 = vrot.slane %v10525_v11, 9 }
 0x24d   : > { %v5365_v31 = vsel %vm9358_vm9, %v5363_v29, %v5364_v20  ;;  %v1888_v12 = vrot.slane %v1886_v3, 4  ;;  %v1891_v13 = vrot.slane %v1889_v27, 5  ;;  %v1897_v62 = vrot.slane %v1895_v14, 5  ;;  %v3691_v20 = vld [vmem:[#allocation2 + $0x48] sm:$0xf] }
 0x24e   : > { %v1901_v47 = vrot.slane %v1899_v40, 4  ;;  %v1907_v41 = vrot.slane %v1905_v1, 5  ;;  %v2182_v30 = vrot.slane %v10527_v22, 5  ;;  %v2185_v35 = vrot.slane %v10531_v59, 5  ;;  %5487 = vst.msk [vmem:[#allocation2 + $0x34] sm:$0xf] %vm841_vm3, %v5365_v31 }
 0x24f   : > { %5488 = vst.msk [vmem:[#allocation2 + $0x38] sm:$0x1] %vm856_vm2, %v5366_v60  ;;  %v1892_v5 = vor.u32 %v1891_v13, %v1888_v12  ;;  %v2455_v2 = vrot.slane %v1886_v3, 5  ;;  %v2456_v34 = vrot.slane %v1889_v27, 6  ;;  %v2459_v36 = vrot.slane %v1899_v40, 5 }
 0x250   : > { %v1902_v49 = vor.u32 %v1901_v47, %v1897_v62  ;;  %v2183_v46 = vsel %vm9686_vm8, %v8067_v28, %v2182_v30  ;;  %v2184_v19 = vrot.slane %v2182_v30, 4  ;;  %v2460_v26 = vrot.slane %v1895_v14, 6  ;;  %v3692_v60 = vld [vmem:[#allocation2 + $0x4c] sm:$0xf]  ;;  %v3693_v12 = vld [vmem:[#allocation2 + $0x50] sm:$0x3] }
 0x251   : > { %v1893_v61 = vrot.slane %v1892_v5, 4  ;;  %v2457_v38 = vor.u32 %v2456_v34, %v2455_v2  ;;  %v2464_v63 = vshrl.u32 %v10531_v59, 16  ;;  %v2467_v7 = vrot.slane %v1905_v1, 6  ;;  %v10568_v13 = vld [vmem:[#allocation2 + $0xa8] sm:$0xf] }
 0x252   : > { %v1903_v16 = vrot.slane %v1902_v49, 4  ;;  %v2186_v9 = vsel %vm9686_vm8, %v2184_v19, %v2185_v35  ;;  %v2461_v23 = vor.u32 %v2460_v26, %v2459_v36  ;;  %v8083_v56 = vrot.slane %v10525_v11, 10  ;;  %v10570_v47 = vld [vmem:[#allocation2 + $0xac] sm:$0xf]  ;;  %v3788_v2 = vld [vmem:[#allocation2 + $0x58] sm:$0xf] }
 0x253   : > { %v1898_v29 = vsel %vm9631_vm15, %v1893_v61, %v1897_v62  ;;  %v2458_v3 = vrot.slane %v2457_v38, 4  ;;  %v2466_v27 = vrot.slane %v2464_v63, 5  ;;  %v2668_v14 = vrot.slane %v10527_v22, 6  ;;  %v3789_v49 = vld [vmem:[#allocation2 + $0x5c] sm:$0x3] }
 0x254   : > { %v1908_v40 = vsel %vm9631_vm15, %v1903_v16, %v1907_v41  ;;  %v2037_v1 = vmax.bf16 %v1898_v29, %v10525_v11  ;;  %v2463_v28 = vrot.slane %v2461_v23, 4  ;;  %v2671_v31 = vrot.slane %v10531_v59, 6  ;;  %v3787_v41 = vld [vmem:[#allocation2 + $0x54] sm:$0xf]  ;;  %v10579_v19 = vld [vmem:[#allocation2 + $0xb0] sm:$0x3] }
 0x255   : > { %v2038_v62 = vmax.bf16 %v1908_v40, %v10527_v22  ;;  %v2462_v30 = vsel %vm9732_vm11, %v2458_v3, %v2461_v23  ;;  %v2468_v35 = vor.u32 %v2467_v7, %v2466_v27  ;;  %v2669_v5 = vsel %vm9739_vm12, %v8083_v56, %v2668_v14 }
 0x256   : > { %v2264_v11 = vmax.bf16 %v2183_v46, %v2037_v1  ;;  %v2670_v34 = vrot.slane %v2668_v14, 4  ;;  %v3739_v59 = vmax.bf16 %v3691_v20, %v10523_v51  ;;  %v3740_v36 = vmax.bf16 %v3692_v60, %v10529_v42 }
 0x257   : > { %v2265_v26 = vmax.bf16 %v2186_v9, %v2038_v62  ;;  %v2469_v22 = vsel %vm9732_vm11, %v2463_v28, %v2468_v35  ;;  %v3741_v61 = vmax.bf16 %v3693_v12, %v10533_v48  ;;  %v1295_v38 = vmax.bf16 %v10568_v13, %v10474_v15 }
 0x258   : > { %v2571_v63 = vmax.bf16 %v2462_v30, %v2264_v11  ;;  %v2672_v46 = vsel %vm9739_vm12, %v2670_v34, %v2671_v31  ;;  %v10588_v7 = vmax.bf16 %v3787_v41, %v3739_v59  ;;  %v10590_v51 = vmax.bf16 %v3788_v2, %v3740_v36 }
 0x259   : > { %v2572_v42 = vmax.bf16 %v2469_v22, %v2265_v26  ;;  %v10592_v16 = vmax.bf16 %v3789_v49, %v3741_v61  ;;  %v1296_v9 = vmax.bf16 %v10570_v47, %v10481_v55  ;;  %v1297_v48 = vmax.bf16 %v10579_v19, %v10485_v58  ;;  %v10610_v22 = vld [vmem:[#allocation2 + $0xac] sm:$0xf] }
 0x25a   : > { %v2750_v23 = vmax.bf16 %v2669_v5, %v2571_v63  ;;  %v3947_v56 = vshrl.u32 %v10588_v7, 16  ;;  %v3950_v20 = vshll.u32 %v10588_v7, 16  ;;  %v3956_v29 = vshll.u32 %v10590_v51, 16  ;;  %v10604_v5 = vld [vmem:[#allocation2 + $0xa8] sm:$0xf] }
 0x25b   : > { %v2751_v3 = vmax.bf16 %v2672_v46, %v2572_v42  ;;  %v3960_v27 = vshrl.u32 %v10590_v51, 16  ;;  %v3966_v14 = vshll.u32 %v10592_v16, 16  ;;  %v8139_v60 = vrot.slane %v10588_v7, 9  ;;  %v1537_v19 = vld [vmem:[#allocation2 + $0xcc] sm:$0xf] }
 0x25c   : > { %v3326_v40 = vrot.slane %v2750_v23, 7  ;;  %v3949_v1 = vrot.slane %v3947_v56, 4  ;;  %v3952_v28 = vrot.slane %v3950_v20, 5  ;;  %v3958_v31 = vrot.slane %v3956_v29, 5 }
 0x25d   : > { %v8100_v12 = vcombine.low %v2750_v23, %v2751_v3  ;;  %v3328_v62 = vrot.slane %v2751_v3, 7  ;;  %v3962_v30 = vrot.slane %v3960_v27, 4  ;;  %v3968_v35 = vrot.slane %v3966_v14, 5  ;;  %v10616_v23 = vld [vmem:[#allocation2 + $0xb0] sm:$0x3] }
 0x25e   : > { %v3327_v41 = vrot.slane %v3326_v40, 4  ;;  %v3953_v2 = vor.u32 %v3952_v28, %v3949_v1  ;;  %v4393_v11 = vrot.slane %v10590_v51, 5  ;;  %v4396_v34 = vrot.slane %v10592_v16, 5  ;;  %3430 = vst.msk [vmem:[#allocation2 + $0xa8] sm:$0xe] %vm1110_vm7, %v3326_v40 }
 0x25f   : > { %8544 = vmatprep.mubr.msk.bf16.mxu0 %vm2840_vm10, %v8100_v12  ;;  %v3330_v59 = vrot.slane %v3328_v62, 4  ;;  %v3963_v36 = vor.u32 %v3962_v30, %v3958_v31  ;;  %v4591_v49 = vrot.slane %v3947_v56, 5  ;;  %v4592_v26 = vrot.slane %v3950_v20, 6 }
 0x260   : > { %v3329_v61 = vsel %vm9358_vm9, %v3327_v41, %v3328_v62  ;;  %v3954_v63 = vrot.slane %v3953_v2, 4  ;;  %v4394_v46 = vsel %vm9686_vm8, %v8139_v60, %v4393_v11  ;;  %v4395_v42 = vrot.slane %v4393_v11, 4  ;;  %v1251_v62 = vld [vmem:[#allocation2 + $0xb8] sm:$0xf] }
 0x261   : > { %3431 = vst.msk [vmem:[#allocation2 + $0xac] sm:$0xf] %vm841_vm3, %v3329_v61  ;;  %v3964_v3 = vrot.slane %v3963_v36, 4  ;;  %v4593_v40 = vor.u32 %v4592_v26, %v4591_v49  ;;  %v4595_v1 = vrot.slane %v3960_v27, 5  ;;  %v4596_v28 = vrot.slane %v3956_v29, 6 }
 0x262   : > { %3432 = vst.msk [vmem:[#allocation2 + $0xb0] sm:$0x1] %vm856_vm2, %v3330_v59  ;;  %v3959_v56 = vsel %vm9631_vm15, %v3954_v63, %v3958_v31  ;;  %v4397_v20 = vsel %vm9686_vm8, %v4395_v42, %v4396_v34  ;;  %v4600_v12 = vshrl.u32 %v10592_v16, 16  ;;  %v4603_v60 = vrot.slane %v3966_v14, 6  ;;  %v1343_v36 = vld [vmem:[#allocation2 + $0xb4] sm:$0xf] }
 0x263   : > { %v3969_v30 = vsel %vm9631_vm15, %v3964_v3, %v3968_v35  ;;  %v4296_v41 = vmax.bf16 %v3959_v56, %v10588_v7  ;;  %v4594_v2 = vrot.slane %v4593_v40, 4  ;;  %v4597_v27 = vor.u32 %v4596_v28, %v4595_v1  ;;  %v1344_v34 = vld [vmem:[#allocation2 + $0xb8] sm:$0xf]  ;;  %v1345_v49 = vld [vmem:[#allocation2 + $0xbc] sm:$0x3] }
 0x264   : > { %v4297_v29 = vmax.bf16 %v3969_v30, %v10590_v51  ;;  %v4602_v11 = vrot.slane %v4600_v12, 5  ;;  %v8155_v59 = vrot.slane %v10588_v7, 10  ;;  %v4873_v31 = vrot.slane %v10590_v51, 6  ;;  %v1250_v63 = vld [vmem:[#allocation2 + $0xb4] sm:$0xf] }
 0x265   : > { %v4520_v26 = vmax.bf16 %v4394_v46, %v4296_v41  ;;  %v4598_v14 = vsel %vm9732_vm11, %v4594_v2, %v4597_v27  ;;  %v4599_v61 = vrot.slane %v4597_v27, 4  ;;  %v4876_v35 = vrot.slane %v10592_v16, 6  ;;  %v1252_v42 = vld [vmem:[#allocation2 + $0xbc] sm:$0x3]  ;;  %v1440_v28 = vld [vmem:[#allocation2 + $0xc0] sm:$0xf] }
 0x266   : > { %v4521_v3 = vmax.bf16 %v4397_v20, %v4297_v29  ;;  %v4604_v40 = vor.u32 %v4603_v60, %v4602_v11  ;;  %v4874_v1 = vsel %vm9739_vm12, %v8155_v59, %v4873_v31  ;;  %v4875_v7 = vrot.slane %v4873_v31, 4  ;;  %v1441_v51 = vld [vmem:[#allocation2 + $0xc4] sm:$0xf]  ;;  %v1442_v20 = vld [vmem:[#allocation2 + $0xc8] sm:$0x3] }
 0x267   : > { %v4824_v56 = vmax.bf16 %v4598_v14, %v4520_v26  ;;  %v1391_v46 = vmax.bf16 %v1343_v36, %v1295_v38  ;;  %v1392_v12 = vmax.bf16 %v1344_v34, %v1296_v9  ;;  %v1393_v16 = vmax.bf16 %v1345_v49, %v1297_v48  ;;  %v1346_v60 = vld [vmem:[#allocation2 + $0xc0] sm:$0xf]  ;;  %v1347_v30 = vld [vmem:[#allocation2 + $0xc4] sm:$0xf]  ;;  %v1348_v27 = vld [vmem:[#allocation2 + $0xc8] sm:$0x3] }
 0x268   : > { %v4605_v41 = vsel %vm9732_vm11, %v4599_v61, %v4604_v40  ;;  %v4877_v2 = vsel %vm9739_vm12, %v4875_v7, %v4876_v35  ;;  %v1298_v15 = vmax.bf16 %v1250_v63, %v10604_v5  ;;  %v1299_v13 = vmax.bf16 %v1251_v62, %v10610_v22  ;;  %v1538_v48 = vld [vmem:[#allocation2 + $0xd0] sm:$0xf]  ;;  %v1539_v29 = vld [vmem:[#allocation2 + $0xd4] sm:$0x3]  ;;  %v10660_v62 = vld [vmem:[#allocation2 + $0xcc] sm:$0xf] }
 0x269   : > { %v4825_v38 = vmax.bf16 %v4605_v41, %v4521_v3  ;;  %v5000_v55 = vmax.bf16 %v4874_v1, %v4824_v56  ;;  %v1488_v47 = vmax.bf16 %v1440_v28, %v1391_v46  ;;  %v1489_v9 = vmax.bf16 %v1441_v51, %v1392_v12  ;;  %v10662_v49 = vld [vmem:[#allocation2 + $0xd0] sm:$0xf]  ;;  %v10672_v35 = vld [vmem:[#allocation2 + $0x3c] sm:$0xf]  ;;  %v10677_v7 = vld [vmem:[#allocation2 + $0x40] sm:$0xf] }
 0x26a   : > { %v1490_v58 = vmax.bf16 %v1442_v20, %v1393_v16  ;;  %v1300_v11 = vmax.bf16 %v1252_v42, %v10616_v23  ;;  %v10652_v59 = vmax.bf16 %v1346_v60, %v1298_v15  ;;  %v10654_v31 = vmax.bf16 %v1347_v30, %v1299_v13  ;;  %v10674_v63 = vld [vmem:[#allocation2 + $0x3c] sm:$0xf]  ;;  %v10684_v12 = vld [vmem:[#allocation2 + $0x44] sm:$0x3]  ;;  %v10690_v41 = vld [vmem:[#allocation2 + $0x40] sm:$0xf] }
 0x26b   : > { %v5001_v36 = vmax.bf16 %v4877_v2, %v4825_v38  ;;  %v5367_v34 = vrot.slane %v5000_v55, 7  ;;  %v10656_v5 = vmax.bf16 %v1537_v19, %v1488_v47  ;;  %v10658_v22 = vmax.bf16 %v1538_v48, %v1489_v9 }
 0x26c   : > { %v10664_v26 = vmax.bf16 %v1539_v29, %v1490_v58  ;;  %v10666_v14 = vmax.bf16 %v1348_v27, %v1300_v11 }
 0x26d   : > { %v8172_v42 = vcombine.low %v5000_v55, %v5001_v36  ;;  %v5368_v3 = vrot.slane %v5367_v34, 4  ;;  %v5369_v40 = vrot.slane %v5001_v36, 7  ;;  %v1910_v1 = vshrl.u32 %v10656_v5, 16  ;;  %5489 = vst.msk [vmem:[#allocation2 + $0x3c] sm:$0xe] %vm1110_vm7, %v5367_v34 }
 0x26e   : > { %v1913_v28 = vshll.u32 %v10656_v5, 16  ;;  %v1919_v51 = vshll.u32 %v10658_v22, 16  ;;  %v1923_v56 = vshrl.u32 %v10658_v22, 16  ;;  %v1929_v46 = vshll.u32 %v10664_v26, 16  ;;  %v10692_v55 = vld [vmem:[#allocation2 + $0x44] sm:$0x3] }
 0x26f   : > { %8593 = vmatmul.mubr.msk.bf16.gmra.mrb[20].mxu1 %vm2840_vm10, %v8172_v42  ;;  %v5370_v16 = vsel %vm9358_vm9, %v5368_v3, %v5369_v40  ;;  %v5371_v20 = vrot.slane %v5369_v40, 4  ;;  %v1912_v60 = vrot.slane %v1910_v1, 4  ;;  %v8068_v30 = vrot.slane %v10656_v5, 9 }
 0x270   : > { %v1915_v2 = vrot.slane %v1913_v28, 5  ;;  %v1921_v15 = vrot.slane %v1919_v51, 5  ;;  %v1925_v13 = vrot.slane %v1923_v56, 4  ;;  %v1931_v38 = vrot.slane %v1929_v46, 5  ;;  %5490 = vst.msk [vmem:[#allocation2 + $0x40] sm:$0xf] %vm841_vm3, %v5370_v16 }
 0x271   : > { %v2189_v47 = vrot.slane %v10658_v22, 5  ;;  %v2192_v9 = vrot.slane %v10664_v26, 5  ;;  %v2470_v27 = vrot.slane %v1910_v1, 5  ;;  %v2471_v58 = vrot.slane %v1913_v28, 6  ;;  %5491 = vst.msk [vmem:[#allocation2 + $0x44] sm:$0x1] %vm856_vm2, %v5371_v20 }
 0x272   : > { %v1916_v19 = vor.u32 %v1915_v2, %v1912_v60  ;;  %v1926_v48 = vor.u32 %v1925_v13, %v1921_v15  ;;  %v2474_v29 = vrot.slane %v1923_v56, 5  ;;  %v2475_v11 = vrot.slane %v1919_v51, 6  ;;  %v1540_v13 = vld [vmem:[#allocation2 + $0xd8] sm:$0xf] }
 0x273   : > { %v2190_v36 = vsel %vm9686_vm8, %v8068_v30, %v2189_v47  ;;  %v2191_v34 = vrot.slane %v2189_v47, 4  ;;  %v2472_v42 = vor.u32 %v2471_v58, %v2470_v27  ;;  %v2479_v3 = vshrl.u32 %v10664_v26, 16  ;;  %v1445_v58 = vld [vmem:[#allocation2 + $0xd4] sm:$0x3] }
 0x274   : > { %v1917_v40 = vrot.slane %v1916_v19, 4  ;;  %v1927_v16 = vrot.slane %v1926_v48, 4  ;;  %v2476_v61 = vor.u32 %v2475_v11, %v2474_v29  ;;  %v2482_v23 = vrot.slane %v1929_v46, 6  ;;  %v1541_v19 = vld [vmem:[#allocation2 + $0xdc] sm:$0xf] }
 0x275   : > { %v2193_v1 = vsel %vm9686_vm8, %v2191_v34, %v2192_v9  ;;  %v2473_v28 = vrot.slane %v2472_v42, 4  ;;  %v2481_v20 = vrot.slane %v2479_v3, 5  ;;  %v8084_v60 = vrot.slane %v10656_v5, 10  ;;  %v1542_v48 = vld [vmem:[#allocation2 + $0xe0] sm:$0x3] }
 0x276   : > { %v1922_v51 = vsel %vm9631_vm15, %v1917_v40, %v1921_v15  ;;  %v1932_v56 = vsel %vm9631_vm15, %v1927_v16, %v1931_v38  ;;  %v2478_v30 = vrot.slane %v2476_v61, 4  ;;  %v2675_v2 = vrot.slane %v10658_v22, 6 }
 0x277   : > { %v2039_v47 = vmax.bf16 %v1922_v51, %v10656_v5  ;;  %v2040_v46 = vmax.bf16 %v1932_v56, %v10658_v22  ;;  %v2477_v9 = vsel %vm9732_vm11, %v2473_v28, %v2476_v61  ;;  %v2483_v27 = vor.u32 %v2482_v23, %v2481_v20 }
 0x278   : > { %v2676_v15 = vsel %vm9739_vm12, %v8084_v60, %v2675_v2  ;;  %v2677_v29 = vrot.slane %v2675_v2, 4  ;;  %v2678_v38 = vrot.slane %v10664_v26, 6  ;;  %v1493_v11 = vmax.bf16 %v1445_v58, %v10666_v14 }
 0x279   : > { %v2266_v34 = vmax.bf16 %v2190_v36, %v2039_v47  ;;  %v2267_v42 = vmax.bf16 %v2193_v1, %v2040_v46  ;;  %v2484_v5 = vsel %vm9732_vm11, %v2478_v30, %v2483_v27  ;;  %v12510_v22 = vmax.bf16 %v10660_v62, %v10652_v59 }
 0x27a   : > { %v2679_v61 = vsel %vm9739_vm12, %v2677_v29, %v2678_v38  ;;  %v12511_v3 = vmax.bf16 %v10662_v49, %v10654_v31  ;;  %v10731_v26 = vmax.bf16 %v1542_v48, %v1493_v11  ;;  %v3550_v14 = vmax.bf16 %v10672_v35, %v10535_v21  ;;  %v3603_v35 = vld [vmem:[#allocation2 + $0x5c] sm:$0x3] }
 0x27b   : > { %v10722_v23 = vmax.bf16 %v1540_v13, %v12510_v22  ;;  %v2573_v36 = vmax.bf16 %v2477_v9, %v2266_v34  ;;  %v2574_v16 = vmax.bf16 %v2484_v5, %v2267_v42 }
 0x27c   : > { %v10729_v40 = vmax.bf16 %v1541_v19, %v12511_v3  ;;  %v1953_v20 = vshll.u32 %v10731_v26, 16  ;;  %v2199_v38 = vrot.slane %v10731_v26, 5 }
 0x27d   : > { %v1934_v1 = vshrl.u32 %v10722_v23, 16  ;;  %v1937_v59 = vshll.u32 %v10722_v23, 16  ;;  %v8069_v31 = vrot.slane %v10722_v23, 9  ;;  %v2752_v49 = vmax.bf16 %v2676_v15, %v2573_v36  ;;  %v10745_v15 = vld [vmem:[#allocation2 + $0xb4] sm:$0xf] }
 0x27e   : > { %v1943_v62 = vshll.u32 %v10729_v40, 16  ;;  %v1947_v28 = vshrl.u32 %v10729_v40, 16  ;;  %v2753_v60 = vmax.bf16 %v2679_v61, %v2574_v16  ;;  %v1955_v13 = vrot.slane %v1953_v20, 5  ;;  %v10751_v16 = vld [vmem:[#allocation2 + $0xbc] sm:$0x3] }
 0x27f   : > { %v1936_v51 = vrot.slane %v1934_v1, 4  ;;  %v1939_v56 = vrot.slane %v1937_v59, 5  ;;  %v2196_v47 = vrot.slane %v10729_v40, 5  ;;  %v3331_v9 = vrot.slane %v2752_v49, 7 }
 0x280   : > { %v1945_v30 = vrot.slane %v1943_v62, 5  ;;  %v1949_v2 = vrot.slane %v1947_v28, 4  ;;  %v8101_v46 = vcombine.low %v2752_v49, %v2753_v60  ;;  %v3333_v27 = vrot.slane %v2753_v60, 7 }
 0x281   : > { %v1940_v58 = vor.u32 %v1939_v56, %v1936_v51  ;;  %v2197_v48 = vsel %vm9686_vm8, %v8069_v31, %v2196_v47  ;;  %v2198_v29 = vrot.slane %v2196_v47, 4  ;;  %v3332_v11 = vrot.slane %v3331_v9, 4  ;;  %3433 = vst.msk [vmem:[#allocation2 + $0xb4] sm:$0xe] %vm1110_vm7, %v3331_v9  ;;  %v10753_v31 = vld [vmem:[#allocation2 + $0xb8] sm:$0xf] }
 0x282   : > { %v1950_v19 = vor.u32 %v1949_v2, %v1945_v30  ;;  %8545 = vmatmul.mubr.msk.bf16.gmra.mrb[56].mxu0 %vm2840_vm10, %v8101_v46  ;;  %v3335_v34 = vrot.slane %v3333_v27, 4  ;;  %v2485_v5 = vrot.slane %v1934_v1, 5  ;;  %v2486_v3 = vrot.slane %v1937_v59, 6 }
 0x283   : > { %v1941_v42 = vrot.slane %v1940_v58, 4  ;;  %v2200_v61 = vsel %vm9686_vm8, %v2198_v29, %v2199_v38  ;;  %v2489_v36 = vrot.slane %v1947_v28, 5  ;;  %v3334_v49 = vsel %vm9358_vm9, %v3332_v11, %v3333_v27  ;;  %v3599_v38 = vld [vmem:[#allocation2 + $0x4c] sm:$0xf]  ;;  %v3694_v11 = vld [vmem:[#allocation2 + $0x54] sm:$0xf] }
 0x284   : > { %v1951_v22 = vrot.slane %v1950_v19, 4  ;;  %v2490_v51 = vrot.slane %v1943_v62, 6  ;;  %v2494_v1 = vshrl.u32 %v10731_v26, 16  ;;  %3435 = vst.msk [vmem:[#allocation2 + $0xbc] sm:$0x1] %vm856_vm2, %v3335_v34  ;;  %v2487_v56 = vor.u32 %v2486_v3, %v2485_v5 }
 0x285   : > { %v1946_v60 = vsel %vm9631_vm15, %v1941_v42, %v1945_v30  ;;  %3434 = vst.msk [vmem:[#allocation2 + $0xb8] sm:$0xf] %vm841_vm3, %v3334_v49  ;;  %v2497_v2 = vrot.slane %v1953_v20, 6  ;;  %v8085_v30 = vrot.slane %v10722_v23, 10  ;;  %v3598_v62 = vld [vmem:[#allocation2 + $0x48] sm:$0xf]  ;;  %v3551_v20 = vmax.bf16 %v10677_v7, %v10545_v10 }
 0x286   : > { %v1956_v59 = vsel %vm9631_vm15, %v1951_v22, %v1955_v13  ;;  %v2041_v28 = vmax.bf16 %v1946_v60, %v10722_v23  ;;  %v2491_v46 = vor.u32 %v2490_v51, %v2489_v36  ;;  %v2496_v9 = vrot.slane %v2494_v1, 5  ;;  %v3600_v5 = vld [vmem:[#allocation2 + $0x50] sm:$0x3]  ;;  %v3505_v22 = vld [vmem:[#allocation2 + $0x48] sm:$0xf] }
 0x287   : > { %v2042_v47 = vmax.bf16 %v1956_v59, %v10729_v40  ;;  %v2488_v58 = vrot.slane %v2487_v56, 4  ;;  %v2682_v19 = vrot.slane %v10729_v40, 6  ;;  %v2685_v29 = vrot.slane %v10731_v26, 6  ;;  %v3695_v26 = vld [vmem:[#allocation2 + $0x58] sm:$0xf] }
 0x288   : > { %v2268_v27 = vmax.bf16 %v2197_v48, %v2041_v28  ;;  %v2493_v34 = vrot.slane %v2491_v46, 4  ;;  %v2498_v42 = vor.u32 %v2497_v2, %v2496_v9  ;;  %v3552_v40 = vmax.bf16 %v10684_v12, %v10549_v18  ;;  %v3506_v36 = vld [vmem:[#allocation2 + $0x4c] sm:$0xf]  ;;  %v3696_v60 = vld [vmem:[#allocation2 + $0x5c] sm:$0x3] }
 0x289   : > { %v2269_v13 = vmax.bf16 %v2200_v61, %v2042_v47  ;;  %v2492_v23 = vsel %vm9732_vm11, %v2488_v58, %v2491_v46  ;;  %v2683_v48 = vsel %vm9739_vm12, %v8085_v30, %v2682_v19  ;;  %v2684_v3 = vrot.slane %v2682_v19, 4  ;;  %v3507_v51 = vld [vmem:[#allocation2 + $0x50] sm:$0x3]  ;;  %v3601_v1 = vld [vmem:[#allocation2 + $0x54] sm:$0xf] }
 0x28a   : > { %v2499_v61 = vsel %vm9732_vm11, %v2493_v34, %v2498_v42  ;;  %v2575_v49 = vmax.bf16 %v2492_v23, %v2268_v27  ;;  %v3646_v10 = vmax.bf16 %v3598_v62, %v3550_v14  ;;  %v3647_v7 = vmax.bf16 %v3599_v38, %v3551_v20  ;;  %v3790_v18 = vld [vmem:[#allocation2 + $0x60] sm:$0xf]  ;;  %v3791_v12 = vld [vmem:[#allocation2 + $0x64] sm:$0xf]  ;;  %v3602_v47 = vld [vmem:[#allocation2 + $0x58] sm:$0xf] }
 0x28b   : > { %v2576_v59 = vmax.bf16 %v2499_v61, %v2269_v13  ;;  %v2686_v28 = vsel %vm9739_vm12, %v2684_v3, %v2685_v29  ;;  %v3648_v56 = vmax.bf16 %v3600_v5, %v3552_v40  ;;  %v3553_v2 = vmax.bf16 %v3505_v22, %v10674_v63  ;;  %v3792_v27 = vld [vmem:[#allocation2 + $0x68] sm:$0x3]  ;;  %v10806_v61 = vld [vmem:[#allocation2 + $0xc4] sm:$0xf] }
 0x28c   : > { %v2754_v46 = vmax.bf16 %v2683_v48, %v2575_v49  ;;  %v3742_v9 = vmax.bf16 %v3694_v11, %v3646_v10  ;;  %v3743_v30 = vmax.bf16 %v3695_v26, %v3647_v7  ;;  %v3554_v21 = vmax.bf16 %v3506_v36, %v10690_v41  ;;  %v10797_v41 = vld [vmem:[#allocation2 + $0xc0] sm:$0xf]  ;;  %v10801_v48 = vld [vmem:[#allocation2 + $0xc8] sm:$0x3] }
 0x28d   : > { %v2755_v14 = vmax.bf16 %v2686_v28, %v2576_v59  ;;  %v3744_v62 = vmax.bf16 %v3696_v60, %v3648_v56  ;;  %v3555_v58 = vmax.bf16 %v3507_v51, %v10692_v55  ;;  %v10787_v19 = vmax.bf16 %v3601_v1, %v3553_v2 }
 0x28e   : > { %v3336_v29 = vrot.slane %v2754_v46, 7  ;;  %v3838_v38 = vmax.bf16 %v3790_v18, %v3742_v9  ;;  %v10789_v13 = vmax.bf16 %v3791_v12, %v3743_v30  ;;  %v10791_v34 = vmax.bf16 %v3602_v47, %v3554_v21 }
 0x28f   : > { %v8102_v63 = vcombine.low %v2754_v46, %v2755_v14  ;;  %v3338_v42 = vrot.slane %v2755_v14, 7  ;;  %v10793_v11 = vmax.bf16 %v3792_v27, %v3744_v62  ;;  %v10795_v20 = vmax.bf16 %v3603_v35, %v3555_v58 }
 0x290   : > { %v3337_v5 = vrot.slane %v3336_v29, 4  ;;  %v3971_v22 = vshrl.u32 %v3838_v38, 16  ;;  %v3974_v23 = vshll.u32 %v3838_v38, 16  ;;  %v3980_v55 = vshll.u32 %v10789_v13, 16  ;;  %3436 = vst.msk [vmem:[#allocation2 + $0xc0] sm:$0xe] %vm1110_vm7, %v3336_v29 }
 0x291   : > { %8548 = vmatprep.mubr.msk.bf16.mxu0 %vm2840_vm10, %v8102_v63  ;;  %v3340_v3 = vrot.slane %v3338_v42, 4  ;;  %v3984_v40 = vshrl.u32 %v10789_v13, 16  ;;  %v3990_v26 = vshll.u32 %v10793_v11, 16  ;;  %v8140_v36 = vrot.slane %v3838_v38, 9 }
 0x292   : > { %v3339_v49 = vsel %vm9358_vm9, %v3337_v5, %v3338_v42  ;;  %v3973_v10 = vrot.slane %v3971_v22, 4  ;;  %v3976_v7 = vrot.slane %v3974_v23, 5  ;;  %v3982_v60 = vrot.slane %v3980_v55, 5  ;;  %v3697_v42 = vld [vmem:[#allocation2 + $0x60] sm:$0xf] }
 0x293   : > { %3437 = vst.msk [vmem:[#allocation2 + $0xc4] sm:$0xf] %vm841_vm3, %v3339_v49  ;;  %v3986_v51 = vrot.slane %v3984_v40, 4  ;;  %v3992_v1 = vrot.slane %v3990_v26, 5  ;;  %v4400_v59 = vrot.slane %v10789_v13, 5  ;;  %v4403_v28 = vrot.slane %v10793_v11, 5 }
 0x294   : > { %3438 = vst.msk [vmem:[#allocation2 + $0xc8] sm:$0x1] %vm856_vm2, %v3340_v3  ;;  %v3977_v56 = vor.u32 %v3976_v7, %v3973_v10  ;;  %v4606_v18 = vrot.slane %v3971_v22, 5  ;;  %v4607_v12 = vrot.slane %v3974_v23, 6  ;;  %v4610_v2 = vrot.slane %v3984_v40, 5 }
 0x295   : > { %v3987_v47 = vor.u32 %v3986_v51, %v3982_v60  ;;  %v4401_v46 = vsel %vm9686_vm8, %v8140_v36, %v4400_v59  ;;  %v4402_v9 = vrot.slane %v4400_v59, 4  ;;  %v4611_v30 = vrot.slane %v3980_v55, 6  ;;  %v3698_v55 = vld [vmem:[#allocation2 + $0x64] sm:$0xf]  ;;  %v3699_v10 = vld [vmem:[#allocation2 + $0x68] sm:$0x3] }
 0x296   : > { %v3978_v27 = vrot.slane %v3977_v56, 4  ;;  %v4608_v21 = vor.u32 %v4607_v12, %v4606_v18  ;;  %v4615_v35 = vshrl.u32 %v10793_v11, 16  ;;  %v4618_v14 = vrot.slane %v3990_v26, 6  ;;  %v3794_v56 = vld [vmem:[#allocation2 + $0x70] sm:$0xf] }
 0x297   : > { %v3988_v62 = vrot.slane %v3987_v47, 4  ;;  %v4404_v58 = vsel %vm9686_vm8, %v4402_v9, %v4403_v28  ;;  %v4612_v29 = vor.u32 %v4611_v30, %v4610_v2  ;;  %v8156_v63 = vrot.slane %v3838_v38, 10  ;;  %v3793_v28 = vld [vmem:[#allocation2 + $0x6c] sm:$0xf]  ;;  %v3795_v2 = vld [vmem:[#allocation2 + $0x74] sm:$0x3] }
 0x298   : > { %v3983_v5 = vsel %vm9631_vm15, %v3978_v27, %v3982_v60  ;;  %v4609_v22 = vrot.slane %v4608_v21, 4  ;;  %v4617_v23 = vrot.slane %v4615_v35, 5  ;;  %v4880_v3 = vrot.slane %v10789_v13, 6 }
 0x299   : > { %v3993_v40 = vsel %vm9631_vm15, %v3988_v62, %v3992_v1  ;;  %v4298_v36 = vmax.bf16 %v3983_v5, %v3838_v38  ;;  %v4614_v26 = vrot.slane %v4612_v29, 4  ;;  %v4883_v49 = vrot.slane %v10793_v11, 6 }
 0x29a   : > { %v4299_v7 = vmax.bf16 %v3993_v40, %v10789_v13  ;;  %v4613_v51 = vsel %vm9732_vm11, %v4609_v22, %v4612_v29  ;;  %v4619_v59 = vor.u32 %v4618_v14, %v4617_v23  ;;  %v4881_v60 = vsel %vm9739_vm12, %v8156_v63, %v4880_v3 }
 0x29b   : > { %v4522_v18 = vmax.bf16 %v4401_v46, %v4298_v36  ;;  %v4882_v12 = vrot.slane %v4880_v3, 4  ;;  %v3745_v1 = vmax.bf16 %v3697_v42, %v10787_v19  ;;  %v3746_v38 = vmax.bf16 %v3698_v55, %v10791_v34 }
 0x29c   : > { %v4523_v11 = vmax.bf16 %v4404_v58, %v4299_v7  ;;  %v4620_v13 = vsel %vm9732_vm11, %v4614_v26, %v4619_v59  ;;  %v3747_v47 = vmax.bf16 %v3699_v10, %v10795_v20  ;;  %v1301_v9 = vmax.bf16 %v10797_v41, %v10745_v15  ;;  %v10855_v7 = vld [vmem:[#allocation2 + $0x48] sm:$0xf]  ;;  %v1545_v41 = vld [vmem:[#allocation2 + $0xec] sm:$0x3] }
 0x29d   : > { %v4826_v30 = vmax.bf16 %v4613_v51, %v4522_v18  ;;  %v4884_v27 = vsel %vm9739_vm12, %v4882_v12, %v4883_v49  ;;  %v10839_v46 = vmax.bf16 %v3793_v28, %v3745_v1  ;;  %v10841_v21 = vmax.bf16 %v3794_v56, %v3746_v38  ;;  %v1544_v15 = vld [vmem:[#allocation2 + $0xe8] sm:$0xf] }
 0x29e   : > { %v4827_v19 = vmax.bf16 %v4620_v13, %v4523_v11  ;;  %v10843_v34 = vmax.bf16 %v3795_v2, %v3747_v47  ;;  %v1302_v35 = vmax.bf16 %v10806_v61, %v10753_v31  ;;  %v1303_v20 = vmax.bf16 %v10801_v48, %v10751_v16  ;;  %v3461_v47 = vld [vmem:[#allocation2 + $0x4c] sm:$0xf]  ;;  %v3606_v48 = vld [vmem:[#allocation2 + $0x68] sm:$0x3] }
 0x29f   : > { %v5002_v14 = vmax.bf16 %v4881_v60, %v4826_v30  ;;  %v3995_v62 = vshrl.u32 %v10839_v46, 16  ;;  %v3998_v58 = vshll.u32 %v10839_v46, 16  ;;  %v4004_v29 = vshll.u32 %v10841_v21, 16  ;;  %v10865_v30 = vld [vmem:[#allocation2 + $0x50] sm:$0x3] }
 0x2a0   : > { %v5003_v63 = vmax.bf16 %v4884_v27, %v4827_v19  ;;  %v4008_v42 = vshrl.u32 %v10841_v21, 16  ;;  %v4014_v5 = vshll.u32 %v10843_v34, 16  ;;  %v8141_v22 = vrot.slane %v10839_v46, 9 }
 0x2a1   : > { %v5372_v23 = vrot.slane %v5002_v14, 7  ;;  %v3997_v3 = vrot.slane %v3995_v62, 4  ;;  %v4000_v55 = vrot.slane %v3998_v58, 5  ;;  %v4006_v40 = vrot.slane %v4004_v29, 5 }
 0x2a2   : > { %v8173_v36 = vcombine.low %v5002_v14, %v5003_v63  ;;  %v5374_v26 = vrot.slane %v5003_v63, 7  ;;  %v4010_v49 = vrot.slane %v4008_v42, 4  ;;  %v4016_v10 = vrot.slane %v4014_v5, 5 }
 0x2a3   : > { %v5373_v51 = vrot.slane %v5372_v23, 4  ;;  %v4001_v59 = vor.u32 %v4000_v55, %v3997_v3  ;;  %v4407_v60 = vrot.slane %v10841_v21, 5  ;;  %v4410_v28 = vrot.slane %v10843_v34, 5  ;;  %5492 = vst.msk [vmem:[#allocation2 + $0x48] sm:$0xe] %vm1110_vm7, %v5372_v23 }
 0x2a4   : > { %8596 = vmatprep.mubr.msk.bf16.mxu1 %vm2840_vm10, %v8173_v36  ;;  %v5376_v56 = vrot.slane %v5374_v26, 4  ;;  %v4011_v18 = vor.u32 %v4010_v49, %v4006_v40  ;;  %v4621_v12 = vrot.slane %v3995_v62, 5  ;;  %v4622_v1 = vrot.slane %v3998_v58, 6 }
 0x2a5   : > { %v5375_v38 = vsel %vm9358_vm9, %v5373_v51, %v5374_v26  ;;  %v4002_v2 = vrot.slane %v4001_v59, 4  ;;  %v4408_v11 = vsel %vm9686_vm8, %v8141_v22, %v4407_v60  ;;  %v4409_v13 = vrot.slane %v4407_v60, 4  ;;  %v1349_v51 = vld [vmem:[#allocation2 + $0xcc] sm:$0xf]  ;;  %v1350_v59 = vld [vmem:[#allocation2 + $0xd0] sm:$0xf] }
 0x2a6   : > { %v4012_v27 = vrot.slane %v4011_v18, 4  ;;  %v4623_v19 = vor.u32 %v4622_v1, %v4621_v12  ;;  %v4625_v14 = vrot.slane %v4008_v42, 5  ;;  %v4626_v63 = vrot.slane %v4004_v29, 6  ;;  %5493 = vst.msk [vmem:[#allocation2 + $0x4c] sm:$0xf] %vm841_vm3, %v5375_v38 }
 0x2a7   : > { %5494 = vst.msk [vmem:[#allocation2 + $0x50] sm:$0x1] %vm856_vm2, %v5376_v56  ;;  %v4007_v62 = vsel %vm9631_vm15, %v4002_v2, %v4006_v40  ;;  %v4411_v58 = vsel %vm9686_vm8, %v4409_v13, %v4410_v28  ;;  %v4630_v22 = vshrl.u32 %v10843_v34, 16  ;;  %v4633_v23 = vrot.slane %v4014_v5, 6  ;;  %v1351_v60 = vld [vmem:[#allocation2 + $0xd4] sm:$0x3] }
 0x2a8   : > { %v4017_v3 = vsel %vm9631_vm15, %v4012_v27, %v4016_v10  ;;  %v4300_v55 = vmax.bf16 %v4007_v62, %v10839_v46  ;;  %v4624_v42 = vrot.slane %v4623_v19, 4  ;;  %v4627_v29 = vor.u32 %v4626_v63, %v4625_v14  ;;  %v1446_v28 = vld [vmem:[#allocation2 + $0xd8] sm:$0xf]  ;;  %v3508_v12 = vld [vmem:[#allocation2 + $0x54] sm:$0xf] }
 0x2a9   : > { %v4301_v36 = vmax.bf16 %v4017_v3, %v10841_v21  ;;  %v4632_v26 = vrot.slane %v4630_v22, 5  ;;  %v8157_v49 = vrot.slane %v10839_v46, 10  ;;  %v4887_v40 = vrot.slane %v10841_v21, 6  ;;  %v3509_v1 = vld [vmem:[#allocation2 + $0x58] sm:$0xf] }
 0x2aa   : > { %v4524_v56 = vmax.bf16 %v4408_v11, %v4300_v55  ;;  %v4628_v5 = vsel %vm9732_vm11, %v4624_v42, %v4627_v29  ;;  %v4629_v10 = vrot.slane %v4627_v29, 4  ;;  %v4890_v18 = vrot.slane %v10843_v34, 6  ;;  %v1447_v21 = vld [vmem:[#allocation2 + $0xdc] sm:$0xf]  ;;  %v1448_v27 = vld [vmem:[#allocation2 + $0xe0] sm:$0x3] }
 0x2ab   : > { %v4525_v38 = vmax.bf16 %v4411_v58, %v4301_v36  ;;  %v4634_v2 = vor.u32 %v4633_v23, %v4632_v26  ;;  %v4888_v46 = vsel %vm9739_vm12, %v8157_v49, %v4887_v40  ;;  %v4889_v13 = vrot.slane %v4887_v40, 4  ;;  %v3510_v63 = vld [vmem:[#allocation2 + $0x5c] sm:$0x3]  ;;  %v3604_v62 = vld [vmem:[#allocation2 + $0x60] sm:$0xf] }
 0x2ac   : > { %v4828_v19 = vmax.bf16 %v4628_v5, %v4524_v56  ;;  %v1397_v11 = vmax.bf16 %v1349_v51, %v1301_v9  ;;  %v1398_v14 = vmax.bf16 %v1350_v59, %v1302_v35  ;;  %v1399_v34 = vmax.bf16 %v1351_v60, %v1303_v20  ;;  %v3605_v58 = vld [vmem:[#allocation2 + $0x64] sm:$0xf]  ;;  %v10899_v20 = vld [vmem:[#allocation2 + $0x6c] sm:$0xf]  ;;  %v10901_v42 = vld [vmem:[#allocation2 + $0x70] sm:$0xf] }
 0x2ad   : > { %v4635_v22 = vsel %vm9732_vm11, %v4629_v10, %v4634_v2  ;;  %v4891_v23 = vsel %vm9739_vm12, %v4889_v13, %v4890_v18  ;;  %v1543_v3 = vld [vmem:[#allocation2 + $0xe4] sm:$0xf]  ;;  %v3556_v9 = vmax.bf16 %v3508_v12, %v10855_v7  ;;  %v3557_v31 = vmax.bf16 %v3509_v1, %v3461_v47  ;;  %v10920_v56 = vld [vmem:[#allocation2 + $0x54] sm:$0xf] }
 0x2ae   : > { %v4829_v61 = vmax.bf16 %v4635_v22, %v4525_v38  ;;  %v5004_v35 = vmax.bf16 %v4888_v46, %v4828_v19  ;;  %v1494_v55 = vmax.bf16 %v1446_v28, %v1397_v11  ;;  %v1495_v16 = vmax.bf16 %v1447_v21, %v1398_v14  ;;  %v10932_v11 = vld [vmem:[#allocation2 + $0x58] sm:$0xf] }
 0x2af   : > { %v1496_v29 = vmax.bf16 %v1448_v27, %v1399_v34  ;;  %v3558_v36 = vmax.bf16 %v3510_v63, %v10865_v30  ;;  %v10904_v26 = vmax.bf16 %v3604_v62, %v3556_v9  ;;  %v10906_v49 = vmax.bf16 %v3605_v58, %v3557_v31  ;;  %v10934_v58 = vld [vmem:[#allocation2 + $0x5c] sm:$0x3] }
 0x2b0   : > { %v5005_v40 = vmax.bf16 %v4891_v23, %v4829_v61  ;;  %v5377_v51 = vrot.slane %v5004_v35, 7  ;;  %v10908_v7 = vmax.bf16 %v1543_v3, %v1494_v55  ;;  %v10910_v47 = vmax.bf16 %v1544_v15, %v1495_v16 }
 0x2b1   : > { %v10912_v59 = vmax.bf16 %v1545_v41, %v1496_v29  ;;  %v10914_v60 = vmax.bf16 %v3606_v48, %v3558_v36  ;;  %v3748_v28 = vmax.bf16 %v10899_v20, %v10904_v26  ;;  %v3749_v30 = vmax.bf16 %v10901_v42, %v10906_v49 }
 0x2b2   : > { %v8174_v5 = vcombine.low %v5004_v35, %v5005_v40  ;;  %v5378_v10 = vrot.slane %v5377_v51, 4  ;;  %v5379_v18 = vrot.slane %v5005_v40, 7  ;;  %v1958_v12 = vshrl.u32 %v10908_v7, 16  ;;  %5495 = vst.msk [vmem:[#allocation2 + $0x54] sm:$0xe] %vm1110_vm7, %v5377_v51 }
 0x2b3   : > { %v1961_v1 = vshll.u32 %v10908_v7, 16  ;;  %v1967_v38 = vshll.u32 %v10910_v47, 16  ;;  %v1971_v2 = vshrl.u32 %v10910_v47, 16  ;;  %v1977_v46 = vshll.u32 %v10912_v59, 16 }
 0x2b4   : > { %8597 = vmatmul.mubr.msk.bf16.gmra.mrb[24].mxu1 %vm2840_vm10, %v8174_v5  ;;  %v5380_v13 = vsel %vm9358_vm9, %v5378_v10, %v5379_v18  ;;  %v5381_v21 = vrot.slane %v5379_v18, 4  ;;  %v1960_v27 = vrot.slane %v1958_v12, 4  ;;  %v8070_v19 = vrot.slane %v10908_v7, 9 }
 0x2b5   : > { %v1963_v14 = vrot.slane %v1961_v1, 5  ;;  %v1969_v34 = vrot.slane %v1967_v38, 5  ;;  %v1973_v63 = vrot.slane %v1971_v2, 4  ;;  %v1979_v62 = vrot.slane %v1977_v46, 5  ;;  %5496 = vst.msk [vmem:[#allocation2 + $0x58] sm:$0xf] %vm841_vm3, %v5380_v13 }
 0x2b6   : > { %v2203_v22 = vrot.slane %v10910_v47, 5  ;;  %v2206_v23 = vrot.slane %v10912_v59, 5  ;;  %v2500_v3 = vrot.slane %v1958_v12, 5  ;;  %v2501_v15 = vrot.slane %v1961_v1, 6  ;;  %5497 = vst.msk [vmem:[#allocation2 + $0x5c] sm:$0x1] %vm856_vm2, %v5381_v21 }
 0x2b7   : > { %v1964_v41 = vor.u32 %v1963_v14, %v1960_v27  ;;  %v1974_v9 = vor.u32 %v1973_v63, %v1969_v34  ;;  %v2504_v31 = vrot.slane %v1971_v2, 5  ;;  %v2505_v61 = vrot.slane %v1967_v38, 6  ;;  %v3702_v1 = vld [vmem:[#allocation2 + $0x74] sm:$0x3]  ;;  %v3796_v27 = vld [vmem:[#allocation2 + $0x78] sm:$0xf] }
 0x2b8   : > { %v2204_v35 = vsel %vm9686_vm8, %v8070_v19, %v2203_v22  ;;  %v2205_v55 = vrot.slane %v2203_v22, 4  ;;  %v2502_v16 = vor.u32 %v2501_v15, %v2500_v3  ;;  %v2509_v48 = vshrl.u32 %v10912_v59, 16  ;;  %v3797_v22 = vld [vmem:[#allocation2 + $0x7c] sm:$0xf]  ;;  %v10955_v3 = vld [vmem:[#allocation2 + $0x60] sm:$0xf] }
 0x2b9   : > { %v1965_v29 = vrot.slane %v1964_v41, 4  ;;  %v1975_v36 = vrot.slane %v1974_v9, 4  ;;  %v2506_v40 = vor.u32 %v2505_v61, %v2504_v31  ;;  %v2512_v51 = vrot.slane %v1977_v46, 6 }
 0x2ba   : > { %v2207_v5 = vsel %vm9686_vm8, %v2205_v55, %v2206_v23  ;;  %v2503_v10 = vrot.slane %v2502_v16, 4  ;;  %v2511_v18 = vrot.slane %v2509_v48, 5  ;;  %v8086_v12 = vrot.slane %v10908_v7, 10  ;;  %v3798_v23 = vld [vmem:[#allocation2 + $0x80] sm:$0x3] }
 0x2bb   : > { %v1970_v38 = vsel %vm9631_vm15, %v1965_v29, %v1969_v34  ;;  %v1980_v2 = vsel %vm9631_vm15, %v1975_v36, %v1979_v62  ;;  %v2508_v13 = vrot.slane %v2506_v40, 4  ;;  %v2689_v21 = vrot.slane %v10910_v47, 6 }
 0x2bc   : > { %v2043_v46 = vmax.bf16 %v1970_v38, %v10908_v7  ;;  %v2044_v19 = vmax.bf16 %v1980_v2, %v10910_v47  ;;  %v2507_v14 = vsel %vm9732_vm11, %v2503_v10, %v2506_v40  ;;  %v2513_v63 = vor.u32 %v2512_v51, %v2511_v18 }
 0x2bd   : > { %v2690_v34 = vsel %vm9739_vm12, %v8086_v12, %v2689_v21  ;;  %v2691_v62 = vrot.slane %v2689_v21, 4  ;;  %v2692_v15 = vrot.slane %v10912_v59, 6  ;;  %v3750_v41 = vmax.bf16 %v3702_v1, %v10914_v60 }
 0x2be   : > { %v2270_v9 = vmax.bf16 %v2204_v35, %v2043_v46  ;;  %v2271_v7 = vmax.bf16 %v2207_v5, %v2044_v19  ;;  %v2514_v47 = vsel %vm9732_vm11, %v2508_v13, %v2513_v63  ;;  %v10966_v31 = vmax.bf16 %v3796_v27, %v3748_v28 }
 0x2bf   : > { %v2693_v61 = vsel %vm9739_vm12, %v2691_v62, %v2692_v15  ;;  %v10973_v55 = vmax.bf16 %v3797_v22, %v3749_v30  ;;  %v10975_v59 = vmax.bf16 %v3798_v23, %v3750_v41  ;;  %v3559_v60 = vmax.bf16 %v10955_v3, %v10920_v56 }
 0x2c0   : > { %v2577_v35 = vmax.bf16 %v2507_v14, %v2270_v9  ;;  %v2578_v16 = vmax.bf16 %v2514_v47, %v2271_v7  ;;  %v4019_v48 = vshrl.u32 %v10966_v31, 16  ;;  %v4022_v20 = vshll.u32 %v10966_v31, 16 }
 0x2c1   : > { %v4028_v26 = vshll.u32 %v10973_v55, 16  ;;  %v4032_v28 = vshrl.u32 %v10973_v55, 16  ;;  %v4038_v29 = vshll.u32 %v10975_v59, 16  ;;  %v8142_v42 = vrot.slane %v10966_v31, 9 }
 0x2c2   : > { %v2756_v49 = vmax.bf16 %v2690_v34, %v2577_v35  ;;  %v2757_v30 = vmax.bf16 %v2693_v61, %v2578_v16  ;;  %v4021_v36 = vrot.slane %v4019_v48, 4  ;;  %v4024_v40 = vrot.slane %v4022_v20, 5 }
 0x2c3   : > { %v4030_v51 = vrot.slane %v4028_v26, 5  ;;  %v4034_v5 = vrot.slane %v4032_v28, 4  ;;  %v4040_v10 = vrot.slane %v4038_v29, 5  ;;  %v4414_v18 = vrot.slane %v10973_v55, 5 }
 0x2c4   : > { %v8103_v12 = vcombine.low %v2756_v49, %v2757_v30  ;;  %v3341_v1 = vrot.slane %v2756_v49, 7  ;;  %v3343_v38 = vrot.slane %v2757_v30, 7  ;;  %v4025_v2 = vor.u32 %v4024_v40, %v4021_v36  ;;  %v3608_v36 = vld [vmem:[#allocation2 + $0x70] sm:$0xf] }
 0x2c5   : > { %v4035_v13 = vor.u32 %v4034_v5, %v4030_v51  ;;  %v4415_v21 = vsel %vm9686_vm8, %v8142_v42, %v4414_v18  ;;  %v4416_v27 = vrot.slane %v4414_v18, 4  ;;  %v4417_v46 = vrot.slane %v10975_v59, 5  ;;  %v3609_v18 = vld [vmem:[#allocation2 + $0x74] sm:$0x3] }
 0x2c6   : > { %8549 = vmatmul.mubr.msk.bf16.gmra.mrb[60].mxu0 %vm2840_vm10, %v8103_v12  ;;  %v3342_v19 = vrot.slane %v3341_v1, 4  ;;  %v3345_v14 = vrot.slane %v3343_v38, 4  ;;  %3439 = vst.msk [vmem:[#allocation2 + $0xcc] sm:$0xe] %vm1110_vm7, %v3341_v1  ;;  %v4026_v63 = vrot.slane %v4025_v2, 4  ;;  %v4636_v22 = vrot.slane %v4019_v48, 5 }
 0x2c7   : > { %v12512_v23 = vpack.c.bf16 %v9349_v53, %v9331_v45  ;;  %v4036_v34 = vrot.slane %v4035_v13, 4  ;;  %v4418_v62 = vsel %vm9686_vm8, %v4416_v27, %v4417_v46  ;;  %v4637_v15 = vrot.slane %v4022_v20, 6  ;;  %v3512_v48 = vld [vmem:[#allocation2 + $0x64] sm:$0xf]  ;;  %v3513_v20 = vld [vmem:[#allocation2 + $0x68] sm:$0x3] }
 0x2c8   : > { %v4640_v41 = vrot.slane %v4032_v28, 5  ;;  %v3344_v9 = vsel %vm9358_vm9, %v3342_v19, %v3343_v38  ;;  %3441 = vst.msk [vmem:[#allocation2 + $0xd4] sm:$0x1] %vm856_vm2, %v3345_v14  ;;  %v4031_v7 = vsel %vm9631_vm15, %v4026_v63, %v4030_v51  ;;  %v4641_v47 = vrot.slane %v4028_v26, 6  ;;  %v3607_v26 = vld [vmem:[#allocation2 + $0x6c] sm:$0xf] }
 0x2c9   : > { %8554 = vmatprep.mubr.msk.bf16.mxu0 %vm2840_vm10, %v12512_v23  ;;  %v4645_v61 = vshrl.u32 %v10975_v59, 16  ;;  %3440 = vst.msk [vmem:[#allocation2 + $0xd0] sm:$0xf] %vm841_vm3, %v3344_v9  ;;  %v4041_v45 = vsel %vm9631_vm15, %v4036_v34, %v4040_v10  ;;  %v4302_v53 = vmax.bf16 %v4031_v7, %v10966_v31  ;;  %v4638_v35 = vor.u32 %v4637_v15, %v4636_v22  ;;  %v3703_v2 = vld [vmem:[#allocation2 + $0x78] sm:$0xf] }
 0x2ca   : > { %v4648_v16 = vrot.slane %v4038_v29, 6  ;;  %v4303_v28 = vmax.bf16 %v4041_v45, %v10973_v55  ;;  %v4642_v42 = vor.u32 %v4641_v47, %v4640_v41  ;;  %v8158_v30 = vrot.slane %v10966_v31, 10  ;;  %v3466_v13 = vld [vmem:[#allocation2 + $0x60] sm:$0xf]  ;;  %v3514_v27 = vld [vmem:[#allocation2 + $0x6c] sm:$0xf] }
 0x2cb   : > { %v4647_v49 = vrot.slane %v4645_v61, 5  ;;  %v4526_v40 = vmax.bf16 %v4415_v21, %v4302_v53  ;;  %v4639_v51 = vrot.slane %v4638_v35, 4  ;;  %v4894_v5 = vrot.slane %v10973_v55, 6  ;;  %v3704_v19 = vld [vmem:[#allocation2 + $0x7c] sm:$0xf] }
 0x2cc   : > { %v4897_v10 = vrot.slane %v10975_v59, 6  ;;  %v4527_v12 = vmax.bf16 %v4418_v62, %v4303_v28  ;;  %v4644_v1 = vrot.slane %v4642_v42, 4  ;;  %v3560_v38 = vmax.bf16 %v3512_v48, %v10932_v11  ;;  %v3467_v59 = vld [vmem:[#allocation2 + $0x64] sm:$0xf]  ;;  %v3515_v14 = vld [vmem:[#allocation2 + $0x70] sm:$0xf] }
 0x2cd   : > { %v4649_v29 = vor.u32 %v4648_v16, %v4647_v49  ;;  %v4643_v31 = vsel %vm9732_vm11, %v4639_v51, %v4642_v42  ;;  %v4895_v21 = vsel %vm9739_vm12, %v8158_v30, %v4894_v5  ;;  %v4896_v46 = vrot.slane %v4894_v5, 4  ;;  %v3705_v34 = vld [vmem:[#allocation2 + $0x80] sm:$0x3]  ;;  %v3516_v15 = vld [vmem:[#allocation2 + $0x74] sm:$0x3] }
 0x2ce   : > { %v3561_v55 = vmax.bf16 %v3513_v20, %v10934_v58  ;;  %v4830_v22 = vmax.bf16 %v4643_v31, %v4526_v40  ;;  %v3655_v11 = vmax.bf16 %v3607_v26, %v3559_v60  ;;  %v3656_v23 = vmax.bf16 %v3608_v36, %v3560_v38  ;;  %v3610_v58 = vld [vmem:[#allocation2 + $0x78] sm:$0xf]  ;;  %v3799_v47 = vld [vmem:[#allocation2 + $0x84] sm:$0xf]  ;;  %v3800_v61 = vld [vmem:[#allocation2 + $0x88] sm:$0xf] }
 0x2cf   : > { %v4650_v63 = vsel %vm9732_vm11, %v4644_v1, %v4649_v29  ;;  %v12513_v62 = vpack.c.bf16 %v9340_v50, %v9325_v39  ;;  %v4898_v9 = vsel %vm9739_vm12, %v4896_v46, %v4897_v10  ;;  %v12514_v56 = vpack.c.bf16 %v9395_v57, %v9379_v44  ;;  %v3611_v60 = vld [vmem:[#allocation2 + $0x7c] sm:$0xf]  ;;  %v3801_v53 = vld [vmem:[#allocation2 + $0x8c] sm:$0x3]  ;;  %v3468_v35 = vld [vmem:[#allocation2 + $0x68] sm:$0x3] }
 0x2d0   : > { %v4831_v41 = vmax.bf16 %v4650_v63, %v4527_v12  ;;  %v3657_v7 = vmax.bf16 %v3609_v18, %v3561_v55  ;;  %v3562_v3 = vmax.bf16 %v3514_v27, %v3466_v13  ;;  %v5006_v45 = vmax.bf16 %v4895_v21, %v4830_v22  ;;  %v3612_v48 = vld [vmem:[#allocation2 + $0x80] sm:$0x3] }
 0x2d1   : > { %8555 = vmatmul.mubr.msk.bf16.vlgmr.msra.gmra.mrb[32].mxu0 %vm2840_vm10, %v12513_v62  ;;  %v3751_v39 = vmax.bf16 %v3703_v2, %v3655_v11  ;;  %v3752_v50 = vmax.bf16 %v3704_v19, %v3656_v23  ;;  %v3563_v16 = vmax.bf16 %v3515_v14, %v3467_v59  ;;  %v3564_v42 = vmax.bf16 %v3516_v15, %v3468_v35  ;;  %v3708_v35 = vld [vmem:[#allocation2 + $0x8c] sm:$0x3] }
 0x2d2   : > { %8558 = vmatprep.mubr.msk.bf16.mxu0 %vm2840_vm10, %v12514_v56  ;;  %v5007_v20 = vmax.bf16 %v4898_v9, %v4831_v41  ;;  %v3753_v28 = vmax.bf16 %v3705_v34, %v3657_v7  ;;  %v11032_v49 = vmax.bf16 %v3610_v58, %v3562_v3  ;;  %v5382_v30 = vrot.slane %v5006_v45, 7  ;;  %v3706_v3 = vld [vmem:[#allocation2 + $0x84] sm:$0xf] }
 0x2d3   : > { %v11034_v26 = vmax.bf16 %v3799_v47, %v3751_v39  ;;  %v11036_v44 = vmax.bf16 %v3800_v61, %v3752_v50  ;;  %v11038_v57 = vmax.bf16 %v3611_v60, %v3563_v16  ;;  %v11042_v5 = vmax.bf16 %v3612_v48, %v3564_v42  ;;  %v3707_v60 = vld [vmem:[#allocation2 + $0x88] sm:$0xf]  ;;  %v11079_v42 = vld [vmem:[#allocation2 + $0x6c] sm:$0xf] }
 0x2d4   : > { %v8175_v36 = vcombine.low %v5006_v45, %v5007_v20  ;;  %v5384_v40 = vrot.slane %v5007_v20, 7  ;;  %v11040_v51 = vmax.bf16 %v3801_v53, %v3753_v28  ;;  %v5383_v10 = vrot.slane %v5382_v30, 4  ;;  %5498 = vst.msk [vmem:[#allocation2 + $0x60] sm:$0xe] %vm1110_vm7, %v5382_v30  ;;  %v11081_v30 = vld [vmem:[#allocation2 + $0x78] sm:$0xf] }
 0x2d5   : > { %v4043_v18 = vshrl.u32 %v11034_v26, 16  ;;  %v4046_v12 = vshll.u32 %v11034_v26, 16  ;;  %v4052_v1 = vshll.u32 %v11036_v44, 16  ;;  %v4056_v38 = vshrl.u32 %v11036_v44, 16 }
 0x2d6   : > { %8600 = vmatprep.mubr.msk.bf16.mxu1 %vm2840_vm10, %v8175_v36  ;;  %v5386_v29 = vrot.slane %v5384_v40, 4  ;;  %v4062_v2 = vshll.u32 %v11040_v51, 16  ;;  %v8143_v13 = vrot.slane %v11034_v26, 9  ;;  %v5385_v27 = vsel %vm9358_vm9, %v5383_v10, %v5384_v40 }
 0x2d7   : > { %v4045_v31 = vrot.slane %v4043_v18, 4  ;;  %v4048_v21 = vrot.slane %v4046_v12, 5  ;;  %v4054_v46 = vrot.slane %v4052_v1, 5  ;;  %v12515_v55 = vpack.c.bf16 %v9386_v25, %v9373_v32  ;;  %5499 = vst.msk [vmem:[#allocation2 + $0x64] sm:$0xf] %vm841_vm3, %v5385_v27 }
 0x2d8   : > { %v4058_v19 = vrot.slane %v4056_v38, 4  ;;  %v4064_v59 = vrot.slane %v4062_v2, 5  ;;  %v4421_v14 = vrot.slane %v11036_v44, 5  ;;  %v4424_v63 = vrot.slane %v11040_v51, 5  ;;  %5500 = vst.msk [vmem:[#allocation2 + $0x68] sm:$0x1] %vm856_vm2, %v5386_v29 }
 0x2d9   : > { %8559 = vmatmul.mubr.msk.bf16.gmra.mrb[36].mxu0 %vm2840_vm10, %v12515_v55  ;;  %v12516_v22 = vpack.c.bf16 %v9448_v8, %v9426_v54  ;;  %v4049_v11 = vor.u32 %v4048_v21, %v4045_v31  ;;  %v4651_v23 = vrot.slane %v4043_v18, 5  ;;  %v4652_v32 = vrot.slane %v4046_v12, 6  ;;  %v3802_v12 = vld [vmem:[#allocation2 + $0x90] sm:$0xf]  ;;  %v11088_v29 = vld [vmem:[#allocation2 + $0x7c] sm:$0xf] }
 0x2da   : > { %v4655_v25 = vrot.slane %v4056_v38, 5  ;;  %v4059_v34 = vor.u32 %v4058_v19, %v4054_v46  ;;  %v4422_v62 = vsel %vm9686_vm8, %v8143_v13, %v4421_v14  ;;  %v4423_v15 = vrot.slane %v4421_v14, 4  ;;  %v3804_v13 = vld [vmem:[#allocation2 + $0x98] sm:$0x3]  ;;  %v11096_v27 = vld [vmem:[#allocation2 + $0x80] sm:$0x3] }
 0x2db   : > { %8562 = vmatprep.mubr.msk.bf16.mxu0 %vm2840_vm10, %v12516_v22  ;;  %v4656_v58 = vrot.slane %v4052_v1, 6  ;;  %v4050_v41 = vrot.slane %v4049_v11, 4  ;;  %v4653_v9 = vor.u32 %v4652_v32, %v4651_v23  ;;  %v4660_v7 = vshrl.u32 %v11040_v51, 16  ;;  %v3803_v1 = vld [vmem:[#allocation2 + $0x94] sm:$0xf] }
 0x2dc   : > { %v4663_v47 = vrot.slane %v4062_v2, 6  ;;  %v4060_v61 = vrot.slane %v4059_v34, 4  ;;  %v4425_v54 = vsel %vm9686_vm8, %v4423_v15, %v4424_v63  ;;  %v8159_v56 = vrot.slane %v11034_v26, 10 }
 0x2dd   : > { %v4657_v8 = vor.u32 %v4656_v58, %v4655_v25  ;;  %v4055_v45 = vsel %vm9631_vm15, %v4050_v41, %v4054_v46  ;;  %v4654_v39 = vrot.slane %v4653_v9, 4  ;;  %v4662_v50 = vrot.slane %v4660_v7, 5 }
 0x2de   : > { %v4901_v53 = vrot.slane %v11036_v44, 6  ;;  %v4065_v16 = vsel %vm9631_vm15, %v4060_v61, %v4064_v59  ;;  %v4304_v48 = vmax.bf16 %v4055_v45, %v11034_v26  ;;  %v4904_v28 = vrot.slane %v11040_v51, 6 }
 0x2df   : > { %v4659_v20 = vrot.slane %v4657_v8, 4  ;;  %v4305_v36 = vmax.bf16 %v4065_v16, %v11036_v44  ;;  %v4658_v40 = vsel %vm9732_vm11, %v4654_v39, %v4657_v8  ;;  %v4664_v10 = vor.u32 %v4663_v47, %v4662_v50 }
 0x2e0   : > { %v4902_v18 = vsel %vm9739_vm12, %v8159_v56, %v4901_v53  ;;  %v12517_v26 = vpack.c.bf16 %v9437_v4, %v9421_v52  ;;  %v4528_v51 = vmax.bf16 %v4422_v62, %v4304_v48  ;;  %v4903_v38 = vrot.slane %v4901_v53, 4  ;;  %v12519_v56 = vld [vmem:[#allocation4_spill] sm:$0xff] }
 0x2e1   : > { %v3754_v44 = vmax.bf16 %v3706_v3, %v11032_v49  ;;  %v3755_v2 = vmax.bf16 %v3707_v60, %v11038_v57  ;;  %v12518_v31 = vpack.c.bf16 %v9518_v43, %v9481_v17  ;;  %v4529_v21 = vmax.bf16 %v4425_v54, %v4305_v36  ;;  %v11113_v17 = vld [vmem:[#allocation2 + $0x70] sm:$0xf]  ;;  %v11115_v43 = vld [vmem:[#allocation2 + $0x74] sm:$0x3] }
 0x2e2   : > { %8563 = vmatmul.mubr.msk.bf16.gmra.mrb[40].mxu0 %vm2840_vm10, %v12517_v26  ;;  %v4665_v52 = vsel %vm9732_vm11, %v4659_v20, %v4664_v10  ;;  %v3756_v4 = vmax.bf16 %v3708_v35, %v11042_v5  ;;  %v3565_v46 = vmax.bf16 %v11081_v30, %v11079_v42  ;;  %v4832_v49 = vmax.bf16 %v4658_v40, %v4528_v51  ;;  %v12520_v3 = vld [vmem:[#allocation3_spill] sm:$0xff]  ;;  %v3807_v42 = vld [vmem:[#allocation2 + $0xa4] sm:$0x3]  ;;  %v3474_v30 = vld [vmem:[#allocation2 + $0x80] sm:$0x3] }
 0x2e3   : > { %8566 = vmatprep.mubr.msk.bf16.mxu0 %vm2840_vm10, %v12518_v31  ;;  %v4905_v57 = vsel %vm9739_vm12, %v4903_v38, %v4904_v28  ;;  %v11109_v55 = vmax.bf16 %v3802_v12, %v3754_v44  ;;  %v11111_v19 = vmax.bf16 %v3803_v1, %v3755_v2  ;;  %v4833_v59 = vmax.bf16 %v4665_v52, %v4529_v21  ;;  %v3614_v31 = vld [vmem:[#allocation2 + $0x88] sm:$0xf] }
 0x2e4   : > { %v11117_v14 = vmax.bf16 %v3804_v13, %v3756_v4  ;;  %v3566_v5 = vmax.bf16 %v11088_v29, %v11113_v17  ;;  %v3567_v63 = vmax.bf16 %v11096_v27, %v11115_v43  ;;  %v5008_v22 = vmax.bf16 %v4902_v18, %v4832_v49  ;;  %v3613_v13 = vld [vmem:[#allocation2 + $0x84] sm:$0xf]  ;;  %v3618_v27 = vld [vmem:[#allocation2 + $0x98] sm:$0x3]  ;;  %v11172_v43 = vld [vmem:[#allocation2 + $0x9c] sm:$0xf] }
 0x2e5   : > { %v4067_v11 = vshrl.u32 %v11109_v55, 16  ;;  %v4070_v23 = vshll.u32 %v11109_v55, 16  ;;  %v4076_v32 = vshll.u32 %v11111_v19, 16  ;;  %v5009_v25 = vmax.bf16 %v4905_v57, %v4833_v59  ;;  %v3615_v57 = vld [vmem:[#allocation2 + $0x8c] sm:$0x3] }
 0x2e6   : > { %v4080_v34 = vshrl.u32 %v11111_v19, 16  ;;  %v4086_v62 = vshll.u32 %v11117_v14, 16  ;;  %v8144_v15 = vrot.slane %v11109_v55, 9  ;;  %v5387_v58 = vrot.slane %v5008_v22, 7  ;;  %v3520_v59 = vld [vmem:[#allocation2 + $0x84] sm:$0xf] }
 0x2e7   : > { %v4069_v41 = vrot.slane %v4067_v11, 4  ;;  %v4072_v9 = vrot.slane %v4070_v23, 5  ;;  %v4078_v7 = vrot.slane %v4076_v32, 5  ;;  %v8176_v47 = vcombine.low %v5008_v22, %v5009_v25 }
 0x2e8   : > { %v5389_v61 = vrot.slane %v5009_v25, 7  ;;  %v4082_v54 = vrot.slane %v4080_v34, 4  ;;  %v4088_v8 = vrot.slane %v4086_v62, 5  ;;  %v12521_v60 = vpack.c.bf16 %v12519_v56, %v12520_v3  ;;  %5501 = vst.msk [vmem:[#allocation2 + $0x6c] sm:$0xe] %vm1110_vm7, %v5387_v58 }
 0x2e9   : > { %v5388_v45 = vrot.slane %v5387_v58, 4  ;;  %v4073_v39 = vor.u32 %v4072_v9, %v4069_v41  ;;  %v4428_v50 = vrot.slane %v11111_v19, 5  ;;  %v4431_v53 = vrot.slane %v11117_v14, 5  ;;  %8601 = vmatmul.mubr.msk.bf16.gmra.mrb[28].mxu1 %vm2840_vm10, %v8176_v47  ;;  %v3709_v25 = vld [vmem:[#allocation2 + $0x90] sm:$0xf] }
 0x2ea   : > { %8567 = vmatmul.mubr.msk.bf16.gmra.mrb[44].mxu0 %vm2840_vm10, %v12521_v60  ;;  %v5391_v35 = vrot.slane %v5389_v61, 4  ;;  %v4083_v16 = vor.u32 %v4082_v54, %v4078_v7  ;;  %v4666_v48 = vrot.slane %v4067_v11, 5  ;;  %v4667_v20 = vrot.slane %v4070_v23, 6  ;;  %v3472_v41 = vld [vmem:[#allocation2 + $0x78] sm:$0xf] }
 0x2eb   : > { %v5390_v28 = vsel %vm9358_vm9, %v5388_v45, %v5389_v61  ;;  %v4074_v36 = vrot.slane %v4073_v39, 4  ;;  %v4429_v40 = vsel %vm9686_vm8, %v8144_v15, %v4428_v50  ;;  %v4430_v10 = vrot.slane %v4428_v50, 4  ;;  %v3473_v9 = vld [vmem:[#allocation2 + $0x7c] sm:$0xf]  ;;  %v3711_v56 = vld [vmem:[#allocation2 + $0x98] sm:$0x3] }
 0x2ec   : > { %v4084_v18 = vrot.slane %v4083_v16, 4  ;;  %v4668_v12 = vor.u32 %v4667_v20, %v4666_v48  ;;  %v4670_v1 = vrot.slane %v4080_v34, 5  ;;  %v4671_v26 = vrot.slane %v4076_v32, 6  ;;  %5502 = vst.msk [vmem:[#allocation2 + $0x70] sm:$0xf] %vm841_vm3, %v5390_v28 }
 0x2ed   : > { %5503 = vst.msk [vmem:[#allocation2 + $0x74] sm:$0x1] %vm856_vm2, %v5391_v35  ;;  %v4079_v51 = vsel %vm9631_vm15, %v4074_v36, %v4078_v7  ;;  %v4432_v38 = vsel %vm9686_vm8, %v4430_v10, %v4431_v53  ;;  %v4675_v44 = vshrl.u32 %v11117_v14, 16  ;;  %v4678_v2 = vrot.slane %v4086_v62, 6  ;;  %v3521_v7 = vld [vmem:[#allocation2 + $0x88] sm:$0xf] }
 0x2ee   : > { %v4089_v21 = vsel %vm9631_vm15, %v4084_v18, %v4088_v8  ;;  %v4306_v52 = vmax.bf16 %v4079_v51, %v11109_v55  ;;  %v4669_v4 = vrot.slane %v4668_v12, 4  ;;  %v4672_v49 = vor.u32 %v4671_v26, %v4670_v1  ;;  %v3522_v39 = vld [vmem:[#allocation2 + $0x8c] sm:$0x3]  ;;  %v3616_v50 = vld [vmem:[#allocation2 + $0x90] sm:$0xf] }
 0x2ef   : > { %v4307_v22 = vmax.bf16 %v4089_v21, %v11111_v19  ;;  %v4677_v11 = vrot.slane %v4675_v44, 5  ;;  %v8160_v23 = vrot.slane %v11109_v55, 10  ;;  %v4908_v32 = vrot.slane %v11111_v19, 6  ;;  %v3710_v55 = vld [vmem:[#allocation2 + $0x94] sm:$0xf] }
 0x2f0   : > { %v4530_v34 = vmax.bf16 %v4429_v40, %v4306_v52  ;;  %v4673_v62 = vsel %vm9732_vm11, %v4669_v4, %v4672_v49  ;;  %v4674_v15 = vrot.slane %v4672_v49, 4  ;;  %v4911_v58 = vrot.slane %v11117_v14, 6  ;;  %v3805_v19 = vld [vmem:[#allocation2 + $0x9c] sm:$0xf]  ;;  %v3617_v53 = vld [vmem:[#allocation2 + $0x94] sm:$0xf] }
 0x2f1   : > { %v4531_v47 = vmax.bf16 %v4432_v38, %v4307_v22  ;;  %v4679_v61 = vor.u32 %v4678_v2, %v4677_v11  ;;  %v4909_v54 = vsel %vm9739_vm12, %v8160_v23, %v4908_v32  ;;  %v4910_v8 = vrot.slane %v4908_v32, 4  ;;  %v3806_v48 = vld [vmem:[#allocation2 + $0xa0] sm:$0xf] }
 0x2f2   : > { %v4834_v3 = vmax.bf16 %v4673_v62, %v4530_v34  ;;  %v3661_v60 = vmax.bf16 %v3613_v13, %v3565_v46  ;;  %v3662_v14 = vmax.bf16 %v3614_v31, %v3566_v5  ;;  %v3663_v45 = vmax.bf16 %v3615_v57, %v3567_v63  ;;  %v11174_v63 = vld [vmem:[#allocation2 + $0xa0] sm:$0xf] }
 0x2f3   : > { %v4680_v35 = vsel %vm9732_vm11, %v4674_v15, %v4679_v61  ;;  %v4912_v16 = vsel %vm9739_vm12, %v4910_v8, %v4911_v58  ;;  %v3568_v46 = vmax.bf16 %v3520_v59, %v3472_v41  ;;  %v3569_v20 = vmax.bf16 %v3521_v7, %v3473_v9 }
 0x2f4   : > { %v4835_v29 = vmax.bf16 %v4680_v35, %v4531_v47  ;;  %v5010_v17 = vmax.bf16 %v4909_v54, %v4834_v3  ;;  %v3757_v5 = vmax.bf16 %v3709_v25, %v3661_v60  ;;  %v3758_v28 = vmax.bf16 %v3710_v55, %v3662_v14 }
 0x2f5   : > { %v3759_v36 = vmax.bf16 %v3711_v56, %v3663_v45  ;;  %v3570_v40 = vmax.bf16 %v3522_v39, %v3474_v30  ;;  %v11176_v10 = vmax.bf16 %v3616_v50, %v3568_v46  ;;  %v11178_v18 = vmax.bf16 %v3617_v53, %v3569_v20 }
 0x2f6   : > { %v5011_v12 = vmax.bf16 %v4912_v16, %v4835_v29  ;;  %v5392_v1 = vrot.slane %v5010_v17, 7  ;;  %v3853_v26 = vmax.bf16 %v3805_v19, %v3757_v5  ;;  %v3854_v51 = vmax.bf16 %v3806_v48, %v3758_v28 }
 0x2f7   : > { %v11180_v38 = vmax.bf16 %v3807_v42, %v3759_v36  ;;  %v11182_v44 = vmax.bf16 %v3618_v27, %v3570_v40  ;;  %v3760_v2 = vmax.bf16 %v11172_v43, %v11176_v10  ;;  %v3761_v13 = vmax.bf16 %v11174_v63, %v11178_v18  ;;  %v3714_v42 = vld [vmem:[#allocation2 + $0xa4] sm:$0x3]  ;;  %v3809_v40 = vld [vmem:[#allocation2 + $0xac] sm:$0xf] }
 0x2f8   : > { %v8177_v31 = vcombine.low %v5010_v17, %v5011_v12  ;;  %v5393_v21 = vrot.slane %v5392_v1, 4  ;;  %v5394_v52 = vrot.slane %v5011_v12, 7  ;;  %v4091_v4 = vshrl.u32 %v3853_v26, 16  ;;  %5504 = vst.msk [vmem:[#allocation2 + $0x78] sm:$0xe] %vm1110_vm7, %v5392_v1 }
 0x2f9   : > { %v4094_v49 = vshll.u32 %v3853_v26, 16  ;;  %v4100_v57 = vshll.u32 %v3854_v51, 16  ;;  %v4104_v59 = vshrl.u32 %v3854_v51, 16  ;;  %v4110_v22 = vshll.u32 %v11180_v38, 16  ;;  %v3808_v17 = vld [vmem:[#allocation2 + $0xa8] sm:$0xf] }
 0x2fa   : > { %8604 = vmatprep.mubr.msk.bf16.mxu1 %vm2840_vm10, %v8177_v31  ;;  %v5395_v11 = vsel %vm9358_vm9, %v5393_v21, %v5394_v52  ;;  %v5396_v23 = vrot.slane %v5394_v52, 4  ;;  %v4093_v32 = vrot.slane %v4091_v4, 4  ;;  %v8145_v25 = vrot.slane %v3853_v26, 9  ;;  %v3810_v12 = vld [vmem:[#allocation2 + $0xb0] sm:$0x3] }
 0x2fb   : > { %v4096_v34 = vrot.slane %v4094_v49, 5  ;;  %v4102_v62 = vrot.slane %v4100_v57, 5  ;;  %v4106_v15 = vrot.slane %v4104_v59, 4  ;;  %v4112_v58 = vrot.slane %v4110_v22, 5  ;;  %5505 = vst.msk [vmem:[#allocation2 + $0x7c] sm:$0xf] %vm841_vm3, %v5395_v11 }
 0x2fc   : > { %v4435_v41 = vrot.slane %v3854_v51, 5  ;;  %v4438_v9 = vrot.slane %v11180_v38, 5  ;;  %v4681_v7 = vrot.slane %v4091_v4, 5  ;;  %v4682_v47 = vrot.slane %v4094_v49, 6  ;;  %5506 = vst.msk [vmem:[#allocation2 + $0x80] sm:$0x1] %vm856_vm2, %v5396_v23 }
 0x2fd   : > { %v4097_v61 = vor.u32 %v4096_v34, %v4093_v32  ;;  %v4107_v54 = vor.u32 %v4106_v15, %v4102_v62  ;;  %v4685_v8 = vrot.slane %v4104_v59, 5  ;;  %v4686_v55 = vrot.slane %v4100_v57, 6  ;;  %v11207_v1 = vld [vmem:[#allocation2 + $0x90] sm:$0xf]  ;;  %v11220_v59 = vld [vmem:[#allocation2 + $0x84] sm:$0xf] }
 0x2fe   : > { %v4436_v56 = vsel %vm9686_vm8, %v8145_v25, %v4435_v41  ;;  %v4437_v19 = vrot.slane %v4435_v41, 4  ;;  %v4683_v3 = vor.u32 %v4682_v47, %v4681_v7  ;;  %v4690_v60 = vshrl.u32 %v11180_v38, 16 }
 0x2ff   : > { %v4098_v14 = vrot.slane %v4097_v61, 4  ;;  %v4108_v45 = vrot.slane %v4107_v54, 4  ;;  %v4687_v39 = vor.u32 %v4686_v55, %v4685_v8  ;;  %v4693_v50 = vrot.slane %v4110_v22, 6 }
 0x300   : > { %v4439_v53 = vsel %vm9686_vm8, %v4437_v19, %v4438_v9  ;;  %v4684_v35 = vrot.slane %v4683_v3, 4  ;;  %v4692_v16 = vrot.slane %v4690_v60, 5  ;;  %v8161_v48 = vrot.slane %v3853_v26, 10 }
 0x301   : > { %v4103_v30 = vsel %vm9631_vm15, %v4098_v14, %v4102_v62  ;;  %v4113_v46 = vsel %vm9631_vm15, %v4108_v45, %v4112_v58  ;;  %v4689_v20 = vrot.slane %v4687_v39, 4  ;;  %v4915_v29 = vrot.slane %v3854_v51, 6 }
 0x302   : > { %v4308_v5 = vmax.bf16 %v4103_v30, %v3853_v26  ;;  %v4309_v28 = vmax.bf16 %v4113_v46, %v3854_v51  ;;  %v4688_v27 = vsel %vm9732_vm11, %v4684_v35, %v4687_v39  ;;  %v4694_v36 = vor.u32 %v4693_v50, %v4692_v16 }
 0x303   : > { %v4916_v31 = vsel %vm9739_vm12, %v8161_v48, %v4915_v29  ;;  %v4917_v21 = vrot.slane %v4915_v29, 4  ;;  %v4918_v52 = vrot.slane %v11180_v38, 6  ;;  %v3762_v4 = vmax.bf16 %v3714_v42, %v11182_v44  ;;  %v3477_v48 = vld [vmem:[#allocation2 + $0x8c] sm:$0x3]  ;;  %v3476_v29 = vld [vmem:[#allocation2 + $0x88] sm:$0xf] }
 0x304   : > { %v4532_v49 = vmax.bf16 %v4436_v56, %v4308_v5  ;;  %v4533_v57 = vmax.bf16 %v4439_v53, %v4309_v28  ;;  %v4695_v26 = vsel %vm9732_vm11, %v4689_v20, %v4694_v36  ;;  %v11218_v51 = vmax.bf16 %v3808_v17, %v3760_v2  ;;  %v3524_v36 = vld [vmem:[#allocation2 + $0x94] sm:$0xf] }
 0x305   : > { %v4919_v22 = vsel %vm9739_vm12, %v4917_v21, %v4918_v52  ;;  %v11227_v38 = vmax.bf16 %v3809_v40, %v3761_v13  ;;  %v11229_v44 = vmax.bf16 %v3810_v12, %v3762_v4  ;;  %v3571_v11 = vmax.bf16 %v11207_v1, %v11220_v59  ;;  %v3525_v40 = vld [vmem:[#allocation2 + $0x98] sm:$0x3]  ;;  %v3619_v4 = vld [vmem:[#allocation2 + $0x9c] sm:$0xf]  ;;  %v3624_v59 = vld [vmem:[#allocation2 + $0xb0] sm:$0x3] }
 0x306   : > { %v4836_v23 = vmax.bf16 %v4688_v27, %v4532_v49  ;;  %v4837_v32 = vmax.bf16 %v4695_v26, %v4533_v57  ;;  %v4115_v43 = vshrl.u32 %v11218_v51, 16  ;;  %v4118_v10 = vshll.u32 %v11218_v51, 16  ;;  %v3620_v49 = vld [vmem:[#allocation2 + $0xa0] sm:$0xf] }
 0x307   : > { %v4124_v2 = vshll.u32 %v11227_v38, 16  ;;  %v4128_v25 = vshrl.u32 %v11227_v38, 16  ;;  %v4134_v34 = vshll.u32 %v11229_v44, 16  ;;  %v8146_v63 = vrot.slane %v11218_v51, 9 }
 0x308   : > { %v5012_v18 = vmax.bf16 %v4916_v31, %v4836_v23  ;;  %v5013_v13 = vmax.bf16 %v4919_v22, %v4837_v32  ;;  %v4117_v62 = vrot.slane %v4115_v43, 4  ;;  %v4120_v15 = vrot.slane %v4118_v10, 5  ;;  %v3621_v32 = vld [vmem:[#allocation2 + $0xa4] sm:$0x3] }
 0x309   : > { %v4126_v58 = vrot.slane %v4124_v2, 5  ;;  %v4130_v41 = vrot.slane %v4128_v25, 4  ;;  %v4136_v9 = vrot.slane %v4134_v34, 5  ;;  %v4442_v7 = vrot.slane %v11227_v38, 5 }
 0x30a   : > { %v8178_v47 = vcombine.low %v5012_v18, %v5013_v13  ;;  %v5397_v61 = vrot.slane %v5012_v18, 7  ;;  %v5399_v54 = vrot.slane %v5013_v13, 7  ;;  %v4121_v8 = vor.u32 %v4120_v15, %v4117_v62  ;;  %v3526_v18 = vld [vmem:[#allocation2 + $0x9c] sm:$0xf] }
 0x30b   : > { %v4131_v55 = vor.u32 %v4130_v41, %v4126_v58  ;;  %v4443_v56 = vsel %vm9686_vm8, %v8146_v63, %v4442_v7  ;;  %v4444_v19 = vrot.slane %v4442_v7, 4  ;;  %v4445_v3 = vrot.slane %v11229_v44, 5  ;;  %v3478_v63 = vld [vmem:[#allocation2 + $0x90] sm:$0xf]  ;;  %v3527_v41 = vld [vmem:[#allocation2 + $0xa0] sm:$0xf] }
 0x30c   : > { %8605 = vmatmul.mubr.msk.bf16.gmra.mrb[0].mxu1 %vm2840_vm10, %v8178_v47  ;;  %v5398_v60 = vrot.slane %v5397_v61, 4  ;;  %v5401_v14 = vrot.slane %v5399_v54, 4  ;;  %v4122_v45 = vrot.slane %v4121_v8, 4  ;;  %v4696_v39 = vrot.slane %v4115_v43, 5  ;;  %5507 = vst.msk [vmem:[#allocation2 + $0x84] sm:$0xe] %vm1110_vm7, %v5397_v61 }
 0x30d   : > { %v4132_v50 = vrot.slane %v4131_v55, 4  ;;  %v4446_v53 = vsel %vm9686_vm8, %v4444_v19, %v4445_v3  ;;  %v4697_v35 = vrot.slane %v4118_v10, 6  ;;  %v4700_v16 = vrot.slane %v4128_v25, 5  ;;  %v3717_v61 = vld [vmem:[#allocation2 + $0xb0] sm:$0x3] }
 0x30e   : > { %v5400_v42 = vsel %vm9358_vm9, %v5398_v60, %v5399_v54  ;;  %v4127_v30 = vsel %vm9631_vm15, %v4122_v45, %v4126_v58  ;;  %v4701_v46 = vrot.slane %v4124_v2, 6  ;;  %v4705_v20 = vshrl.u32 %v11229_v44, 16  ;;  %5509 = vst.msk [vmem:[#allocation2 + $0x8c] sm:$0x1] %vm856_vm2, %v5401_v14  ;;  %v3716_v58 = vld [vmem:[#allocation2 + $0xac] sm:$0xf] }
 0x30f   : > { %v4137_v17 = vsel %vm9631_vm15, %v4132_v50, %v4136_v9  ;;  %v4310_v5 = vmax.bf16 %v4127_v30, %v11218_v51  ;;  %v4698_v28 = vor.u32 %v4697_v35, %v4696_v39  ;;  %v4708_v27 = vrot.slane %v4134_v34, 6  ;;  %5508 = vst.msk [vmem:[#allocation2 + $0x88] sm:$0xf] %vm841_vm3, %v5400_v42  ;;  %v3715_v34 = vld [vmem:[#allocation2 + $0xa8] sm:$0xf] }
 0x310   : > { %v4311_v12 = vmax.bf16 %v4137_v17, %v11227_v38  ;;  %v4702_v31 = vor.u32 %v4701_v46, %v4700_v16  ;;  %v4707_v21 = vrot.slane %v4705_v20, 5  ;;  %v8162_v52 = vrot.slane %v11218_v51, 10  ;;  %v3528_v54 = vld [vmem:[#allocation2 + $0xa4] sm:$0x3]  ;;  %v3622_v8 = vld [vmem:[#allocation2 + $0xa8] sm:$0xf] }
 0x311   : > { %v4534_v57 = vmax.bf16 %v4443_v56, %v4310_v5  ;;  %v4699_v26 = vrot.slane %v4698_v28, 4  ;;  %v4922_v22 = vrot.slane %v11227_v38, 6  ;;  %v4925_v23 = vrot.slane %v11229_v44, 6  ;;  %v3479_v38 = vld [vmem:[#allocation2 + $0x94] sm:$0xf] }
 0x312   : > { %v4535_v43 = vmax.bf16 %v4446_v53, %v4311_v12  ;;  %v4704_v10 = vrot.slane %v4702_v31, 4  ;;  %v4709_v2 = vor.u32 %v4708_v27, %v4707_v21  ;;  %v3572_v25 = vmax.bf16 %v3524_v36, %v3476_v29  ;;  %v3811_v3 = vld [vmem:[#allocation2 + $0xb4] sm:$0xf]  ;;  %v3812_v60 = vld [vmem:[#allocation2 + $0xb8] sm:$0xf] }
 0x313   : > { %v4703_v13 = vsel %vm9732_vm11, %v4699_v26, %v4702_v31  ;;  %v4923_v51 = vsel %vm9739_vm12, %v8162_v52, %v4922_v22  ;;  %v4924_v62 = vrot.slane %v4922_v22, 4  ;;  %v3573_v15 = vmax.bf16 %v3525_v40, %v3477_v48  ;;  %v3623_v45 = vld [vmem:[#allocation2 + $0xac] sm:$0xf]  ;;  %v3813_v35 = vld [vmem:[#allocation2 + $0xbc] sm:$0x3] }
 0x314   : > { %v4710_v44 = vsel %vm9732_vm11, %v4704_v10, %v4709_v2  ;;  %v4838_v9 = vmax.bf16 %v4703_v13, %v4534_v57  ;;  %v3667_v7 = vmax.bf16 %v3619_v4, %v3571_v11  ;;  %v3668_v47 = vmax.bf16 %v3620_v49, %v3572_v25  ;;  %v3480_v16 = vld [vmem:[#allocation2 + $0x98] sm:$0x3] }
 0x315   : > { %v4839_v55 = vmax.bf16 %v4710_v44, %v4535_v43  ;;  %v4926_v56 = vsel %vm9739_vm12, %v4924_v62, %v4925_v23  ;;  %v3669_v19 = vmax.bf16 %v3621_v32, %v3573_v15  ;;  %v3574_v14 = vmax.bf16 %v3526_v18, %v3478_v63 }
 0x316   : > { %v5014_v39 = vmax.bf16 %v4923_v51, %v4838_v9  ;;  %v3763_v50 = vmax.bf16 %v3715_v34, %v3667_v7  ;;  %v3764_v53 = vmax.bf16 %v3716_v58, %v3668_v47  ;;  %v3575_v1 = vmax.bf16 %v3527_v41, %v3479_v38 }
 0x317   : > { %v5015_v11 = vmax.bf16 %v4926_v56, %v4839_v55  ;;  %v3765_v48 = vmax.bf16 %v3717_v61, %v3669_v19  ;;  %v3576_v42 = vmax.bf16 %v3528_v54, %v3480_v16  ;;  %v11272_v30 = vmax.bf16 %v3622_v8, %v3574_v14  ;;  %v3718_v8 = vld [vmem:[#allocation2 + $0xb4] sm:$0xf]  ;;  %v3719_v55 = vld [vmem:[#allocation2 + $0xb8] sm:$0xf]  ;;  %v3720_v14 = vld [vmem:[#allocation2 + $0xbc] sm:$0x3] }
 0x318   : > { %v5402_v46 = vrot.slane %v5014_v39, 7  ;;  %v3859_v20 = vmax.bf16 %v3811_v3, %v3763_v50  ;;  %v11274_v29 = vmax.bf16 %v3812_v60, %v3764_v53  ;;  %v11276_v17 = vmax.bf16 %v3623_v45, %v3575_v1  ;;  %v11304_v16 = vld [vmem:[#allocation2 + $0xa8] sm:$0xf] }
 0x319   : > { %v8179_v5 = vcombine.low %v5014_v39, %v5015_v11  ;;  %v5404_v28 = vrot.slane %v5015_v11, 7  ;;  %v11278_v27 = vmax.bf16 %v3813_v35, %v3765_v48  ;;  %v11280_v36 = vmax.bf16 %v3624_v59, %v3576_v42  ;;  %v3814_v35 = vld [vmem:[#allocation2 + $0xc0] sm:$0xf]  ;;  %v3815_v42 = vld [vmem:[#allocation2 + $0xc4] sm:$0xf] }
 0x31a   : > { %v5403_v40 = vrot.slane %v5402_v46, 4  ;;  %v4139_v12 = vshrl.u32 %v3859_v20, 16  ;;  %v4142_v31 = vshll.u32 %v3859_v20, 16  ;;  %v4148_v21 = vshll.u32 %v11274_v29, 16  ;;  %5510 = vst.msk [vmem:[#allocation2 + $0x90] sm:$0xe] %vm1110_vm7, %v5402_v46 }
 0x31b   : > { %8608 = vmatprep.mubr.msk.bf16.mxu1 %vm2840_vm10, %v8179_v5  ;;  %v5406_v52 = vrot.slane %v5404_v28, 4  ;;  %v4152_v4 = vshrl.u32 %v11274_v29, 16  ;;  %v4158_v49 = vshll.u32 %v11278_v27, 16  ;;  %v8147_v57 = vrot.slane %v3859_v20, 9  ;;  %v3816_v46 = vld [vmem:[#allocation2 + $0xc8] sm:$0x3] }
 0x31c   : > { %v5405_v26 = vsel %vm9358_vm9, %v5403_v40, %v5404_v28  ;;  %v4141_v22 = vrot.slane %v4139_v12, 4  ;;  %v4144_v23 = vrot.slane %v4142_v31, 5  ;;  %v4150_v32 = vrot.slane %v4148_v21, 5  ;;  %v11311_v5 = vld [vmem:[#allocation2 + $0x9c] sm:$0xf] }
 0x31d   : > { %v4154_v43 = vrot.slane %v4152_v4, 4  ;;  %v4160_v10 = vrot.slane %v4158_v49, 5  ;;  %v4449_v2 = vrot.slane %v11274_v29, 5  ;;  %v4452_v25 = vrot.slane %v11278_v27, 5  ;;  %5511 = vst.msk [vmem:[#allocation2 + $0x94] sm:$0xf] %vm841_vm3, %v5405_v26 }
 0x31e   : > { %5512 = vst.msk [vmem:[#allocation2 + $0x98] sm:$0x1] %vm856_vm2, %v5406_v52  ;;  %v4145_v34 = vor.u32 %v4144_v23, %v4141_v22  ;;  %v4711_v63 = vrot.slane %v4139_v12, 5  ;;  %v4712_v18 = vrot.slane %v4142_v31, 6  ;;  %v4715_v13 = vrot.slane %v4152_v4, 5 }
 0x31f   : > { %v4155_v51 = vor.u32 %v4154_v43, %v4150_v32  ;;  %v4450_v62 = vsel %vm9686_vm8, %v8147_v57, %v4449_v2  ;;  %v4451_v15 = vrot.slane %v4449_v2, 4  ;;  %v4716_v58 = vrot.slane %v4148_v21, 6  ;;  %v11315_v12 = vld [vmem:[#allocation2 + $0xac] sm:$0xf]  ;;  %v11330_v26 = vld [vmem:[#allocation2 + $0xa0] sm:$0xf] }
 0x320   : > { %v4146_v38 = vrot.slane %v4145_v34, 4  ;;  %v4713_v41 = vor.u32 %v4712_v18, %v4711_v63  ;;  %v4720_v44 = vshrl.u32 %v11278_v27, 16  ;;  %v4723_v9 = vrot.slane %v4158_v49, 6  ;;  %v11332_v22 = vld [vmem:[#allocation2 + $0xa4] sm:$0x3] }
 0x321   : > { %v4156_v7 = vrot.slane %v4155_v51, 4  ;;  %v4453_v47 = vsel %vm9686_vm8, %v4451_v15, %v4452_v25  ;;  %v4717_v61 = vor.u32 %v4716_v58, %v4715_v13  ;;  %v8163_v54 = vrot.slane %v3859_v20, 10 }
 0x322   : > { %v4151_v56 = vsel %vm9631_vm15, %v4146_v38, %v4150_v32  ;;  %v4714_v19 = vrot.slane %v4713_v41, 4  ;;  %v4722_v3 = vrot.slane %v4720_v44, 5  ;;  %v4929_v60 = vrot.slane %v11274_v29, 6 }
 0x323   : > { %v4161_v45 = vsel %vm9631_vm15, %v4156_v7, %v4160_v10  ;;  %v4312_v39 = vmax.bf16 %v4151_v56, %v3859_v20  ;;  %v4719_v50 = vrot.slane %v4717_v61, 4  ;;  %v4932_v53 = vrot.slane %v11278_v27, 6 }
 0x324   : > { %v4313_v1 = vmax.bf16 %v4161_v45, %v11274_v29  ;;  %v4718_v59 = vsel %vm9732_vm11, %v4714_v19, %v4717_v61  ;;  %v4724_v11 = vor.u32 %v4723_v9, %v4722_v3  ;;  %v4930_v48 = vsel %vm9739_vm12, %v8163_v54, %v4929_v60  ;;  %v11317_v29 = vld [vmem:[#allocation2 + $0xb0] sm:$0x3] }
 0x325   : > { %v4536_v20 = vmax.bf16 %v4450_v62, %v4312_v39  ;;  %v4931_v28 = vrot.slane %v4929_v60, 4  ;;  %v3766_v27 = vmax.bf16 %v3718_v8, %v11272_v30  ;;  %v3767_v40 = vmax.bf16 %v3719_v55, %v11276_v17 }
 0x326   : > { %v4537_v31 = vmax.bf16 %v4453_v47, %v4313_v1  ;;  %v4725_v21 = vsel %vm9732_vm11, %v4719_v50, %v4724_v11  ;;  %v3768_v52 = vmax.bf16 %v3720_v14, %v11280_v36  ;;  %v3577_v4 = vmax.bf16 %v11304_v16, %v11311_v5  ;;  %v3818_v16 = vld [vmem:[#allocation2 + $0xd0] sm:$0xf] }
 0x327   : > { %v4840_v49 = vmax.bf16 %v4718_v59, %v4536_v20  ;;  %v4933_v57 = vsel %vm9739_vm12, %v4931_v28, %v4932_v53  ;;  %v11326_v30 = vmax.bf16 %v3814_v35, %v3766_v27  ;;  %v11328_v17 = vmax.bf16 %v3815_v42, %v3767_v40 }
 0x328   : > { %v4841_v23 = vmax.bf16 %v4725_v21, %v4537_v31  ;;  %v11334_v32 = vmax.bf16 %v3816_v46, %v3768_v52  ;;  %v3578_v36 = vmax.bf16 %v11315_v12, %v11330_v26  ;;  %v3579_v43 = vmax.bf16 %v11317_v29, %v11332_v22  ;;  %v3625_v46 = vld [vmem:[#allocation2 + $0xb4] sm:$0xf]  ;;  %v3626_v31 = vld [vmem:[#allocation2 + $0xb8] sm:$0xf]  ;;  %v3627_v21 = vld [vmem:[#allocation2 + $0xbc] sm:$0x3] }
 0x329   : > { %v5016_v10 = vmax.bf16 %v4930_v48, %v4840_v49  ;;  %v4163_v2 = vshrl.u32 %v11326_v30, 16  ;;  %v4166_v25 = vshll.u32 %v11326_v30, 16  ;;  %v4172_v34 = vshll.u32 %v11328_v17, 16  ;;  %v3819_v29 = vld [vmem:[#allocation2 + $0xd4] sm:$0x3] }
 0x32a   : > { %v5017_v63 = vmax.bf16 %v4933_v57, %v4841_v23  ;;  %v4176_v18 = vshrl.u32 %v11328_v17, 16  ;;  %v4182_v13 = vshll.u32 %v11334_v32, 16  ;;  %v8148_v51 = vrot.slane %v11326_v30, 9  ;;  %v11385_v22 = vld [vmem:[#allocation2 + $0xcc] sm:$0xf] }
 0x32b   : > { %v5407_v62 = vrot.slane %v5016_v10, 7  ;;  %v4165_v15 = vrot.slane %v4163_v2, 4  ;;  %v4168_v58 = vrot.slane %v4166_v25, 5  ;;  %v4174_v38 = vrot.slane %v4172_v34, 5 }
 0x32c   : > { %v8180_v41 = vcombine.low %v5016_v10, %v5017_v63  ;;  %v5409_v44 = vrot.slane %v5017_v63, 7  ;;  %v4178_v9 = vrot.slane %v4176_v18, 4  ;;  %v4184_v7 = vrot.slane %v4182_v13, 5  ;;  %v3721_v10 = vld [vmem:[#allocation2 + $0xc0] sm:$0xf] }
 0x32d   : > { %v5408_v47 = vrot.slane %v5407_v62, 4  ;;  %v4169_v61 = vor.u32 %v4168_v58, %v4165_v15  ;;  %v4456_v54 = vrot.slane %v11328_v17, 5  ;;  %v4459_v8 = vrot.slane %v11334_v32, 5  ;;  %5513 = vst.msk [vmem:[#allocation2 + $0x9c] sm:$0xe] %vm1110_vm7, %v5407_v62 }
 0x32e   : > { %8609 = vmatmul.mubr.msk.bf16.gmra.mrb[4].mxu1 %vm2840_vm10, %v8180_v41  ;;  %v5411_v55 = vrot.slane %v5409_v44, 4  ;;  %v4179_v56 = vor.u32 %v4178_v9, %v4174_v38  ;;  %v4726_v19 = vrot.slane %v4163_v2, 5  ;;  %v4727_v3 = vrot.slane %v4166_v25, 6  ;;  %v3722_v2 = vld [vmem:[#allocation2 + $0xc4] sm:$0xf] }
 0x32f   : > { %v5410_v60 = vsel %vm9358_vm9, %v5408_v47, %v5409_v44  ;;  %v4170_v14 = vrot.slane %v4169_v61, 4  ;;  %v4457_v45 = vsel %vm9686_vm8, %v8148_v51, %v4456_v54  ;;  %v4458_v39 = vrot.slane %v4456_v54, 4  ;;  %v3484_v51 = vld [vmem:[#allocation2 + $0xa8] sm:$0xf]  ;;  %v3532_v62 = vld [vmem:[#allocation2 + $0xb4] sm:$0xf] }
 0x330   : > { %v4180_v50 = vrot.slane %v4179_v56, 4  ;;  %v4728_v53 = vor.u32 %v4727_v3, %v4726_v19  ;;  %v4730_v35 = vrot.slane %v4176_v18, 5  ;;  %v4731_v1 = vrot.slane %v4172_v34, 6  ;;  %5514 = vst.msk [vmem:[#allocation2 + $0xa0] sm:$0xf] %vm841_vm3, %v5410_v60 }
 0x331   : > { %5515 = vst.msk [vmem:[#allocation2 + $0xa4] sm:$0x1] %vm856_vm2, %v5411_v55  ;;  %v4175_v59 = vsel %vm9631_vm15, %v4170_v14, %v4174_v38  ;;  %v4460_v11 = vsel %vm9686_vm8, %v4458_v39, %v4459_v8  ;;  %v4735_v48 = vshrl.u32 %v11334_v32, 16  ;;  %v4738_v42 = vrot.slane %v4182_v13, 6  ;;  %v3723_v13 = vld [vmem:[#allocation2 + $0xc8] sm:$0x3] }
 0x332   : > { %v4185_v20 = vsel %vm9631_vm15, %v4180_v50, %v4184_v7  ;;  %v4314_v28 = vmax.bf16 %v4175_v59, %v11326_v30  ;;  %v4729_v27 = vrot.slane %v4728_v53, 4  ;;  %v4732_v40 = vor.u32 %v4731_v1, %v4730_v35  ;;  %v3533_v15 = vld [vmem:[#allocation2 + $0xb8] sm:$0xf]  ;;  %v3628_v44 = vld [vmem:[#allocation2 + $0xc0] sm:$0xf] }
 0x333   : > { %v4315_v52 = vmax.bf16 %v4185_v20, %v11328_v17  ;;  %v4737_v49 = vrot.slane %v4735_v48, 5  ;;  %v8164_v57 = vrot.slane %v11326_v30, 10  ;;  %v4936_v23 = vrot.slane %v11328_v17, 6  ;;  %v3485_v17 = vld [vmem:[#allocation2 + $0xac] sm:$0xf] }
 0x334   : > { %v4538_v25 = vmax.bf16 %v4457_v45, %v4314_v28  ;;  %v4733_v34 = vsel %vm9732_vm11, %v4729_v27, %v4732_v40  ;;  %v4734_v63 = vrot.slane %v4732_v40, 4  ;;  %v4939_v18 = vrot.slane %v11334_v32, 6  ;;  %v3486_v61 = vld [vmem:[#allocation2 + $0xb0] sm:$0x3]  ;;  %v3534_v54 = vld [vmem:[#allocation2 + $0xbc] sm:$0x3] }
 0x335   : > { %v4539_v58 = vmax.bf16 %v4460_v11, %v4315_v52  ;;  %v4739_v38 = vor.u32 %v4738_v42, %v4737_v49  ;;  %v4937_v30 = vsel %vm9739_vm12, %v8164_v57, %v4936_v23  ;;  %v4938_v41 = vrot.slane %v4936_v23, 4  ;;  %v3629_v8 = vld [vmem:[#allocation2 + $0xc4] sm:$0xf]  ;;  %v3817_v19 = vld [vmem:[#allocation2 + $0xcc] sm:$0xf] }
 0x336   : > { %v4842_v9 = vmax.bf16 %v4733_v34, %v4538_v25  ;;  %v3673_v7 = vmax.bf16 %v3625_v46, %v3577_v4  ;;  %v3674_v32 = vmax.bf16 %v3626_v31, %v3578_v36  ;;  %v3675_v47 = vmax.bf16 %v3627_v21, %v3579_v43  ;;  %v3630_v3 = vld [vmem:[#allocation2 + $0xc8] sm:$0x3]  ;;  %v11387_v43 = vld [vmem:[#allocation2 + $0xd0] sm:$0xf] }
 0x337   : > { %v4740_v55 = vsel %vm9732_vm11, %v4734_v63, %v4739_v38  ;;  %v4940_v56 = vsel %vm9739_vm12, %v4938_v41, %v4939_v18  ;;  %v3580_v5 = vmax.bf16 %v3532_v62, %v3484_v51  ;;  %v3581_v4 = vmax.bf16 %v3533_v15, %v3485_v17 }
 0x338   : > { %v4843_v12 = vmax.bf16 %v4740_v55, %v4539_v58  ;;  %v5018_v26 = vmax.bf16 %v4937_v30, %v4842_v9  ;;  %v3769_v36 = vmax.bf16 %v3721_v10, %v3673_v7  ;;  %v3770_v60 = vmax.bf16 %v3722_v2, %v3674_v32 }
 0x339   : > { %v3771_v14 = vmax.bf16 %v3723_v13, %v3675_v47  ;;  %v3582_v45 = vmax.bf16 %v3534_v54, %v3486_v61  ;;  %v11389_v39 = vmax.bf16 %v3628_v44, %v3580_v5  ;;  %v11391_v50 = vmax.bf16 %v3629_v8, %v3581_v4 }
 0x33a   : > { %v5019_v53 = vmax.bf16 %v4940_v56, %v4843_v12  ;;  %v5412_v35 = vrot.slane %v5018_v26, 7  ;;  %v3865_v1 = vmax.bf16 %v3817_v19, %v3769_v36  ;;  %v3866_v59 = vmax.bf16 %v3818_v16, %v3770_v60  ;;  %v3726_v16 = vld [vmem:[#allocation2 + $0xd4] sm:$0x3] }
 0x33b   : > { %v11393_v11 = vmax.bf16 %v3819_v29, %v3771_v14  ;;  %v11395_v48 = vmax.bf16 %v3630_v3, %v3582_v45  ;;  %v3772_v42 = vmax.bf16 %v11385_v22, %v11389_v39  ;;  %v3773_v46 = vmax.bf16 %v11387_v43, %v11391_v50  ;;  %v3821_v45 = vld [vmem:[#allocation2 + $0xdc] sm:$0xf] }
 0x33c   : > { %v8181_v20 = vcombine.low %v5018_v26, %v5019_v53  ;;  %v5413_v28 = vrot.slane %v5412_v35, 4  ;;  %v5414_v27 = vrot.slane %v5019_v53, 7  ;;  %v4187_v40 = vshrl.u32 %v3865_v1, 16  ;;  %5516 = vst.msk [vmem:[#allocation2 + $0xa8] sm:$0xe] %vm1110_vm7, %v5412_v35 }
 0x33d   : > { %v4190_v31 = vshll.u32 %v3865_v1, 16  ;;  %v4196_v21 = vshll.u32 %v3866_v59, 16  ;;  %v4200_v52 = vshrl.u32 %v3866_v59, 16  ;;  %v4206_v49 = vshll.u32 %v11393_v11, 16  ;;  %v3820_v26 = vld [vmem:[#allocation2 + $0xd8] sm:$0xf] }
 0x33e   : > { %8612 = vmatprep.mubr.msk.bf16.mxu1 %vm2840_vm10, %v8181_v20  ;;  %v5415_v57 = vsel %vm9358_vm9, %v5413_v28, %v5414_v27  ;;  %v5416_v23 = vrot.slane %v5414_v27, 4  ;;  %v4189_v10 = vrot.slane %v4187_v40, 4  ;;  %v8149_v2 = vrot.slane %v3865_v1, 9  ;;  %v3822_v53 = vld [vmem:[#allocation2 + $0xe0] sm:$0x3] }
 0x33f   : > { %v4192_v25 = vrot.slane %v4190_v31, 5  ;;  %v4198_v34 = vrot.slane %v4196_v21, 5  ;;  %v4202_v63 = vrot.slane %v4200_v52, 4  ;;  %v4208_v18 = vrot.slane %v4206_v49, 5  ;;  %5517 = vst.msk [vmem:[#allocation2 + $0xac] sm:$0xf] %vm841_vm3, %v5415_v57 }
 0x340   : > { %v4463_v13 = vrot.slane %v3866_v59, 5  ;;  %v4466_v51 = vrot.slane %v11393_v11, 5  ;;  %v4741_v62 = vrot.slane %v4187_v40, 5  ;;  %v4742_v15 = vrot.slane %v4190_v31, 6  ;;  %5518 = vst.msk [vmem:[#allocation2 + $0xb0] sm:$0x1] %vm856_vm2, %v5416_v23 }
 0x341   : > { %v4193_v58 = vor.u32 %v4192_v25, %v4189_v10  ;;  %v4203_v38 = vor.u32 %v4202_v63, %v4198_v34  ;;  %v4745_v30 = vrot.slane %v4200_v52, 5  ;;  %v4746_v41 = vrot.slane %v4196_v21, 6  ;;  %v11420_v35 = vld [vmem:[#allocation2 + $0xc0] sm:$0xf]  ;;  %v11433_v52 = vld [vmem:[#allocation2 + $0xb4] sm:$0xf] }
 0x342   : > { %v4464_v17 = vsel %vm9686_vm8, %v8149_v2, %v4463_v13  ;;  %v4465_v44 = vrot.slane %v4463_v13, 4  ;;  %v4743_v9 = vor.u32 %v4742_v15, %v4741_v62  ;;  %v4750_v7 = vshrl.u32 %v11393_v11, 16 }
 0x343   : > { %v4194_v32 = vrot.slane %v4193_v58, 4  ;;  %v4204_v47 = vrot.slane %v4203_v38, 4  ;;  %v4747_v61 = vor.u32 %v4746_v41, %v4745_v30  ;;  %v4753_v54 = vrot.slane %v4206_v49, 6 }
 0x344   : > { %v4467_v8 = vsel %vm9686_vm8, %v4465_v44, %v4466_v51  ;;  %v4744_v55 = vrot.slane %v4743_v9, 4  ;;  %v4752_v56 = vrot.slane %v4750_v7, 5  ;;  %v8165_v19 = vrot.slane %v3865_v1, 10 }
 0x345   : > { %v4199_v5 = vsel %vm9631_vm15, %v4194_v32, %v4198_v34  ;;  %v4209_v4 = vsel %vm9631_vm15, %v4204_v47, %v4208_v18  ;;  %v4749_v3 = vrot.slane %v4747_v61, 4  ;;  %v4943_v12 = vrot.slane %v3866_v59, 6 }
 0x346   : > { %v4316_v36 = vmax.bf16 %v4199_v5, %v3865_v1  ;;  %v4317_v60 = vmax.bf16 %v4209_v4, %v3866_v59  ;;  %v4748_v29 = vsel %vm9732_vm11, %v4744_v55, %v4747_v61  ;;  %v4754_v14 = vor.u32 %v4753_v54, %v4752_v56 }
 0x347   : > { %v4944_v20 = vsel %vm9739_vm12, %v8165_v19, %v4943_v12  ;;  %v4945_v28 = vrot.slane %v4943_v12, 4  ;;  %v4946_v27 = vrot.slane %v11393_v11, 6  ;;  %v3774_v40 = vmax.bf16 %v3726_v16, %v11395_v48  ;;  %v3489_v19 = vld [vmem:[#allocation2 + $0xbc] sm:$0x3]  ;;  %v3488_v12 = vld [vmem:[#allocation2 + $0xb8] sm:$0xf] }
 0x348   : > { %v4540_v31 = vmax.bf16 %v4464_v17, %v4316_v36  ;;  %v4541_v21 = vmax.bf16 %v4467_v8, %v4317_v60  ;;  %v4755_v1 = vsel %vm9732_vm11, %v4749_v3, %v4754_v14  ;;  %v11431_v59 = vmax.bf16 %v3820_v26, %v3772_v42  ;;  %v3536_v14 = vld [vmem:[#allocation2 + $0xc4] sm:$0xf] }
 0x349   : > { %v4947_v49 = vsel %vm9739_vm12, %v4945_v28, %v4946_v27  ;;  %v11440_v11 = vmax.bf16 %v3821_v45, %v3773_v46  ;;  %v11442_v48 = vmax.bf16 %v3822_v53, %v3774_v40  ;;  %v3583_v57 = vmax.bf16 %v11420_v35, %v11433_v52  ;;  %v3537_v27 = vld [vmem:[#allocation2 + $0xc8] sm:$0x3]  ;;  %v3631_v40 = vld [vmem:[#allocation2 + $0xcc] sm:$0xf]  ;;  %v5674_v35 = vld [vmem:[#allocation2 + $0x20] sm:$0x3] }
 0x34a   : > { %v4844_v23 = vmax.bf16 %v4748_v29, %v4540_v31  ;;  %v4845_v10 = vmax.bf16 %v4755_v1, %v4541_v21  ;;  %v4211_v22 = vshrl.u32 %v11431_v59, 16  ;;  %v4214_v39 = vshll.u32 %v11431_v59, 16  ;;  %v5528_v31 = vld [vmem:[#allocation2] sm:$0xf]  ;;  %v5576_v21 = vld [vmem:[#allocation2 + $0xc] sm:$0xf] }
 0x34b   : > { %v4220_v42 = vshll.u32 %v11440_v11, 16  ;;  %v4224_v2 = vshrl.u32 %v11440_v11, 16  ;;  %v4230_v25 = vshll.u32 %v11442_v48, 16  ;;  %v8150_v43 = vrot.slane %v11431_v59, 9 }
 0x34c   : > { %v5020_v50 = vmax.bf16 %v4944_v20, %v4844_v23  ;;  %v5021_v46 = vmax.bf16 %v4947_v49, %v4845_v10  ;;  %v4213_v34 = vrot.slane %v4211_v22, 4  ;;  %v4216_v63 = vrot.slane %v4214_v39, 5 }
 0x34d   : > { %v4222_v18 = vrot.slane %v4220_v42, 5  ;;  %v4226_v13 = vrot.slane %v4224_v2, 4  ;;  %v4232_v51 = vrot.slane %v4230_v25, 5  ;;  %v4470_v62 = vrot.slane %v11440_v11, 5 }
 0x34e   : > { %v8182_v15 = vcombine.low %v5020_v50, %v5021_v46  ;;  %v5417_v58 = vrot.slane %v5020_v50, 7  ;;  %v5419_v38 = vrot.slane %v5021_v46, 7  ;;  %v4217_v30 = vor.u32 %v4216_v63, %v4213_v34  ;;  %v3633_v50 = vld [vmem:[#allocation2 + $0xd4] sm:$0x3]  ;;  %v5530_v46 = vld [vmem:[#allocation2 + $0x8] sm:$0x3] }
 0x34f   : > { %v4227_v41 = vor.u32 %v4226_v13, %v4222_v18  ;;  %v4471_v17 = vsel %vm9686_vm8, %v8150_v43, %v4470_v62  ;;  %v4472_v44 = vrot.slane %v4470_v62, 4  ;;  %v4473_v9 = vrot.slane %v11442_v48, 5  ;;  %v5577_v34 = vld [vmem:[#allocation2 + $0x10] sm:$0xf] }
 0x350   : > { %8613 = vmatmul.mubr.msk.bf16.gmra.mrb[8].mxu1 %vm2840_vm10, %v8182_v15  ;;  %v5418_v7 = vrot.slane %v5417_v58, 4  ;;  %v5421_v32 = vrot.slane %v5419_v38, 4  ;;  %v4218_v47 = vrot.slane %v4217_v30, 4  ;;  %v4756_v61 = vrot.slane %v4211_v22, 5  ;;  %5519 = vst.msk [vmem:[#allocation2 + $0xb4] sm:$0xe] %vm1110_vm7, %v5417_v58 }
 0x351   : > { %v4228_v54 = vrot.slane %v4227_v41, 4  ;;  %v4474_v8 = vsel %vm9686_vm8, %v4472_v44, %v4473_v9  ;;  %v4757_v55 = vrot.slane %v4214_v39, 6  ;;  %v4760_v56 = vrot.slane %v4224_v2, 5  ;;  %v3632_v22 = vld [vmem:[#allocation2 + $0xd0] sm:$0xf] }
 0x352   : > { %v5420_v16 = vsel %vm9358_vm9, %v5418_v7, %v5419_v38  ;;  %v4223_v5 = vsel %vm9631_vm15, %v4218_v47, %v4222_v18  ;;  %v4761_v4 = vrot.slane %v4220_v42, 6  ;;  %v4765_v3 = vshrl.u32 %v11442_v48, 16  ;;  %5521 = vst.msk [vmem:[#allocation2 + $0xbc] sm:$0x1] %vm856_vm2, %v5421_v32  ;;  %v5529_v39 = vld [vmem:[#allocation2 + $0x4] sm:$0xf] }
 0x353   : > { %v4233_v26 = vsel %vm9631_vm15, %v4228_v54, %v4232_v51  ;;  %v4318_v36 = vmax.bf16 %v4223_v5, %v11431_v59  ;;  %v4758_v60 = vor.u32 %v4757_v55, %v4756_v61  ;;  %v4768_v29 = vrot.slane %v4230_v25, 6  ;;  %5520 = vst.msk [vmem:[#allocation2 + $0xb8] sm:$0xf] %vm841_vm3, %v5420_v16  ;;  %v3728_v51 = vld [vmem:[#allocation2 + $0xdc] sm:$0xf] }
 0x354   : > { %v4319_v45 = vmax.bf16 %v4233_v26, %v11440_v11  ;;  %v4762_v53 = vor.u32 %v4761_v4, %v4760_v56  ;;  %v4767_v20 = vrot.slane %v4765_v3, 5  ;;  %v8166_v28 = vrot.slane %v11431_v59, 10  ;;  %v3729_v38 = vld [vmem:[#allocation2 + $0xe0] sm:$0x3]  ;;  %v5578_v30 = vld [vmem:[#allocation2 + $0x14] sm:$0x3] }
 0x355   : > { %v4542_v1 = vmax.bf16 %v4471_v17, %v4318_v36  ;;  %v4759_v49 = vrot.slane %v4758_v60, 4  ;;  %v4950_v23 = vrot.slane %v11440_v11, 6  ;;  %v4953_v10 = vrot.slane %v11442_v48, 6  ;;  %v3727_v11 = vld [vmem:[#allocation2 + $0xd8] sm:$0xf] }
 0x356   : > { %v4543_v42 = vmax.bf16 %v4474_v8, %v4319_v45  ;;  %v4764_v2 = vrot.slane %v4762_v53, 4  ;;  %v4769_v25 = vor.u32 %v4768_v29, %v4767_v20  ;;  %v3584_v43 = vmax.bf16 %v3536_v14, %v3488_v12  ;;  %v5672_v41 = vld [vmem:[#allocation2 + $0x18] sm:$0xf]  ;;  %v3823_v7 = vld [vmem:[#allocation2 + $0xe4] sm:$0xf] }
 0x357   : > { %v4763_v59 = vsel %vm9732_vm11, %v4759_v49, %v4762_v53  ;;  %v4951_v63 = vsel %vm9739_vm12, %v8166_v28, %v4950_v23  ;;  %v4952_v18 = vrot.slane %v4950_v23, 4  ;;  %v3585_v13 = vmax.bf16 %v3537_v27, %v3489_v19  ;;  %v3824_v32 = vld [vmem:[#allocation2 + $0xe8] sm:$0xf]  ;;  %v5673_v61 = vld [vmem:[#allocation2 + $0x1c] sm:$0xf] }
 0x358   : > { %v4770_v48 = vsel %vm9732_vm11, %v4764_v2, %v4769_v25  ;;  %v4846_v62 = vmax.bf16 %v4763_v59, %v4542_v1  ;;  %v3679_v15 = vmax.bf16 %v3631_v40, %v3583_v57  ;;  %v3680_v58 = vmax.bf16 %v3632_v22, %v3584_v43  ;;  %v3825_v56 = vld [vmem:[#allocation2 + $0xec] sm:$0x3] }
 0x359   : > { %v4847_v17 = vmax.bf16 %v4770_v48, %v4543_v42  ;;  %v4954_v44 = vsel %vm9739_vm12, %v4952_v18, %v4953_v10  ;;  %v3681_v9 = vmax.bf16 %v3633_v50, %v3585_v13  ;;  %v5624_v47 = vmax.bf16 %v5576_v21, %v5528_v31 }
 0x35a   : > { %v5022_v54 = vmax.bf16 %v4951_v63, %v4846_v62  ;;  %v3775_v8 = vmax.bf16 %v3727_v11, %v3679_v15  ;;  %v3776_v55 = vmax.bf16 %v3728_v51, %v3680_v58  ;;  %v5625_v19 = vmax.bf16 %v5577_v34, %v5529_v39  ;;  %v5768_v62 = vld [vmem:[#allocation2 + $0x24] sm:$0xf]  ;;  %v5769_v15 = vld [vmem:[#allocation2 + $0x28] sm:$0xf] }
 0x35b   : > { %v5023_v52 = vmax.bf16 %v4954_v44, %v4847_v17  ;;  %v3777_v57 = vmax.bf16 %v3729_v38, %v3681_v9  ;;  %v5626_v16 = vmax.bf16 %v5578_v30, %v5530_v46  ;;  %v11485_v5 = vmax.bf16 %v5672_v41, %v5624_v47  ;;  %v5770_v17 = vld [vmem:[#allocation2 + $0x2c] sm:$0x3] }
 0x35c   : > { %v5422_v4 = vrot.slane %v5022_v54, 7  ;;  %v11487_v3 = vmax.bf16 %v3823_v7, %v3775_v8  ;;  %v11489_v12 = vmax.bf16 %v3824_v32, %v3776_v55  ;;  %v11491_v26 = vmax.bf16 %v5673_v61, %v5625_v19  ;;  %v11517_v44 = vld [vmem:[#allocation2 + $0xc] sm:$0xf]  ;;  %v11522_v61 = vld [vmem:[#allocation2 + $0x18] sm:$0xf] }
 0x35d   : > { %v8183_v36 = vcombine.low %v5022_v54, %v5023_v52  ;;  %v5424_v60 = vrot.slane %v5023_v52, 7  ;;  %v11493_v29 = vmax.bf16 %v3825_v56, %v3777_v57  ;;  %v11495_v14 = vmax.bf16 %v5674_v35, %v5626_v16  ;;  %v5864_v19 = vld [vmem:[#allocation2 + $0x30] sm:$0xf] }
 0x35e   : > { %v5423_v45 = vrot.slane %v5422_v4, 4  ;;  %v4235_v53 = vshrl.u32 %v11487_v3, 16  ;;  %v4238_v20 = vshll.u32 %v11487_v3, 16  ;;  %v4244_v28 = vshll.u32 %v11489_v12, 16  ;;  %5522 = vst.msk [vmem:[#allocation2 + $0xc0] sm:$0xe] %vm1110_vm7, %v5422_v4 }
 0x35f   : > { %8616 = vmatprep.mubr.msk.bf16.mxu1 %vm2840_vm10, %v8183_v36  ;;  %v5426_v27 = vrot.slane %v5424_v60, 4  ;;  %v4248_v40 = vshrl.u32 %v11489_v12, 16  ;;  %v4254_v31 = vshll.u32 %v11493_v29, 16  ;;  %v8151_v21 = vrot.slane %v11487_v3, 9  ;;  %v11528_v35 = vld [vmem:[#allocation2 + $0x10] sm:$0xf] }
 0x360   : > { %v5425_v1 = vsel %vm9358_vm9, %v5423_v45, %v5424_v60  ;;  %v4237_v49 = vrot.slane %v4235_v53, 4  ;;  %v4240_v23 = vrot.slane %v4238_v20, 5  ;;  %v4246_v10 = vrot.slane %v4244_v28, 5  ;;  %v5865_v36 = vld [vmem:[#allocation2 + $0x34] sm:$0xf] }
 0x361   : > { %v4250_v22 = vrot.slane %v4248_v40, 4  ;;  %v4256_v39 = vrot.slane %v4254_v31, 5  ;;  %v4477_v42 = vrot.slane %v11489_v12, 5  ;;  %v4480_v2 = vrot.slane %v11493_v29, 5  ;;  %5523 = vst.msk [vmem:[#allocation2 + $0xc4] sm:$0xf] %vm841_vm3, %v5425_v1 }
 0x362   : > { %5524 = vst.msk [vmem:[#allocation2 + $0xc8] sm:$0x1] %vm856_vm2, %v5426_v27  ;;  %v4241_v25 = vor.u32 %v4240_v23, %v4237_v49  ;;  %v4771_v43 = vrot.slane %v4235_v53, 5  ;;  %v4772_v50 = vrot.slane %v4238_v20, 6  ;;  %v4775_v46 = vrot.slane %v4248_v40, 5 }
 0x363   : > { %v4251_v34 = vor.u32 %v4250_v22, %v4246_v10  ;;  %v4478_v59 = vsel %vm9686_vm8, %v8151_v21, %v4477_v42  ;;  %v4479_v63 = vrot.slane %v4477_v42, 4  ;;  %v4776_v18 = vrot.slane %v4244_v28, 6  ;;  %v11535_v60 = vld [vmem:[#allocation2 + $0x14] sm:$0x3]  ;;  %v11537_v45 = vld [vmem:[#allocation2 + $0x1c] sm:$0xf] }
 0x364   : > { %v4242_v13 = vrot.slane %v4241_v25, 4  ;;  %v4773_v11 = vor.u32 %v4772_v50, %v4771_v43  ;;  %v4780_v51 = vshrl.u32 %v11493_v29, 16  ;;  %v4783_v48 = vrot.slane %v4254_v31, 6  ;;  %v5866_v28 = vld [vmem:[#allocation2 + $0x38] sm:$0x3] }
 0x365   : > { %v4252_v58 = vrot.slane %v4251_v34, 4  ;;  %v4481_v38 = vsel %vm9686_vm8, %v4479_v63, %v4480_v2  ;;  %v4777_v30 = vor.u32 %v4776_v18, %v4775_v46  ;;  %v8167_v41 = vrot.slane %v11487_v3, 10 }
 0x366   : > { %v4247_v9 = vsel %vm9631_vm15, %v4242_v13, %v4246_v10  ;;  %v4774_v7 = vrot.slane %v4773_v11, 4  ;;  %v4782_v32 = vrot.slane %v4780_v51, 5  ;;  %v4957_v47 = vrot.slane %v11489_v12, 6 }
 0x367   : > { %v4257_v54 = vsel %vm9631_vm15, %v4252_v58, %v4256_v39  ;;  %v4320_v8 = vmax.bf16 %v4247_v9, %v11487_v3  ;;  %v4779_v55 = vrot.slane %v4777_v30, 4  ;;  %v4960_v56 = vrot.slane %v11493_v29, 6 }
 0x368   : > { %v4321_v52 = vmax.bf16 %v4257_v54, %v11489_v12  ;;  %v4778_v57 = vsel %vm9732_vm11, %v4774_v7, %v4777_v30  ;;  %v4784_v16 = vor.u32 %v4783_v48, %v4782_v32  ;;  %v4958_v4 = vsel %vm9739_vm12, %v8167_v41, %v4957_v47  ;;  %v11541_v12 = vld [vmem:[#allocation2 + $0x20] sm:$0x3] }
 0x369   : > { %v4544_v3 = vmax.bf16 %v4478_v59, %v4320_v8  ;;  %v4959_v53 = vrot.slane %v4957_v47, 4  ;;  %v5816_v29 = vmax.bf16 %v5768_v62, %v11485_v5  ;;  %v5817_v20 = vmax.bf16 %v5769_v15, %v11491_v26 }
 0x36a   : > { %v4545_v27 = vmax.bf16 %v4481_v38, %v4321_v52  ;;  %v4785_v40 = vsel %vm9732_vm11, %v4779_v55, %v4784_v16  ;;  %v5818_v31 = vmax.bf16 %v5770_v17, %v11495_v14  ;;  %v5627_v21 = vmax.bf16 %v11522_v61, %v11517_v44  ;;  %v5868_v44 = vld [vmem:[#allocation2 + $0x40] sm:$0xf]  ;;  %v5869_v61 = vld [vmem:[#allocation2 + $0x44] sm:$0x3] }
 0x36b   : > { %v4848_v1 = vmax.bf16 %v4778_v57, %v4544_v3  ;;  %v4961_v49 = vsel %vm9739_vm12, %v4959_v53, %v4960_v56  ;;  %v11550_v23 = vmax.bf16 %v5864_v19, %v5816_v29  ;;  %v11552_v5 = vmax.bf16 %v5865_v36, %v5817_v20  ;;  %v5675_v36 = vld [vmem:[#allocation2 + $0x24] sm:$0xf] }
 0x36c   : > { %v4849_v26 = vmax.bf16 %v4785_v40, %v4545_v27  ;;  %v11554_v10 = vmax.bf16 %v5866_v28, %v5818_v31  ;;  %v5628_v22 = vmax.bf16 %v11537_v45, %v11528_v35  ;;  %v5629_v14 = vmax.bf16 %v11541_v12, %v11535_v60  ;;  %v5676_v28 = vld [vmem:[#allocation2 + $0x28] sm:$0xf]  ;;  %v5677_v27 = vld [vmem:[#allocation2 + $0x2c] sm:$0x3]  ;;  %v11605_v35 = vld [vmem:[#allocation2 + $0x30] sm:$0xf] }
 0x36d   : > { %v5024_v39 = vmax.bf16 %v4958_v4, %v4848_v1  ;;  %v5961_v42 = vshrl.u32 %v11550_v23, 16  ;;  %v5964_v2 = vshll.u32 %v11550_v23, 16  ;;  %v5970_v25 = vshll.u32 %v11552_v5, 16 }
 0x36e   : > { %v5025_v43 = vmax.bf16 %v4961_v49, %v4849_v26  ;;  %v5974_v50 = vshrl.u32 %v11552_v5, 16  ;;  %v5980_v46 = vshll.u32 %v11554_v10, 16  ;;  %v8201_v34 = vrot.slane %v11550_v23, 9  ;;  %v5582_v26 = vld [vmem:[#allocation2 + $0x24] sm:$0xf] }
 0x36f   : > { %v5427_v59 = vrot.slane %v5024_v39, 7  ;;  %v5963_v63 = vrot.slane %v5961_v42, 4  ;;  %v5966_v18 = vrot.slane %v5964_v2, 5  ;;  %v5972_v13 = vrot.slane %v5970_v25, 5 }
 0x370   : > { %v8184_v11 = vcombine.low %v5024_v39, %v5025_v43  ;;  %v5429_v51 = vrot.slane %v5025_v43, 7  ;;  %v5976_v48 = vrot.slane %v5974_v50, 4  ;;  %v5982_v62 = vrot.slane %v5980_v46, 5  ;;  %v5771_v43 = vld [vmem:[#allocation2 + $0x30] sm:$0xf] }
 0x371   : > { %v5428_v15 = vrot.slane %v5427_v59, 4  ;;  %5525 = vst.msk [vmem:[#allocation2 + $0xcc] sm:$0xe] %vm1110_vm7, %v5427_v59  ;;  %v5967_v58 = vor.u32 %v5966_v18, %v5963_v63  ;;  %v6458_v38 = vrot.slane %v11552_v5, 5  ;;  %v6461_v30 = vrot.slane %v11554_v10, 5 }
 0x372   : > { %8617 = vmatmul.mubr.msk.bf16.gmra.mrb[12].mxu1 %vm2840_vm10, %v8184_v11  ;;  %v5431_v41 = vrot.slane %v5429_v51, 4  ;;  %v5977_v17 = vor.u32 %v5976_v48, %v5972_v13  ;;  %v6632_v9 = vrot.slane %v5961_v42, 5  ;;  %v6633_v7 = vrot.slane %v5964_v2, 6  ;;  %v5867_v11 = vld [vmem:[#allocation2 + $0x3c] sm:$0xf] }
 0x373   : > { %v5430_v32 = vsel %vm9358_vm9, %v5428_v15, %v5429_v51  ;;  %v5968_v47 = vrot.slane %v5967_v58, 4  ;;  %v6459_v54 = vsel %vm9686_vm8, %v8201_v34, %v6458_v38  ;;  %v6460_v8 = vrot.slane %v6458_v38, 4  ;;  %v5583_v34 = vld [vmem:[#allocation2 + $0x28] sm:$0xf]  ;;  %v5536_v15 = vld [vmem:[#allocation2 + $0x20] sm:$0x3] }
 0x374   : > { %5526 = vst.msk [vmem:[#allocation2 + $0xd0] sm:$0xf] %vm841_vm3, %v5430_v32  ;;  %v5978_v55 = vrot.slane %v5977_v17, 4  ;;  %v6634_v56 = vor.u32 %v6633_v7, %v6632_v9  ;;  %v6636_v19 = vrot.slane %v5974_v50, 5  ;;  %v6637_v52 = vrot.slane %v5970_v25, 6 }
 0x375   : > { %5527 = vst.msk [vmem:[#allocation2 + $0xd4] sm:$0x1] %vm856_vm2, %v5431_v41  ;;  %v5973_v57 = vsel %vm9631_vm15, %v5968_v47, %v5972_v13  ;;  %v6462_v33 = vsel %vm9686_vm8, %v6460_v8, %v6461_v30  ;;  %v6641_v16 = vshrl.u32 %v11554_v10, 16  ;;  %v6644_v4 = vrot.slane %v5980_v46, 6  ;;  %v5534_v50 = vld [vmem:[#allocation2 + $0x18] sm:$0xf] }
 0x376   : > { %v5983_v3 = vsel %vm9631_vm15, %v5978_v55, %v5982_v62  ;;  %v6376_v53 = vmax.bf16 %v5973_v57, %v11550_v23  ;;  %v6635_v29 = vrot.slane %v6634_v56, 4  ;;  %v6638_v20 = vor.u32 %v6637_v52, %v6636_v19  ;;  %v5535_v46 = vld [vmem:[#allocation2 + $0x1c] sm:$0xf]  ;;  %v5772_v13 = vld [vmem:[#allocation2 + $0x34] sm:$0xf] }
 0x377   : > { %v6377_v40 = vmax.bf16 %v5983_v3, %v11552_v5  ;;  %v6643_v31 = vrot.slane %v6641_v16, 5  ;;  %v8217_v1 = vrot.slane %v11550_v23, 10  ;;  %v6938_v49 = vrot.slane %v11552_v5, 6  ;;  %v5773_v5 = vld [vmem:[#allocation2 + $0x38] sm:$0x3] }
 0x378   : > { %v6600_v39 = vmax.bf16 %v6459_v54, %v6376_v53  ;;  %v6639_v42 = vsel %vm9732_vm11, %v6635_v29, %v6638_v20  ;;  %v6640_v2 = vrot.slane %v6638_v20, 4  ;;  %v6941_v25 = vrot.slane %v11554_v10, 6  ;;  %v5584_v58 = vld [vmem:[#allocation2 + $0x2c] sm:$0x3]  ;;  %v5678_v38 = vld [vmem:[#allocation2 + $0x30] sm:$0xf] }
 0x379   : > { %v6601_v59 = vmax.bf16 %v6462_v33, %v6377_v40  ;;  %v6645_v63 = vor.u32 %v6644_v4, %v6643_v31  ;;  %v6939_v18 = vsel %vm9739_vm12, %v8217_v1, %v6938_v49  ;;  %v6940_v23 = vrot.slane %v6938_v49, 4  ;;  %v5679_v30 = vld [vmem:[#allocation2 + $0x34] sm:$0xf]  ;;  %v11607_v7 = vld [vmem:[#allocation2 + $0x3c] sm:$0xf] }
 0x37a   : > { %v6904_v51 = vmax.bf16 %v6639_v42, %v6600_v39  ;;  %v5723_v48 = vmax.bf16 %v5675_v36, %v5627_v21  ;;  %v5724_v10 = vmax.bf16 %v5676_v28, %v5628_v22  ;;  %v5725_v62 = vmax.bf16 %v5677_v27, %v5629_v14  ;;  %v5680_v14 = vld [vmem:[#allocation2 + $0x38] sm:$0x3]  ;;  %v11609_v32 = vld [vmem:[#allocation2 + $0x40] sm:$0xf]  ;;  %v11615_v56 = vld [vmem:[#allocation2 + $0x24] sm:$0xf] }
 0x37b   : > { %v6646_v41 = vsel %vm9732_vm11, %v6640_v2, %v6645_v63  ;;  %v6942_v17 = vsel %vm9739_vm12, %v6940_v23, %v6941_v25  ;;  %v5630_v21 = vmax.bf16 %v5582_v26, %v5534_v50  ;;  %v5631_v9 = vmax.bf16 %v5583_v34, %v5535_v46 }
 0x37c   : > { %v6905_v45 = vmax.bf16 %v6646_v41, %v6601_v59  ;;  %v7080_v22 = vmax.bf16 %v6939_v18, %v6904_v51  ;;  %v5819_v60 = vmax.bf16 %v5771_v43, %v5723_v48  ;;  %v5820_v12 = vmax.bf16 %v5772_v13, %v5724_v10 }
 0x37d   : > { %v5821_v47 = vmax.bf16 %v5773_v5, %v5725_v62  ;;  %v5632_v54 = vmax.bf16 %v5584_v58, %v5536_v15  ;;  %v11611_v8 = vmax.bf16 %v5678_v38, %v5630_v21  ;;  %v11613_v55 = vmax.bf16 %v5679_v30, %v5631_v9  ;;  %v5870_v21 = vld [vmem:[#allocation2 + $0x48] sm:$0xf]  ;;  %v5871_v9 = vld [vmem:[#allocation2 + $0x4c] sm:$0xf] }
 0x37e   : > { %v7081_v19 = vmax.bf16 %v6942_v17, %v6905_v45  ;;  %v5915_v52 = vmax.bf16 %v5867_v11, %v5819_v60  ;;  %v5916_v57 = vmax.bf16 %v5868_v44, %v5820_v12  ;;  %v5633_v33 = vmax.bf16 %v11605_v35, %v11615_v56  ;;  %v5776_v11 = vld [vmem:[#allocation2 + $0x44] sm:$0x3] }
 0x37f   : > { %v5917_v16 = vmax.bf16 %v5869_v61, %v5821_v47  ;;  %v5728_v4 = vmax.bf16 %v5680_v14, %v5632_v54  ;;  %v5822_v36 = vmax.bf16 %v11607_v7, %v11611_v8  ;;  %v5823_v3 = vmax.bf16 %v11609_v32, %v11613_v55  ;;  %v5872_v14 = vld [vmem:[#allocation2 + $0x50] sm:$0x3]  ;;  %v11632_v7 = vld [vmem:[#allocation2 + $0x34] sm:$0xf] }
 0x380   : > { %v8234_v53 = vcombine.low %v7080_v22, %v7081_v19  ;;  %v5985_v29 = vshrl.u32 %v5915_v52, 16  ;;  %v5988_v20 = vshll.u32 %v5915_v52, 16  ;;  %v5994_v28 = vshll.u32 %v5916_v57, 16 }
 0x381   : > { %v5998_v27 = vshrl.u32 %v5916_v57, 16  ;;  %v6004_v40 = vshll.u32 %v5917_v16, 16  ;;  %v8202_v31 = vrot.slane %v5915_v52, 9  ;;  %v6465_v1 = vrot.slane %v5916_v57, 5 }
 0x382   : > { %8622 = vmatprep.mubr.msk.bf16.mxu1 %vm2840_vm10, %v8234_v53  ;;  %v5987_v49 = vrot.slane %v5985_v29, 4  ;;  %v5990_v26 = vrot.slane %v5988_v20, 5  ;;  %v5996_v39 = vrot.slane %v5994_v28, 5  ;;  %v6468_v42 = vrot.slane %v5917_v16, 5 }
 0x383   : > { %v6000_v2 = vrot.slane %v5998_v27, 4  ;;  %v6006_v25 = vrot.slane %v6004_v40, 5  ;;  %v6466_v43 = vsel %vm9686_vm8, %v8202_v31, %v6465_v1  ;;  %v6467_v50 = vrot.slane %v6465_v1, 4 }
 0x384   : > { %v5991_v46 = vor.u32 %v5990_v26, %v5987_v49  ;;  %v6647_v34 = vrot.slane %v5985_v29, 5  ;;  %v6648_v59 = vrot.slane %v5988_v20, 6  ;;  %v6651_v63 = vrot.slane %v5998_v27, 5 }
 0x385   : > { %v6001_v18 = vor.u32 %v6000_v2, %v5996_v39  ;;  %v6469_v23 = vsel %vm9686_vm8, %v6467_v50, %v6468_v42  ;;  %v6652_v13 = vrot.slane %v5994_v28, 6  ;;  %v6656_v5 = vshrl.u32 %v5917_v16, 16 }
 0x386   : > { %v5992_v51 = vrot.slane %v5991_v46, 4  ;;  %v6649_v48 = vor.u32 %v6648_v59, %v6647_v34  ;;  %v6659_v10 = vrot.slane %v6004_v40, 6  ;;  %v8218_v62 = vrot.slane %v5915_v52, 10 }
 0x387   : > { %v6002_v15 = vrot.slane %v6001_v18, 4  ;;  %v6653_v58 = vor.u32 %v6652_v13, %v6651_v63  ;;  %v6658_v38 = vrot.slane %v6656_v5, 5  ;;  %v6945_v30 = vrot.slane %v5916_v57, 6 }
 0x388   : > { %v5997_v41 = vsel %vm9631_vm15, %v5992_v51, %v5996_v39  ;;  %v6650_v17 = vrot.slane %v6649_v48, 4  ;;  %v6948_v44 = vrot.slane %v5917_v16, 6  ;;  %v5824_v61 = vmax.bf16 %v5776_v11, %v5728_v4  ;;  %v11642_v4 = vld [vmem:[#allocation2 + $0x28] sm:$0xf] }
 0x389   : > { %v6007_v45 = vsel %vm9631_vm15, %v6002_v15, %v6006_v25  ;;  %v6378_v22 = vmax.bf16 %v5997_v41, %v5915_v52  ;;  %v6655_v60 = vrot.slane %v6653_v58, 4  ;;  %v6660_v12 = vor.u32 %v6659_v10, %v6658_v38 }
 0x38a   : > { %v6379_v32 = vmax.bf16 %v6007_v45, %v5916_v57  ;;  %v6654_v47 = vsel %vm9732_vm11, %v6650_v17, %v6653_v58  ;;  %v6946_v54 = vsel %vm9739_vm12, %v8218_v62, %v6945_v30  ;;  %v6947_v8 = vrot.slane %v6945_v30, 4 }
 0x38b   : > { %v6602_v55 = vmax.bf16 %v6466_v43, %v6378_v22  ;;  %v6661_v19 = vsel %vm9732_vm11, %v6655_v60, %v6660_v12  ;;  %v11640_v16 = vmax.bf16 %v5870_v21, %v5822_v36  ;;  %v5919_v52 = vmax.bf16 %v5871_v9, %v5823_v3  ;;  %v5587_v21 = vld [vmem:[#allocation2 + $0x38] sm:$0x3]  ;;  %v5539_v12 = vld [vmem:[#allocation2 + $0x2c] sm:$0x3] }
 0x38c   : > { %v6603_v53 = vmax.bf16 %v6469_v23, %v6379_v32  ;;  %v6949_v57 = vsel %vm9739_vm12, %v6947_v8, %v6948_v44  ;;  %v11646_v29 = vmax.bf16 %v5872_v14, %v5824_v61  ;;  %v5634_v20 = vmax.bf16 %v11632_v7, %v11642_v4  ;;  %v5681_v14 = vld [vmem:[#allocation2 + $0x3c] sm:$0xf]  ;;  %v5682_v7 = vld [vmem:[#allocation2 + $0x40] sm:$0xf] }
 0x38d   : > { %v6906_v28 = vmax.bf16 %v6654_v47, %v6602_v55  ;;  %v6009_v27 = vshrl.u32 %v11640_v16, 16  ;;  %v6012_v40 = vshll.u32 %v11640_v16, 16  ;;  %v6018_v31 = vshll.u32 %v5919_v52, 16  ;;  %v5683_v55 = vld [vmem:[#allocation2 + $0x44] sm:$0x3] }
 0x38e   : > { %v6907_v36 = vmax.bf16 %v6661_v19, %v6603_v53  ;;  %v6022_v1 = vshrl.u32 %v5919_v52, 16  ;;  %v6028_v3 = vshll.u32 %v11646_v29, 16  ;;  %v8203_v49 = vrot.slane %v11640_v16, 9  ;;  %v5540_v19 = vld [vmem:[#allocation2 + $0x30] sm:$0xf] }
 0x38f   : > { %v7082_v26 = vmax.bf16 %v6946_v54, %v6906_v28  ;;  %v6011_v39 = vrot.slane %v6009_v27, 4  ;;  %v6014_v42 = vrot.slane %v6012_v40, 5  ;;  %v6020_v2 = vrot.slane %v6018_v31, 5  ;;  %v5588_v4 = vld [vmem:[#allocation2 + $0x3c] sm:$0xf] }
 0x390   : > { %v7083_v25 = vmax.bf16 %v6949_v57, %v6907_v36  ;;  %v6024_v43 = vrot.slane %v6022_v1, 4  ;;  %v6030_v50 = vrot.slane %v6028_v3, 5  ;;  %v6472_v46 = vrot.slane %v5919_v52, 5 }
 0x391   : > { %v6015_v34 = vor.u32 %v6014_v42, %v6011_v39  ;;  %v6475_v59 = vrot.slane %v11646_v29, 5  ;;  %v6662_v63 = vrot.slane %v6009_v27, 5  ;;  %v6663_v18 = vrot.slane %v6012_v40, 6  ;;  %v5777_v27 = vld [vmem:[#allocation2 + $0x48] sm:$0xf] }
 0x392   : > { %v8235_v23 = vcombine.low %v7082_v26, %v7083_v25  ;;  %v6025_v13 = vor.u32 %v6024_v43, %v6020_v2  ;;  %v6473_v5 = vsel %vm9686_vm8, %v8203_v49, %v6472_v46  ;;  %v6474_v11 = vrot.slane %v6472_v46, 4  ;;  %v5778_v40 = vld [vmem:[#allocation2 + $0x4c] sm:$0xf]  ;;  %v5590_v49 = vld [vmem:[#allocation2 + $0x44] sm:$0x3] }
 0x393   : > { %v6016_v51 = vrot.slane %v6015_v34, 4  ;;  %v6664_v48 = vor.u32 %v6663_v18, %v6662_v63  ;;  %v6666_v10 = vrot.slane %v6022_v1, 5  ;;  %v6667_v62 = vrot.slane %v6018_v31, 6  ;;  %v5684_v26 = vld [vmem:[#allocation2 + $0x48] sm:$0xf] }
 0x394   : > { %8623 = vmatmul.mubr.msk.bf16.vlgmr.msra.gmra.mrb[16].mxu1 %vm2840_vm10, %v8235_v23  ;;  %v6026_v15 = vrot.slane %v6025_v13, 4  ;;  %v6476_v58 = vsel %vm9686_vm8, %v6474_v11, %v6475_v59  ;;  %v6671_v38 = vshrl.u32 %v11646_v29, 16  ;;  %v6674_v30 = vrot.slane %v6028_v3, 6  ;;  %v5541_v3 = vld [vmem:[#allocation2 + $0x34] sm:$0xf] }
 0x395   : > { %v6021_v41 = vsel %vm9631_vm15, %v6016_v51, %v6020_v2  ;;  %v6665_v17 = vrot.slane %v6664_v48, 4  ;;  %v6668_v44 = vor.u32 %v6667_v62, %v6666_v10  ;;  %v8219_v61 = vrot.slane %v11640_v16, 10  ;;  %v5779_v25 = vld [vmem:[#allocation2 + $0x50] sm:$0x3]  ;;  %v5873_v43 = vld [vmem:[#allocation2 + $0x54] sm:$0xf] }
 0x396   : > { %v6031_v9 = vsel %vm9631_vm15, %v6026_v15, %v6030_v50  ;;  %v6380_v45 = vmax.bf16 %v6021_v41, %v11640_v16  ;;  %v6673_v22 = vrot.slane %v6671_v38, 5  ;;  %v6952_v60 = vrot.slane %v5919_v52, 6  ;;  %v5874_v50 = vld [vmem:[#allocation2 + $0x58] sm:$0xf]  ;;  %v5686_v63 = vld [vmem:[#allocation2 + $0x50] sm:$0x3] }
 0x397   : > { %v6381_v32 = vmax.bf16 %v6031_v9, %v5919_v52  ;;  %v6669_v47 = vsel %vm9732_vm11, %v6665_v17, %v6668_v44  ;;  %v6670_v54 = vrot.slane %v6668_v44, 4  ;;  %v6955_v8 = vrot.slane %v11646_v29, 6  ;;  %v5589_v29 = vld [vmem:[#allocation2 + $0x40] sm:$0xf]  ;;  %v5875_v23 = vld [vmem:[#allocation2 + $0x5c] sm:$0x3] }
 0x398   : > { %v6604_v53 = vmax.bf16 %v6473_v5, %v6380_v45  ;;  %v6675_v57 = vor.u32 %v6674_v30, %v6673_v22  ;;  %v6953_v16 = vsel %vm9739_vm12, %v8219_v61, %v6952_v60  ;;  %v6954_v28 = vrot.slane %v6952_v60, 4  ;;  %v5780_v15 = vld [vmem:[#allocation2 + $0x54] sm:$0xf]  ;;  %v11689_v30 = vld [vmem:[#allocation2 + $0x48] sm:$0xf] }
 0x399   : > { %v6605_v31 = vmax.bf16 %v6476_v58, %v6381_v32  ;;  %v5635_v36 = vmax.bf16 %v5587_v21, %v5539_v12  ;;  %v5729_v52 = vmax.bf16 %v5681_v14, %v5633_v33  ;;  %v5730_v1 = vmax.bf16 %v5682_v7, %v5634_v20  ;;  %v5542_v33 = vld [vmem:[#allocation2 + $0x38] sm:$0x3]  ;;  %v5685_v20 = vld [vmem:[#allocation2 + $0x4c] sm:$0xf]  ;;  %v11699_v60 = vld [vmem:[#allocation2 + $0x3c] sm:$0xf] }
 0x39a   : > { %v6676_v39 = vsel %vm9732_vm11, %v6670_v54, %v6675_v57  ;;  %v6908_v42 = vmax.bf16 %v6669_v47, %v6604_v53  ;;  %v6956_v2 = vsel %vm9739_vm12, %v6954_v28, %v6955_v8  ;;  %v5636_v46 = vmax.bf16 %v5588_v4, %v5540_v19 }
 0x39b   : > { %v6909_v34 = vmax.bf16 %v6676_v39, %v6605_v31  ;;  %v5731_v59 = vmax.bf16 %v5683_v55, %v5635_v36  ;;  %v5825_v35 = vmax.bf16 %v5777_v27, %v5729_v52  ;;  %v5826_v56 = vmax.bf16 %v5778_v40, %v5730_v1  ;;  %v5781_v39 = vld [vmem:[#allocation2 + $0x58] sm:$0xf] }
 0x39c   : > { %v7084_v18 = vmax.bf16 %v6953_v16, %v6908_v42  ;;  %v5637_v13 = vmax.bf16 %v5589_v29, %v5541_v3  ;;  %v5638_v5 = vmax.bf16 %v5590_v49, %v5542_v33  ;;  %v11679_v11 = vmax.bf16 %v5684_v26, %v5636_v46  ;;  %v5876_v46 = vld [vmem:[#allocation2 + $0x60] sm:$0xf] }
 0x39d   : > { %v7085_v51 = vmax.bf16 %v6956_v2, %v6909_v34  ;;  %v5827_v48 = vmax.bf16 %v5779_v25, %v5731_v59  ;;  %v11681_v10 = vmax.bf16 %v5873_v43, %v5825_v35  ;;  %v11683_v62 = vmax.bf16 %v5874_v50, %v5826_v56  ;;  %v5782_v50 = vld [vmem:[#allocation2 + $0x5c] sm:$0x3] }
 0x39e   : > { %v11685_v58 = vmax.bf16 %v5685_v20, %v5637_v13  ;;  %v11687_v38 = vmax.bf16 %v5686_v63, %v5638_v5  ;;  %v5828_v22 = vmax.bf16 %v5780_v15, %v11679_v11  ;;  %v5639_v32 = vmax.bf16 %v11689_v30, %v11699_v60  ;;  %v5878_v13 = vld [vmem:[#allocation2 + $0x68] sm:$0x3]  ;;  %v11725_v15 = vld [vmem:[#allocation2 + $0x4c] sm:$0xf] }
 0x39f   : > { %v8236_v41 = vcombine.low %v7084_v18, %v7085_v51  ;;  %v11691_v17 = vmax.bf16 %v5875_v23, %v5827_v48  ;;  %v6033_v44 = vshrl.u32 %v11681_v10, 16  ;;  %v6036_v61 = vshll.u32 %v11681_v10, 16  ;;  %v5877_v23 = vld [vmem:[#allocation2 + $0x64] sm:$0xf] }
 0x3a0   : > { %v6042_v21 = vshll.u32 %v11683_v62, 16  ;;  %v6046_v9 = vshrl.u32 %v11683_v62, 16  ;;  %v6479_v45 = vrot.slane %v11683_v62, 5  ;;  %v8204_v8 = vrot.slane %v11681_v10, 9 }
 0x3a1   : > { %8626 = vmatprep.mubr.msk.bf16.mxu1 %vm2840_vm10, %v8236_v41  ;;  %v6035_v12 = vrot.slane %v6033_v44, 4  ;;  %v6038_v14 = vrot.slane %v6036_v61, 5  ;;  %v6052_v7 = vshll.u32 %v11691_v17, 16  ;;  %v6482_v55 = vrot.slane %v11691_v17, 5 }
 0x3a2   : > { %v6044_v47 = vrot.slane %v6042_v21, 5  ;;  %v6048_v54 = vrot.slane %v6046_v9, 4  ;;  %v6481_v4 = vrot.slane %v6479_v45, 4  ;;  %v6677_v53 = vrot.slane %v6033_v44, 5 }
 0x3a3   : > { %v6039_v19 = vor.u32 %v6038_v14, %v6035_v12  ;;  %v6678_v57 = vrot.slane %v6036_v61, 6  ;;  %v6480_v28 = vsel %vm9686_vm8, %v8204_v8, %v6479_v45  ;;  %v6681_v27 = vrot.slane %v6046_v9, 5 }
 0x3a4   : > { %v6049_v16 = vor.u32 %v6048_v54, %v6044_v47  ;;  %v6682_v40 = vrot.slane %v6042_v21, 6  ;;  %v6686_v52 = vshrl.u32 %v11691_v17, 16  ;;  %v6689_v1 = vrot.slane %v6052_v7, 6  ;;  %v11738_v21 = vld [vmem:[#allocation2 + $0x40] sm:$0xf] }
 0x3a5   : > { %v6040_v31 = vrot.slane %v6039_v19, 4  ;;  %v6679_v36 = vor.u32 %v6678_v57, %v6677_v53  ;;  %v6054_v29 = vrot.slane %v6052_v7, 5  ;;  %v6959_v26 = vrot.slane %v11683_v62, 6 }
 0x3a6   : > { %v6050_v3 = vrot.slane %v6049_v16, 4  ;;  %v6683_v49 = vor.u32 %v6682_v40, %v6681_v27  ;;  %v6483_v2 = vsel %vm9686_vm8, %v6481_v4, %v6482_v55  ;;  %v6688_v25 = vrot.slane %v6686_v52, 5 }
 0x3a7   : > { %v6045_v42 = vsel %vm9631_vm15, %v6040_v31, %v6044_v47  ;;  %v8220_v43 = vrot.slane %v11681_v10, 10  ;;  %v6680_v35 = vrot.slane %v6679_v36, 4  ;;  %v6961_v63 = vrot.slane %v6959_v26, 4 }
 0x3a8   : > { %v6055_v34 = vsel %vm9631_vm15, %v6050_v3, %v6054_v29  ;;  %v6382_v59 = vmax.bf16 %v6045_v42, %v11681_v10  ;;  %v6685_v56 = vrot.slane %v6683_v49, 4  ;;  %v6690_v20 = vor.u32 %v6689_v1, %v6688_v25 }
 0x3a9   : > { %v6383_v33 = vmax.bf16 %v6055_v34, %v11683_v62  ;;  %v6962_v18 = vrot.slane %v11691_v17, 6  ;;  %v5829_v11 = vmax.bf16 %v5781_v39, %v11685_v58  ;;  %v5830_v51 = vmax.bf16 %v5782_v50, %v11687_v38 }
 0x3aa   : > { %v6606_v5 = vmax.bf16 %v6480_v28, %v6382_v59  ;;  %v11723_v48 = vmax.bf16 %v5876_v46, %v5828_v22  ;;  %v6684_v41 = vsel %vm9732_vm11, %v6680_v35, %v6683_v49  ;;  %v6691_v62 = vsel %vm9732_vm11, %v6685_v56, %v6690_v20  ;;  %v5593_v56 = vld [vmem:[#allocation2 + $0x50] sm:$0x3] }
 0x3ab   : > { %v6607_v10 = vmax.bf16 %v6483_v2, %v6383_v33  ;;  %v6960_v17 = vsel %vm9739_vm12, %v8220_v43, %v6959_v26  ;;  %v11733_v61 = vmax.bf16 %v5877_v23, %v5829_v11  ;;  %v11735_v58 = vmax.bf16 %v5878_v13, %v5830_v51  ;;  %v5687_v33 = vld [vmem:[#allocation2 + $0x54] sm:$0xf]  ;;  %v5545_v13 = vld [vmem:[#allocation2 + $0x44] sm:$0x3] }
 0x3ac   : > { %v6910_v44 = vmax.bf16 %v6684_v41, %v6606_v5  ;;  %v6057_v38 = vshrl.u32 %v11723_v48, 16  ;;  %v6963_v45 = vsel %vm9739_vm12, %v6961_v63, %v6962_v18  ;;  %v6060_v22 = vshll.u32 %v11723_v48, 16  ;;  %v5688_v5 = vld [vmem:[#allocation2 + $0x58] sm:$0xf]  ;;  %v5689_v41 = vld [vmem:[#allocation2 + $0x5c] sm:$0x3] }
 0x3ad   : > { %v6911_v9 = vmax.bf16 %v6691_v62, %v6607_v10  ;;  %v5640_v12 = vmax.bf16 %v11725_v15, %v11738_v21  ;;  %v6066_v7 = vshll.u32 %v11733_v61, 16  ;;  %v6070_v47 = vshrl.u32 %v11733_v61, 16  ;;  %v5783_v62 = vld [vmem:[#allocation2 + $0x60] sm:$0xf]  ;;  %v5784_v21 = vld [vmem:[#allocation2 + $0x64] sm:$0xf] }
 0x3ae   : > { %v6059_v14 = vrot.slane %v6057_v38, 4  ;;  %v8205_v54 = vrot.slane %v11723_v48, 9  ;;  %v7086_v8 = vmax.bf16 %v6960_v17, %v6910_v44  ;;  %v6062_v19 = vrot.slane %v6060_v22, 5 }
 0x3af   : > { %v7087_v55 = vmax.bf16 %v6963_v45, %v6911_v9  ;;  %v6076_v4 = vshll.u32 %v11735_v58, 16  ;;  %v6068_v53 = vrot.slane %v6066_v7, 5  ;;  %v6072_v57 = vrot.slane %v6070_v47, 4  ;;  %v5546_v9 = vld [vmem:[#allocation2 + $0x48] sm:$0xf] }
 0x3b0   : > { %v6486_v16 = vrot.slane %v11733_v61, 5  ;;  %v6692_v28 = vrot.slane %v6057_v38, 5  ;;  %v6063_v40 = vor.u32 %v6062_v19, %v6059_v14  ;;  %v6489_v31 = vrot.slane %v11735_v58, 5  ;;  %v5594_v45 = vld [vmem:[#allocation2 + $0x54] sm:$0xf] }
 0x3b1   : > { %v8237_v27 = vcombine.low %v7086_v8, %v7087_v55  ;;  %v8221_v36 = vrot.slane %v11723_v48, 10  ;;  %v6073_v52 = vor.u32 %v6072_v57, %v6068_v53  ;;  %v6078_v1 = vrot.slane %v6076_v4, 5  ;;  %v5596_v8 = vld [vmem:[#allocation2 + $0x5c] sm:$0x3]  ;;  %v5880_v19 = vld [vmem:[#allocation2 + $0x70] sm:$0xf] }
 0x3b2   : > { %v6693_v3 = vrot.slane %v6060_v22, 6  ;;  %v6696_v29 = vrot.slane %v6070_v47, 5  ;;  %v6064_v49 = vrot.slane %v6063_v40, 4  ;;  %v6697_v26 = vrot.slane %v6066_v7, 6  ;;  %v5785_v47 = vld [vmem:[#allocation2 + $0x68] sm:$0x3] }
 0x3b3   : > { %8627 = vmatmul.mubr.msk.bf16.gmra.mrb[20].mxu1 %vm2840_vm10, %v8237_v27  ;;  %v6701_v39 = vshrl.u32 %v11735_v58, 16  ;;  %v6704_v42 = vrot.slane %v6076_v4, 6  ;;  %v6074_v2 = vrot.slane %v6073_v52, 4  ;;  %v6488_v25 = vrot.slane %v6486_v16, 4  ;;  %v5547_v4 = vld [vmem:[#allocation2 + $0x4c] sm:$0xf] }
 0x3b4   : > { %v6694_v43 = vor.u32 %v6693_v3, %v6692_v28  ;;  %v6966_v50 = vrot.slane %v11733_v61, 6  ;;  %v6069_v46 = vsel %vm9631_vm15, %v6064_v49, %v6068_v53  ;;  %v6487_v34 = vsel %vm9686_vm8, %v8205_v54, %v6486_v16  ;;  %v5595_v54 = vld [vmem:[#allocation2 + $0x58] sm:$0xf]  ;;  %v5690_v53 = vld [vmem:[#allocation2 + $0x60] sm:$0xf] }
 0x3b5   : > { %v6698_v59 = vor.u32 %v6697_v26, %v6696_v29  ;;  %v6703_v35 = vrot.slane %v6701_v39, 5  ;;  %v6079_v20 = vsel %vm9631_vm15, %v6074_v2, %v6078_v1  ;;  %v6384_v63 = vmax.bf16 %v6069_v46, %v11723_v48  ;;  %v5881_v27 = vld [vmem:[#allocation2 + $0x74] sm:$0x3]  ;;  %v5548_v40 = vld [vmem:[#allocation2 + $0x50] sm:$0x3] }
 0x3b6   : > { %v6695_v18 = vrot.slane %v6694_v43, 4  ;;  %v6969_v23 = vrot.slane %v11735_v58, 6  ;;  %v6385_v11 = vmax.bf16 %v6079_v20, %v11733_v61  ;;  %v6968_v10 = vrot.slane %v6966_v50, 4  ;;  %v5879_v58 = vld [vmem:[#allocation2 + $0x6c] sm:$0xf] }
 0x3b7   : > { %v6700_v51 = vrot.slane %v6698_v59, 4  ;;  %v6705_v15 = vor.u32 %v6704_v42, %v6703_v35  ;;  %v6490_v17 = vsel %vm9686_vm8, %v6488_v25, %v6489_v31  ;;  %v6608_v44 = vmax.bf16 %v6487_v34, %v6384_v63  ;;  %v5691_v31 = vld [vmem:[#allocation2 + $0x64] sm:$0xf]  ;;  %v5692_v39 = vld [vmem:[#allocation2 + $0x68] sm:$0x3] }
 0x3b8   : > { %v5641_v38 = vmax.bf16 %v5593_v56, %v5545_v13  ;;  %v5735_v48 = vmax.bf16 %v5687_v33, %v5639_v32  ;;  %v6609_v22 = vmax.bf16 %v6490_v17, %v6385_v11  ;;  %v6699_v61 = vsel %vm9732_vm11, %v6695_v18, %v6698_v59 }
 0x3b9   : > { %v6967_v14 = vsel %vm9739_vm12, %v8221_v36, %v6966_v50  ;;  %v5736_v7 = vmax.bf16 %v5688_v5, %v5640_v12  ;;  %v6706_v55 = vsel %vm9732_vm11, %v6700_v51, %v6705_v15  ;;  %v6912_v30 = vmax.bf16 %v6699_v61, %v6608_v44 }
 0x3ba   : > { %v5737_v60 = vmax.bf16 %v5689_v41, %v5641_v38  ;;  %v5831_v32 = vmax.bf16 %v5783_v62, %v5735_v48  ;;  %v6913_v57 = vmax.bf16 %v6706_v55, %v6609_v22  ;;  %v6970_v16 = vsel %vm9739_vm12, %v6968_v10, %v6969_v23  ;;  %v5787_v55 = vld [vmem:[#allocation2 + $0x70] sm:$0xf] }
 0x3bb   : > { %v5832_v28 = vmax.bf16 %v5784_v21, %v5736_v7  ;;  %v5642_v12 = vmax.bf16 %v5594_v45, %v5546_v9  ;;  %v5643_v1 = vmax.bf16 %v5595_v54, %v5547_v4  ;;  %v5644_v3 = vmax.bf16 %v5596_v8, %v5548_v40  ;;  %v5883_v40 = vld [vmem:[#allocation2 + $0x7c] sm:$0xf] }
 0x3bc   : > { %v5833_v36 = vmax.bf16 %v5785_v47, %v5737_v60  ;;  %v11777_v52 = vmax.bf16 %v5879_v58, %v5831_v32  ;;  %v7088_v29 = vmax.bf16 %v6967_v14, %v6912_v30  ;;  %v7089_v49 = vmax.bf16 %v6970_v16, %v6913_v57  ;;  %v5786_v14 = vld [vmem:[#allocation2 + $0x6c] sm:$0xf]  ;;  %v5788_v30 = vld [vmem:[#allocation2 + $0x74] sm:$0x3] }
 0x3bd   : > { %v11779_v26 = vmax.bf16 %v5880_v19, %v5832_v28  ;;  %v11781_v42 = vmax.bf16 %v5690_v53, %v5642_v12  ;;  %v5739_v50 = vmax.bf16 %v5691_v31, %v5643_v1  ;;  %v5740_v63 = vmax.bf16 %v5692_v39, %v5644_v3  ;;  %v5882_v53 = vld [vmem:[#allocation2 + $0x78] sm:$0xf]  ;;  %v5884_v12 = vld [vmem:[#allocation2 + $0x80] sm:$0x3] }
 0x3be   : > { %v11783_v2 = vmax.bf16 %v5881_v27, %v5833_v36  ;;  %v6081_v25 = vshrl.u32 %v11777_v52, 16  ;;  %v6084_v43 = vshll.u32 %v11777_v52, 16  ;;  %v8238_v46 = vcombine.low %v7088_v29, %v7089_v49  ;;  %v5597_v29 = vld [vmem:[#allocation2 + $0x60] sm:$0xf]  ;;  %v11809_v49 = vld [vmem:[#allocation2 + $0x64] sm:$0xf] }
 0x3bf   : > { %v6090_v34 = vshll.u32 %v11779_v26, 16  ;;  %v6094_v59 = vshrl.u32 %v11779_v26, 16  ;;  %v6493_v35 = vrot.slane %v11779_v26, 5  ;;  %v8206_v13 = vrot.slane %v11777_v52, 9 }
 0x3c0   : > { %v6083_v56 = vrot.slane %v6081_v25, 4  ;;  %v6086_v33 = vrot.slane %v6084_v43, 5  ;;  %v6100_v20 = vshll.u32 %v11783_v2, 16  ;;  %8630 = vmatprep.mubr.msk.bf16.mxu1 %vm2840_vm10, %v8238_v46  ;;  %v6496_v5 = vrot.slane %v11783_v2, 5 }
 0x3c1   : > { %v6092_v18 = vrot.slane %v6090_v34, 5  ;;  %v6096_v23 = vrot.slane %v6094_v59, 4  ;;  %v6495_v51 = vrot.slane %v6493_v35, 4  ;;  %v6707_v15 = vrot.slane %v6081_v25, 5  ;;  %v11817_v25 = vld [vmem:[#allocation2 + $0x68] sm:$0x3] }
 0x3c2   : > { %v6087_v11 = vor.u32 %v6086_v33, %v6083_v56  ;;  %v6708_v10 = vrot.slane %v6084_v43, 6  ;;  %v6494_v62 = vsel %vm9686_vm8, %v8206_v13, %v6493_v35  ;;  %v6711_v17 = vrot.slane %v6094_v59, 5  ;;  %v5550_v59 = vld [vmem:[#allocation2 + $0x58] sm:$0xf]  ;;  %v5551_v33 = vld [vmem:[#allocation2 + $0x5c] sm:$0x3] }
 0x3c3   : > { %v6097_v41 = vor.u32 %v6096_v23, %v6092_v18  ;;  %v6712_v44 = vrot.slane %v6090_v34, 6  ;;  %v6716_v21 = vshrl.u32 %v11783_v2, 16  ;;  %v6719_v58 = vrot.slane %v6100_v20, 6  ;;  %v5549_v34 = vld [vmem:[#allocation2 + $0x54] sm:$0xf] }
 0x3c4   : > { %v6088_v38 = vrot.slane %v6087_v11, 4  ;;  %v6709_v48 = vor.u32 %v6708_v10, %v6707_v15  ;;  %v6102_v45 = vrot.slane %v6100_v20, 5  ;;  %v6973_v61 = vrot.slane %v11779_v26, 6  ;;  %v5693_v11 = vld [vmem:[#allocation2 + $0x6c] sm:$0xf] }
 0x3c5   : > { %v6098_v9 = vrot.slane %v6097_v41, 4  ;;  %v6713_v22 = vor.u32 %v6712_v44, %v6711_v17  ;;  %v6497_v47 = vsel %vm9686_vm8, %v6495_v51, %v6496_v5  ;;  %v6718_v54 = vrot.slane %v6716_v21, 5 }
 0x3c6   : > { %v6093_v7 = vsel %vm9631_vm15, %v6088_v38, %v6092_v18  ;;  %v8222_v8 = vrot.slane %v11777_v52, 10  ;;  %v6710_v19 = vrot.slane %v6709_v48, 4  ;;  %v6975_v28 = vrot.slane %v6973_v61, 4 }
 0x3c7   : > { %v6103_v60 = vsel %vm9631_vm15, %v6098_v9, %v6102_v45  ;;  %v6386_v32 = vmax.bf16 %v6093_v7, %v11777_v52  ;;  %v6715_v4 = vrot.slane %v6713_v22, 4  ;;  %v6720_v16 = vor.u32 %v6719_v58, %v6718_v54 }
 0x3c8   : > { %v6387_v57 = vmax.bf16 %v6103_v60, %v11779_v26  ;;  %v6976_v27 = vrot.slane %v11783_v2, 6  ;;  %v5834_v36 = vmax.bf16 %v5786_v14, %v11781_v42  ;;  %v5835_v1 = vmax.bf16 %v5787_v55, %v5739_v50 }
 0x3c9   : > { %v6610_v31 = vmax.bf16 %v6494_v62, %v6386_v32  ;;  %v5836_v3 = vmax.bf16 %v5788_v30, %v5740_v63  ;;  %v6714_v39 = vsel %vm9732_vm11, %v6710_v19, %v6713_v22  ;;  %v6721_v26 = vsel %vm9732_vm11, %v6715_v4, %v6720_v16  ;;  %v5694_v16 = vld [vmem:[#allocation2 + $0x70] sm:$0xf] }
 0x3ca   : > { %v6611_v52 = vmax.bf16 %v6497_v47, %v6387_v57  ;;  %v6974_v2 = vsel %vm9739_vm12, %v8222_v8, %v6973_v61  ;;  %v11819_v46 = vmax.bf16 %v5882_v53, %v5834_v36  ;;  %v11821_v42 = vmax.bf16 %v5883_v40, %v5835_v1 }
 0x3cb   : > { %v6914_v43 = vmax.bf16 %v6714_v39, %v6610_v31  ;;  %v11823_v50 = vmax.bf16 %v5884_v12, %v5836_v3  ;;  %v6977_v56 = vsel %vm9739_vm12, %v6975_v28, %v6976_v27  ;;  %v5645_v20 = vmax.bf16 %v5597_v29, %v5549_v34  ;;  %v5695_v31 = vld [vmem:[#allocation2 + $0x74] sm:$0x3] }
 0x3cc   : > { %v6915_v35 = vmax.bf16 %v6721_v26, %v6611_v52  ;;  %v5646_v63 = vmax.bf16 %v11809_v49, %v5550_v59  ;;  %v6105_v18 = vshrl.u32 %v11819_v46, 16  ;;  %v6108_v23 = vshll.u32 %v11819_v46, 16  ;;  %v5789_v49 = vld [vmem:[#allocation2 + $0x78] sm:$0xf] }
 0x3cd   : > { %v6114_v13 = vshll.u32 %v11821_v42, 16  ;;  %v5647_v5 = vmax.bf16 %v11817_v25, %v5551_v33  ;;  %v7090_v51 = vmax.bf16 %v6974_v2, %v6914_v43  ;;  %v6118_v10 = vshrl.u32 %v11821_v42, 16  ;;  %v5790_v25 = vld [vmem:[#allocation2 + $0x7c] sm:$0xf]  ;;  %v5791_v43 = vld [vmem:[#allocation2 + $0x80] sm:$0x3] }
 0x3ce   : > { %v7091_v15 = vmax.bf16 %v6977_v56, %v6915_v35  ;;  %v6124_v41 = vshll.u32 %v11823_v50, 16  ;;  %v6107_v62 = vrot.slane %v6105_v18, 4  ;;  %v6110_v17 = vrot.slane %v6108_v23, 5  ;;  %v5885_v33 = vld [vmem:[#allocation2 + $0x84] sm:$0xf] }
 0x3cf   : > { %v6116_v44 = vrot.slane %v6114_v13, 5  ;;  %v6500_v38 = vrot.slane %v11821_v42, 5  ;;  %v6120_v21 = vrot.slane %v6118_v10, 4  ;;  %v8207_v58 = vrot.slane %v11819_v46, 9 }
 0x3d0   : > { %v8239_v48 = vcombine.low %v7090_v51, %v7091_v15  ;;  %v5741_v9 = vmax.bf16 %v5693_v11, %v5645_v20  ;;  %v6111_v45 = vor.u32 %v6110_v17, %v6107_v62  ;;  %v6126_v22 = vrot.slane %v6124_v41, 5  ;;  %v5886_v20 = vld [vmem:[#allocation2 + $0x88] sm:$0xf]  ;;  %v11856_v11 = vld [vmem:[#allocation2 + $0x70] sm:$0xf] }
 0x3d1   : > { %v6503_v61 = vrot.slane %v11823_v50, 5  ;;  %v6722_v14 = vrot.slane %v6105_v18, 5  ;;  %v6121_v7 = vor.u32 %v6120_v21, %v6116_v44  ;;  %v6723_v47 = vrot.slane %v6108_v23, 6  ;;  %v11858_v51 = vld [vmem:[#allocation2 + $0x74] sm:$0x3] }
 0x3d2   : > { %8631 = vmatmul.mubr.msk.bf16.gmra.mrb[24].mxu1 %vm2840_vm10, %v8239_v48  ;;  %v6726_v54 = vrot.slane %v6118_v10, 5  ;;  %v6727_v8 = vrot.slane %v6114_v13, 6  ;;  %v6112_v55 = vrot.slane %v6111_v45, 4  ;;  %v6501_v30 = vsel %vm9686_vm8, %v8207_v58, %v6500_v38  ;;  %v5887_v13 = vld [vmem:[#allocation2 + $0x8c] sm:$0x3] }
 0x3d3   : > { %v6731_v60 = vshrl.u32 %v11823_v50, 16  ;;  %v6734_v32 = vrot.slane %v6124_v41, 6  ;;  %v6122_v19 = vrot.slane %v6121_v7, 4  ;;  %v6502_v4 = vrot.slane %v6500_v38, 4  ;;  %v5552_v41 = vld [vmem:[#allocation2 + $0x60] sm:$0xf] }
 0x3d4   : > { %v6724_v53 = vor.u32 %v6723_v47, %v6722_v14  ;;  %v6728_v57 = vor.u32 %v6727_v8, %v6726_v54  ;;  %v6117_v28 = vsel %vm9631_vm15, %v6112_v55, %v6116_v44  ;;  %v8223_v40 = vrot.slane %v11819_v46, 10  ;;  %v11866_v38 = vld [vmem:[#allocation2 + $0x64] sm:$0xf]  ;;  %v11868_v48 = vld [vmem:[#allocation2 + $0x68] sm:$0x3] }
 0x3d5   : > { %v6733_v27 = vrot.slane %v6731_v60, 5  ;;  %v6980_v12 = vrot.slane %v11821_v42, 6  ;;  %v6127_v36 = vsel %vm9631_vm15, %v6122_v19, %v6126_v22  ;;  %v6388_v1 = vmax.bf16 %v6117_v28, %v11819_v46  ;;  %v5600_v46 = vld [vmem:[#allocation2 + $0x6c] sm:$0xf]  ;;  %v5696_v58 = vld [vmem:[#allocation2 + $0x78] sm:$0xf] }
 0x3d6   : > { %v6730_v3 = vrot.slane %v6728_v57, 4  ;;  %v6983_v29 = vrot.slane %v11823_v50, 6  ;;  %v6389_v52 = vmax.bf16 %v6127_v36, %v11821_v42  ;;  %v6725_v39 = vrot.slane %v6724_v53, 4 }
 0x3d7   : > { %v6735_v26 = vor.u32 %v6734_v32, %v6733_v27  ;;  %v6982_v2 = vrot.slane %v6980_v12, 4  ;;  %v6504_v34 = vsel %vm9686_vm8, %v6502_v4, %v6503_v61  ;;  %v6612_v59 = vmax.bf16 %v6501_v30, %v6388_v1 }
 0x3d8   : > { %v5742_v35 = vmax.bf16 %v5694_v16, %v5646_v63  ;;  %v5743_v56 = vmax.bf16 %v5695_v31, %v5647_v5  ;;  %v6613_v18 = vmax.bf16 %v6504_v34, %v6389_v52  ;;  %v6729_v50 = vsel %vm9732_vm11, %v6725_v39, %v6728_v57 }
 0x3d9   : > { %v6981_v42 = vsel %vm9739_vm12, %v8223_v40, %v6980_v12  ;;  %v5837_v23 = vmax.bf16 %v5789_v49, %v5741_v9  ;;  %v6736_v63 = vsel %vm9732_vm11, %v6730_v3, %v6735_v26  ;;  %v6916_v5 = vmax.bf16 %v6729_v50, %v6612_v59  ;;  %v5792_v50 = vld [vmem:[#allocation2 + $0x84] sm:$0xf] }
 0x3da   : > { %v5838_v15 = vmax.bf16 %v5790_v25, %v5742_v35  ;;  %v5839_v10 = vmax.bf16 %v5791_v43, %v5743_v56  ;;  %v6917_v62 = vmax.bf16 %v6736_v63, %v6613_v18  ;;  %v6984_v17 = vsel %vm9739_vm12, %v6982_v2, %v6983_v29  ;;  %v5697_v35 = vld [vmem:[#allocation2 + $0x7c] sm:$0xf]  ;;  %v5698_v56 = vld [vmem:[#allocation2 + $0x80] sm:$0x3]  ;;  %v5794_v63 = vld [vmem:[#allocation2 + $0x8c] sm:$0x3] }
 0x3db   : > { %v11864_v44 = vmax.bf16 %v5885_v33, %v5837_v23  ;;  %v5648_v21 = vmax.bf16 %v5600_v46, %v5552_v41  ;;  %v5649_v22 = vmax.bf16 %v11856_v11, %v11866_v38  ;;  %v5650_v61 = vmax.bf16 %v11858_v51, %v11868_v48  ;;  %v5604_v38 = vld [vmem:[#allocation2 + $0x7c] sm:$0xf] }
 0x3dc   : > { %v11870_v9 = vmax.bf16 %v5886_v20, %v5838_v15  ;;  %v11872_v45 = vmax.bf16 %v5887_v13, %v5839_v10  ;;  %v7092_v14 = vmax.bf16 %v6981_v42, %v6916_v5  ;;  %v7093_v7 = vmax.bf16 %v6984_v17, %v6917_v62  ;;  %v5793_v42 = vld [vmem:[#allocation2 + $0x88] sm:$0xf]  ;;  %v5555_v5 = vld [vmem:[#allocation2 + $0x6c] sm:$0xf]  ;;  %v5603_v15 = vld [vmem:[#allocation2 + $0x78] sm:$0xf] }
 0x3dd   : > { %v6129_v47 = vshrl.u32 %v11864_v44, 16  ;;  %v6132_v54 = vshll.u32 %v11864_v44, 16  ;;  %v11883_v60 = vmax.bf16 %v5696_v58, %v5648_v21  ;;  %v8208_v28 = vrot.slane %v11864_v44, 9 }
 0x3de   : > { %v6138_v8 = vshll.u32 %v11870_v9, 16  ;;  %v6142_v55 = vshrl.u32 %v11870_v9, 16  ;;  %v6507_v30 = vrot.slane %v11870_v9, 5  ;;  %v8240_v32 = vcombine.low %v7092_v14, %v7093_v7  ;;  %v5888_v7 = vld [vmem:[#allocation2 + $0x90] sm:$0xf] }
 0x3df   : > { %v6131_v19 = vrot.slane %v6129_v47, 4  ;;  %v6134_v4 = vrot.slane %v6132_v54, 5  ;;  %v6148_v53 = vshll.u32 %v11872_v45, 16  ;;  %v6510_v27 = vrot.slane %v11872_v45, 5 }
 0x3e0   : > { %v6140_v57 = vrot.slane %v6138_v8, 5  ;;  %v6144_v16 = vrot.slane %v6142_v55, 4  ;;  %8634 = vmatprep.mubr.msk.bf16.mxu1 %vm2840_vm10, %v8240_v32  ;;  %v6509_v12 = vrot.slane %v6507_v30, 4  ;;  %v6737_v31 = vrot.slane %v6129_v47, 5  ;;  %v5556_v47 = vld [vmem:[#allocation2 + $0x70] sm:$0xf] }
 0x3e1   : > { %v6135_v40 = vor.u32 %v6134_v4, %v6131_v19  ;;  %v6738_v36 = vrot.slane %v6132_v54, 6  ;;  %v6741_v3 = vrot.slane %v6142_v55, 5  ;;  %v6742_v29 = vrot.slane %v6138_v8, 6  ;;  %v5699_v54 = vld [vmem:[#allocation2 + $0x84] sm:$0xf] }
 0x3e2   : > { %v6145_v1 = vor.u32 %v6144_v16, %v6140_v57  ;;  %v6746_v49 = vshrl.u32 %v11872_v45, 16  ;;  %v6150_v39 = vrot.slane %v6148_v53, 5  ;;  %v6749_v2 = vrot.slane %v6148_v53, 6  ;;  %v11908_v32 = vld [vmem:[#allocation2 + $0x80] sm:$0x3] }
 0x3e3   : > { %v6136_v52 = vrot.slane %v6135_v40, 4  ;;  %v6739_v26 = vor.u32 %v6738_v36, %v6737_v31  ;;  %v6508_v43 = vsel %vm9686_vm8, %v8208_v28, %v6507_v30  ;;  %v6743_v34 = vor.u32 %v6742_v29, %v6741_v3  ;;  %v5890_v30 = vld [vmem:[#allocation2 + $0x98] sm:$0x3] }
 0x3e4   : > { %v6146_v25 = vrot.slane %v6145_v1, 4  ;;  %v6748_v59 = vrot.slane %v6746_v49, 5  ;;  %v6511_v20 = vsel %vm9686_vm8, %v6509_v12, %v6510_v27  ;;  %v6987_v18 = vrot.slane %v11870_v9, 6  ;;  %v11916_v27 = vld [vmem:[#allocation2 + $0x74] sm:$0x3] }
 0x3e5   : > { %v6141_v33 = vsel %vm9631_vm15, %v6136_v52, %v6140_v57  ;;  %v6740_v46 = vrot.slane %v6739_v26, 4  ;;  %v6745_v11 = vrot.slane %v6743_v34, 4  ;;  %v8224_v41 = vrot.slane %v11864_v44, 10 }
 0x3e6   : > { %v6151_v23 = vsel %vm9631_vm15, %v6146_v25, %v6150_v39  ;;  %v6390_v13 = vmax.bf16 %v6141_v33, %v11864_v44  ;;  %v6750_v51 = vor.u32 %v6749_v2, %v6748_v59  ;;  %v6989_v62 = vrot.slane %v6987_v18, 4  ;;  %v5889_v44 = vld [vmem:[#allocation2 + $0x94] sm:$0xf] }
 0x3e7   : > { %v6391_v10 = vmax.bf16 %v6151_v23, %v11870_v9  ;;  %v6990_v17 = vrot.slane %v11872_v45, 6  ;;  %v6744_v21 = vsel %vm9732_vm11, %v6740_v46, %v6743_v34  ;;  %v5745_v58 = vmax.bf16 %v5697_v35, %v5649_v22  ;;  %v11934_v35 = vpop.f32.mrb[48].mxu0 }
 0x3e8   : > { %v6614_v48 = vmax.bf16 %v6508_v43, %v6390_v13  ;;  %v5746_v14 = vmax.bf16 %v5698_v56, %v5650_v61  ;;  %v6751_v55 = vsel %vm9732_vm11, %v6745_v11, %v6750_v51  ;;  %v5840_v9 = vmax.bf16 %v5792_v50, %v11883_v60  ;;  %v5700_v60 = vld [vmem:[#allocation2 + $0x88] sm:$0xf] }
 0x3e9   : > { %v6615_v8 = vmax.bf16 %v6511_v20, %v6391_v10  ;;  %v5651_v45 = vmax.bf16 %v5603_v15, %v5555_v5  ;;  %v5841_v4 = vmax.bf16 %v5793_v42, %v5745_v58  ;;  %v5652_v57 = vmax.bf16 %v5604_v38, %v5556_v47  ;;  %v5701_v47 = vld [vmem:[#allocation2 + $0x8c] sm:$0x3] }
 0x3ea   : > { %v6918_v19 = vmax.bf16 %v6744_v21, %v6614_v48  ;;  %v5842_v53 = vmax.bf16 %v5794_v63, %v5746_v14  ;;  %v6988_v61 = vsel %vm9739_vm12, %v8224_v41, %v6987_v18  ;;  %v6991_v16 = vsel %vm9739_vm12, %v6989_v62, %v6990_v17  ;;  %v11938_v18 = vpop.f32.mrb[49].mxu0 }
 0x3eb   : > { %v6919_v22 = vmax.bf16 %v6751_v55, %v6615_v8  ;;  %v11914_v28 = vmax.bf16 %v5888_v7, %v5840_v9  ;;  %v11918_v40 = vmax.bf16 %v5889_v44, %v5841_v4  ;;  %v5653_v31 = vmax.bf16 %v11908_v32, %v11916_v27  ;;  %v11941_v11 = vpop.f32.mrb[50].mxu0 }
 0x3ec   : > { %v11920_v12 = vmax.bf16 %v5890_v30, %v5842_v53  ;;  %v11924_v36 = vmax.bf16 %v5699_v54, %v5651_v45  ;;  %v7094_v1 = vmax.bf16 %v6988_v61, %v6918_v19  ;;  %v11931_v2 = vmax.bf16 %v5700_v60, %v5652_v57  ;;  %v11944_v10 = vpop.f32.mrb[51].mxu0  ;;  %v5795_v30 = vld [vmem:[#allocation2 + $0x90] sm:$0xf]  ;;  %v5891_v61 = vld [vmem:[#allocation2 + $0x9c] sm:$0xf] }
 0x3ed   : > { %v7095_v3 = vmax.bf16 %v6991_v16, %v6919_v22  ;;  %v6153_v29 = vshrl.u32 %v11914_v28, 16  ;;  %v6156_v49 = vshll.u32 %v11914_v28, 16  ;;  %v6162_v52 = vshll.u32 %v11918_v40, 16  ;;  %v11946_v48 = vpop.f32.mrb[52].mxu0  ;;  %v5796_v22 = vld [vmem:[#allocation2 + $0x94] sm:$0xf] }
 0x3ee   : > { %v6166_v39 = vshrl.u32 %v11918_v40, 16  ;;  %v6172_v26 = vshll.u32 %v11920_v12, 16  ;;  %v6514_v59 = vrot.slane %v11918_v40, 5  ;;  %v8209_v20 = vrot.slane %v11914_v28, 9  ;;  %v11950_v54 = vpop.f32.mrb[53].mxu0 }
 0x3ef   : > { %v8241_v25 = vcombine.low %v7094_v1, %v7095_v3  ;;  %v6155_v43 = vrot.slane %v6153_v29, 4  ;;  %v6158_v34 = vrot.slane %v6156_v49, 5  ;;  %v6164_v56 = vrot.slane %v6162_v52, 5  ;;  %v11956_v45 = vpop.f32.mrb[54].mxu0  ;;  %v5606_v16 = vld [vmem:[#allocation2 + $0x84] sm:$0xf] }
 0x3f0   : > { %v6168_v33 = vrot.slane %v6166_v39, 4  ;;  %v6517_v46 = vrot.slane %v11920_v12, 5  ;;  %v6174_v42 = vrot.slane %v6172_v26, 5  ;;  %v6752_v23 = vrot.slane %v6153_v29, 5  ;;  %12522 = vst [vmem:[#allocation4_spill] sm:$0xff] %v11956_v45  ;;  %v11961_v60 = vpop.f32.mrb[55].mxu0 }
 0x3f1   : > { %8635 = vmatmul.mubr.msk.bf16.gmra.mrb[28].mxu1 %vm2840_vm10, %v8241_v25  ;;  %v6159_v50 = vor.u32 %v6158_v34, %v6155_v43  ;;  %v6753_v13 = vrot.slane %v6156_v49, 6  ;;  %v6756_v63 = vrot.slane %v6166_v39, 5  ;;  %v6757_v5 = vrot.slane %v6162_v52, 6  ;;  %12523 = vst [vmem:[#allocation3_spill] sm:$0xff] %v11961_v60  ;;  %v5797_v49 = vld [vmem:[#allocation2 + $0x98] sm:$0x3] }
 0x3f2   : > { %v6169_v51 = vor.u32 %v6168_v33, %v6164_v56  ;;  %v6761_v15 = vshrl.u32 %v11920_v12, 16  ;;  %v6516_v62 = vrot.slane %v6514_v59, 4  ;;  %v6764_v38 = vrot.slane %v6172_v26, 6  ;;  %v11967_v52 = vpop.f32.mrb[56].mxu0  ;;  %v11975_v34 = vld [vmem:[#allocation2 + $0x88] sm:$0xf] }
 0x3f3   : > { %v6160_v41 = vrot.slane %v6159_v50, 4  ;;  %v6754_v17 = vor.u32 %v6753_v13, %v6752_v23  ;;  %v6515_v58 = vsel %vm9686_vm8, %v8209_v20, %v6514_v59  ;;  %v6758_v14 = vor.u32 %v6757_v5, %v6756_v63  ;;  %12524 = vst [vmem:[#allocation5_spill] sm:$0xff] %v11967_v52  ;;  %v11977_v59 = vpop.f32.mrb[57].mxu0  ;;  %v11984_v50 = vld [vmem:[#allocation2 + $0x8c] sm:$0x3] }
 0x3f4   : > { %v6170_v21 = vrot.slane %v6169_v51, 4  ;;  %v6763_v7 = vrot.slane %v6761_v15, 5  ;;  %v6994_v9 = vrot.slane %v11918_v40, 6  ;;  %v6997_v44 = vrot.slane %v11920_v12, 6  ;;  %12525 = vst [vmem:[#allocation6_spill] sm:$0xff] %v11977_v59  ;;  %v11986_v32 = vpop.f32.mrb[58].mxu0 }
 0x3f5   : > { %v6165_v8 = vsel %vm9631_vm15, %v6160_v41, %v6164_v56  ;;  %v6755_v55 = vrot.slane %v6754_v17, 4  ;;  %v6760_v53 = vrot.slane %v6758_v14, 4  ;;  %v6518_v12 = vsel %vm9686_vm8, %v6516_v62, %v6517_v46  ;;  %v5893_v46 = vld [vmem:[#allocation2 + $0xa4] sm:$0x3]  ;;  %12526 = vst [vmem:[#allocation7_spill] sm:$0xff] %v11986_v32  ;;  %v11994_v51 = vpop.f32.mrb[59].mxu0 }
 0x3f6   : > { %v6175_v19 = vsel %vm9631_vm15, %v6170_v21, %v6174_v42  ;;  %v6392_v4 = vmax.bf16 %v6165_v8, %v11914_v28  ;;  %v6765_v57 = vor.u32 %v6764_v38, %v6763_v7  ;;  %v8225_v3 = vrot.slane %v11914_v28, 10  ;;  %v5558_v23 = vld [vmem:[#allocation2 + $0x78] sm:$0xf]  ;;  %v11992_v13 = vld [vmem:[#allocation2 + $0x7c] sm:$0xf]  ;;  %12527 = vst [vmem:[#allocation8_spill] sm:$0xff] %v11994_v51 }
 0x3f7   : > { %v6393_v1 = vmax.bf16 %v6175_v19, %v11918_v40  ;;  %v6996_v29 = vrot.slane %v6994_v9, 4  ;;  %v6759_v26 = vsel %vm9732_vm11, %v6755_v55, %v6758_v14  ;;  %v5749_v25 = vmax.bf16 %v5701_v47, %v5653_v31  ;;  %v5892_v40 = vld [vmem:[#allocation2 + $0xa0] sm:$0xf]  ;;  %v12002_v62 = vpop.f32.mrb[60].mxu0  ;;  %v5702_v14 = vld [vmem:[#allocation2 + $0x90] sm:$0xf] }
 0x3f8   : > { %v6616_v39 = vmax.bf16 %v6515_v58, %v6392_v4  ;;  %v5843_v43 = vmax.bf16 %v5795_v30, %v11924_v36  ;;  %v6766_v56 = vsel %vm9732_vm11, %v6760_v53, %v6765_v57  ;;  %v6995_v33 = vsel %vm9739_vm12, %v8225_v3, %v6994_v9  ;;  %12528 = vst [vmem:[#allocation9_spill] sm:$0xff] %v12002_v62  ;;  %v12010_v7 = vpop.f32.mrb[61].mxu0  ;;  %v5711_v60 = vld [vmem:[#allocation2 + $0xb4] sm:$0xf] }
 0x3f9   : > { %v6617_v28 = vmax.bf16 %v6518_v12, %v6393_v1  ;;  %v5844_v20 = vmax.bf16 %v5796_v22, %v11931_v2  ;;  %v6998_v31 = vsel %vm9739_vm12, %v6996_v29, %v6997_v44  ;;  %v5845_v36 = vmax.bf16 %v5797_v49, %v5749_v25  ;;  %v11998_v2 = vld [vmem:[#allocation2 + $0x80] sm:$0x3]  ;;  %12529 = vst [vmem:[#allocation10_spill] sm:$0xff] %v12010_v7  ;;  %v12014_v44 = vpop.f32.mrb[62].mxu0 }
 0x3fa   : > { %v6920_v27 = vmax.bf16 %v6759_v26, %v6616_v39  ;;  %v11990_v42 = vmax.bf16 %v5891_v61, %v5843_v43  ;;  %v5654_v15 = vmax.bf16 %v5606_v16, %v5558_v23  ;;  %v5655_v41 = vmax.bf16 %v11975_v34, %v11992_v13  ;;  %12530 = vst [vmem:[#allocation11_spill] sm:$0xff] %v12014_v44  ;;  %v12018_v57 = vpop.f32.mrb[63].mxu0 }
 0x3fb   : > { %v6921_v63 = vmax.bf16 %v6766_v56, %v6617_v28  ;;  %v11996_v5 = vmax.bf16 %v5892_v40, %v5844_v20  ;;  %v12004_v17 = vmax.bf16 %v5893_v46, %v5845_v36  ;;  %v5656_v58 = vmax.bf16 %v11984_v50, %v11998_v2  ;;  %12531 = vst [vmem:[#allocation12_spill] sm:$0xff] %v12018_v57  ;;  %v12022_v12 = vpop.f32.mrb[32].mxu0 }
 0x3fc   : > { %v6177_v38 = vshrl.u32 %v11990_v42, 16  ;;  %v6180_v21 = vshll.u32 %v11990_v42, 16  ;;  %v7096_v47 = vmax.bf16 %v6995_v33, %v6920_v27  ;;  %v12020_v1 = vmax.bf16 %v5702_v14, %v5654_v15  ;;  %v12026_v26 = vpop.f32.mrb[33].mxu0 }
 0x3fd   : > { %v7097_v8 = vmax.bf16 %v6998_v31, %v6921_v63  ;;  %v6186_v55 = vshll.u32 %v11996_v5, 16  ;;  %v6190_v9 = vshrl.u32 %v11996_v5, 16  ;;  %v6196_v4 = vshll.u32 %v12004_v17, 16  ;;  %v12029_v56 = vpop.f32.mrb[34].mxu0  ;;  %v5703_v31 = vld [vmem:[#allocation2 + $0x94] sm:$0xf] }
 0x3fe   : > { %v6179_v30 = vrot.slane %v6177_v38, 4  ;;  %v6182_v19 = vrot.slane %v6180_v21, 5  ;;  %v6521_v53 = vrot.slane %v11996_v5, 5  ;;  %v8210_v29 = vrot.slane %v11990_v42, 9  ;;  %v12032_v36 = vpop.f32.mrb[35].mxu0 }
 0x3ff   : > { %v8242_v22 = vcombine.low %v7096_v47, %v7097_v8  ;;  %v6188_v61 = vrot.slane %v6186_v55, 5  ;;  %v6192_v16 = vrot.slane %v6190_v9, 4  ;;  %v6524_v39 = vrot.slane %v12004_v17, 5  ;;  %v5704_v47 = vld [vmem:[#allocation2 + $0x98] sm:$0x3] }
 0x400   : > { %v6183_v3 = vor.u32 %v6182_v19, %v6179_v30  ;;  %v6523_v49 = vrot.slane %v6521_v53, 4  ;;  %v6767_v43 = vrot.slane %v6177_v38, 5  ;;  %v6768_v40 = vrot.slane %v6180_v21, 6  ;;  %v12036_v38 = vpop.f32.mrb[36].mxu0  ;;  %v5798_v30 = vld [vmem:[#allocation2 + $0x9c] sm:$0xf] }
 0x401   : > { %8638 = vmatprep.mubr.msk.bf16.mxu1 %vm2840_vm10, %v8242_v22  ;;  %v6193_v25 = vor.u32 %v6192_v16, %v6188_v61  ;;  %v6771_v28 = vrot.slane %v6190_v9, 5  ;;  %v6198_v20 = vrot.slane %v6196_v4, 5  ;;  %v6772_v46 = vrot.slane %v6186_v55, 6  ;;  %v12041_v19 = vpop.f32.mrb[37].mxu0 }
 0x402   : > { %v6184_v33 = vrot.slane %v6183_v3, 4  ;;  %v6776_v27 = vshrl.u32 %v12004_v17, 16  ;;  %v6522_v63 = vsel %vm9686_vm8, %v8210_v29, %v6521_v53  ;;  %v6769_v15 = vor.u32 %v6768_v40, %v6767_v43  ;;  %v5799_v3 = vld [vmem:[#allocation2 + $0xa0] sm:$0xf]  ;;  %v5800_v29 = vld [vmem:[#allocation2 + $0xa4] sm:$0x3] }
 0x403   : > { %v6194_v23 = vrot.slane %v6193_v25, 4  ;;  %v6779_v14 = vrot.slane %v6196_v4, 6  ;;  %v6773_v8 = vor.u32 %v6772_v46, %v6771_v28  ;;  %v7001_v55 = vrot.slane %v11996_v5, 6  ;;  %v12048_v25 = vpop.f32.mrb[38].mxu0 }
 0x404   : > { %v6189_v21 = vsel %vm9631_vm15, %v6184_v33, %v6188_v61  ;;  %v6778_v9 = vrot.slane %v6776_v27, 5  ;;  %v6525_v4 = vsel %vm9686_vm8, %v6523_v49, %v6524_v39  ;;  %v6770_v16 = vrot.slane %v6769_v15, 4  ;;  %v5894_v33 = vld [vmem:[#allocation2 + $0xa8] sm:$0xf]  ;;  %v12052_v46 = vpop.f32.mrb[39].mxu0 }
 0x405   : > { %v6199_v22 = vsel %vm9631_vm15, %v6194_v23, %v6198_v20  ;;  %v6394_v53 = vmax.bf16 %v6189_v21, %v11990_v42  ;;  %v6775_v43 = vrot.slane %v6773_v8, 4  ;;  %v7004_v28 = vrot.slane %v12004_v17, 6  ;;  %v5609_v39 = vld [vmem:[#allocation2 + $0x90] sm:$0xf]  ;;  %v12058_v15 = vpop.f32.mrb[40].mxu0 }
 0x406   : > { %v6395_v61 = vmax.bf16 %v6199_v22, %v11996_v5  ;;  %v6780_v40 = vor.u32 %v6779_v14, %v6778_v9  ;;  %v8226_v27 = vrot.slane %v11990_v42, 10  ;;  %v7003_v23 = vrot.slane %v7001_v55, 4  ;;  %v5895_v14 = vld [vmem:[#allocation2 + $0xac] sm:$0xf]  ;;  %v12066_v42 = vld [vmem:[#allocation2 + $0x94] sm:$0xf] }
 0x407   : > { %v6618_v20 = vmax.bf16 %v6522_v63, %v6394_v53  ;;  %v5751_v49 = vmax.bf16 %v5703_v31, %v5655_v41  ;;  %v6774_v5 = vsel %vm9732_vm11, %v6770_v16, %v6773_v8  ;;  %v5752_v17 = vmax.bf16 %v5704_v47, %v5656_v58  ;;  %v12068_v9 = vpop.f32.mrb[41].mxu0  ;;  %v5896_v8 = vld [vmem:[#allocation2 + $0xb0] sm:$0x3]  ;;  %v5561_v22 = vld [vmem:[#allocation2 + $0x84] sm:$0xf] }
 0x408   : > { %v6619_v21 = vmax.bf16 %v6525_v4, %v6395_v61  ;;  %v5846_v63 = vmax.bf16 %v5798_v30, %v12020_v1  ;;  %v6781_v34 = vsel %vm9732_vm11, %v6775_v43, %v6780_v40  ;;  %v7002_v41 = vsel %vm9739_vm12, %v8226_v27, %v7001_v55  ;;  %v12074_v53 = vpop.f32.mrb[42].mxu0  ;;  %v12080_v47 = vld [vmem:[#allocation2 + $0x88] sm:$0xf]  ;;  %v12082_v30 = vld [vmem:[#allocation2 + $0x98] sm:$0x3] }
 0x409   : > { %v6922_v13 = vmax.bf16 %v6774_v5, %v6618_v20  ;;  %v5847_v31 = vmax.bf16 %v5799_v3, %v5751_v49  ;;  %v7005_v2 = vsel %vm9739_vm12, %v7003_v23, %v7004_v28  ;;  %v5848_v58 = vmax.bf16 %v5800_v29, %v5752_v17  ;;  %v12084_v4 = vpop.f32.mrb[43].mxu0  ;;  %v12088_v3 = vld [vmem:[#allocation2 + $0x8c] sm:$0x3]  ;;  %v5705_v27 = vld [vmem:[#allocation2 + $0x9c] sm:$0xf] }
 0x40a   : > { %v6923_v50 = vmax.bf16 %v6781_v34, %v6619_v21  ;;  %v12078_v1 = vmax.bf16 %v5894_v33, %v5846_v63  ;;  %v5657_v61 = vmax.bf16 %v5609_v39, %v5561_v22  ;;  %v5658_v43 = vmax.bf16 %v12066_v42, %v12080_v47  ;;  %v12092_v40 = vpop.f32.mrb[44].mxu0 }
 0x40b   : > { %v7098_v16 = vmax.bf16 %v7002_v41, %v6922_v13  ;;  %v12086_v55 = vmax.bf16 %v5895_v14, %v5847_v31  ;;  %v12094_v28 = vmax.bf16 %v5896_v8, %v5848_v58  ;;  %v12098_v23 = vpop.f32.mrb[45].mxu0  ;;  %v5659_v5 = vmax.bf16 %v12082_v30, %v12088_v3 }
 0x40c   : > { %v7099_v29 = vmax.bf16 %v7005_v2, %v6923_v50  ;;  %v6201_v33 = vshrl.u32 %v12078_v1, 16  ;;  %v6204_v20 = vshll.u32 %v12078_v1, 16  ;;  %v12105_v17 = vpop.f32.mrb[46].mxu0  ;;  %v8211_v8 = vrot.slane %v12078_v1, 9 }
 0x40d   : > { %v6210_v49 = vshll.u32 %v12086_v55, 16  ;;  %v6214_v21 = vshrl.u32 %v12086_v55, 16  ;;  %v6528_v39 = vrot.slane %v12086_v55, 5  ;;  %v6220_v34 = vshll.u32 %v12094_v28, 16  ;;  %v12108_v13 = vpop.f32.mrb[47].mxu0 }
 0x40e   : > { %v8243_v63 = vcombine.low %v7098_v16, %v7099_v29  ;;  %v6203_v14 = vrot.slane %v6201_v33, 4  ;;  %v6206_v42 = vrot.slane %v6204_v20, 5  ;;  %v5753_v22 = vmax.bf16 %v5705_v27, %v5657_v61 }
 0x40f   : > { %v6212_v41 = vrot.slane %v6210_v49, 5  ;;  %v6216_v31 = vrot.slane %v6214_v21, 4  ;;  %v6530_v2 = vrot.slane %v6528_v39, 4  ;;  %v6531_v58 = vrot.slane %v12094_v28, 5 }
 0x410   : > { %8639 = vmatmul.mubr.msk.bf16.gmra.mrb[0].mxu1 %vm2840_vm10, %v8243_v63  ;;  %v6207_v50 = vor.u32 %v6206_v42, %v6203_v14  ;;  %v6782_v47 = vrot.slane %v6201_v33, 5  ;;  %v6783_v16 = vrot.slane %v6204_v20, 6  ;;  %v6786_v3 = vrot.slane %v6214_v21, 5  ;;  %v5706_v14 = vld [vmem:[#allocation2 + $0xa0] sm:$0xf] }
 0x411   : > { %v6217_v30 = vor.u32 %v6216_v31, %v6212_v41  ;;  %v6787_v29 = vrot.slane %v6210_v49, 6  ;;  %v6529_v44 = vsel %vm9686_vm8, %v8211_v8, %v6528_v39  ;;  %v6791_v7 = vshrl.u32 %v12094_v28, 16  ;;  %v5707_v21 = vld [vmem:[#allocation2 + $0xa4] sm:$0x3]  ;;  %v5801_v31 = vld [vmem:[#allocation2 + $0xa8] sm:$0xf] }
 0x412   : > { %v6208_v57 = vrot.slane %v6207_v50, 4  ;;  %v6794_v62 = vrot.slane %v6220_v34, 6  ;;  %v6222_v61 = vrot.slane %v6220_v34, 5  ;;  %v6784_v27 = vor.u32 %v6783_v16, %v6782_v47  ;;  %v5802_v47 = vld [vmem:[#allocation2 + $0xac] sm:$0xf] }
 0x413   : > { %v6218_v51 = vrot.slane %v6217_v30, 4  ;;  %v6788_v63 = vor.u32 %v6787_v29, %v6786_v3  ;;  %v6532_v33 = vsel %vm9686_vm8, %v6530_v2, %v6531_v58  ;;  %v6793_v20 = vrot.slane %v6791_v7, 5  ;;  %v5803_v30 = vld [vmem:[#allocation2 + $0xb0] sm:$0x3]  ;;  %v5897_v7 = vld [vmem:[#allocation2 + $0xb4] sm:$0xf] }
 0x414   : > { %v6213_v42 = vsel %vm9631_vm15, %v6208_v57, %v6212_v41  ;;  %v7008_v49 = vrot.slane %v12086_v55, 6  ;;  %v7011_v50 = vrot.slane %v12094_v28, 6  ;;  %v6785_v41 = vrot.slane %v6784_v27, 4  ;;  %v5612_v58 = vld [vmem:[#allocation2 + $0x9c] sm:$0xf] }
 0x415   : > { %v6223_v39 = vsel %vm9631_vm15, %v6218_v51, %v6222_v61  ;;  %v6396_v8 = vmax.bf16 %v6213_v42, %v12078_v1  ;;  %v6790_v34 = vrot.slane %v6788_v63, 4  ;;  %v6795_v16 = vor.u32 %v6794_v62, %v6793_v20  ;;  %v5898_v51 = vld [vmem:[#allocation2 + $0xb8] sm:$0xf]  ;;  %v5564_v61 = vld [vmem:[#allocation2 + $0x90] sm:$0xf] }
 0x416   : > { %v6397_v57 = vmax.bf16 %v6223_v39, %v12086_v55  ;;  %v7010_v2 = vrot.slane %v7008_v49, 4  ;;  %v8227_v29 = vrot.slane %v12078_v1, 10  ;;  %v5754_v32 = vmax.bf16 %v5706_v14, %v5658_v43  ;;  %v5899_v27 = vld [vmem:[#allocation2 + $0xbc] sm:$0x3]  ;;  %v12131_v62 = vld [vmem:[#allocation2 + $0xa0] sm:$0xf] }
 0x417   : > { %v6620_v3 = vmax.bf16 %v6529_v44, %v6396_v8  ;;  %v5755_v59 = vmax.bf16 %v5707_v21, %v5659_v5  ;;  %v6789_v28 = vsel %vm9732_vm11, %v6785_v41, %v6788_v63  ;;  %v6796_v52 = vsel %vm9732_vm11, %v6790_v34, %v6795_v16  ;;  %v12133_v20 = vld [vmem:[#allocation2 + $0xa4] sm:$0x3]  ;;  %v12141_v21 = vld [vmem:[#allocation2 + $0x94] sm:$0xf] }
 0x418   : > { %v6621_v42 = vmax.bf16 %v6532_v33, %v6397_v57  ;;  %v5849_v55 = vmax.bf16 %v5801_v31, %v5753_v22  ;;  %v5850_v39 = vmax.bf16 %v5802_v47, %v5754_v32  ;;  %v5660_v43 = vmax.bf16 %v5612_v58, %v5564_v61  ;;  %v12143_v22 = vld [vmem:[#allocation2 + $0x98] sm:$0x3]  ;;  %v5708_v31 = vld [vmem:[#allocation2 + $0xa8] sm:$0xf] }
 0x419   : > { %v6924_v44 = vmax.bf16 %v6789_v28, %v6620_v3  ;;  %v5851_v1 = vmax.bf16 %v5803_v30, %v5755_v59  ;;  %v7009_v14 = vsel %vm9739_vm12, %v8227_v29, %v7008_v49  ;;  %v7012_v63 = vsel %vm9739_vm12, %v7010_v2, %v7011_v50 }
 0x41a   : > { %v6925_v5 = vmax.bf16 %v6796_v52, %v6621_v42  ;;  %v12139_v33 = vmax.bf16 %v5897_v7, %v5849_v55  ;;  %v12145_v8 = vmax.bf16 %v5898_v51, %v5850_v39  ;;  %v5661_v52 = vmax.bf16 %v12131_v62, %v12141_v21  ;;  %v5709_v21 = vld [vmem:[#allocation2 + $0xac] sm:$0xf] }
 0x41b   : > { %v12147_v34 = vmax.bf16 %v5899_v27, %v5851_v1  ;;  %v5662_v59 = vmax.bf16 %v12133_v20, %v12143_v22  ;;  %v7100_v32 = vmax.bf16 %v7009_v14, %v6924_v44  ;;  %v12158_v16 = vmax.bf16 %v5708_v31, %v5660_v43 }
 0x41c   : > { %v7101_v49 = vmax.bf16 %v7012_v63, %v6925_v5  ;;  %v6225_v50 = vshrl.u32 %v12139_v33, 16  ;;  %v6228_v47 = vshll.u32 %v12139_v33, 16  ;;  %v6234_v30 = vshll.u32 %v12145_v8, 16 }
 0x41d   : > { %v6238_v57 = vshrl.u32 %v12145_v8, 16  ;;  %v6535_v41 = vrot.slane %v12145_v8, 5  ;;  %v6244_v3 = vshll.u32 %v12147_v34, 16  ;;  %v8212_v61 = vrot.slane %v12139_v33, 9 }
 0x41e   : > { %v8244_v2 = vcombine.low %v7100_v32, %v7101_v49  ;;  %v6227_v7 = vrot.slane %v6225_v50, 4  ;;  %v6230_v58 = vrot.slane %v6228_v47, 5  ;;  %v6236_v29 = vrot.slane %v6234_v30, 5 }
 0x41f   : > { %v6240_v51 = vrot.slane %v6238_v57, 4  ;;  %v6538_v42 = vrot.slane %v12147_v34, 5  ;;  %v6537_v55 = vrot.slane %v6535_v41, 4  ;;  %v6797_v27 = vrot.slane %v6225_v50, 5 }
 0x420   : > { %8642 = vmatprep.mubr.msk.bf16.mxu1 %vm2840_vm10, %v8244_v2  ;;  %v6231_v28 = vor.u32 %v6230_v58, %v6227_v7  ;;  %v6798_v62 = vrot.slane %v6228_v47, 6  ;;  %v6801_v44 = vrot.slane %v6238_v57, 5  ;;  %v6802_v39 = vrot.slane %v6234_v30, 6  ;;  %v5710_v2 = vld [vmem:[#allocation2 + $0xb0] sm:$0x3] }
 0x421   : > { %v6241_v20 = vor.u32 %v6240_v51, %v6236_v29  ;;  %v6806_v1 = vshrl.u32 %v12147_v34, 16  ;;  %v6246_v5 = vrot.slane %v6244_v3, 5  ;;  %v6809_v63 = vrot.slane %v6244_v3, 6  ;;  %v5804_v7 = vld [vmem:[#allocation2 + $0xb4] sm:$0xf] }
 0x422   : > { %v6232_v43 = vrot.slane %v6231_v28, 4  ;;  %v6799_v14 = vor.u32 %v6798_v62, %v6797_v27  ;;  %v6536_v31 = vsel %vm9686_vm8, %v8212_v61, %v6535_v41  ;;  %v6803_v32 = vor.u32 %v6802_v39, %v6801_v44  ;;  %v5805_v58 = vld [vmem:[#allocation2 + $0xb8] sm:$0xf]  ;;  %v5806_v3 = vld [vmem:[#allocation2 + $0xbc] sm:$0x3] }
 0x423   : > { %v6242_v22 = vrot.slane %v6241_v20, 4  ;;  %v6808_v49 = vrot.slane %v6806_v1, 5  ;;  %v6539_v47 = vsel %vm9686_vm8, %v6537_v55, %v6538_v42  ;;  %v7015_v57 = vrot.slane %v12145_v8, 6  ;;  %v5900_v27 = vld [vmem:[#allocation2 + $0xc0] sm:$0xf] }
 0x424   : > { %v6237_v50 = vsel %vm9631_vm15, %v6232_v43, %v6236_v29  ;;  %v6800_v30 = vrot.slane %v6799_v14, 4  ;;  %v6805_v61 = vrot.slane %v6803_v32, 4  ;;  %v5615_v62 = vld [vmem:[#allocation2 + $0xa8] sm:$0xf]  ;;  %v8228_v29 = vrot.slane %v12139_v33, 10 }
 0x425   : > { %v6247_v51 = vsel %vm9631_vm15, %v6242_v22, %v6246_v5  ;;  %v6398_v41 = vmax.bf16 %v6237_v50, %v12139_v33  ;;  %v6810_v28 = vor.u32 %v6809_v63, %v6808_v49  ;;  %v7017_v44 = vrot.slane %v7015_v57, 4  ;;  %v5616_v55 = vld [vmem:[#allocation2 + $0xac] sm:$0xf]  ;;  %v5901_v14 = vld [vmem:[#allocation2 + $0xc4] sm:$0xf] }
 0x426   : > { %v6399_v20 = vmax.bf16 %v6247_v51, %v12145_v8  ;;  %v7018_v42 = vrot.slane %v12147_v34, 6  ;;  %v6804_v1 = vsel %vm9732_vm11, %v6800_v30, %v6803_v32  ;;  %v5757_v43 = vmax.bf16 %v5709_v21, %v5661_v52  ;;  %v5902_v22 = vld [vmem:[#allocation2 + $0xc8] sm:$0x3]  ;;  %v5567_v50 = vld [vmem:[#allocation2 + $0x9c] sm:$0xf] }
 0x427   : > { %v6622_v39 = vmax.bf16 %v6536_v31, %v6398_v41  ;;  %v5758_v5 = vmax.bf16 %v5710_v2, %v5662_v59  ;;  %v6811_v49 = vsel %vm9732_vm11, %v6805_v61, %v6810_v28  ;;  %v5852_v8 = vmax.bf16 %v5804_v7, %v12158_v16  ;;  %v5568_v33 = vld [vmem:[#allocation2 + $0xa0] sm:$0xf]  ;;  %v12183_v51 = vld [vmem:[#allocation2 + $0xb0] sm:$0x3]  ;;  %v5712_v16 = vld [vmem:[#allocation2 + $0xb8] sm:$0xf] }
 0x428   : > { %v6623_v63 = vmax.bf16 %v6539_v47, %v6399_v20  ;;  %v5663_v34 = vmax.bf16 %v5615_v62, %v5567_v50  ;;  %v5853_v41 = vmax.bf16 %v5805_v58, %v5757_v43  ;;  %v5664_v32 = vmax.bf16 %v5616_v55, %v5568_v33  ;;  %v5569_v47 = vld [vmem:[#allocation2 + $0xa4] sm:$0x3] }
 0x429   : > { %v6926_v31 = vmax.bf16 %v6804_v1, %v6622_v39  ;;  %v5854_v45 = vmax.bf16 %v5806_v3, %v5758_v5  ;;  %v7016_v59 = vsel %vm9739_vm12, %v8228_v29, %v7015_v57  ;;  %v7019_v21 = vsel %vm9739_vm12, %v7017_v44, %v7018_v42 }
 0x42a   : > { %v6927_v52 = vmax.bf16 %v6811_v49, %v6623_v63  ;;  %v12189_v2 = vmax.bf16 %v5900_v27, %v5852_v8  ;;  %v12191_v7 = vmax.bf16 %v5901_v14, %v5853_v41  ;;  %v5665_v61 = vmax.bf16 %v12183_v51, %v5569_v47 }
 0x42b   : > { %v12193_v30 = vmax.bf16 %v5902_v22, %v5854_v45  ;;  %v12196_v58 = vmax.bf16 %v5711_v60, %v5663_v34  ;;  %v7102_v3 = vmax.bf16 %v7016_v59, %v6926_v31  ;;  %v12203_v44 = vmax.bf16 %v5712_v16, %v5664_v32  ;;  %v5713_v16 = vld [vmem:[#allocation2 + $0xbc] sm:$0x3] }
 0x42c   : > { %v7103_v28 = vmax.bf16 %v7019_v21, %v6927_v52  ;;  %v6249_v62 = vshrl.u32 %v12189_v2, 16  ;;  %v6252_v57 = vshll.u32 %v12189_v2, 16  ;;  %v6258_v20 = vshll.u32 %v12191_v7, 16 }
 0x42d   : > { %v6262_v27 = vshrl.u32 %v12191_v7, 16  ;;  %v6268_v29 = vshll.u32 %v12193_v30, 16  ;;  %v6542_v60 = vrot.slane %v12191_v7, 5  ;;  %v8213_v43 = vrot.slane %v12189_v2, 9 }
 0x42e   : > { %v8245_v45 = vcombine.low %v7102_v3, %v7103_v28  ;;  %v6251_v42 = vrot.slane %v6249_v62, 4  ;;  %v6254_v55 = vrot.slane %v6252_v57, 5  ;;  %v6260_v39 = vrot.slane %v6258_v20, 5 }
 0x42f   : > { %v6264_v1 = vrot.slane %v6262_v27, 4  ;;  %v6545_v5 = vrot.slane %v12193_v30, 5  ;;  %v6270_v22 = vrot.slane %v6268_v29, 5  ;;  %v6812_v50 = vrot.slane %v6249_v62, 5 }
 0x430   : > { %8643 = vmatmul.mubr.msk.bf16.gmra.mrb[4].mxu1 %vm2840_vm10, %v8245_v45  ;;  %v6255_v14 = vor.u32 %v6254_v55, %v6251_v42  ;;  %v6813_v63 = vrot.slane %v6252_v57, 6  ;;  %v6816_v8 = vrot.slane %v6262_v27, 5  ;;  %v6817_v33 = vrot.slane %v6258_v20, 6  ;;  %v5807_v20 = vld [vmem:[#allocation2 + $0xc0] sm:$0xf] }
 0x431   : > { %v6265_v49 = vor.u32 %v6264_v1, %v6260_v39  ;;  %v6821_v51 = vshrl.u32 %v12193_v30, 16  ;;  %v6544_v31 = vrot.slane %v6542_v60, 4  ;;  %v6824_v32 = vrot.slane %v6268_v29, 6  ;;  %v5808_v55 = vld [vmem:[#allocation2 + $0xc4] sm:$0xf] }
 0x432   : > { %v6256_v34 = vrot.slane %v6255_v14, 4  ;;  %v6814_v41 = vor.u32 %v6813_v63, %v6812_v50  ;;  %v6543_v59 = vsel %vm9686_vm8, %v8213_v43, %v6542_v60  ;;  %v6818_v21 = vor.u32 %v6817_v33, %v6816_v8  ;;  %v5809_v14 = vld [vmem:[#allocation2 + $0xc8] sm:$0x3]  ;;  %v5903_v50 = vld [vmem:[#allocation2 + $0xcc] sm:$0xf] }
 0x433   : > { %v6266_v52 = vrot.slane %v6265_v49, 4  ;;  %v6823_v47 = vrot.slane %v6821_v51, 5  ;;  %v7022_v62 = vrot.slane %v12191_v7, 6  ;;  %v7025_v57 = vrot.slane %v12193_v30, 6  ;;  %v5904_v8 = vld [vmem:[#allocation2 + $0xd0] sm:$0xf] }
 0x434   : > { %v6261_v3 = vsel %vm9631_vm15, %v6256_v34, %v6260_v39  ;;  %v6815_v28 = vrot.slane %v6814_v41, 4  ;;  %v6820_v45 = vrot.slane %v6818_v21, 4  ;;  %v6546_v1 = vsel %vm9686_vm8, %v6544_v31, %v6545_v5  ;;  %v5618_v33 = vld [vmem:[#allocation2 + $0xb4] sm:$0xf]  ;;  %v12226_v51 = vld [vmem:[#allocation2 + $0xb8] sm:$0xf] }
 0x435   : > { %v6271_v27 = vsel %vm9631_vm15, %v6266_v52, %v6270_v22  ;;  %v6400_v29 = vmax.bf16 %v6261_v3, %v12189_v2  ;;  %v6825_v42 = vor.u32 %v6824_v32, %v6823_v47  ;;  %v8229_v39 = vrot.slane %v12189_v2, 10  ;;  %v5905_v31 = vld [vmem:[#allocation2 + $0xd4] sm:$0x3]  ;;  %v12233_v41 = vld [vmem:[#allocation2 + $0xbc] sm:$0x3] }
 0x436   : > { %v6401_v60 = vmax.bf16 %v6271_v27, %v12191_v7  ;;  %v7024_v43 = vrot.slane %v7022_v62, 4  ;;  %v6819_v63 = vsel %vm9732_vm11, %v6815_v28, %v6818_v21  ;;  %v5761_v22 = vmax.bf16 %v5713_v16, %v5665_v61  ;;  %v5571_v21 = vld [vmem:[#allocation2 + $0xac] sm:$0xf]  ;;  %v5572_v3 = vld [vmem:[#allocation2 + $0xb0] sm:$0x3] }
 0x437   : > { %v6624_v30 = vmax.bf16 %v6543_v59, %v6400_v29  ;;  %v5855_v49 = vmax.bf16 %v5807_v20, %v12196_v58  ;;  %v6826_v5 = vsel %vm9732_vm11, %v6820_v45, %v6825_v42  ;;  %v7023_v2 = vsel %vm9739_vm12, %v8229_v39, %v7022_v62  ;;  %v5570_v59 = vld [vmem:[#allocation2 + $0xa8] sm:$0xf]  ;;  %v5714_v29 = vld [vmem:[#allocation2 + $0xc0] sm:$0xf] }
 0x438   : > { %v6625_v7 = vmax.bf16 %v6546_v1, %v6401_v60  ;;  %v5856_v34 = vmax.bf16 %v5808_v55, %v12203_v44  ;;  %v7026_v61 = vsel %vm9739_vm12, %v7024_v43, %v7025_v57  ;;  %v5857_v58 = vmax.bf16 %v5809_v14, %v5761_v22 }
 0x439   : > { %v6928_v32 = vmax.bf16 %v6819_v63, %v6624_v30  ;;  %v12237_v52 = vmax.bf16 %v5903_v50, %v5855_v49  ;;  %v5666_v28 = vmax.bf16 %v5618_v33, %v5570_v59  ;;  %v5667_v62 = vmax.bf16 %v12226_v51, %v5571_v21 }
 0x43a   : > { %v6929_v47 = vmax.bf16 %v6826_v5, %v6625_v7  ;;  %v12239_v16 = vmax.bf16 %v5904_v8, %v5856_v34  ;;  %v12242_v44 = vmax.bf16 %v5905_v31, %v5857_v58  ;;  %v5668_v57 = vmax.bf16 %v12233_v41, %v5572_v3 }
 0x43b   : > { %v6273_v20 = vshrl.u32 %v12237_v52, 16  ;;  %v6276_v27 = vshll.u32 %v12237_v52, 16  ;;  %v7104_v45 = vmax.bf16 %v7023_v2, %v6928_v32  ;;  %v5762_v22 = vmax.bf16 %v5714_v29, %v5666_v28 }
 0x43c   : > { %v7105_v42 = vmax.bf16 %v7026_v61, %v6929_v47  ;;  %v6282_v55 = vshll.u32 %v12239_v16, 16  ;;  %v6286_v60 = vshrl.u32 %v12239_v16, 16  ;;  %v6292_v43 = vshll.u32 %v12242_v44, 16 }
 0x43d   : > { %v6275_v1 = vrot.slane %v6273_v20, 4  ;;  %v6278_v39 = vrot.slane %v6276_v27, 5  ;;  %v6549_v14 = vrot.slane %v12239_v16, 5  ;;  %v8214_v8 = vrot.slane %v12237_v52, 9 }
 0x43e   : > { %v8246_v50 = vcombine.low %v7104_v45, %v7105_v42  ;;  %v6284_v30 = vrot.slane %v6282_v55, 5  ;;  %v6288_v63 = vrot.slane %v6286_v60, 4  ;;  %v6552_v51 = vrot.slane %v12242_v44, 5 }
 0x43f   : > { %v6279_v49 = vor.u32 %v6278_v39, %v6275_v1  ;;  %v6551_v33 = vrot.slane %v6549_v14, 4  ;;  %v6827_v5 = vrot.slane %v6273_v20, 5  ;;  %v6828_v2 = vrot.slane %v6276_v27, 6  ;;  %v5715_v27 = vld [vmem:[#allocation2 + $0xc4] sm:$0xf] }
 0x440   : > { %8646 = vmatprep.mubr.msk.bf16.mxu1 %vm2840_vm10, %v8246_v50  ;;  %v6289_v7 = vor.u32 %v6288_v63, %v6284_v30  ;;  %v6831_v34 = vrot.slane %v6286_v60, 5  ;;  %v6294_v41 = vrot.slane %v6292_v43, 5  ;;  %v6832_v32 = vrot.slane %v6282_v55, 6  ;;  %v5716_v1 = vld [vmem:[#allocation2 + $0xc8] sm:$0x3] }
 0x441   : > { %v6280_v31 = vrot.slane %v6279_v49, 4  ;;  %v6836_v61 = vshrl.u32 %v12242_v44, 16  ;;  %v6550_v59 = vsel %vm9686_vm8, %v8214_v8, %v6549_v14  ;;  %v6829_v21 = vor.u32 %v6828_v2, %v6827_v5  ;;  %v5810_v39 = vld [vmem:[#allocation2 + $0xcc] sm:$0xf]  ;;  %v5811_v63 = vld [vmem:[#allocation2 + $0xd0] sm:$0xf] }
 0x442   : > { %v6290_v58 = vrot.slane %v6289_v7, 4  ;;  %v6839_v47 = vrot.slane %v6292_v43, 6  ;;  %v6833_v28 = vor.u32 %v6832_v32, %v6831_v34  ;;  %v7029_v20 = vrot.slane %v12239_v16, 6  ;;  %v5812_v2 = vld [vmem:[#allocation2 + $0xd4] sm:$0x3] }
 0x443   : > { %v6285_v3 = vsel %vm9631_vm15, %v6280_v31, %v6284_v30  ;;  %v6838_v29 = vrot.slane %v6836_v61, 5  ;;  %v6553_v55 = vsel %vm9686_vm8, %v6551_v33, %v6552_v51  ;;  %v8230_v60 = vrot.slane %v12237_v52, 10  ;;  %v5906_v34 = vld [vmem:[#allocation2 + $0xd8] sm:$0xf]  ;;  %v5621_v32 = vld [vmem:[#allocation2 + $0xc0] sm:$0xf] }
 0x444   : > { %v6295_v45 = vsel %vm9631_vm15, %v6290_v58, %v6294_v41  ;;  %v6402_v42 = vmax.bf16 %v6285_v3, %v12237_v52  ;;  %v6830_v14 = vrot.slane %v6829_v21, 4  ;;  %v6835_v50 = vrot.slane %v6833_v28, 4  ;;  %v5907_v41 = vld [vmem:[#allocation2 + $0xdc] sm:$0xf]  ;;  %v5573_v3 = vld [vmem:[#allocation2 + $0xb4] sm:$0xf] }
 0x445   : > { %v6403_v43 = vmax.bf16 %v6295_v45, %v12239_v16  ;;  %v6840_v30 = vor.u32 %v6839_v47, %v6838_v29  ;;  %v7031_v8 = vrot.slane %v7029_v20, 4  ;;  %v7032_v7 = vrot.slane %v12242_v44, 6  ;;  %v5622_v29 = vld [vmem:[#allocation2 + $0xc4] sm:$0xf] }
 0x446   : > { %v6626_v49 = vmax.bf16 %v6550_v59, %v6402_v42  ;;  %v5763_v5 = vmax.bf16 %v5715_v27, %v5667_v62  ;;  %v6834_v33 = vsel %vm9732_vm11, %v6830_v14, %v6833_v28  ;;  %v5764_v52 = vmax.bf16 %v5716_v1, %v5668_v57  ;;  %v5908_v59 = vld [vmem:[#allocation2 + $0xe0] sm:$0x3]  ;;  %v5574_v27 = vld [vmem:[#allocation2 + $0xb8] sm:$0xf] }
 0x447   : > { %v6627_v31 = vmax.bf16 %v6553_v55, %v6403_v43  ;;  %v5858_v51 = vmax.bf16 %v5810_v39, %v5762_v22  ;;  %v6841_v16 = vsel %vm9732_vm11, %v6835_v50, %v6840_v30  ;;  %v7030_v62 = vsel %vm9739_vm12, %v8230_v60, %v7029_v20  ;;  %v5623_v60 = vld [vmem:[#allocation2 + $0xc8] sm:$0x3]  ;;  %v5717_v39 = vld [vmem:[#allocation2 + $0xcc] sm:$0xf] }
 0x448   : > { %v6930_v61 = vmax.bf16 %v6834_v33, %v6626_v49  ;;  %v5859_v58 = vmax.bf16 %v5811_v63, %v5763_v5  ;;  %v5860_v44 = vmax.bf16 %v5812_v2, %v5764_v52  ;;  %v7033_v57 = vsel %vm9739_vm12, %v7031_v8, %v7032_v7  ;;  %v5575_v5 = vld [vmem:[#allocation2 + $0xbc] sm:$0x3] }
 0x449   : > { %v6931_v21 = vmax.bf16 %v6841_v16, %v6627_v31  ;;  %v12274_v47 = vmax.bf16 %v5906_v34, %v5858_v51  ;;  %v5669_v45 = vmax.bf16 %v5621_v32, %v5573_v3  ;;  %v5670_v30 = vmax.bf16 %v5622_v29, %v5574_v27 }
 0x44a   : > { %v7106_v22 = vmax.bf16 %v7030_v62, %v6930_v61  ;;  %v12278_v28 = vmax.bf16 %v5907_v41, %v5859_v58  ;;  %v12280_v55 = vmax.bf16 %v5908_v59, %v5860_v44  ;;  %v5671_v31 = vmax.bf16 %v5623_v60, %v5575_v5  ;;  %v5718_v60 = vld [vmem:[#allocation2 + $0xd0] sm:$0xf] }
 0x44b   : > { %v7107_v42 = vmax.bf16 %v7033_v57, %v6931_v21  ;;  %v6297_v1 = vshrl.u32 %v12274_v47, 16  ;;  %v6300_v20 = vshll.u32 %v12274_v47, 16  ;;  %v5765_v33 = vmax.bf16 %v5717_v39, %v5669_v45  ;;  %v5719_v39 = vld [vmem:[#allocation2 + $0xd4] sm:$0x3] }
 0x44c   : > { %v6306_v43 = vshll.u32 %v12278_v28, 16  ;;  %v6310_v14 = vshrl.u32 %v12278_v28, 16  ;;  %v6556_v50 = vrot.slane %v12278_v28, 5  ;;  %v6316_v7 = vshll.u32 %v12280_v55, 16 }
 0x44d   : > { %v8247_v63 = vcombine.low %v7106_v22, %v7107_v42  ;;  %v6299_v49 = vrot.slane %v6297_v1, 4  ;;  %v6302_v8 = vrot.slane %v6300_v20, 5  ;;  %v6559_v41 = vrot.slane %v12280_v55, 5 }
 0x44e   : > { %v6308_v2 = vrot.slane %v6306_v43, 5  ;;  %v6312_v34 = vrot.slane %v6310_v14, 4  ;;  %v6558_v51 = vrot.slane %v6556_v50, 4  ;;  %v6842_v32 = vrot.slane %v6297_v1, 5 }
 0x44f   : > { %8647 = vmatmul.mubr.msk.bf16.gmra.mrb[8].mxu1 %vm2840_vm10, %v8247_v63  ;;  %v6303_v52 = vor.u32 %v6302_v8, %v6299_v49  ;;  %v6843_v61 = vrot.slane %v6300_v20, 6  ;;  %v6846_v58 = vrot.slane %v6310_v14, 5  ;;  %v6847_v59 = vrot.slane %v6306_v43, 6  ;;  %v5813_v8 = vld [vmem:[#allocation2 + $0xd8] sm:$0xf] }
 0x450   : > { %v6313_v16 = vor.u32 %v6312_v34, %v6308_v2  ;;  %v8215_v62 = vrot.slane %v12274_v47, 9  ;;  %v6851_v44 = vshrl.u32 %v12280_v55, 16  ;;  %v6854_v3 = vrot.slane %v6316_v7, 6  ;;  %v5814_v34 = vld [vmem:[#allocation2 + $0xdc] sm:$0xf] }
 0x451   : > { %v6304_v21 = vrot.slane %v6303_v52, 4  ;;  %v6318_v57 = vrot.slane %v6316_v7, 5  ;;  %v6844_v22 = vor.u32 %v6843_v61, %v6842_v32  ;;  %v6848_v27 = vor.u32 %v6847_v59, %v6846_v58  ;;  %v5815_v52 = vld [vmem:[#allocation2 + $0xe0] sm:$0x3]  ;;  %v5909_v59 = vld [vmem:[#allocation2 + $0xe4] sm:$0xf] }
 0x452   : > { %v6314_v29 = vrot.slane %v6313_v16, 4  ;;  %v6557_v42 = vsel %vm9686_vm8, %v8215_v62, %v6556_v50  ;;  %v6853_v1 = vrot.slane %v6851_v44, 5  ;;  %v7036_v20 = vrot.slane %v12278_v28, 6  ;;  %v5910_v44 = vld [vmem:[#allocation2 + $0xe8] sm:$0xf] }
 0x453   : > { %v6309_v45 = vsel %vm9631_vm15, %v6304_v21, %v6308_v2  ;;  %v6560_v63 = vsel %vm9686_vm8, %v6558_v51, %v6559_v41  ;;  %v6850_v49 = vrot.slane %v6848_v27, 4  ;;  %v6845_v5 = vrot.slane %v6844_v22, 4 }
 0x454   : > { %v6319_v43 = vsel %vm9631_vm15, %v6314_v29, %v6318_v57  ;;  %v6404_v14 = vmax.bf16 %v6309_v45, %v12274_v47  ;;  %v6855_v2 = vor.u32 %v6854_v3, %v6853_v1  ;;  %v7039_v50 = vrot.slane %v12280_v55, 6 }
 0x455   : > { %v6405_v7 = vmax.bf16 %v6319_v43, %v12278_v28  ;;  %v7038_v16 = vrot.slane %v7036_v20, 4  ;;  %v5766_v61 = vmax.bf16 %v5718_v60, %v5670_v30  ;;  %v5767_v58 = vmax.bf16 %v5719_v39, %v5671_v31  ;;  %v5911_v28 = vld [vmem:[#allocation2 + $0xec] sm:$0x3] }
 0x456   : > { %v6628_v32 = vmax.bf16 %v6557_v42, %v6404_v14  ;;  %v6849_v62 = vsel %vm9732_vm11, %v6845_v5, %v6848_v27  ;;  %v8231_v51 = vrot.slane %v12274_v47, 10  ;;  %v5861_v41 = vmax.bf16 %v5813_v8, %v5765_v33 }
 0x457   : > { %v6629_v21 = vmax.bf16 %v6560_v63, %v6405_v7  ;;  %v6856_v3 = vsel %vm9732_vm11, %v6850_v49, %v6855_v2  ;;  %v5862_v29 = vmax.bf16 %v5814_v34, %v5766_v61  ;;  %v5863_v57 = vmax.bf16 %v5815_v52, %v5767_v58 }
 0x458   : > { %v6932_v55 = vmax.bf16 %v6849_v62, %v6628_v32  ;;  %v12309_v45 = vmax.bf16 %v5909_v59, %v5861_v41  ;;  %v7037_v30 = vsel %vm9739_vm12, %v8231_v51, %v7036_v20  ;;  %v7040_v31 = vsel %vm9739_vm12, %v7038_v16, %v7039_v50 }
 0x459   : > { %v6933_v22 = vmax.bf16 %v6856_v3, %v6629_v21  ;;  %v5958_v27 = vmax.bf16 %v5910_v44, %v5862_v29  ;;  %v5959_v47 = vmax.bf16 %v5911_v28, %v5863_v57 }
 0x45a   : > { %v7108_v33 = vmax.bf16 %v7037_v30, %v6932_v55  ;;  %v6321_v1 = vshrl.u32 %v12309_v45, 16  ;;  %v6324_v60 = vshll.u32 %v12309_v45, 16  ;;  %v8216_v29 = vrot.slane %v12309_v45, 9 }
 0x45b   : > { %v7109_v42 = vmax.bf16 %v7040_v31, %v6933_v22  ;;  %v6330_v39 = vshll.u32 %v5958_v27, 16  ;;  %v6334_v43 = vshrl.u32 %v5958_v27, 16  ;;  %v6340_v8 = vshll.u32 %v5959_v47, 16 }
 0x45c   : > { %v6323_v63 = vrot.slane %v6321_v1, 4  ;;  %v6326_v49 = vrot.slane %v6324_v60, 5  ;;  %v6563_v20 = vrot.slane %v5958_v27, 5  ;;  %v6566_v50 = vrot.slane %v5959_v47, 5 }
 0x45d   : > { %v8248_v14 = vcombine.low %v7108_v33, %v7109_v42  ;;  %v6332_v7 = vrot.slane %v6330_v39, 5  ;;  %v6336_v5 = vrot.slane %v6334_v43, 4  ;;  %v6857_v34 = vrot.slane %v6321_v1, 5 }
 0x45e   : > { %v6327_v2 = vor.u32 %v6326_v49, %v6323_v63  ;;  %v6858_v52 = vrot.slane %v6324_v60, 6  ;;  %v6861_v16 = vrot.slane %v6334_v43, 5  ;;  %v6862_v61 = vrot.slane %v6330_v39, 6 }
 0x45f   : > { %8650 = vmatprep.mubr.msk.bf16.mxu1 %vm2840_vm10, %v8248_v14  ;;  %v6337_v32 = vor.u32 %v6336_v5, %v6332_v7  ;;  %v6866_v58 = vshrl.u32 %v5959_v47, 16  ;;  %v6342_v21 = vrot.slane %v6340_v8, 5  ;;  %v6869_v51 = vrot.slane %v6340_v8, 6 }
 0x460   : > { %v6328_v59 = vrot.slane %v6327_v2, 4  ;;  %v6859_v62 = vor.u32 %v6858_v52, %v6857_v34  ;;  %v6565_v44 = vrot.slane %v6563_v20, 4  ;;  %v6863_v28 = vor.u32 %v6862_v61, %v6861_v16 }
 0x461   : > { %v6338_v41 = vrot.slane %v6337_v32, 4  ;;  %v6868_v3 = vrot.slane %v6866_v58, 5  ;;  %v7043_v57 = vrot.slane %v5958_v27, 6  ;;  %v6564_v1 = vsel %vm9686_vm8, %v8216_v29, %v6563_v20 }
 0x462   : > { %v6333_v55 = vsel %vm9631_vm15, %v6328_v59, %v6332_v7  ;;  %v6865_v31 = vrot.slane %v6863_v28, 4  ;;  %v6860_v60 = vrot.slane %v6859_v62, 4  ;;  %v6567_v39 = vsel %vm9686_vm8, %v6565_v44, %v6566_v50  ;;  %v12333_v7 = vld [vmem:[%s12491_s4] ss:$0 sm:$0xff] }
 0x463   : > { %v6343_v22 = vsel %vm9631_vm15, %v6338_v41, %v6342_v21  ;;  %v6406_v30 = vmax.bf16 %v6333_v55, %v12309_v45  ;;  %v6870_v33 = vor.u32 %v6869_v51, %v6868_v3  ;;  %v7045_v14 = vrot.slane %v7043_v57, 4 }
 0x464   : > { %v6407_v42 = vmax.bf16 %v6343_v22, %v5958_v27  ;;  %v7046_v63 = vrot.slane %v5959_v47, 6  ;;  %v6864_v0 = vsel %vm9732_vm11, %v6860_v60, %v6863_v28  ;;  %v8232_v6 = vrot.slane %v12309_v45, 10 }
 0x465   : > { %v6630_v43 = vmax.bf16 %v6564_v1, %v6406_v30  ;;  %v6871_v27 = vsel %vm9732_vm11, %v6865_v31, %v6870_v33 }
 0x466   : > { %v6631_v49 = vmax.bf16 %v6567_v39, %v6407_v42  ;;  %v7044_v52 = vsel %vm9739_vm12, %v8232_v6, %v7043_v57  ;;  %v7047_v32 = vsel %vm9739_vm12, %v7045_v14, %v7046_v63 }
 0x467   : > { %v8624_v8 = vpop.f32.mrb[16].mxu1  ;;  %v6934_v5 = vmax.bf16 %v6864_v0, %v6630_v43 }
 0x468   : > { %v8656_v20 = vadd.f32 %v8624_v8, %v12022_v12  ;;  %v7279_v2 = vpop.f32.mrb[17].mxu1  ;;  %v6935_v47 = vmax.bf16 %v6871_v27, %v6631_v49 }
 0x469   : > { %v8657_v50 = vadd.f32 %v7279_v2, %v12026_v26  ;;  %v8625_v34 = vpop.f32.mrb[18].mxu1  ;;  %v7110_v58 = vmax.bf16 %v7044_v52, %v6934_v5 }
 0x46a   : > { %v7447_v16 = vadd.f32 %v8656_v20, %v12333_v7  ;;  %v8658_v24 = vadd.f32 %v8625_v34, %v12029_v56  ;;  %v7282_v61 = vpop.f32.mrb[19].mxu1  ;;  %v7111_v45 = vmax.bf16 %v7047_v32, %v6935_v47 }
 0x46b   : > { %v7445_v12 = vadd.f32 %v8657_v50, %v12333_v7  ;;  %v8659_v59 = vadd.f32 %v7282_v61, %v12032_v36 }
 0x46c   : > { %v8269_v21 = vmul.f32 -1.442695, %v7447_v16  ;;  %v7448_v26 = vadd.f32 %v8658_v24, %v12333_v7  ;;  %v8249_v62 = vcombine.low %v7110_v58, %v7111_v45 }
 0x46d   : > { %v8267_v51 = vmul.f32 -1.442695, %v7445_v12  ;;  %v7446_v41 = vadd.f32 %v8659_v59, %v12333_v7 }
 0x46e   : > { %8927 = vpow2.f32 %v8269_v21  ;;  %v8270_v37 = vmul.f32 -1.442695, %v7448_v26  ;;  %8651 = vmatmul.mubr.msk.bf16.gmra.mrb[12].mxu1 %vm2840_vm10, %v8249_v62 }
 0x46f   : > { %8929 = vpow2.f32 %v8267_v51  ;;  %v8268_v56 = vmul.f32 -1.442695, %v7446_v41 }
 0x470   : > { %8931 = vpow2.f32 %v8270_v37 }
 0x471   : > { %8933 = vpow2.f32 %v8268_v56 }
 0x478   : > { %v8928_v44 = vpop.eup %8927 }
 0x479   : > { %v8930_v28 = vpop.eup %8929  ;;  %v7575_v3 = vadd.f32 1.0, %v8928_v44 }
 0x47a   : > { %v8932_v36 = vpop.eup %8931  ;;  %v7573_v55 = vadd.f32 1.0, %v8930_v28 }
 0x47b   : > { %v8934_v29 = vpop.eup %8933  ;;  %8935 = vrcp.f32 %v7575_v3  ;;  %v7576_v57 = vadd.f32 1.0, %v8932_v36 }
 0x47c   : > { %8937 = vrcp.f32 %v7573_v55  ;;  %v7574_v22 = vadd.f32 1.0, %v8934_v29 }
 0x47d   : > { %8939 = vrcp.f32 %v7576_v57 }
 0x47e   : > { %8941 = vrcp.f32 %v7574_v22 }
 0x485   : > { %v8936_v30 = vpop.eup %8935 }
 0x486   : > { %v8938_v31 = vpop.eup %8937  ;;  %v7671_v33 = vmul.f32 %v8936_v30, %v7447_v16  ;;  %v8628_v42 = vpop.f32.mrb[20].mxu1 }
 0x487   : > { %v8940_v1 = vpop.eup %8939  ;;  %v7669_v60 = vmul.f32 %v8938_v31, %v7445_v12  ;;  %v8660_v39 = vadd.f32 %v8628_v42, %v12036_v38  ;;  %v7295_v43 = vpop.f32.mrb[21].mxu1 }
 0x488   : > { %v8942_v14 = vpop.eup %8941  ;;  %v8369_v63 = vpack.c.bf16 %v7671_v33, %v7671_v33  ;;  %v7672_v49 = vmul.f32 %v8940_v1, %v7448_v26  ;;  %v8661_v0 = vadd.f32 %v7295_v43, %v12041_v19  ;;  %v8629_v8 = vpop.f32.mrb[22].mxu1 }
 0x489   : > { %v8367_v27 = vpack.c.bf16 %v7669_v60, %v7669_v60  ;;  %v7670_v5 = vmul.f32 %v8942_v14, %v7446_v41  ;;  %v7451_v6 = vadd.f32 %v8660_v39, %v12333_v7  ;;  %v8662_v20 = vadd.f32 %v8629_v8, %v12048_v25  ;;  %v7298_v2 = vpop.f32.mrb[23].mxu1 }
 0x48a   : > { %7832 = vst.msk [vmem:[%s12356_s23 + $0x8] sm:$0xf] %vm7829_vm0, %v8369_v63  ;;  %v8370_v38 = vpack.c.bf16 %v7672_v49, %v7672_v49  ;;  %v7449_v47 = vadd.f32 %v8661_v0, %v12333_v7  ;;  %v8663_v50 = vadd.f32 %v7298_v2, %v12052_v46 }
 0x48b   : > { %7830 = vst.msk [vmem:[%s12356_s23] sm:$0xf] %vm7829_vm0, %v8367_v27  ;;  %v8368_v34 = vpack.c.bf16 %v7670_v5, %v7670_v5  ;;  %v8273_v19 = vmul.f32 -1.442695, %v7451_v6  ;;  %v7452_v52 = vadd.f32 %v8662_v20, %v12333_v7 }
 0x48c   : > { %7833 = vst.msk [vmem:[%s12356_s23 + $0xc] sm:$0xf] %vm7829_vm0, %v8370_v38  ;;  %v8271_v32 = vmul.f32 -1.442695, %v7449_v47  ;;  %v7450_v16 = vadd.f32 %v8663_v50, %v12333_v7 }
 0x48d   : > { %7831 = vst.msk [vmem:[%s12356_s23 + $0x4] sm:$0xf] %vm7829_vm0, %v8368_v34  ;;  %8943 = vpow2.f32 %v8273_v19  ;;  %v8274_v25 = vmul.f32 -1.442695, %v7452_v52 }
 0x48e   : > { %8945 = vpow2.f32 %v8271_v32  ;;  %v8272_v24 = vmul.f32 -1.442695, %v7450_v16 }
 0x48f   : > { %8947 = vpow2.f32 %v8274_v25 }
 0x490   : > { %8949 = vpow2.f32 %v8272_v24 }
 0x497   : > { %v8944_v46 = vpop.eup %8943 }
 0x498   : > { %v8946_v61 = vpop.eup %8945  ;;  %v7579_v58 = vadd.f32 1.0, %v8944_v46 }
 0x499   : > { %v8948_v45 = vpop.eup %8947  ;;  %v7577_v12 = vadd.f32 1.0, %v8946_v61 }
 0x49a   : > { %v8950_v59 = vpop.eup %8949  ;;  %8951 = vrcp.f32 %v7579_v58  ;;  %v7580_v21 = vadd.f32 1.0, %v8948_v45 }
 0x49b   : > { %8953 = vrcp.f32 %v7577_v12  ;;  %v7578_v26 = vadd.f32 1.0, %v8950_v59 }
 0x49c   : > { %8955 = vrcp.f32 %v7580_v21 }
 0x49d   : > { %8957 = vrcp.f32 %v7578_v26 }
 0x4a4   : > { %v8952_v62 = vpop.eup %8951 }
 0x4a5   : > { %v8954_v51 = vpop.eup %8953  ;;  %v7675_v41 = vmul.f32 %v8952_v62, %v7451_v6  ;;  %v8632_v37 = vpop.f32.mrb[24].mxu1 }
 0x4a6   : > { %v8956_v56 = vpop.eup %8955  ;;  %v7673_v44 = vmul.f32 %v8954_v51, %v7449_v47  ;;  %v8664_v28 = vadd.f32 %v8632_v37, %v12058_v15  ;;  %v7311_v3 = vpop.f32.mrb[25].mxu1 }
 0x4a7   : > { %v8958_v36 = vpop.eup %8957  ;;  %v8373_v55 = vpack.c.bf16 %v7675_v41, %v7675_v41  ;;  %v7676_v29 = vmul.f32 %v8956_v56, %v7452_v52  ;;  %v8665_v57 = vadd.f32 %v7311_v3, %v12068_v9  ;;  %v8633_v22 = vpop.f32.mrb[26].mxu1 }
 0x4a8   : > { %v8371_v30 = vpack.c.bf16 %v7673_v44, %v7673_v44  ;;  %v7674_v31 = vmul.f32 %v8958_v36, %v7450_v16  ;;  %v7455_v33 = vadd.f32 %v8664_v28, %v12333_v7  ;;  %v8666_v42 = vadd.f32 %v8633_v22, %v12074_v53  ;;  %v7314_v1 = vpop.f32.mrb[27].mxu1 }
 0x4a9   : > { %7836 = vst.msk [vmem:[%s12356_s23 + $0x18] sm:$0xf] %vm7829_vm0, %v8373_v55  ;;  %v8374_v15 = vpack.c.bf16 %v7676_v29, %v7676_v29  ;;  %v7453_v60 = vadd.f32 %v8665_v57, %v12333_v7  ;;  %v8667_v39 = vadd.f32 %v7314_v1, %v12084_v4 }
 0x4aa   : > { %7834 = vst.msk [vmem:[%s12356_s23 + $0x10] sm:$0xf] %vm7829_vm0, %v8371_v30  ;;  %v8372_v43 = vpack.c.bf16 %v7674_v31, %v7674_v31  ;;  %v8277_v9 = vmul.f32 -1.442695, %v7455_v33  ;;  %v7456_v14 = vadd.f32 %v8666_v42, %v12333_v7 }
 0x4ab   : > { %7837 = vst.msk [vmem:[%s12356_s23 + $0x1c] sm:$0xf] %vm7829_vm0, %v8374_v15  ;;  %v8275_v63 = vmul.f32 -1.442695, %v7453_v60  ;;  %v7454_v49 = vadd.f32 %v8667_v39, %v12333_v7 }
 0x4ac   : > { %7835 = vst.msk [vmem:[%s12356_s23 + $0x14] sm:$0xf] %vm7829_vm0, %v8372_v43  ;;  %8959 = vpow2.f32 %v8277_v9  ;;  %v8278_v53 = vmul.f32 -1.442695, %v7456_v14 }
 0x4ad   : > { %8961 = vpow2.f32 %v8275_v63  ;;  %v8276_v0 = vmul.f32 -1.442695, %v7454_v49 }
 0x4ae   : > { %8963 = vpow2.f32 %v8278_v53 }
 0x4af   : > { %8965 = vpow2.f32 %v8276_v0 }
 0x4b6   : > { %v8960_v4 = vpop.eup %8959 }
 0x4b7   : > { %v8962_v8 = vpop.eup %8961  ;;  %v7583_v27 = vadd.f32 1.0, %v8960_v4 }
 0x4b8   : > { %v8964_v5 = vpop.eup %8963  ;;  %v7581_v6 = vadd.f32 1.0, %v8962_v8 }
 0x4b9   : > { %v8966_v20 = vpop.eup %8965  ;;  %8967 = vrcp.f32 %v7583_v27  ;;  %v7584_v2 = vadd.f32 1.0, %v8964_v5 }
 0x4ba   : > { %8969 = vrcp.f32 %v7581_v6  ;;  %v7582_v38 = vadd.f32 1.0, %v8966_v20 }
 0x4bb   : > { %8971 = vrcp.f32 %v7584_v2 }
 0x4bc   : > { %8973 = vrcp.f32 %v7582_v38 }
 0x4c3   : > { %v8968_v47 = vpop.eup %8967 }
 0x4c4   : > { %v8970_v50 = vpop.eup %8969  ;;  %v7679_v34 = vmul.f32 %v8968_v47, %v7455_v33  ;;  %v8636_v19 = vpop.f32.mrb[28].mxu1 }
 0x4c5   : > { %v8972_v52 = vpop.eup %8971  ;;  %v7677_v32 = vmul.f32 %v8970_v50, %v7453_v60  ;;  %v8668_v16 = vadd.f32 %v8636_v19, %v12092_v40  ;;  %v7327_v25 = vpop.f32.mrb[29].mxu1 }
 0x4c6   : > { %v8974_v24 = vpop.eup %8973  ;;  %v8377_v46 = vpack.c.bf16 %v7679_v34, %v7679_v34  ;;  %v7680_v61 = vmul.f32 %v8972_v52, %v7456_v14  ;;  %v8669_v58 = vadd.f32 %v7327_v25, %v12098_v23  ;;  %v8637_v45 = vpop.f32.mrb[30].mxu1 }
 0x4c7   : > { %v8375_v12 = vpack.c.bf16 %v7677_v32, %v7677_v32  ;;  %v7678_v59 = vmul.f32 %v8974_v24, %v7454_v49  ;;  %v7459_v21 = vadd.f32 %v8668_v16, %v12333_v7  ;;  %v8670_v26 = vadd.f32 %v8637_v45, %v12105_v17  ;;  %v7330_v62 = vpop.f32.mrb[31].mxu1 }
 0x4c8   : > { %7840 = vst.msk [vmem:[%s12356_s23 + $0x28] sm:$0xf] %vm7829_vm0, %v8377_v46  ;;  %v8378_v40 = vpack.c.bf16 %v7680_v61, %v7680_v61  ;;  %v7457_v51 = vadd.f32 %v8669_v58, %v12333_v7  ;;  %v8671_v41 = vadd.f32 %v7330_v62, %v12108_v13 }
 0x4c9   : > { %7838 = vst.msk [vmem:[%s12356_s23 + $0x20] sm:$0xf] %vm7829_vm0, %v8375_v12  ;;  %v8376_v37 = vpack.c.bf16 %v7678_v59, %v7678_v59  ;;  %v8281_v23 = vmul.f32 -1.442695, %v7459_v21  ;;  %v7460_v56 = vadd.f32 %v8670_v26, %v12333_v7 }
 0x4ca   : > { %7841 = vst.msk [vmem:[%s12356_s23 + $0x2c] sm:$0xf] %vm7829_vm0, %v8378_v40  ;;  %v8279_v44 = vmul.f32 -1.442695, %v7457_v51  ;;  %v7458_v28 = vadd.f32 %v8671_v41, %v12333_v7 }
 0x4cb   : > { %7839 = vst.msk [vmem:[%s12356_s23 + $0x24] sm:$0xf] %vm7829_vm0, %v8376_v37  ;;  %8975 = vpow2.f32 %v8281_v23  ;;  %v8282_v17 = vmul.f32 -1.442695, %v7460_v56 }
 0x4cc   : > { %8977 = vpow2.f32 %v8279_v44  ;;  %v8280_v3 = vmul.f32 -1.442695, %v7458_v28 }
 0x4cd   : > { %8979 = vpow2.f32 %v8282_v17 }
 0x4ce   : > { %8981 = vpow2.f32 %v8280_v3 }
 0x4d5   : > { %v8976_v13 = vpop.eup %8975 }
 0x4d6   : > { %v8978_v36 = vpop.eup %8977  ;;  %v7587_v55 = vadd.f32 1.0, %v8976_v13  ;;  %v12532_v13 = vld [vmem:[#allocation4_spill] sm:$0xff] }
 0x4d7   : > { %v8980_v29 = vpop.eup %8979  ;;  %v7585_v57 = vadd.f32 1.0, %v8978_v36 }
 0x4d8   : > { %v8982_v22 = vpop.eup %8981  ;;  %8983 = vrcp.f32 %v7587_v55  ;;  %v7588_v30 = vadd.f32 1.0, %v8980_v29 }
 0x4d9   : > { %8985 = vrcp.f32 %v7585_v57  ;;  %v7586_v31 = vadd.f32 1.0, %v8982_v22  ;;  %v12533_v57 = vld [vmem:[#allocation3_spill] sm:$0xff] }
 0x4da   : > { %8987 = vrcp.f32 %v7588_v30 }
 0x4db   : > { %8989 = vrcp.f32 %v7586_v31 }
 0x4e2   : > { %v8984_v33 = vpop.eup %8983 }
 0x4e3   : > { %v8986_v42 = vpop.eup %8985  ;;  %v7683_v1 = vmul.f32 %v8984_v33, %v7459_v21  ;;  %v8640_v15 = vpop.f32.mrb[0].mxu1 }
 0x4e4   : > { %v8988_v60 = vpop.eup %8987  ;;  %v7681_v39 = vmul.f32 %v8986_v42, %v7457_v51  ;;  %v8672_v43 = vadd.f32 %v8640_v15, %v11934_v35  ;;  %v7343_v9 = vpop.f32.mrb[1].mxu1 }
 0x4e5   : > { %v8990_v14 = vpop.eup %8989  ;;  %v8381_v63 = vpack.c.bf16 %v7683_v1, %v7683_v1  ;;  %v7684_v49 = vmul.f32 %v8988_v60, %v7460_v56  ;;  %v8673_v53 = vadd.f32 %v7343_v9, %v11938_v18  ;;  %v8641_v0 = vpop.f32.mrb[2].mxu1 }
 0x4e6   : > { %v8379_v4 = vpack.c.bf16 %v7681_v39, %v7681_v39  ;;  %v7682_v8 = vmul.f32 %v8990_v14, %v7458_v28  ;;  %v7463_v27 = vadd.f32 %v8672_v43, %v12333_v7  ;;  %v8674_v5 = vadd.f32 %v8641_v0, %v11941_v11  ;;  %v7346_v6 = vpop.f32.mrb[3].mxu1 }
 0x4e7   : > { %7844 = vst.msk [vmem:[%s12356_s23 + $0x38] sm:$0xf] %vm7829_vm0, %v8381_v63  ;;  %v8382_v35 = vpack.c.bf16 %v7684_v49, %v7684_v49  ;;  %v7461_v20 = vadd.f32 %v8673_v53, %v12333_v7  ;;  %v8675_v2 = vadd.f32 %v7346_v6, %v11944_v10  ;;  %v12534_v6 = vld [vmem:[#allocation5_spill] sm:$0xff] }
 0x4e8   : > { %7842 = vst.msk [vmem:[%s12356_s23 + $0x30] sm:$0xf] %vm7829_vm0, %v8379_v4  ;;  %v8380_v38 = vpack.c.bf16 %v7682_v8, %v7682_v8  ;;  %v8285_v18 = vmul.f32 -1.442695, %v7463_v27  ;;  %v7464_v47 = vadd.f32 %v8674_v5, %v12333_v7 }
 0x4e9   : > { %7845 = vst.msk [vmem:[%s12356_s23 + $0x3c] sm:$0xf] %vm7829_vm0, %v8382_v35  ;;  %v8283_v50 = vmul.f32 -1.442695, %v7461_v20  ;;  %v7462_v34 = vadd.f32 %v8675_v2, %v12333_v7 }
 0x4ea   : > { %7843 = vst.msk [vmem:[%s12356_s23 + $0x34] sm:$0xf] %vm7829_vm0, %v8380_v38  ;;  %8991 = vpow2.f32 %v8285_v18  ;;  %v8286_v11 = vmul.f32 -1.442695, %v7464_v47 }
 0x4eb   : > { %8993 = vpow2.f32 %v8283_v50  ;;  %v8284_v19 = vmul.f32 -1.442695, %v7462_v34 }
 0x4ec   : > { %8995 = vpow2.f32 %v8286_v11 }
 0x4ed   : > { %8997 = vpow2.f32 %v8284_v19 }
 0x4f4   : > { %v8992_v10 = vpop.eup %8991 }
 0x4f5   : > { %v8994_v52 = vpop.eup %8993  ;;  %v7591_v32 = vadd.f32 1.0, %v8992_v10 }
 0x4f6   : > { %v8996_v16 = vpop.eup %8995  ;;  %v7589_v25 = vadd.f32 1.0, %v8994_v52  ;;  %v12536_v52 = vld [vmem:[#allocation7_spill] sm:$0xff] }
 0x4f7   : > { %v8998_v24 = vpop.eup %8997  ;;  %8999 = vrcp.f32 %v7591_v32  ;;  %v7592_v46 = vadd.f32 1.0, %v8996_v16 }
 0x4f8   : > { %9001 = vrcp.f32 %v7589_v25  ;;  %v7590_v61 = vadd.f32 1.0, %v8998_v24 }
 0x4f9   : > { %9003 = vrcp.f32 %v7592_v46  ;;  %v12537_v46 = vld [vmem:[#allocation8_spill] sm:$0xff] }
 0x4fa   : > { %9005 = vrcp.f32 %v7590_v61 }
 0x501   : > { %v9000_v58 = vpop.eup %8999 }
 0x502   : > { %v9002_v45 = vpop.eup %9001  ;;  %v7687_v12 = vmul.f32 %v9000_v58, %v7463_v27 }
 0x503   : > { %v9004_v59 = vpop.eup %9003  ;;  %v7685_v21 = vmul.f32 %v9002_v45, %v7461_v20  ;;  %v8644_v26 = vpop.f32.mrb[4].mxu1 }
 0x504   : > { %v9006_v62 = vpop.eup %9005  ;;  %v8385_v40 = vpack.c.bf16 %v7687_v12, %v7687_v12  ;;  %v7688_v51 = vmul.f32 %v9004_v59, %v7464_v47  ;;  %v8676_v41 = vadd.f32 %v8644_v26, %v11946_v48  ;;  %v7359_v37 = vpop.f32.mrb[5].mxu1  ;;  %v12535_v47 = vld [vmem:[#allocation6_spill] sm:$0xff] }
 0x505   : > { %v8383_v23 = vpack.c.bf16 %v7685_v21, %v7685_v21  ;;  %v7686_v56 = vmul.f32 %v9006_v62, %v7462_v34  ;;  %v8677_v44 = vadd.f32 %v7359_v37, %v11950_v54  ;;  %v8645_v28 = vpop.f32.mrb[6].mxu1 }
 0x506   : > { %7848 = vst.msk [vmem:[%s12356_s23 + $0x48] sm:$0xf] %vm7829_vm0, %v8385_v40  ;;  %v8386_v17 = vpack.c.bf16 %v7688_v51, %v7688_v51  ;;  %v7467_v3 = vadd.f32 %v8676_v41, %v12333_v7  ;;  %v8678_v36 = vadd.f32 %v8645_v28, %v12532_v13  ;;  %v7362_v55 = vpop.f32.mrb[7].mxu1 }
 0x507   : > { %7846 = vst.msk [vmem:[%s12356_s23 + $0x40] sm:$0xf] %vm7829_vm0, %v8383_v23  ;;  %v8384_v29 = vpack.c.bf16 %v7686_v56, %v7686_v56  ;;  %v7465_v48 = vadd.f32 %v8677_v44, %v12333_v7  ;;  %v8679_v22 = vadd.f32 %v7362_v55, %v12533_v57 }
 0x508   : > { %7849 = vst.msk [vmem:[%s12356_s23 + $0x4c] sm:$0xf] %vm7829_vm0, %v8386_v17  ;;  %v8289_v30 = vmul.f32 -1.442695, %v7467_v3  ;;  %v7468_v54 = vadd.f32 %v8678_v36, %v12333_v7 }
 0x509   : > { %7847 = vst.msk [vmem:[%s12356_s23 + $0x44] sm:$0xf] %vm7829_vm0, %v8384_v29  ;;  %v8287_v31 = vmul.f32 -1.442695, %v7465_v48  ;;  %v7466_v33 = vadd.f32 %v8679_v22, %v12333_v7 }
 0x50a   : > { %9007 = vpow2.f32 %v8289_v30  ;;  %v8290_v42 = vmul.f32 -1.442695, %v7468_v54  ;;  %v12538_v30 = vld [vmem:[#allocation9_spill] sm:$0xff] }
 0x50b   : > { %9009 = vpow2.f32 %v8287_v31  ;;  %v8288_v1 = vmul.f32 -1.442695, %v7466_v33 }
 0x50c   : > { %9011 = vpow2.f32 %v8290_v42 }
 0x50d   : > { %9013 = vpow2.f32 %v8288_v1  ;;  %v12539_v1 = vld [vmem:[#allocation10_spill] sm:$0xff] }
 0x514   : > { %v9008_v15 = vpop.eup %9007 }
 0x515   : > { %v9010_v60 = vpop.eup %9009  ;;  %v7595_v39 = vadd.f32 1.0, %v9008_v15 }
 0x516   : > { %v9012_v43 = vpop.eup %9011  ;;  %v7593_v9 = vadd.f32 1.0, %v9010_v60 }
 0x517   : > { %v9014_v14 = vpop.eup %9013  ;;  %9015 = vrcp.f32 %v7595_v39  ;;  %v7596_v63 = vadd.f32 1.0, %v9012_v43 }
 0x518   : > { %9017 = vrcp.f32 %v7593_v9  ;;  %v7594_v49 = vadd.f32 1.0, %v9014_v14  ;;  %v12540_v9 = vld [vmem:[#allocation11_spill] sm:$0xff] }
 0x519   : > { %9019 = vrcp.f32 %v7596_v63 }
 0x51a   : > { %9021 = vrcp.f32 %v7594_v49 }
 0x521   : > { %v9016_v53 = vpop.eup %9015 }
 0x522   : > { %v9018_v0 = vpop.eup %9017  ;;  %v7691_v4 = vmul.f32 %v9016_v53, %v7467_v3  ;;  %v8648_v8 = vpop.f32.mrb[8].mxu1 }
 0x523   : > { %v9020_v27 = vpop.eup %9019  ;;  %v7689_v5 = vmul.f32 %v9018_v0, %v7465_v48  ;;  %v8680_v35 = vadd.f32 %v8648_v8, %v12534_v6  ;;  %v7375_v20 = vpop.f32.mrb[9].mxu1  ;;  %v12541_v0 = vld [vmem:[#allocation12_spill] sm:$0xff] }
 0x524   : > { %v9022_v2 = vpop.eup %9021  ;;  %v8389_v38 = vpack.c.bf16 %v7691_v4, %v7691_v4  ;;  %v7692_v18 = vmul.f32 %v9020_v27, %v7468_v54  ;;  %v8681_v50 = vadd.f32 %v7375_v20, %v12535_v47  ;;  %v8649_v34 = vpop.f32.mrb[10].mxu1 }
 0x525   : > { %v8387_v11 = vpack.c.bf16 %v7689_v5, %v7689_v5  ;;  %v7690_v19 = vmul.f32 %v9022_v2, %v7466_v33  ;;  %v7471_v10 = vadd.f32 %v8680_v35, %v12333_v7  ;;  %v8682_v32 = vadd.f32 %v8649_v34, %v12536_v52  ;;  %v7378_v16 = vpop.f32.mrb[11].mxu1 }
 0x526   : > { %7852 = vst.msk [vmem:[%s12356_s23 + $0x58] sm:$0xf] %vm7829_vm0, %v8389_v38  ;;  %v8390_v25 = vpack.c.bf16 %v7692_v18, %v7692_v18  ;;  %v7469_v24 = vadd.f32 %v8681_v50, %v12333_v7  ;;  %v8683_v61 = vadd.f32 %v7378_v16, %v12537_v46 }
 0x527   : > { %7850 = vst.msk [vmem:[%s12356_s23 + $0x50] sm:$0xf] %vm7829_vm0, %v8387_v11  ;;  %v8388_v58 = vpack.c.bf16 %v7690_v19, %v7690_v19  ;;  %v8293_v45 = vmul.f32 -1.442695, %v7471_v10  ;;  %v7472_v12 = vadd.f32 %v8682_v32, %v12333_v7 }
 0x528   : > { %7853 = vst.msk [vmem:[%s12356_s23 + $0x5c] sm:$0xf] %vm7829_vm0, %v8390_v25  ;;  %v8291_v59 = vmul.f32 -1.442695, %v7469_v24  ;;  %v7470_v21 = vadd.f32 %v8683_v61, %v12333_v7 }
 0x529   : > { %7851 = vst.msk [vmem:[%s12356_s23 + $0x54] sm:$0xf] %vm7829_vm0, %v8388_v58  ;;  %9023 = vpow2.f32 %v8293_v45  ;;  %v8294_v26 = vmul.f32 -1.442695, %v7472_v12 }
 0x52a   : > { %9025 = vpow2.f32 %v8291_v59  ;;  %v8292_v62 = vmul.f32 -1.442695, %v7470_v21 }
 0x52b   : > { %9027 = vpow2.f32 %v8294_v26 }
 0x52c   : > { %9029 = vpow2.f32 %v8292_v62 }
 0x533   : > { %v9024_v40 = vpop.eup %9023 }
 0x534   : > { %v9026_v51 = vpop.eup %9025  ;;  %v7599_v41 = vadd.f32 1.0, %v9024_v40 }
 0x535   : > { %v9028_v37 = vpop.eup %9027  ;;  %v7597_v23 = vadd.f32 1.0, %v9026_v51 }
 0x536   : > { %v9030_v56 = vpop.eup %9029  ;;  %9031 = vrcp.f32 %v7599_v41  ;;  %v7600_v44 = vadd.f32 1.0, %v9028_v37 }
 0x537   : > { %9033 = vrcp.f32 %v7597_v23  ;;  %v7598_v28 = vadd.f32 1.0, %v9030_v56 }
 0x538   : > { %9035 = vrcp.f32 %v7600_v44 }
 0x539   : > { %9037 = vrcp.f32 %v7598_v28 }
 0x540   : > { %v9032_v17 = vpop.eup %9031 }
 0x541   : > { %v9034_v3 = vpop.eup %9033  ;;  %v7695_v13 = vmul.f32 %v9032_v17, %v7471_v10  ;;  %v8652_v29 = vpop.f32.mrb[12].mxu1 }
 0x542   : > { %v9036_v36 = vpop.eup %9035  ;;  %v7693_v55 = vmul.f32 %v9034_v3, %v7469_v24  ;;  %v8684_v54 = vadd.f32 %v8652_v29, %v12538_v30  ;;  %v7391_v31 = vpop.f32.mrb[13].mxu1 }
 0x543   : > { %v9038_v48 = vpop.eup %9037  ;;  %v8393_v57 = vpack.c.bf16 %v7695_v13, %v7695_v13  ;;  %v7696_v22 = vmul.f32 %v9036_v36, %v7472_v12  ;;  %v8685_v15 = vadd.f32 %v7391_v31, %v12539_v1  ;;  %v8653_v60 = vpop.f32.mrb[14].mxu1 }
 0x544   : > { %v8391_v33 = vpack.c.bf16 %v7693_v55, %v7693_v55  ;;  %v7694_v42 = vmul.f32 %v9038_v48, %v7470_v21  ;;  %v7475_v43 = vadd.f32 %v8684_v54, %v12333_v7  ;;  %v8686_v14 = vadd.f32 %v8653_v60, %v12540_v9  ;;  %v7394_v63 = vpop.f32.mrb[15].mxu1 }
 0x545   : > { %7856 = vst.msk [vmem:[%s12356_s23 + $0x68] sm:$0xf] %vm7829_vm0, %v8393_v57  ;;  %v8394_v39 = vpack.c.bf16 %v7696_v22, %v7696_v22  ;;  %v7473_v53 = vadd.f32 %v8685_v15, %v12333_v7  ;;  %v8687_v4 = vadd.f32 %v7394_v63, %v12541_v0 }
 0x546   : > { %7854 = vst.msk [vmem:[%s12356_s23 + $0x60] sm:$0xf] %vm7829_vm0, %v8391_v33  ;;  %v8392_v49 = vpack.c.bf16 %v7694_v42, %v7694_v42  ;;  %v8297_v8 = vmul.f32 -1.442695, %v7475_v43  ;;  %v7476_v27 = vadd.f32 %v8686_v14, %v12333_v7 }
 0x547   : > { %7857 = vst.msk [vmem:[%s12356_s23 + $0x6c] sm:$0xf] %vm7829_vm0, %v8394_v39  ;;  %v8295_v5 = vmul.f32 -1.442695, %v7473_v53  ;;  %v7474_v6 = vadd.f32 %v8687_v4, %v12333_v7 }
 0x548   : > { %7855 = vst.msk [vmem:[%s12356_s23 + $0x64] sm:$0xf] %vm7829_vm0, %v8392_v49  ;;  %9039 = vpow2.f32 %v8297_v8  ;;  %v8298_v35 = vmul.f32 -1.442695, %v7476_v27 }
 0x549   : > { %9041 = vpow2.f32 %v8295_v5  ;;  %v8296_v20 = vmul.f32 -1.442695, %v7474_v6 }
 0x54a   : > { %9043 = vpow2.f32 %v8298_v35 }
 0x54b   : > { %9045 = vpow2.f32 %v8296_v20 }
 0x552   : > { %v9040_v2 = vpop.eup %9039 }
 0x553   : > { %v9042_v38 = vpop.eup %9041  ;;  %v7603_v18 = vadd.f32 1.0, %v9040_v2 }
 0x554   : > { %v9044_v47 = vpop.eup %9043  ;;  %v7601_v50 = vadd.f32 1.0, %v9042_v38 }
 0x555   : > { %v9046_v34 = vpop.eup %9045  ;;  %9047 = vrcp.f32 %v7603_v18  ;;  %v7604_v11 = vadd.f32 1.0, %v9044_v47 }
 0x556   : > { %9049 = vrcp.f32 %v7601_v50  ;;  %v7602_v19 = vadd.f32 1.0, %v9046_v34 }
 0x557   : > { %9051 = vrcp.f32 %v7604_v11 }
 0x558   : > { %9053 = vrcp.f32 %v7602_v19 }
 0x55f   : > { %v9048_v7 = vpop.eup %9047 }
 0x560   : > { %v9050_v10 = vpop.eup %9049  ;;  %v7699_v52 = vmul.f32 %v9048_v7, %v7475_v43 }
 0x561   : > { %v9052_v32 = vpop.eup %9051  ;;  %v7697_v16 = vmul.f32 %v9050_v10, %v7473_v53 }
 0x562   : > { %v9054_v25 = vpop.eup %9053  ;;  %v8397_v24 = vpack.c.bf16 %v7699_v52, %v7699_v52  ;;  %v7700_v46 = vmul.f32 %v9052_v32, %v7476_v27 }
 0x563   : > { %v8395_v61 = vpack.c.bf16 %v7697_v16, %v7697_v16  ;;  %v7698_v58 = vmul.f32 %v9054_v25, %v7474_v6 }
 0x564   : > { %7860 = vst.msk [vmem:[%s12356_s23 + $0x78] sm:$0xf] %vm7829_vm0, %v8397_v24  ;;  %v8398_v45 = vpack.c.bf16 %v7700_v46, %v7700_v46 }
 0x565   : > { %7858 = vst.msk [vmem:[%s12356_s23 + $0x70] sm:$0xf] %vm7829_vm0, %v8395_v61  ;;  %v8396_v12 = vpack.c.bf16 %v7698_v58, %v7698_v58 }
 0x566   : > { %7861 = vst.msk [vmem:[%s12356_s23 + $0x7c] sm:$0xf] %vm7829_vm0, %v8398_v45 }
 0x567   : > { %7859 = vst.msk [vmem:[%s12356_s23 + $0x74] sm:$0xf] %vm7829_vm0, %v8396_v12 }
 0x568 PF: > { %s15_s20 = sadd.s32 1, %s9078_s20   ;;  %s12542_s18 = smov %s9074_s19 }
 0x569   : > { %p12_p5 = scmp.ge.s32.totalorder %s15_s20, 4   ;;  %s12543_s19 = smov %s12545_s21 }
 0x56b   :  { %14 = sbr.rel (!%p12_p5) target bundleno = 2 (0x2), region = 78 }

</bundles_post_ra>
